<compile_context>
chip_gen: v5e
topology: v5e:2x2
jax: 0.10.0
libtpu: 0.0.40
codegen_flags: <defaults>
</compile_context>

<pallas_src>
import math
import jax
import jax.numpy as jnp
from jax.experimental import pallas as pl
from jax.experimental.pallas import tpu as pltpu

# ----------------------------- model hyper-params (small) --------------------
D_MODEL = 32
NUM_HEADS = 4
D_K = D_MODEL // NUM_HEADS
DIM_FF = 64
N_LAYERS = 2
ENC_INP = 2
DEC_INP = 3
DEC_OUT = 3
SEQ = 8
BATCH = 2
EPS = 1e-5          # PyTorch LayerNorm default eps
NEG_INF = -1e9      # matches masked_fill(mask == 0, -1e9)

# ----------------------------- flat parameter ordering -----------------------
_ATTN = ("wq", "bq", "wk", "bk", "wv", "bv", "wo", "bo")
_EMBED_NAMES = ("src_w", "src_b", "tgt_w", "tgt_b", "pe", "out_w", "out_b")
_ENC_NAMES = tuple(f"enc_{n}" for n in _ATTN) + tuple(
    f"enc_{n}" for n in ("ln1_g", "ln1_b", "ln2_g", "ln2_b", "w1", "b1", "w2", "b2")
)
_DEC_NAMES = (
    tuple(f"dec_sa_{n}" for n in _ATTN)
    + tuple(f"dec_ca_{n}" for n in _ATTN)
    + tuple(
        f"dec_{n}"
        for n in ("ln1_g", "ln1_b", "ln2_g", "ln2_b", "ln3_g", "ln3_b",
                  "w1", "b1", "w2", "b2")
    )
)
PARAM_NAMES = _EMBED_NAMES + _ENC_NAMES + _DEC_NAMES


# ----------------------------- fused Pallas kernel ----------------------------
def _row(ref, l):
    """(1, N) slice of a layer-stacked (L, N) parameter ref."""
    return ref[pl.ds(l, 1), :]


def _layer_norm(y, g, b):
    # LayerNorm over last dim (biased variance), g/b are (1, D).
    mean = jnp.mean(y, axis=-1, keepdims=True)
    var = jnp.mean((y - mean) ** 2, axis=-1, keepdims=True)
    return (y - mean) * jax.lax.rsqrt(var + EPS) * g + b


def _ffn(x, w1, b1, w2, b2):
    h = jnp.dot(x, w1, preferred_element_type=jnp.float32) + b1
    h = jnp.maximum(h, 0.0)
    return jnp.dot(h, w2, preferred_element_type=jnp.float32) + b2


def _mha(xq, xkv, w, mask):
    """Multi-head attention on flattened [B*S, D] slabs, heads split in-kernel.

    w: dict with 'wq','wk','wv','wo' (D,D) and 'bq','bk','bv','bo' (1,D) values.
    mask: None, or a bool (Sq, Sk) mask shared across batch & heads.
    """
    q = jnp.dot(xq, w["wq"], preferred_element_type=jnp.float32) + w["bq"]
    k = jnp.dot(xkv, w["wk"], preferred_element_type=jnp.float32) + w["bk"]
    v = jnp.dot(xkv, w["wv"], preferred_element_type=jnp.float32) + w["bv"]

    sq = xq.shape[0] // BATCH
    sk = xkv.shape[0] // BATCH
    scale = 1.0 / math.sqrt(D_K)

    batch_outs = []
    for b in range(BATCH):
        qb = q[b * sq:(b + 1) * sq, :]
        kb = k[b * sk:(b + 1) * sk, :]
        vb = v[b * sk:(b + 1) * sk, :]
        head_outs = []
        for h in range(NUM_HEADS):
            qh = qb[:, h * D_K:(h + 1) * D_K] * scale
            kh = kb[:, h * D_K:(h + 1) * D_K]
            vh = vb[:, h * D_K:(h + 1) * D_K]
            # q @ k^T without an explicit transpose.
            s = jax.lax.dot_general(
                qh, kh, (((1,), (1,)), ((), ())),
                preferred_element_type=jnp.float32)            # (Sq, Sk)
            if mask is not None:
                s = jnp.where(mask, s, NEG_INF)
            s = s - jnp.max(s, axis=-1, keepdims=True)
            p = jnp.exp(s)
            p = p * pl.reciprocal(jnp.sum(p, axis=-1, keepdims=True))
            head_outs.append(
                jnp.dot(p, vh, preferred_element_type=jnp.float32))
        batch_outs.append(jnp.concatenate(head_outs, axis=-1))   # (Sq, D)
    o = jnp.concatenate(batch_outs, axis=0)                      # (B*Sq, D)
    return jnp.dot(o, w["wo"], preferred_element_type=jnp.float32) + w["bo"]


def _transformer_kernel(*refs):
    src_ref, trg_ref = refs[0], refs[1]
    p = dict(zip(PARAM_NAMES, refs[2:2 + len(PARAM_NAMES)]))
    out_ref = refs[2 + len(PARAM_NAMES)]

    # ---- embeddings + positional encoding (fused) ----
    pe = p["pe"][...]                                   # (SEQ, D)
    pe_rep = jnp.concatenate([pe] * BATCH, axis=0)      # (B*SEQ, D)

    s = (jnp.dot(src_ref[...], p["src_w"][...],
                 preferred_element_type=jnp.float32) + p["src_b"][...]) + pe_rep
    t = (jnp.dot(trg_ref[...], p["tgt_w"][...],
                 preferred_element_type=jnp.float32) + p["tgt_b"][...]) + pe_rep

    # ---- in-kernel causal mask for decoder self-attention ----
    row = jax.lax.broadcasted_iota(jnp.int32, (SEQ, SEQ), 0)
    col = jax.lax.broadcasted_iota(jnp.int32, (SEQ, SEQ), 1)
    causal = row >= col

    def attn_weights(prefix, l):
        return {
            "wq": p[f"{prefix}wq"][l], "bq": _row(p[f"{prefix}bq"], l),
            "wk": p[f"{prefix}wk"][l], "bk": _row(p[f"{prefix}bk"], l),
            "wv": p[f"{prefix}wv"][l], "bv": _row(p[f"{prefix}bv"], l),
            "wo": p[f"{prefix}wo"][l], "bo": _row(p[f"{prefix}bo"], l),
        }

    # ---- encoder stack (layers unrolled, everything stays in VMEM) ----
    for l in range(N_LAYERS):
        a = _mha(s, s, attn_weights("enc_", l), None)   # encoder attn: no mask
        s = s + _layer_norm(a, _row(p["enc_ln1_g"], l), _row(p["enc_ln1_b"], l))
        f = _ffn(s, p["enc_w1"][l], _row(p["enc_b1"], l),
                 p["enc_w2"][l], _row(p["enc_b2"], l))
        s = s + _layer_norm(f, _row(p["enc_ln2_g"], l), _row(p["enc_ln2_b"], l))

    # ---- decoder stack ----
    for l in range(N_LAYERS):
        a = _mha(t, t, attn_weights("dec_sa_", l), causal)
        t = t + _layer_norm(a, _row(p["dec_ln1_g"], l), _row(p["dec_ln1_b"], l))
        a = _mha(t, s, attn_weights("dec_ca_", l), None)  # src mask is all-ones
        t = t + _layer_norm(a, _row(p["dec_ln2_g"], l), _row(p["dec_ln2_b"], l))
        f = _ffn(t, p["dec_w1"][l], _row(p["dec_b1"], l),
                 p["dec_w2"][l], _row(p["dec_b2"], l))
        t = t + _layer_norm(f, _row(p["dec_ln3_g"], l), _row(p["dec_ln3_b"], l))

    # ---- final output projection (fused) ----
    out_ref[...] = (
        jnp.dot(t, p["out_w"][...], preferred_element_type=jnp.float32)
        + p["out_b"][...]
    )


# ----------------------------- Pallas wrapper ---------------------------------
def _full_spec(shape):
    nd = len(shape)
    return pl.BlockSpec(shape, lambda i, _nd=nd: (0,) * _nd)


def pallas_transformer_forward(flat_params, src, trg):
    B, Ss, _ = src.shape
    _, St, _ = trg.shape
    src2d = src.reshape(B * Ss, ENC_INP)
    trg2d = trg.reshape(B * St, DEC_INP)

    inputs = [src2d, trg2d] + [flat_params[n] for n in PARAM_NAMES]
    in_specs = [_full_spec(x.shape) for x in inputs]

    out = pl.pallas_call(
        _transformer_kernel,
        grid=(1,),
        out_shape=jax.ShapeDtypeStruct((B * St, DEC_OUT), jnp.float32),
        in_specs=in_specs,
        out_specs=_full_spec((B * St, DEC_OUT)),
        compiler_params=pltpu.CompilerParams(
            dimension_semantics=("arbitrary",)),
    )(*inputs)
    return out.reshape(B, St, DEC_OUT)


# ----------------------------- pure-JAX reference -----------------------------
def ref_linear(x, w, b):
    return x @ w + b[None, :]


def ref_attention(q, k, v, mask):
    s = jnp.einsum("bqd,bkd->bqk", q, k) / math.sqrt(q.shape[-1])
    s = jnp.where(mask == 0.0, NEG_INF, s)
    p = jax.nn.softmax(s, axis=-1)
    return jnp.einsum("bqk,bkd->bqd", p, v)


def ref_mha(p, q_in, k_in, v_in, mask):
    B, Sq, D = q_in.shape
    Sk = k_in.shape[1]
    H, Dk = NUM_HEADS, D_K

    def proj(x, w, b, S):
        y = ref_linear(x.reshape(B * S, D), w, b)
        return y.reshape(B, S, H, Dk).transpose(0, 2, 1, 3).reshape(B * H, S, Dk)

    q = proj(q_in, p["wq"], p["bq"], Sq)
    k = proj(k_in, p["wk"], p["bk"], Sk)
    v = proj(v_in, p["wv"], p["bv"], Sk)

    if mask is None:
        m = jnp.ones((B * H, Sq, Sk), jnp.float32)
    else:
        m = jnp.broadcast_to(mask[:, None, :, :], (B, H, Sq, Sk)).reshape(B * H, Sq, Sk)

    o = ref_attention(q, k, v, m)
    o = o.reshape(B, H, Sq, Dk).transpose(0, 2, 1, 3).reshape(B * Sq, D)
    return ref_linear(o, p["wo"], p["bo"]).reshape(B, Sq, D)


def ref_add_layernorm(x, y, gamma, beta):
    mean = jnp.mean(y, axis=-1, keepdims=True)
    var = jnp.mean((y - mean) ** 2, axis=-1, keepdims=True)
    yn = (y - mean) / jnp.sqrt(var + EPS)
    return x + yn * gamma[None, None, :] + beta[None, None, :]


def ref_ffn(x, w1, b1, w2, b2):
    return jnp.maximum(x @ w1 + b1, 0.0) @ w2 + b2


def ref_encoder_block(p, x):
    a = ref_mha(p["self_attn"], x, x, x, None)
    x = ref_add_layernorm(x, a, p["ln1_g"], p["ln1_b"])
    f = ref_ffn(x, p["w1"], p["b1"], p["w2"], p["b2"])
    x = ref_add_layernorm(x, f, p["ln2_g"], p["ln2_b"])
    return x


def ref_decoder_block(p, x, memory, src_mask, tgt_mask):
    a = ref_mha(p["self_attn"], x, x, x, tgt_mask)
    x = ref_add_layernorm(x, a, p["ln1_g"], p["ln1_b"])
    a = ref_mha(p["src_attn"], x, memory, memory, src_mask)
    x = ref_add_layernorm(x, a, p["ln2_g"], p["ln2_b"])
    f = ref_ffn(x, p["w1"], p["b1"], p["w2"], p["b2"])
    x = ref_add_layernorm(x, f, p["ln3_g"], p["ln3_b"])
    return x


def ref_transformer_forward(params, src, trg, src_mask, trg_mask):
    B, Ss, _ = src.shape
    _, St, _ = trg.shape
    pe = params["pe"]

    s = ref_linear(src.reshape(B * Ss, ENC_INP), params["src_w"],
                   params["src_b"]).reshape(B, Ss, D_MODEL) + pe[None, :Ss, :]
    t = ref_linear(trg.reshape(B * St, DEC_INP), params["tgt_w"],
                   params["tgt_b"]).reshape(B, St, D_MODEL) + pe[None, :St, :]

    for lp in params["encoder"]:
        s = ref_encoder_block(lp, s)
    for lp in params["decoder"]:
        t = ref_decoder_block(lp, t, s, src_mask, trg_mask)

    return ref_linear(t.reshape(B * St, D_MODEL), params["out_w"],
                      params["out_b"]).reshape(B, St, DEC_OUT)


# ----------------------------- deterministic parameter init -------------------
def make_params(key):
    keys = iter(jax.random.split(key, 256))

    def xavier(shape):
        fan_in, fan_out = shape
        bound = math.sqrt(6.0 / (fan_in + fan_out))
        return jax.random.uniform(
            next(keys), shape, jnp.float32, minval=-bound, maxval=bound)

    def mha_params():
        return {
            "wq": xavier((D_MODEL, D_MODEL)), "bq": jnp.zeros((D_MODEL,), jnp.float32),
            "wk": xavier((D_MODEL, D_MODEL)), "bk": jnp.zeros((D_MODEL,), jnp.float32),
            "wv": xavier((D_MODEL, D_MODEL)), "bv": jnp.zeros((D_MODEL,), jnp.float32),
            "wo": xavier((D_MODEL, D_MODEL)), "bo": jnp.zeros((D_MODEL,), jnp.float32),
        }

    def ffn_ln(n_ln):
        d = {
            "w1": xavier((D_MODEL, DIM_FF)), "b1": jnp.zeros((DIM_FF,), jnp.float32),
            "w2": xavier((DIM_FF, D_MODEL)), "b2": jnp.zeros((D_MODEL,), jnp.float32),
        }
        for i in range(1, n_ln + 1):
            d[f"ln{i}_g"] = jnp.ones((D_MODEL,), jnp.float32)
            d[f"ln{i}_b"] = jnp.zeros((D_MODEL,), jnp.float32)
        return d

    encoder = []
    for _ in range(N_LAYERS):
        lp = {"self_attn": mha_params()}
        lp.update(ffn_ln(2))
        encoder.append(lp)

    decoder = []
    for _ in range(N_LAYERS):
        lp = {"self_attn": mha_params(), "src_attn": mha_params()}
        lp.update(ffn_ln(3))
        decoder.append(lp)

    # sinusoidal positional encoding buffer
    pos = jnp.arange(SEQ, dtype=jnp.float32)[:, None]
    div = jnp.exp(jnp.arange(0, D_MODEL, 2, dtype=jnp.float32)
                  * (-math.log(10000.0) / D_MODEL))
    pe = jnp.zeros((SEQ, D_MODEL), jnp.float32)
    pe = pe.at[:, 0::2].set(jnp.sin(pos * div))
    pe = pe.at[:, 1::2].set(jnp.cos(pos * div))

    return {
        "encoder": encoder, "decoder": decoder,
        "src_w": xavier((ENC_INP, D_MODEL)), "src_b": jnp.zeros((D_MODEL,), jnp.float32),
        "tgt_w": xavier((DEC_INP, D_MODEL)), "tgt_b": jnp.zeros((D_MODEL,), jnp.float32),
        "out_w": xavier((D_MODEL, DEC_OUT)), "out_b": jnp.zeros((DEC_OUT,), jnp.float32),
        "pe": pe,
    }


def build_flat_params(params):
    """Stack per-layer weights along a leading layer axis for the fused kernel."""
    enc, dec = params["encoder"], params["decoder"]
    fp = {
        "src_w": params["src_w"], "src_b": params["src_b"].reshape(1, D_MODEL),
        "tgt_w": params["tgt_w"], "tgt_b": params["tgt_b"].reshape(1, D_MODEL),
        "pe": params["pe"],
        "out_w": params["out_w"], "out_b": params["out_b"].reshape(1, DEC_OUT),
    }

    def stk(layers, getter):
        return jnp.stack([getter(lp) for lp in layers], axis=0)

    for nm in _ATTN:
        fp[f"enc_{nm}"] = stk(enc, lambda lp, nm=nm: lp["self_attn"][nm])
        fp[f"dec_sa_{nm}"] = stk(dec, lambda lp, nm=nm: lp["self_attn"][nm])
        fp[f"dec_ca_{nm}"] = stk(dec, lambda lp, nm=nm: lp["src_attn"][nm])
    for nm in ("ln1_g", "ln1_b", "ln2_g", "ln2_b", "w1", "b1", "w2", "b2"):
        fp[f"enc_{nm}"] = stk(enc, lambda lp, nm=nm: lp[nm])
    for nm in ("ln1_g", "ln1_b", "ln2_g", "ln2_b", "ln3_g", "ln3_b",
               "w1", "b1", "w2", "b2"):
        fp[f"dec_{nm}"] = stk(dec, lambda lp, nm=nm: lp[nm])
    return fp


# ----------------------------- main --------------------------------------------
if __name__ == "__main__":
    key = jax.random.PRNGKey(0)
    kp, ks, kt = jax.random.split(key, 3)

    params = make_params(kp)
    src = jax.random.normal(ks, (BATCH, SEQ, ENC_INP), jnp.float32)
    trg = jax.random.normal(kt, (BATCH, SEQ, DEC_INP), jnp.float32)
    src_mask = jnp.ones((BATCH, 1, SEQ), jnp.float32)
    trg_mask = jnp.broadcast_to(
        jnp.tril(jnp.ones((SEQ, SEQ), jnp.float32)), (BATCH, SEQ, SEQ))

    flat_params = build_flat_params(params)

    fused_forward = jax.jit(pallas_transformer_forward)
    out = fused_forward(flat_params, src, trg)
    out = jax.block_until_ready(out)
    assert out.shape == (BATCH, SEQ, DEC_OUT)

    ref = ref_transformer_forward(params, src, trg, src_mask, trg_mask)
    max_err = float(jnp.max(jnp.abs(out - ref)))
    if max_err < 2e-3:
        print("KERNEL_OK")
    else:
        print(f"MISMATCH max_err={max_err}")
</pallas_src>

<mosaic_0001>
module attributes {stable_mosaic.version = 11 : i64} {
  func.func @_transformer_kernel(%arg0: i32, %arg1: memref<16x2xf32, #tpu.memory_space<vmem>>, %arg2: memref<16x3xf32, #tpu.memory_space<vmem>>, %arg3: memref<2x32xf32, #tpu.memory_space<vmem>>, %arg4: memref<1x32xf32, #tpu.memory_space<vmem>>, %arg5: memref<3x32xf32, #tpu.memory_space<vmem>>, %arg6: memref<1x32xf32, #tpu.memory_space<vmem>>, %arg7: memref<8x32xf32, #tpu.memory_space<vmem>>, %arg8: memref<32x3xf32, #tpu.memory_space<vmem>>, %arg9: memref<1x3xf32, #tpu.memory_space<vmem>>, %arg10: memref<2x32x32xf32, #tpu.memory_space<vmem>>, %arg11: memref<2x32xf32, #tpu.memory_space<vmem>>, %arg12: memref<2x32x32xf32, #tpu.memory_space<vmem>>, %arg13: memref<2x32xf32, #tpu.memory_space<vmem>>, %arg14: memref<2x32x32xf32, #tpu.memory_space<vmem>>, %arg15: memref<2x32xf32, #tpu.memory_space<vmem>>, %arg16: memref<2x32x32xf32, #tpu.memory_space<vmem>>, %arg17: memref<2x32xf32, #tpu.memory_space<vmem>>, %arg18: memref<2x32xf32, #tpu.memory_space<vmem>>, %arg19: memref<2x32xf32, #tpu.memory_space<vmem>>, %arg20: memref<2x32xf32, #tpu.memory_space<vmem>>, %arg21: memref<2x32xf32, #tpu.memory_space<vmem>>, %arg22: memref<2x32x64xf32, #tpu.memory_space<vmem>>, %arg23: memref<2x64xf32, #tpu.memory_space<vmem>>, %arg24: memref<2x64x32xf32, #tpu.memory_space<vmem>>, %arg25: memref<2x32xf32, #tpu.memory_space<vmem>>, %arg26: memref<2x32x32xf32, #tpu.memory_space<vmem>>, %arg27: memref<2x32xf32, #tpu.memory_space<vmem>>, %arg28: memref<2x32x32xf32, #tpu.memory_space<vmem>>, %arg29: memref<2x32xf32, #tpu.memory_space<vmem>>, %arg30: memref<2x32x32xf32, #tpu.memory_space<vmem>>, %arg31: memref<2x32xf32, #tpu.memory_space<vmem>>, %arg32: memref<2x32x32xf32, #tpu.memory_space<vmem>>, %arg33: memref<2x32xf32, #tpu.memory_space<vmem>>, %arg34: memref<2x32x32xf32, #tpu.memory_space<vmem>>, %arg35: memref<2x32xf32, #tpu.memory_space<vmem>>, %arg36: memref<2x32x32xf32, #tpu.memory_space<vmem>>, %arg37: memref<2x32xf32, #tpu.memory_space<vmem>>, %arg38: memref<2x32x32xf32, #tpu.memory_space<vmem>>, %arg39: memref<2x32xf32, #tpu.memory_space<vmem>>, %arg40: memref<2x32x32xf32, #tpu.memory_space<vmem>>, %arg41: memref<2x32xf32, #tpu.memory_space<vmem>>, %arg42: memref<2x32xf32, #tpu.memory_space<vmem>>, %arg43: memref<2x32xf32, #tpu.memory_space<vmem>>, %arg44: memref<2x32xf32, #tpu.memory_space<vmem>>, %arg45: memref<2x32xf32, #tpu.memory_space<vmem>>, %arg46: memref<2x32xf32, #tpu.memory_space<vmem>>, %arg47: memref<2x32xf32, #tpu.memory_space<vmem>>, %arg48: memref<2x32x64xf32, #tpu.memory_space<vmem>>, %arg49: memref<2x64xf32, #tpu.memory_space<vmem>>, %arg50: memref<2x64x32xf32, #tpu.memory_space<vmem>>, %arg51: memref<2x32xf32, #tpu.memory_space<vmem>>, %arg52: memref<16x3xf32, #tpu.memory_space<vmem>>) attributes {dimension_semantics = [#tpu.dimension_semantics<arbitrary>], iteration_bounds = array<i64: 1>, scalar_prefetch = 0 : i64, scratch_operands = 0 : i64, tpu.core_type = #tpu.core_type<tc>, window_params = [{pipeline_mode = #tpu.pipeline_mode<synchronous>, transform_indices = @transform_0, window_bounds = array<i64: 16, 2>}, {pipeline_mode = #tpu.pipeline_mode<synchronous>, transform_indices = @transform_1, window_bounds = array<i64: 16, 3>}, {pipeline_mode = #tpu.pipeline_mode<synchronous>, transform_indices = @transform_2, window_bounds = array<i64: 2, 32>}, {pipeline_mode = #tpu.pipeline_mode<synchronous>, transform_indices = @transform_3, window_bounds = array<i64: 1, 32>}, {pipeline_mode = #tpu.pipeline_mode<synchronous>, transform_indices = @transform_4, window_bounds = array<i64: 3, 32>}, {pipeline_mode = #tpu.pipeline_mode<synchronous>, transform_indices = @transform_5, window_bounds = array<i64: 1, 32>}, {pipeline_mode = #tpu.pipeline_mode<synchronous>, transform_indices = @transform_6, window_bounds = array<i64: 8, 32>}, {pipeline_mode = #tpu.pipeline_mode<synchronous>, transform_indices = @transform_7, window_bounds = array<i64: 32, 3>}, {pipeline_mode = #tpu.pipeline_mode<synchronous>, transform_indices = @transform_8, window_bounds = array<i64: 1, 3>}, {pipeline_mode = #tpu.pipeline_mode<synchronous>, transform_indices = @transform_9, window_bounds = array<i64: 2, 32, 32>}, {pipeline_mode = #tpu.pipeline_mode<synchronous>, transform_indices = @transform_10, window_bounds = array<i64: 2, 32>}, {pipeline_mode = #tpu.pipeline_mode<synchronous>, transform_indices = @transform_11, window_bounds = array<i64: 2, 32, 32>}, {pipeline_mode = #tpu.pipeline_mode<synchronous>, transform_indices = @transform_12, window_bounds = array<i64: 2, 32>}, {pipeline_mode = #tpu.pipeline_mode<synchronous>, transform_indices = @transform_13, window_bounds = array<i64: 2, 32, 32>}, {pipeline_mode = #tpu.pipeline_mode<synchronous>, transform_indices = @transform_14, window_bounds = array<i64: 2, 32>}, {pipeline_mode = #tpu.pipeline_mode<synchronous>, transform_indices = @transform_15, window_bounds = array<i64: 2, 32, 32>}, {pipeline_mode = #tpu.pipeline_mode<synchronous>, transform_indices = @transform_16, window_bounds = array<i64: 2, 32>}, {pipeline_mode = #tpu.pipeline_mode<synchronous>, transform_indices = @transform_17, window_bounds = array<i64: 2, 32>}, {pipeline_mode = #tpu.pipeline_mode<synchronous>, transform_indices = @transform_18, window_bounds = array<i64: 2, 32>}, {pipeline_mode = #tpu.pipeline_mode<synchronous>, transform_indices = @transform_19, window_bounds = array<i64: 2, 32>}, {pipeline_mode = #tpu.pipeline_mode<synchronous>, transform_indices = @transform_20, window_bounds = array<i64: 2, 32>}, {pipeline_mode = #tpu.pipeline_mode<synchronous>, transform_indices = @transform_21, window_bounds = array<i64: 2, 32, 64>}, {pipeline_mode = #tpu.pipeline_mode<synchronous>, transform_indices = @transform_22, window_bounds = array<i64: 2, 64>}, {pipeline_mode = #tpu.pipeline_mode<synchronous>, transform_indices = @transform_23, window_bounds = array<i64: 2, 64, 32>}, {pipeline_mode = #tpu.pipeline_mode<synchronous>, transform_indices = @transform_24, window_bounds = array<i64: 2, 32>}, {pipeline_mode = #tpu.pipeline_mode<synchronous>, transform_indices = @transform_25, window_bounds = array<i64: 2, 32, 32>}, {pipeline_mode = #tpu.pipeline_mode<synchronous>, transform_indices = @transform_26, window_bounds = array<i64: 2, 32>}, {pipeline_mode = #tpu.pipeline_mode<synchronous>, transform_indices = @transform_27, window_bounds = array<i64: 2, 32, 32>}, {pipeline_mode = #tpu.pipeline_mode<synchronous>, transform_indices = @transform_28, window_bounds = array<i64: 2, 32>}, {pipeline_mode = #tpu.pipeline_mode<synchronous>, transform_indices = @transform_29, window_bounds = array<i64: 2, 32, 32>}, {pipeline_mode = #tpu.pipeline_mode<synchronous>, transform_indices = @transform_30, window_bounds = array<i64: 2, 32>}, {pipeline_mode = #tpu.pipeline_mode<synchronous>, transform_indices = @transform_31, window_bounds = array<i64: 2, 32, 32>}, {pipeline_mode = #tpu.pipeline_mode<synchronous>, transform_indices = @transform_32, window_bounds = array<i64: 2, 32>}, {pipeline_mode = #tpu.pipeline_mode<synchronous>, transform_indices = @transform_33, window_bounds = array<i64: 2, 32, 32>}, {pipeline_mode = #tpu.pipeline_mode<synchronous>, transform_indices = @transform_34, window_bounds = array<i64: 2, 32>}, {pipeline_mode = #tpu.pipeline_mode<synchronous>, transform_indices = @transform_35, window_bounds = array<i64: 2, 32, 32>}, {pipeline_mode = #tpu.pipeline_mode<synchronous>, transform_indices = @transform_36, window_bounds = array<i64: 2, 32>}, {pipeline_mode = #tpu.pipeline_mode<synchronous>, transform_indices = @transform_37, window_bounds = array<i64: 2, 32, 32>}, {pipeline_mode = #tpu.pipeline_mode<synchronous>, transform_indices = @transform_38, window_bounds = array<i64: 2, 32>}, {pipeline_mode = #tpu.pipeline_mode<synchronous>, transform_indices = @transform_39, window_bounds = array<i64: 2, 32, 32>}, {pipeline_mode = #tpu.pipeline_mode<synchronous>, transform_indices = @transform_40, window_bounds = array<i64: 2, 32>}, {pipeline_mode = #tpu.pipeline_mode<synchronous>, transform_indices = @transform_41, window_bounds = array<i64: 2, 32>}, {pipeline_mode = #tpu.pipeline_mode<synchronous>, transform_indices = @transform_42, window_bounds = array<i64: 2, 32>}, {pipeline_mode = #tpu.pipeline_mode<synchronous>, transform_indices = @transform_43, window_bounds = array<i64: 2, 32>}, {pipeline_mode = #tpu.pipeline_mode<synchronous>, transform_indices = @transform_44, window_bounds = array<i64: 2, 32>}, {pipeline_mode = #tpu.pipeline_mode<synchronous>, transform_indices = @transform_45, window_bounds = array<i64: 2, 32>}, {pipeline_mode = #tpu.pipeline_mode<synchronous>, transform_indices = @transform_46, window_bounds = array<i64: 2, 32>}, {pipeline_mode = #tpu.pipeline_mode<synchronous>, transform_indices = @transform_47, window_bounds = array<i64: 2, 32, 64>}, {pipeline_mode = #tpu.pipeline_mode<synchronous>, transform_indices = @transform_48, window_bounds = array<i64: 2, 64>}, {pipeline_mode = #tpu.pipeline_mode<synchronous>, transform_indices = @transform_49, window_bounds = array<i64: 2, 64, 32>}, {pipeline_mode = #tpu.pipeline_mode<synchronous>, transform_indices = @transform_50, window_bounds = array<i64: 2, 32>}, {pipeline_mode = #tpu.pipeline_mode<synchronous>, transform_indices = @transform_51, window_bounds = array<i64: 16, 3>}]} {
    %c0 = arith.constant 0 : index
    %c0_0 = arith.constant 0 : index
    %0 = vector.load %arg7[%c0, %c0_0] : memref<8x32xf32, #tpu.memory_space<vmem>>, vector<8x32xf32>
    %1 = tpu.concatenate %0, %0 in 0 : vector<8x32xf32>, vector<8x32xf32> -> vector<16x32xf32>
    %c0_1 = arith.constant 0 : index
    %c0_2 = arith.constant 0 : index
    %2 = vector.load %arg1[%c0_1, %c0_2] : memref<16x2xf32, #tpu.memory_space<vmem>>, vector<16x2xf32>
    %c0_3 = arith.constant 0 : index
    %c0_4 = arith.constant 0 : index
    %3 = vector.load %arg3[%c0_3, %c0_4] : memref<2x32xf32, #tpu.memory_space<vmem>>, vector<2x32xf32>
    %cst = arith.constant dense<0.000000e+00> : vector<16x32xf32>
    %4 = tpu.matmul %2, %3, %cst {dimension_numbers = #tpu.dot_dimension_numbers<[1], [0], [0], [1], [0, 0, 1, 1], [], []>} : vector<16x2xf32>, vector<2x32xf32>, vector<16x32xf32> -> vector<16x32xf32>
    %c0_5 = arith.constant 0 : index
    %c0_6 = arith.constant 0 : index
    %5 = vector.load %arg4[%c0_5, %c0_6] : memref<1x32xf32, #tpu.memory_space<vmem>>, vector<1x32xf32>
    %6 = vector.broadcast %5 : vector<1x32xf32> to vector<16x32xf32>
    %7 = arith.addf %4, %6 : vector<16x32xf32>
    %8 = arith.addf %7, %1 : vector<16x32xf32>
    %c0_7 = arith.constant 0 : index
    %c0_8 = arith.constant 0 : index
    %9 = vector.load %arg2[%c0_7, %c0_8] : memref<16x3xf32, #tpu.memory_space<vmem>>, vector<16x3xf32>
    %c0_9 = arith.constant 0 : index
    %c0_10 = arith.constant 0 : index
    %10 = vector.load %arg5[%c0_9, %c0_10] : memref<3x32xf32, #tpu.memory_space<vmem>>, vector<3x32xf32>
    %cst_11 = arith.constant dense<0.000000e+00> : vector<16x32xf32>
    %11 = tpu.matmul %9, %10, %cst_11 {dimension_numbers = #tpu.dot_dimension_numbers<[1], [0], [0], [1], [0, 0, 1, 1], [], []>} : vector<16x3xf32>, vector<3x32xf32>, vector<16x32xf32> -> vector<16x32xf32>
    %c0_12 = arith.constant 0 : index
    %c0_13 = arith.constant 0 : index
    %12 = vector.load %arg6[%c0_12, %c0_13] : memref<1x32xf32, #tpu.memory_space<vmem>>, vector<1x32xf32>
    %13 = vector.broadcast %12 : vector<1x32xf32> to vector<16x32xf32>
    %14 = arith.addf %11, %13 : vector<16x32xf32>
    %15 = arith.addf %14, %1 : vector<16x32xf32>
    %16 = tpu.iota {dimensions = array<i32: 0>} : vector<8x8xi32>
    %17 = tpu.iota {dimensions = array<i32: 1>} : vector<8x8xi32>
    %18 = arith.cmpi sge, %16, %17 : vector<8x8xi32>
    %c0_14 = arith.constant 0 : index
    %c0_15 = arith.constant 0 : index
    %c0_16 = arith.constant 0 : index
    %19 = vector.load %arg10[%c0_14, %c0_15, %c0_16] : memref<2x32x32xf32, #tpu.memory_space<vmem>>, vector<1x32x32xf32>
    %20 = vector.shape_cast %19 : vector<1x32x32xf32> to vector<32x32xf32>
    %c0_17 = arith.constant 0 : index
    %c0_18 = arith.constant 0 : index
    %21 = vector.load %arg11[%c0_17, %c0_18] : memref<2x32xf32, #tpu.memory_space<vmem>>, vector<1x32xf32>
    %c0_19 = arith.constant 0 : index
    %c0_20 = arith.constant 0 : index
    %c0_21 = arith.constant 0 : index
    %22 = vector.load %arg12[%c0_19, %c0_20, %c0_21] : memref<2x32x32xf32, #tpu.memory_space<vmem>>, vector<1x32x32xf32>
    %23 = vector.shape_cast %22 : vector<1x32x32xf32> to vector<32x32xf32>
    %c0_22 = arith.constant 0 : index
    %c0_23 = arith.constant 0 : index
    %24 = vector.load %arg13[%c0_22, %c0_23] : memref<2x32xf32, #tpu.memory_space<vmem>>, vector<1x32xf32>
    %c0_24 = arith.constant 0 : index
    %c0_25 = arith.constant 0 : index
    %c0_26 = arith.constant 0 : index
    %25 = vector.load %arg14[%c0_24, %c0_25, %c0_26] : memref<2x32x32xf32, #tpu.memory_space<vmem>>, vector<1x32x32xf32>
    %26 = vector.shape_cast %25 : vector<1x32x32xf32> to vector<32x32xf32>
    %c0_27 = arith.constant 0 : index
    %c0_28 = arith.constant 0 : index
    %27 = vector.load %arg15[%c0_27, %c0_28] : memref<2x32xf32, #tpu.memory_space<vmem>>, vector<1x32xf32>
    %c0_29 = arith.constant 0 : index
    %c0_30 = arith.constant 0 : index
    %c0_31 = arith.constant 0 : index
    %28 = vector.load %arg16[%c0_29, %c0_30, %c0_31] : memref<2x32x32xf32, #tpu.memory_space<vmem>>, vector<1x32x32xf32>
    %29 = vector.shape_cast %28 : vector<1x32x32xf32> to vector<32x32xf32>
    %c0_32 = arith.constant 0 : index
    %c0_33 = arith.constant 0 : index
    %30 = vector.load %arg17[%c0_32, %c0_33] : memref<2x32xf32, #tpu.memory_space<vmem>>, vector<1x32xf32>
    %cst_34 = arith.constant dense<0.000000e+00> : vector<16x32xf32>
    %31 = tpu.matmul %8, %20, %cst_34 {dimension_numbers = #tpu.dot_dimension_numbers<[1], [0], [0], [1], [0, 0, 1, 1], [], []>} : vector<16x32xf32>, vector<32x32xf32>, vector<16x32xf32> -> vector<16x32xf32>
    %32 = vector.broadcast %21 : vector<1x32xf32> to vector<16x32xf32>
    %33 = arith.addf %31, %32 : vector<16x32xf32>
    %cst_35 = arith.constant dense<0.000000e+00> : vector<16x32xf32>
    %34 = tpu.matmul %8, %23, %cst_35 {dimension_numbers = #tpu.dot_dimension_numbers<[1], [0], [0], [1], [0, 0, 1, 1], [], []>} : vector<16x32xf32>, vector<32x32xf32>, vector<16x32xf32> -> vector<16x32xf32>
    %35 = vector.broadcast %24 : vector<1x32xf32> to vector<16x32xf32>
    %36 = arith.addf %34, %35 : vector<16x32xf32>
    %cst_36 = arith.constant dense<0.000000e+00> : vector<16x32xf32>
    %37 = tpu.matmul %8, %26, %cst_36 {dimension_numbers = #tpu.dot_dimension_numbers<[1], [0], [0], [1], [0, 0, 1, 1], [], []>} : vector<16x32xf32>, vector<32x32xf32>, vector<16x32xf32> -> vector<16x32xf32>
    %38 = vector.broadcast %27 : vector<1x32xf32> to vector<16x32xf32>
    %39 = arith.addf %37, %38 : vector<16x32xf32>
    %40 = vector.extract_strided_slice %33 {offsets = [0, 0], sizes = [8, 32], strides = [1, 1]} : vector<16x32xf32> to vector<8x32xf32>
    %41 = vector.extract_strided_slice %36 {offsets = [0, 0], sizes = [8, 32], strides = [1, 1]} : vector<16x32xf32> to vector<8x32xf32>
    %42 = vector.extract_strided_slice %39 {offsets = [0, 0], sizes = [8, 32], strides = [1, 1]} : vector<16x32xf32> to vector<8x32xf32>
    %43 = vector.extract_strided_slice %40 {offsets = [0, 0], sizes = [8, 8], strides = [1, 1]} : vector<8x32xf32> to vector<8x8xf32>
    %cst_37 = arith.constant 0.353553385 : f32
    %44 = vector.broadcast %cst_37 : f32 to vector<8x8xf32>
    %45 = arith.mulf %43, %44 : vector<8x8xf32>
    %46 = vector.extract_strided_slice %41 {offsets = [0, 0], sizes = [8, 8], strides = [1, 1]} : vector<8x32xf32> to vector<8x8xf32>
    %47 = vector.extract_strided_slice %42 {offsets = [0, 0], sizes = [8, 8], strides = [1, 1]} : vector<8x32xf32> to vector<8x8xf32>
    %cst_38 = arith.constant dense<0.000000e+00> : vector<8x8xf32>
    %48 = tpu.matmul %45, %46, %cst_38 {dimension_numbers = #tpu.dot_dimension_numbers<[1], [1], [0], [0], [0, 0, 1, 0], [], []>} : vector<8x8xf32>, vector<8x8xf32>, vector<8x8xf32> -> vector<8x8xf32>
    %cst_39 = arith.constant dense<0xFF800000> : vector<8xf32>
    %49 = vector.multi_reduction <maximumf>, %48, %cst_39 [1] : vector<8x8xf32> to vector<8xf32>
    %50 = vector.shape_cast %49 : vector<8xf32> to vector<8x1xf32>
    %51 = vector.broadcast %50 : vector<8x1xf32> to vector<8x8xf32>
    %52 = arith.subf %48, %51 : vector<8x8xf32>
    %53 = math.exp %52 : vector<8x8xf32>
    %cst_40 = arith.constant dense<0.000000e+00> : vector<8xf32>
    %54 = vector.multi_reduction <add>, %53, %cst_40 [1] : vector<8x8xf32> to vector<8xf32>
    %55 = vector.shape_cast %54 : vector<8xf32> to vector<8x1xf32>
    %56 = tpu.reciprocal %55 : vector<8x1xf32> -> vector<8x1xf32>
    %57 = vector.broadcast %56 : vector<8x1xf32> to vector<8x8xf32>
    %58 = arith.mulf %53, %57 : vector<8x8xf32>
    %cst_41 = arith.constant dense<0.000000e+00> : vector<8x8xf32>
    %59 = tpu.matmul %58, %47, %cst_41 {dimension_numbers = #tpu.dot_dimension_numbers<[1], [0], [0], [1], [0, 0, 1, 1], [], []>} : vector<8x8xf32>, vector<8x8xf32>, vector<8x8xf32> -> vector<8x8xf32>
    %60 = vector.extract_strided_slice %40 {offsets = [0, 8], sizes = [8, 8], strides = [1, 1]} : vector<8x32xf32> to vector<8x8xf32>
    %cst_42 = arith.constant 0.353553385 : f32
    %61 = vector.broadcast %cst_42 : f32 to vector<8x8xf32>
    %62 = arith.mulf %60, %61 : vector<8x8xf32>
    %63 = vector.extract_strided_slice %41 {offsets = [0, 8], sizes = [8, 8], strides = [1, 1]} : vector<8x32xf32> to vector<8x8xf32>
    %64 = vector.extract_strided_slice %42 {offsets = [0, 8], sizes = [8, 8], strides = [1, 1]} : vector<8x32xf32> to vector<8x8xf32>
    %cst_43 = arith.constant dense<0.000000e+00> : vector<8x8xf32>
    %65 = tpu.matmul %62, %63, %cst_43 {dimension_numbers = #tpu.dot_dimension_numbers<[1], [1], [0], [0], [0, 0, 1, 0], [], []>} : vector<8x8xf32>, vector<8x8xf32>, vector<8x8xf32> -> vector<8x8xf32>
    %cst_44 = arith.constant dense<0xFF800000> : vector<8xf32>
    %66 = vector.multi_reduction <maximumf>, %65, %cst_44 [1] : vector<8x8xf32> to vector<8xf32>
    %67 = vector.shape_cast %66 : vector<8xf32> to vector<8x1xf32>
    %68 = vector.broadcast %67 : vector<8x1xf32> to vector<8x8xf32>
    %69 = arith.subf %65, %68 : vector<8x8xf32>
    %70 = math.exp %69 : vector<8x8xf32>
    %cst_45 = arith.constant dense<0.000000e+00> : vector<8xf32>
    %71 = vector.multi_reduction <add>, %70, %cst_45 [1] : vector<8x8xf32> to vector<8xf32>
    %72 = vector.shape_cast %71 : vector<8xf32> to vector<8x1xf32>
    %73 = tpu.reciprocal %72 : vector<8x1xf32> -> vector<8x1xf32>
    %74 = vector.broadcast %73 : vector<8x1xf32> to vector<8x8xf32>
    %75 = arith.mulf %70, %74 : vector<8x8xf32>
    %cst_46 = arith.constant dense<0.000000e+00> : vector<8x8xf32>
    %76 = tpu.matmul %75, %64, %cst_46 {dimension_numbers = #tpu.dot_dimension_numbers<[1], [0], [0], [1], [0, 0, 1, 1], [], []>} : vector<8x8xf32>, vector<8x8xf32>, vector<8x8xf32> -> vector<8x8xf32>
    %77 = vector.extract_strided_slice %40 {offsets = [0, 16], sizes = [8, 8], strides = [1, 1]} : vector<8x32xf32> to vector<8x8xf32>
    %cst_47 = arith.constant 0.353553385 : f32
    %78 = vector.broadcast %cst_47 : f32 to vector<8x8xf32>
    %79 = arith.mulf %77, %78 : vector<8x8xf32>
    %80 = vector.extract_strided_slice %41 {offsets = [0, 16], sizes = [8, 8], strides = [1, 1]} : vector<8x32xf32> to vector<8x8xf32>
    %81 = vector.extract_strided_slice %42 {offsets = [0, 16], sizes = [8, 8], strides = [1, 1]} : vector<8x32xf32> to vector<8x8xf32>
    %cst_48 = arith.constant dense<0.000000e+00> : vector<8x8xf32>
    %82 = tpu.matmul %79, %80, %cst_48 {dimension_numbers = #tpu.dot_dimension_numbers<[1], [1], [0], [0], [0, 0, 1, 0], [], []>} : vector<8x8xf32>, vector<8x8xf32>, vector<8x8xf32> -> vector<8x8xf32>
    %cst_49 = arith.constant dense<0xFF800000> : vector<8xf32>
    %83 = vector.multi_reduction <maximumf>, %82, %cst_49 [1] : vector<8x8xf32> to vector<8xf32>
    %84 = vector.shape_cast %83 : vector<8xf32> to vector<8x1xf32>
    %85 = vector.broadcast %84 : vector<8x1xf32> to vector<8x8xf32>
    %86 = arith.subf %82, %85 : vector<8x8xf32>
    %87 = math.exp %86 : vector<8x8xf32>
    %cst_50 = arith.constant dense<0.000000e+00> : vector<8xf32>
    %88 = vector.multi_reduction <add>, %87, %cst_50 [1] : vector<8x8xf32> to vector<8xf32>
    %89 = vector.shape_cast %88 : vector<8xf32> to vector<8x1xf32>
    %90 = tpu.reciprocal %89 : vector<8x1xf32> -> vector<8x1xf32>
    %91 = vector.broadcast %90 : vector<8x1xf32> to vector<8x8xf32>
    %92 = arith.mulf %87, %91 : vector<8x8xf32>
    %cst_51 = arith.constant dense<0.000000e+00> : vector<8x8xf32>
    %93 = tpu.matmul %92, %81, %cst_51 {dimension_numbers = #tpu.dot_dimension_numbers<[1], [0], [0], [1], [0, 0, 1, 1], [], []>} : vector<8x8xf32>, vector<8x8xf32>, vector<8x8xf32> -> vector<8x8xf32>
    %94 = vector.extract_strided_slice %40 {offsets = [0, 24], sizes = [8, 8], strides = [1, 1]} : vector<8x32xf32> to vector<8x8xf32>
    %cst_52 = arith.constant 0.353553385 : f32
    %95 = vector.broadcast %cst_52 : f32 to vector<8x8xf32>
    %96 = arith.mulf %94, %95 : vector<8x8xf32>
    %97 = vector.extract_strided_slice %41 {offsets = [0, 24], sizes = [8, 8], strides = [1, 1]} : vector<8x32xf32> to vector<8x8xf32>
    %98 = vector.extract_strided_slice %42 {offsets = [0, 24], sizes = [8, 8], strides = [1, 1]} : vector<8x32xf32> to vector<8x8xf32>
    %cst_53 = arith.constant dense<0.000000e+00> : vector<8x8xf32>
    %99 = tpu.matmul %96, %97, %cst_53 {dimension_numbers = #tpu.dot_dimension_numbers<[1], [1], [0], [0], [0, 0, 1, 0], [], []>} : vector<8x8xf32>, vector<8x8xf32>, vector<8x8xf32> -> vector<8x8xf32>
    %cst_54 = arith.constant dense<0xFF800000> : vector<8xf32>
    %100 = vector.multi_reduction <maximumf>, %99, %cst_54 [1] : vector<8x8xf32> to vector<8xf32>
    %101 = vector.shape_cast %100 : vector<8xf32> to vector<8x1xf32>
    %102 = vector.broadcast %101 : vector<8x1xf32> to vector<8x8xf32>
    %103 = arith.subf %99, %102 : vector<8x8xf32>
    %104 = math.exp %103 : vector<8x8xf32>
    %cst_55 = arith.constant dense<0.000000e+00> : vector<8xf32>
    %105 = vector.multi_reduction <add>, %104, %cst_55 [1] : vector<8x8xf32> to vector<8xf32>
    %106 = vector.shape_cast %105 : vector<8xf32> to vector<8x1xf32>
    %107 = tpu.reciprocal %106 : vector<8x1xf32> -> vector<8x1xf32>
    %108 = vector.broadcast %107 : vector<8x1xf32> to vector<8x8xf32>
    %109 = arith.mulf %104, %108 : vector<8x8xf32>
    %cst_56 = arith.constant dense<0.000000e+00> : vector<8x8xf32>
    %110 = tpu.matmul %109, %98, %cst_56 {dimension_numbers = #tpu.dot_dimension_numbers<[1], [0], [0], [1], [0, 0, 1, 1], [], []>} : vector<8x8xf32>, vector<8x8xf32>, vector<8x8xf32> -> vector<8x8xf32>
    %111 = tpu.concatenate %59, %76, %93, %110 in 1 : vector<8x8xf32>, vector<8x8xf32>, vector<8x8xf32>, vector<8x8xf32> -> vector<8x32xf32>
    %112 = vector.extract_strided_slice %33 {offsets = [8, 0], sizes = [8, 32], strides = [1, 1]} : vector<16x32xf32> to vector<8x32xf32>
    %113 = vector.extract_strided_slice %36 {offsets = [8, 0], sizes = [8, 32], strides = [1, 1]} : vector<16x32xf32> to vector<8x32xf32>
    %114 = vector.extract_strided_slice %39 {offsets = [8, 0], sizes = [8, 32], strides = [1, 1]} : vector<16x32xf32> to vector<8x32xf32>
    %115 = vector.extract_strided_slice %112 {offsets = [0, 0], sizes = [8, 8], strides = [1, 1]} : vector<8x32xf32> to vector<8x8xf32>
    %cst_57 = arith.constant 0.353553385 : f32
    %116 = vector.broadcast %cst_57 : f32 to vector<8x8xf32>
    %117 = arith.mulf %115, %116 : vector<8x8xf32>
    %118 = vector.extract_strided_slice %113 {offsets = [0, 0], sizes = [8, 8], strides = [1, 1]} : vector<8x32xf32> to vector<8x8xf32>
    %119 = vector.extract_strided_slice %114 {offsets = [0, 0], sizes = [8, 8], strides = [1, 1]} : vector<8x32xf32> to vector<8x8xf32>
    %cst_58 = arith.constant dense<0.000000e+00> : vector<8x8xf32>
    %120 = tpu.matmul %117, %118, %cst_58 {dimension_numbers = #tpu.dot_dimension_numbers<[1], [1], [0], [0], [0, 0, 1, 0], [], []>} : vector<8x8xf32>, vector<8x8xf32>, vector<8x8xf32> -> vector<8x8xf32>
    %cst_59 = arith.constant dense<0xFF800000> : vector<8xf32>
    %121 = vector.multi_reduction <maximumf>, %120, %cst_59 [1] : vector<8x8xf32> to vector<8xf32>
    %122 = vector.shape_cast %121 : vector<8xf32> to vector<8x1xf32>
    %123 = vector.broadcast %122 : vector<8x1xf32> to vector<8x8xf32>
    %124 = arith.subf %120, %123 : vector<8x8xf32>
    %125 = math.exp %124 : vector<8x8xf32>
    %cst_60 = arith.constant dense<0.000000e+00> : vector<8xf32>
    %126 = vector.multi_reduction <add>, %125, %cst_60 [1] : vector<8x8xf32> to vector<8xf32>
    %127 = vector.shape_cast %126 : vector<8xf32> to vector<8x1xf32>
    %128 = tpu.reciprocal %127 : vector<8x1xf32> -> vector<8x1xf32>
    %129 = vector.broadcast %128 : vector<8x1xf32> to vector<8x8xf32>
    %130 = arith.mulf %125, %129 : vector<8x8xf32>
    %cst_61 = arith.constant dense<0.000000e+00> : vector<8x8xf32>
    %131 = tpu.matmul %130, %119, %cst_61 {dimension_numbers = #tpu.dot_dimension_numbers<[1], [0], [0], [1], [0, 0, 1, 1], [], []>} : vector<8x8xf32>, vector<8x8xf32>, vector<8x8xf32> -> vector<8x8xf32>
    %132 = vector.extract_strided_slice %112 {offsets = [0, 8], sizes = [8, 8], strides = [1, 1]} : vector<8x32xf32> to vector<8x8xf32>
    %cst_62 = arith.constant 0.353553385 : f32
    %133 = vector.broadcast %cst_62 : f32 to vector<8x8xf32>
    %134 = arith.mulf %132, %133 : vector<8x8xf32>
    %135 = vector.extract_strided_slice %113 {offsets = [0, 8], sizes = [8, 8], strides = [1, 1]} : vector<8x32xf32> to vector<8x8xf32>
    %136 = vector.extract_strided_slice %114 {offsets = [0, 8], sizes = [8, 8], strides = [1, 1]} : vector<8x32xf32> to vector<8x8xf32>
    %cst_63 = arith.constant dense<0.000000e+00> : vector<8x8xf32>
    %137 = tpu.matmul %134, %135, %cst_63 {dimension_numbers = #tpu.dot_dimension_numbers<[1], [1], [0], [0], [0, 0, 1, 0], [], []>} : vector<8x8xf32>, vector<8x8xf32>, vector<8x8xf32> -> vector<8x8xf32>
    %cst_64 = arith.constant dense<0xFF800000> : vector<8xf32>
    %138 = vector.multi_reduction <maximumf>, %137, %cst_64 [1] : vector<8x8xf32> to vector<8xf32>
    %139 = vector.shape_cast %138 : vector<8xf32> to vector<8x1xf32>
    %140 = vector.broadcast %139 : vector<8x1xf32> to vector<8x8xf32>
    %141 = arith.subf %137, %140 : vector<8x8xf32>
    %142 = math.exp %141 : vector<8x8xf32>
    %cst_65 = arith.constant dense<0.000000e+00> : vector<8xf32>
    %143 = vector.multi_reduction <add>, %142, %cst_65 [1] : vector<8x8xf32> to vector<8xf32>
    %144 = vector.shape_cast %143 : vector<8xf32> to vector<8x1xf32>
    %145 = tpu.reciprocal %144 : vector<8x1xf32> -> vector<8x1xf32>
    %146 = vector.broadcast %145 : vector<8x1xf32> to vector<8x8xf32>
    %147 = arith.mulf %142, %146 : vector<8x8xf32>
    %cst_66 = arith.constant dense<0.000000e+00> : vector<8x8xf32>
    %148 = tpu.matmul %147, %136, %cst_66 {dimension_numbers = #tpu.dot_dimension_numbers<[1], [0], [0], [1], [0, 0, 1, 1], [], []>} : vector<8x8xf32>, vector<8x8xf32>, vector<8x8xf32> -> vector<8x8xf32>
    %149 = vector.extract_strided_slice %112 {offsets = [0, 16], sizes = [8, 8], strides = [1, 1]} : vector<8x32xf32> to vector<8x8xf32>
    %cst_67 = arith.constant 0.353553385 : f32
    %150 = vector.broadcast %cst_67 : f32 to vector<8x8xf32>
    %151 = arith.mulf %149, %150 : vector<8x8xf32>
    %152 = vector.extract_strided_slice %113 {offsets = [0, 16], sizes = [8, 8], strides = [1, 1]} : vector<8x32xf32> to vector<8x8xf32>
    %153 = vector.extract_strided_slice %114 {offsets = [0, 16], sizes = [8, 8], strides = [1, 1]} : vector<8x32xf32> to vector<8x8xf32>
    %cst_68 = arith.constant dense<0.000000e+00> : vector<8x8xf32>
    %154 = tpu.matmul %151, %152, %cst_68 {dimension_numbers = #tpu.dot_dimension_numbers<[1], [1], [0], [0], [0, 0, 1, 0], [], []>} : vector<8x8xf32>, vector<8x8xf32>, vector<8x8xf32> -> vector<8x8xf32>
    %cst_69 = arith.constant dense<0xFF800000> : vector<8xf32>
    %155 = vector.multi_reduction <maximumf>, %154, %cst_69 [1] : vector<8x8xf32> to vector<8xf32>
    %156 = vector.shape_cast %155 : vector<8xf32> to vector<8x1xf32>
    %157 = vector.broadcast %156 : vector<8x1xf32> to vector<8x8xf32>
    %158 = arith.subf %154, %157 : vector<8x8xf32>
    %159 = math.exp %158 : vector<8x8xf32>
    %cst_70 = arith.constant dense<0.000000e+00> : vector<8xf32>
    %160 = vector.multi_reduction <add>, %159, %cst_70 [1] : vector<8x8xf32> to vector<8xf32>
    %161 = vector.shape_cast %160 : vector<8xf32> to vector<8x1xf32>
    %162 = tpu.reciprocal %161 : vector<8x1xf32> -> vector<8x1xf32>
    %163 = vector.broadcast %162 : vector<8x1xf32> to vector<8x8xf32>
    %164 = arith.mulf %159, %163 : vector<8x8xf32>
    %cst_71 = arith.constant dense<0.000000e+00> : vector<8x8xf32>
    %165 = tpu.matmul %164, %153, %cst_71 {dimension_numbers = #tpu.dot_dimension_numbers<[1], [0], [0], [1], [0, 0, 1, 1], [], []>} : vector<8x8xf32>, vector<8x8xf32>, vector<8x8xf32> -> vector<8x8xf32>
    %166 = vector.extract_strided_slice %112 {offsets = [0, 24], sizes = [8, 8], strides = [1, 1]} : vector<8x32xf32> to vector<8x8xf32>
    %cst_72 = arith.constant 0.353553385 : f32
    %167 = vector.broadcast %cst_72 : f32 to vector<8x8xf32>
    %168 = arith.mulf %166, %167 : vector<8x8xf32>
    %169 = vector.extract_strided_slice %113 {offsets = [0, 24], sizes = [8, 8], strides = [1, 1]} : vector<8x32xf32> to vector<8x8xf32>
    %170 = vector.extract_strided_slice %114 {offsets = [0, 24], sizes = [8, 8], strides = [1, 1]} : vector<8x32xf32> to vector<8x8xf32>
    %cst_73 = arith.constant dense<0.000000e+00> : vector<8x8xf32>
    %171 = tpu.matmul %168, %169, %cst_73 {dimension_numbers = #tpu.dot_dimension_numbers<[1], [1], [0], [0], [0, 0, 1, 0], [], []>} : vector<8x8xf32>, vector<8x8xf32>, vector<8x8xf32> -> vector<8x8xf32>
    %cst_74 = arith.constant dense<0xFF800000> : vector<8xf32>
    %172 = vector.multi_reduction <maximumf>, %171, %cst_74 [1] : vector<8x8xf32> to vector<8xf32>
    %173 = vector.shape_cast %172 : vector<8xf32> to vector<8x1xf32>
    %174 = vector.broadcast %173 : vector<8x1xf32> to vector<8x8xf32>
    %175 = arith.subf %171, %174 : vector<8x8xf32>
    %176 = math.exp %175 : vector<8x8xf32>
    %cst_75 = arith.constant dense<0.000000e+00> : vector<8xf32>
    %177 = vector.multi_reduction <add>, %176, %cst_75 [1] : vector<8x8xf32> to vector<8xf32>
    %178 = vector.shape_cast %177 : vector<8xf32> to vector<8x1xf32>
    %179 = tpu.reciprocal %178 : vector<8x1xf32> -> vector<8x1xf32>
    %180 = vector.broadcast %179 : vector<8x1xf32> to vector<8x8xf32>
    %181 = arith.mulf %176, %180 : vector<8x8xf32>
    %cst_76 = arith.constant dense<0.000000e+00> : vector<8x8xf32>
    %182 = tpu.matmul %181, %170, %cst_76 {dimension_numbers = #tpu.dot_dimension_numbers<[1], [0], [0], [1], [0, 0, 1, 1], [], []>} : vector<8x8xf32>, vector<8x8xf32>, vector<8x8xf32> -> vector<8x8xf32>
    %183 = tpu.concatenate %131, %148, %165, %182 in 1 : vector<8x8xf32>, vector<8x8xf32>, vector<8x8xf32>, vector<8x8xf32> -> vector<8x32xf32>
    %184 = tpu.concatenate %111, %183 in 0 : vector<8x32xf32>, vector<8x32xf32> -> vector<16x32xf32>
    %cst_77 = arith.constant dense<0.000000e+00> : vector<16x32xf32>
    %185 = tpu.matmul %184, %29, %cst_77 {dimension_numbers = #tpu.dot_dimension_numbers<[1], [0], [0], [1], [0, 0, 1, 1], [], []>} : vector<16x32xf32>, vector<32x32xf32>, vector<16x32xf32> -> vector<16x32xf32>
    %186 = vector.broadcast %30 : vector<1x32xf32> to vector<16x32xf32>
    %187 = arith.addf %185, %186 : vector<16x32xf32>
    %c0_78 = arith.constant 0 : index
    %c0_79 = arith.constant 0 : index
    %188 = vector.load %arg18[%c0_78, %c0_79] : memref<2x32xf32, #tpu.memory_space<vmem>>, vector<1x32xf32>
    %c0_80 = arith.constant 0 : index
    %c0_81 = arith.constant 0 : index
    %189 = vector.load %arg19[%c0_80, %c0_81] : memref<2x32xf32, #tpu.memory_space<vmem>>, vector<1x32xf32>
    %cst_82 = arith.constant dense<0.000000e+00> : vector<16xf32>
    %190 = vector.multi_reduction <add>, %187, %cst_82 [1] : vector<16x32xf32> to vector<16xf32>
    %191 = vector.shape_cast %190 : vector<16xf32> to vector<16x1xf32>
    %cst_83 = arith.constant 3.200000e+01 : f32
    %192 = vector.broadcast %cst_83 : f32 to vector<16x1xf32>
    %193 = arith.divf %191, %192 : vector<16x1xf32>
    %194 = vector.broadcast %193 : vector<16x1xf32> to vector<16x32xf32>
    %195 = arith.subf %187, %194 : vector<16x32xf32>
    %196 = arith.mulf %195, %195 : vector<16x32xf32>
    %cst_84 = arith.constant dense<0.000000e+00> : vector<16xf32>
    %197 = vector.multi_reduction <add>, %196, %cst_84 [1] : vector<16x32xf32> to vector<16xf32>
    %198 = vector.shape_cast %197 : vector<16xf32> to vector<16x1xf32>
    %cst_85 = arith.constant 3.200000e+01 : f32
    %199 = vector.broadcast %cst_85 : f32 to vector<16x1xf32>
    %200 = arith.divf %198, %199 : vector<16x1xf32>
    %201 = vector.broadcast %193 : vector<16x1xf32> to vector<16x32xf32>
    %202 = arith.subf %187, %201 : vector<16x32xf32>
    %cst_86 = arith.constant 9.99999974E-6 : f32
    %203 = vector.broadcast %cst_86 : f32 to vector<16x1xf32>
    %204 = arith.addf %200, %203 : vector<16x1xf32>
    %205 = math.rsqrt %204 : vector<16x1xf32>
    %206 = vector.broadcast %205 : vector<16x1xf32> to vector<16x32xf32>
    %207 = arith.mulf %202, %206 : vector<16x32xf32>
    %208 = vector.broadcast %188 : vector<1x32xf32> to vector<16x32xf32>
    %209 = arith.mulf %207, %208 : vector<16x32xf32>
    %210 = vector.broadcast %189 : vector<1x32xf32> to vector<16x32xf32>
    %211 = arith.addf %209, %210 : vector<16x32xf32>
    %212 = arith.addf %8, %211 : vector<16x32xf32>
    %c0_87 = arith.constant 0 : index
    %c0_88 = arith.constant 0 : index
    %c0_89 = arith.constant 0 : index
    %213 = vector.load %arg22[%c0_87, %c0_88, %c0_89] : memref<2x32x64xf32, #tpu.memory_space<vmem>>, vector<1x32x64xf32>
    %214 = vector.shape_cast %213 : vector<1x32x64xf32> to vector<32x64xf32>
    %c0_90 = arith.constant 0 : index
    %c0_91 = arith.constant 0 : index
    %215 = vector.load %arg23[%c0_90, %c0_91] : memref<2x64xf32, #tpu.memory_space<vmem>>, vector<1x64xf32>
    %c0_92 = arith.constant 0 : index
    %c0_93 = arith.constant 0 : index
    %c0_94 = arith.constant 0 : index
    %216 = vector.load %arg24[%c0_92, %c0_93, %c0_94] : memref<2x64x32xf32, #tpu.memory_space<vmem>>, vector<1x64x32xf32>
    %217 = vector.shape_cast %216 : vector<1x64x32xf32> to vector<64x32xf32>
    %c0_95 = arith.constant 0 : index
    %c0_96 = arith.constant 0 : index
    %218 = vector.load %arg25[%c0_95, %c0_96] : memref<2x32xf32, #tpu.memory_space<vmem>>, vector<1x32xf32>
    %cst_97 = arith.constant dense<0.000000e+00> : vector<16x64xf32>
    %219 = tpu.matmul %212, %214, %cst_97 {dimension_numbers = #tpu.dot_dimension_numbers<[1], [0], [0], [1], [0, 0, 1, 1], [], []>} : vector<16x32xf32>, vector<32x64xf32>, vector<16x64xf32> -> vector<16x64xf32>
    %220 = vector.broadcast %215 : vector<1x64xf32> to vector<16x64xf32>
    %221 = arith.addf %219, %220 : vector<16x64xf32>
    %cst_98 = arith.constant 0.000000e+00 : f32
    %222 = vector.broadcast %cst_98 : f32 to vector<16x64xf32>
    %223 = arith.maximumf %221, %222 : vector<16x64xf32>
    %cst_99 = arith.constant dense<0.000000e+00> : vector<16x32xf32>
    %224 = tpu.matmul %223, %217, %cst_99 {dimension_numbers = #tpu.dot_dimension_numbers<[1], [0], [0], [1], [0, 0, 1, 1], [], []>} : vector<16x64xf32>, vector<64x32xf32>, vector<16x32xf32> -> vector<16x32xf32>
    %225 = vector.broadcast %218 : vector<1x32xf32> to vector<16x32xf32>
    %226 = arith.addf %224, %225 : vector<16x32xf32>
    %c0_100 = arith.constant 0 : index
    %c0_101 = arith.constant 0 : index
    %227 = vector.load %arg20[%c0_100, %c0_101] : memref<2x32xf32, #tpu.memory_space<vmem>>, vector<1x32xf32>
    %c0_102 = arith.constant 0 : index
    %c0_103 = arith.constant 0 : index
    %228 = vector.load %arg21[%c0_102, %c0_103] : memref<2x32xf32, #tpu.memory_space<vmem>>, vector<1x32xf32>
    %cst_104 = arith.constant dense<0.000000e+00> : vector<16xf32>
    %229 = vector.multi_reduction <add>, %226, %cst_104 [1] : vector<16x32xf32> to vector<16xf32>
    %230 = vector.shape_cast %229 : vector<16xf32> to vector<16x1xf32>
    %cst_105 = arith.constant 3.200000e+01 : f32
    %231 = vector.broadcast %cst_105 : f32 to vector<16x1xf32>
    %232 = arith.divf %230, %231 : vector<16x1xf32>
    %233 = vector.broadcast %232 : vector<16x1xf32> to vector<16x32xf32>
    %234 = arith.subf %226, %233 : vector<16x32xf32>
    %235 = arith.mulf %234, %234 : vector<16x32xf32>
    %cst_106 = arith.constant dense<0.000000e+00> : vector<16xf32>
    %236 = vector.multi_reduction <add>, %235, %cst_106 [1] : vector<16x32xf32> to vector<16xf32>
    %237 = vector.shape_cast %236 : vector<16xf32> to vector<16x1xf32>
    %cst_107 = arith.constant 3.200000e+01 : f32
    %238 = vector.broadcast %cst_107 : f32 to vector<16x1xf32>
    %239 = arith.divf %237, %238 : vector<16x1xf32>
    %240 = vector.broadcast %232 : vector<16x1xf32> to vector<16x32xf32>
    %241 = arith.subf %226, %240 : vector<16x32xf32>
    %cst_108 = arith.constant 9.99999974E-6 : f32
    %242 = vector.broadcast %cst_108 : f32 to vector<16x1xf32>
    %243 = arith.addf %239, %242 : vector<16x1xf32>
    %244 = math.rsqrt %243 : vector<16x1xf32>
    %245 = vector.broadcast %244 : vector<16x1xf32> to vector<16x32xf32>
    %246 = arith.mulf %241, %245 : vector<16x32xf32>
    %247 = vector.broadcast %227 : vector<1x32xf32> to vector<16x32xf32>
    %248 = arith.mulf %246, %247 : vector<16x32xf32>
    %249 = vector.broadcast %228 : vector<1x32xf32> to vector<16x32xf32>
    %250 = arith.addf %248, %249 : vector<16x32xf32>
    %251 = arith.addf %212, %250 : vector<16x32xf32>
    %c1 = arith.constant 1 : index
    %c0_109 = arith.constant 0 : index
    %c0_110 = arith.constant 0 : index
    %252 = vector.load %arg10[%c1, %c0_109, %c0_110] : memref<2x32x32xf32, #tpu.memory_space<vmem>>, vector<1x32x32xf32>
    %253 = vector.shape_cast %252 : vector<1x32x32xf32> to vector<32x32xf32>
    %c1_111 = arith.constant 1 : index
    %c0_112 = arith.constant 0 : index
    %254 = vector.load %arg11[%c1_111, %c0_112] : memref<2x32xf32, #tpu.memory_space<vmem>>, vector<1x32xf32>
    %c1_113 = arith.constant 1 : index
    %c0_114 = arith.constant 0 : index
    %c0_115 = arith.constant 0 : index
    %255 = vector.load %arg12[%c1_113, %c0_114, %c0_115] : memref<2x32x32xf32, #tpu.memory_space<vmem>>, vector<1x32x32xf32>
    %256 = vector.shape_cast %255 : vector<1x32x32xf32> to vector<32x32xf32>
    %c1_116 = arith.constant 1 : index
    %c0_117 = arith.constant 0 : index
    %257 = vector.load %arg13[%c1_116, %c0_117] : memref<2x32xf32, #tpu.memory_space<vmem>>, vector<1x32xf32>
    %c1_118 = arith.constant 1 : index
    %c0_119 = arith.constant 0 : index
    %c0_120 = arith.constant 0 : index
    %258 = vector.load %arg14[%c1_118, %c0_119, %c0_120] : memref<2x32x32xf32, #tpu.memory_space<vmem>>, vector<1x32x32xf32>
    %259 = vector.shape_cast %258 : vector<1x32x32xf32> to vector<32x32xf32>
    %c1_121 = arith.constant 1 : index
    %c0_122 = arith.constant 0 : index
    %260 = vector.load %arg15[%c1_121, %c0_122] : memref<2x32xf32, #tpu.memory_space<vmem>>, vector<1x32xf32>
    %c1_123 = arith.constant 1 : index
    %c0_124 = arith.constant 0 : index
    %c0_125 = arith.constant 0 : index
    %261 = vector.load %arg16[%c1_123, %c0_124, %c0_125] : memref<2x32x32xf32, #tpu.memory_space<vmem>>, vector<1x32x32xf32>
    %262 = vector.shape_cast %261 : vector<1x32x32xf32> to vector<32x32xf32>
    %c1_126 = arith.constant 1 : index
    %c0_127 = arith.constant 0 : index
    %263 = vector.load %arg17[%c1_126, %c0_127] : memref<2x32xf32, #tpu.memory_space<vmem>>, vector<1x32xf32>
    %cst_128 = arith.constant dense<0.000000e+00> : vector<16x32xf32>
    %264 = tpu.matmul %251, %253, %cst_128 {dimension_numbers = #tpu.dot_dimension_numbers<[1], [0], [0], [1], [0, 0, 1, 1], [], []>} : vector<16x32xf32>, vector<32x32xf32>, vector<16x32xf32> -> vector<16x32xf32>
    %265 = vector.broadcast %254 : vector<1x32xf32> to vector<16x32xf32>
    %266 = arith.addf %264, %265 : vector<16x32xf32>
    %cst_129 = arith.constant dense<0.000000e+00> : vector<16x32xf32>
    %267 = tpu.matmul %251, %256, %cst_129 {dimension_numbers = #tpu.dot_dimension_numbers<[1], [0], [0], [1], [0, 0, 1, 1], [], []>} : vector<16x32xf32>, vector<32x32xf32>, vector<16x32xf32> -> vector<16x32xf32>
    %268 = vector.broadcast %257 : vector<1x32xf32> to vector<16x32xf32>
    %269 = arith.addf %267, %268 : vector<16x32xf32>
    %cst_130 = arith.constant dense<0.000000e+00> : vector<16x32xf32>
    %270 = tpu.matmul %251, %259, %cst_130 {dimension_numbers = #tpu.dot_dimension_numbers<[1], [0], [0], [1], [0, 0, 1, 1], [], []>} : vector<16x32xf32>, vector<32x32xf32>, vector<16x32xf32> -> vector<16x32xf32>
    %271 = vector.broadcast %260 : vector<1x32xf32> to vector<16x32xf32>
    %272 = arith.addf %270, %271 : vector<16x32xf32>
    %273 = vector.extract_strided_slice %266 {offsets = [0, 0], sizes = [8, 32], strides = [1, 1]} : vector<16x32xf32> to vector<8x32xf32>
    %274 = vector.extract_strided_slice %269 {offsets = [0, 0], sizes = [8, 32], strides = [1, 1]} : vector<16x32xf32> to vector<8x32xf32>
    %275 = vector.extract_strided_slice %272 {offsets = [0, 0], sizes = [8, 32], strides = [1, 1]} : vector<16x32xf32> to vector<8x32xf32>
    %276 = vector.extract_strided_slice %273 {offsets = [0, 0], sizes = [8, 8], strides = [1, 1]} : vector<8x32xf32> to vector<8x8xf32>
    %cst_131 = arith.constant 0.353553385 : f32
    %277 = vector.broadcast %cst_131 : f32 to vector<8x8xf32>
    %278 = arith.mulf %276, %277 : vector<8x8xf32>
    %279 = vector.extract_strided_slice %274 {offsets = [0, 0], sizes = [8, 8], strides = [1, 1]} : vector<8x32xf32> to vector<8x8xf32>
    %280 = vector.extract_strided_slice %275 {offsets = [0, 0], sizes = [8, 8], strides = [1, 1]} : vector<8x32xf32> to vector<8x8xf32>
    %cst_132 = arith.constant dense<0.000000e+00> : vector<8x8xf32>
    %281 = tpu.matmul %278, %279, %cst_132 {dimension_numbers = #tpu.dot_dimension_numbers<[1], [1], [0], [0], [0, 0, 1, 0], [], []>} : vector<8x8xf32>, vector<8x8xf32>, vector<8x8xf32> -> vector<8x8xf32>
    %cst_133 = arith.constant dense<0xFF800000> : vector<8xf32>
    %282 = vector.multi_reduction <maximumf>, %281, %cst_133 [1] : vector<8x8xf32> to vector<8xf32>
    %283 = vector.shape_cast %282 : vector<8xf32> to vector<8x1xf32>
    %284 = vector.broadcast %283 : vector<8x1xf32> to vector<8x8xf32>
    %285 = arith.subf %281, %284 : vector<8x8xf32>
    %286 = math.exp %285 : vector<8x8xf32>
    %cst_134 = arith.constant dense<0.000000e+00> : vector<8xf32>
    %287 = vector.multi_reduction <add>, %286, %cst_134 [1] : vector<8x8xf32> to vector<8xf32>
    %288 = vector.shape_cast %287 : vector<8xf32> to vector<8x1xf32>
    %289 = tpu.reciprocal %288 : vector<8x1xf32> -> vector<8x1xf32>
    %290 = vector.broadcast %289 : vector<8x1xf32> to vector<8x8xf32>
    %291 = arith.mulf %286, %290 : vector<8x8xf32>
    %cst_135 = arith.constant dense<0.000000e+00> : vector<8x8xf32>
    %292 = tpu.matmul %291, %280, %cst_135 {dimension_numbers = #tpu.dot_dimension_numbers<[1], [0], [0], [1], [0, 0, 1, 1], [], []>} : vector<8x8xf32>, vector<8x8xf32>, vector<8x8xf32> -> vector<8x8xf32>
    %293 = vector.extract_strided_slice %273 {offsets = [0, 8], sizes = [8, 8], strides = [1, 1]} : vector<8x32xf32> to vector<8x8xf32>
    %cst_136 = arith.constant 0.353553385 : f32
    %294 = vector.broadcast %cst_136 : f32 to vector<8x8xf32>
    %295 = arith.mulf %293, %294 : vector<8x8xf32>
    %296 = vector.extract_strided_slice %274 {offsets = [0, 8], sizes = [8, 8], strides = [1, 1]} : vector<8x32xf32> to vector<8x8xf32>
    %297 = vector.extract_strided_slice %275 {offsets = [0, 8], sizes = [8, 8], strides = [1, 1]} : vector<8x32xf32> to vector<8x8xf32>
    %cst_137 = arith.constant dense<0.000000e+00> : vector<8x8xf32>
    %298 = tpu.matmul %295, %296, %cst_137 {dimension_numbers = #tpu.dot_dimension_numbers<[1], [1], [0], [0], [0, 0, 1, 0], [], []>} : vector<8x8xf32>, vector<8x8xf32>, vector<8x8xf32> -> vector<8x8xf32>
    %cst_138 = arith.constant dense<0xFF800000> : vector<8xf32>
    %299 = vector.multi_reduction <maximumf>, %298, %cst_138 [1] : vector<8x8xf32> to vector<8xf32>
    %300 = vector.shape_cast %299 : vector<8xf32> to vector<8x1xf32>
    %301 = vector.broadcast %300 : vector<8x1xf32> to vector<8x8xf32>
    %302 = arith.subf %298, %301 : vector<8x8xf32>
    %303 = math.exp %302 : vector<8x8xf32>
    %cst_139 = arith.constant dense<0.000000e+00> : vector<8xf32>
    %304 = vector.multi_reduction <add>, %303, %cst_139 [1] : vector<8x8xf32> to vector<8xf32>
    %305 = vector.shape_cast %304 : vector<8xf32> to vector<8x1xf32>
    %306 = tpu.reciprocal %305 : vector<8x1xf32> -> vector<8x1xf32>
    %307 = vector.broadcast %306 : vector<8x1xf32> to vector<8x8xf32>
    %308 = arith.mulf %303, %307 : vector<8x8xf32>
    %cst_140 = arith.constant dense<0.000000e+00> : vector<8x8xf32>
    %309 = tpu.matmul %308, %297, %cst_140 {dimension_numbers = #tpu.dot_dimension_numbers<[1], [0], [0], [1], [0, 0, 1, 1], [], []>} : vector<8x8xf32>, vector<8x8xf32>, vector<8x8xf32> -> vector<8x8xf32>
    %310 = vector.extract_strided_slice %273 {offsets = [0, 16], sizes = [8, 8], strides = [1, 1]} : vector<8x32xf32> to vector<8x8xf32>
    %cst_141 = arith.constant 0.353553385 : f32
    %311 = vector.broadcast %cst_141 : f32 to vector<8x8xf32>
    %312 = arith.mulf %310, %311 : vector<8x8xf32>
    %313 = vector.extract_strided_slice %274 {offsets = [0, 16], sizes = [8, 8], strides = [1, 1]} : vector<8x32xf32> to vector<8x8xf32>
    %314 = vector.extract_strided_slice %275 {offsets = [0, 16], sizes = [8, 8], strides = [1, 1]} : vector<8x32xf32> to vector<8x8xf32>
    %cst_142 = arith.constant dense<0.000000e+00> : vector<8x8xf32>
    %315 = tpu.matmul %312, %313, %cst_142 {dimension_numbers = #tpu.dot_dimension_numbers<[1], [1], [0], [0], [0, 0, 1, 0], [], []>} : vector<8x8xf32>, vector<8x8xf32>, vector<8x8xf32> -> vector<8x8xf32>
    %cst_143 = arith.constant dense<0xFF800000> : vector<8xf32>
    %316 = vector.multi_reduction <maximumf>, %315, %cst_143 [1] : vector<8x8xf32> to vector<8xf32>
    %317 = vector.shape_cast %316 : vector<8xf32> to vector<8x1xf32>
    %318 = vector.broadcast %317 : vector<8x1xf32> to vector<8x8xf32>
    %319 = arith.subf %315, %318 : vector<8x8xf32>
    %320 = math.exp %319 : vector<8x8xf32>
    %cst_144 = arith.constant dense<0.000000e+00> : vector<8xf32>
    %321 = vector.multi_reduction <add>, %320, %cst_144 [1] : vector<8x8xf32> to vector<8xf32>
    %322 = vector.shape_cast %321 : vector<8xf32> to vector<8x1xf32>
    %323 = tpu.reciprocal %322 : vector<8x1xf32> -> vector<8x1xf32>
    %324 = vector.broadcast %323 : vector<8x1xf32> to vector<8x8xf32>
    %325 = arith.mulf %320, %324 : vector<8x8xf32>
    %cst_145 = arith.constant dense<0.000000e+00> : vector<8x8xf32>
    %326 = tpu.matmul %325, %314, %cst_145 {dimension_numbers = #tpu.dot_dimension_numbers<[1], [0], [0], [1], [0, 0, 1, 1], [], []>} : vector<8x8xf32>, vector<8x8xf32>, vector<8x8xf32> -> vector<8x8xf32>
    %327 = vector.extract_strided_slice %273 {offsets = [0, 24], sizes = [8, 8], strides = [1, 1]} : vector<8x32xf32> to vector<8x8xf32>
    %cst_146 = arith.constant 0.353553385 : f32
    %328 = vector.broadcast %cst_146 : f32 to vector<8x8xf32>
    %329 = arith.mulf %327, %328 : vector<8x8xf32>
    %330 = vector.extract_strided_slice %274 {offsets = [0, 24], sizes = [8, 8], strides = [1, 1]} : vector<8x32xf32> to vector<8x8xf32>
    %331 = vector.extract_strided_slice %275 {offsets = [0, 24], sizes = [8, 8], strides = [1, 1]} : vector<8x32xf32> to vector<8x8xf32>
    %cst_147 = arith.constant dense<0.000000e+00> : vector<8x8xf32>
    %332 = tpu.matmul %329, %330, %cst_147 {dimension_numbers = #tpu.dot_dimension_numbers<[1], [1], [0], [0], [0, 0, 1, 0], [], []>} : vector<8x8xf32>, vector<8x8xf32>, vector<8x8xf32> -> vector<8x8xf32>
    %cst_148 = arith.constant dense<0xFF800000> : vector<8xf32>
    %333 = vector.multi_reduction <maximumf>, %332, %cst_148 [1] : vector<8x8xf32> to vector<8xf32>
    %334 = vector.shape_cast %333 : vector<8xf32> to vector<8x1xf32>
    %335 = vector.broadcast %334 : vector<8x1xf32> to vector<8x8xf32>
    %336 = arith.subf %332, %335 : vector<8x8xf32>
    %337 = math.exp %336 : vector<8x8xf32>
    %cst_149 = arith.constant dense<0.000000e+00> : vector<8xf32>
    %338 = vector.multi_reduction <add>, %337, %cst_149 [1] : vector<8x8xf32> to vector<8xf32>
    %339 = vector.shape_cast %338 : vector<8xf32> to vector<8x1xf32>
    %340 = tpu.reciprocal %339 : vector<8x1xf32> -> vector<8x1xf32>
    %341 = vector.broadcast %340 : vector<8x1xf32> to vector<8x8xf32>
    %342 = arith.mulf %337, %341 : vector<8x8xf32>
    %cst_150 = arith.constant dense<0.000000e+00> : vector<8x8xf32>
    %343 = tpu.matmul %342, %331, %cst_150 {dimension_numbers = #tpu.dot_dimension_numbers<[1], [0], [0], [1], [0, 0, 1, 1], [], []>} : vector<8x8xf32>, vector<8x8xf32>, vector<8x8xf32> -> vector<8x8xf32>
    %344 = tpu.concatenate %292, %309, %326, %343 in 1 : vector<8x8xf32>, vector<8x8xf32>, vector<8x8xf32>, vector<8x8xf32> -> vector<8x32xf32>
    %345 = vector.extract_strided_slice %266 {offsets = [8, 0], sizes = [8, 32], strides = [1, 1]} : vector<16x32xf32> to vector<8x32xf32>
    %346 = vector.extract_strided_slice %269 {offsets = [8, 0], sizes = [8, 32], strides = [1, 1]} : vector<16x32xf32> to vector<8x32xf32>
    %347 = vector.extract_strided_slice %272 {offsets = [8, 0], sizes = [8, 32], strides = [1, 1]} : vector<16x32xf32> to vector<8x32xf32>
    %348 = vector.extract_strided_slice %345 {offsets = [0, 0], sizes = [8, 8], strides = [1, 1]} : vector<8x32xf32> to vector<8x8xf32>
    %cst_151 = arith.constant 0.353553385 : f32
    %349 = vector.broadcast %cst_151 : f32 to vector<8x8xf32>
    %350 = arith.mulf %348, %349 : vector<8x8xf32>
    %351 = vector.extract_strided_slice %346 {offsets = [0, 0], sizes = [8, 8], strides = [1, 1]} : vector<8x32xf32> to vector<8x8xf32>
    %352 = vector.extract_strided_slice %347 {offsets = [0, 0], sizes = [8, 8], strides = [1, 1]} : vector<8x32xf32> to vector<8x8xf32>
    %cst_152 = arith.constant dense<0.000000e+00> : vector<8x8xf32>
    %353 = tpu.matmul %350, %351, %cst_152 {dimension_numbers = #tpu.dot_dimension_numbers<[1], [1], [0], [0], [0, 0, 1, 0], [], []>} : vector<8x8xf32>, vector<8x8xf32>, vector<8x8xf32> -> vector<8x8xf32>
    %cst_153 = arith.constant dense<0xFF800000> : vector<8xf32>
    %354 = vector.multi_reduction <maximumf>, %353, %cst_153 [1] : vector<8x8xf32> to vector<8xf32>
    %355 = vector.shape_cast %354 : vector<8xf32> to vector<8x1xf32>
    %356 = vector.broadcast %355 : vector<8x1xf32> to vector<8x8xf32>
    %357 = arith.subf %353, %356 : vector<8x8xf32>
    %358 = math.exp %357 : vector<8x8xf32>
    %cst_154 = arith.constant dense<0.000000e+00> : vector<8xf32>
    %359 = vector.multi_reduction <add>, %358, %cst_154 [1] : vector<8x8xf32> to vector<8xf32>
    %360 = vector.shape_cast %359 : vector<8xf32> to vector<8x1xf32>
    %361 = tpu.reciprocal %360 : vector<8x1xf32> -> vector<8x1xf32>
    %362 = vector.broadcast %361 : vector<8x1xf32> to vector<8x8xf32>
    %363 = arith.mulf %358, %362 : vector<8x8xf32>
    %cst_155 = arith.constant dense<0.000000e+00> : vector<8x8xf32>
    %364 = tpu.matmul %363, %352, %cst_155 {dimension_numbers = #tpu.dot_dimension_numbers<[1], [0], [0], [1], [0, 0, 1, 1], [], []>} : vector<8x8xf32>, vector<8x8xf32>, vector<8x8xf32> -> vector<8x8xf32>
    %365 = vector.extract_strided_slice %345 {offsets = [0, 8], sizes = [8, 8], strides = [1, 1]} : vector<8x32xf32> to vector<8x8xf32>
    %cst_156 = arith.constant 0.353553385 : f32
    %366 = vector.broadcast %cst_156 : f32 to vector<8x8xf32>
    %367 = arith.mulf %365, %366 : vector<8x8xf32>
    %368 = vector.extract_strided_slice %346 {offsets = [0, 8], sizes = [8, 8], strides = [1, 1]} : vector<8x32xf32> to vector<8x8xf32>
    %369 = vector.extract_strided_slice %347 {offsets = [0, 8], sizes = [8, 8], strides = [1, 1]} : vector<8x32xf32> to vector<8x8xf32>
    %cst_157 = arith.constant dense<0.000000e+00> : vector<8x8xf32>
    %370 = tpu.matmul %367, %368, %cst_157 {dimension_numbers = #tpu.dot_dimension_numbers<[1], [1], [0], [0], [0, 0, 1, 0], [], []>} : vector<8x8xf32>, vector<8x8xf32>, vector<8x8xf32> -> vector<8x8xf32>
    %cst_158 = arith.constant dense<0xFF800000> : vector<8xf32>
    %371 = vector.multi_reduction <maximumf>, %370, %cst_158 [1] : vector<8x8xf32> to vector<8xf32>
    %372 = vector.shape_cast %371 : vector<8xf32> to vector<8x1xf32>
    %373 = vector.broadcast %372 : vector<8x1xf32> to vector<8x8xf32>
    %374 = arith.subf %370, %373 : vector<8x8xf32>
    %375 = math.exp %374 : vector<8x8xf32>
    %cst_159 = arith.constant dense<0.000000e+00> : vector<8xf32>
    %376 = vector.multi_reduction <add>, %375, %cst_159 [1] : vector<8x8xf32> to vector<8xf32>
    %377 = vector.shape_cast %376 : vector<8xf32> to vector<8x1xf32>
    %378 = tpu.reciprocal %377 : vector<8x1xf32> -> vector<8x1xf32>
    %379 = vector.broadcast %378 : vector<8x1xf32> to vector<8x8xf32>
    %380 = arith.mulf %375, %379 : vector<8x8xf32>
    %cst_160 = arith.constant dense<0.000000e+00> : vector<8x8xf32>
    %381 = tpu.matmul %380, %369, %cst_160 {dimension_numbers = #tpu.dot_dimension_numbers<[1], [0], [0], [1], [0, 0, 1, 1], [], []>} : vector<8x8xf32>, vector<8x8xf32>, vector<8x8xf32> -> vector<8x8xf32>
    %382 = vector.extract_strided_slice %345 {offsets = [0, 16], sizes = [8, 8], strides = [1, 1]} : vector<8x32xf32> to vector<8x8xf32>
    %cst_161 = arith.constant 0.353553385 : f32
    %383 = vector.broadcast %cst_161 : f32 to vector<8x8xf32>
    %384 = arith.mulf %382, %383 : vector<8x8xf32>
    %385 = vector.extract_strided_slice %346 {offsets = [0, 16], sizes = [8, 8], strides = [1, 1]} : vector<8x32xf32> to vector<8x8xf32>
    %386 = vector.extract_strided_slice %347 {offsets = [0, 16], sizes = [8, 8], strides = [1, 1]} : vector<8x32xf32> to vector<8x8xf32>
    %cst_162 = arith.constant dense<0.000000e+00> : vector<8x8xf32>
    %387 = tpu.matmul %384, %385, %cst_162 {dimension_numbers = #tpu.dot_dimension_numbers<[1], [1], [0], [0], [0, 0, 1, 0], [], []>} : vector<8x8xf32>, vector<8x8xf32>, vector<8x8xf32> -> vector<8x8xf32>
    %cst_163 = arith.constant dense<0xFF800000> : vector<8xf32>
    %388 = vector.multi_reduction <maximumf>, %387, %cst_163 [1] : vector<8x8xf32> to vector<8xf32>
    %389 = vector.shape_cast %388 : vector<8xf32> to vector<8x1xf32>
    %390 = vector.broadcast %389 : vector<8x1xf32> to vector<8x8xf32>
    %391 = arith.subf %387, %390 : vector<8x8xf32>
    %392 = math.exp %391 : vector<8x8xf32>
    %cst_164 = arith.constant dense<0.000000e+00> : vector<8xf32>
    %393 = vector.multi_reduction <add>, %392, %cst_164 [1] : vector<8x8xf32> to vector<8xf32>
    %394 = vector.shape_cast %393 : vector<8xf32> to vector<8x1xf32>
    %395 = tpu.reciprocal %394 : vector<8x1xf32> -> vector<8x1xf32>
    %396 = vector.broadcast %395 : vector<8x1xf32> to vector<8x8xf32>
    %397 = arith.mulf %392, %396 : vector<8x8xf32>
    %cst_165 = arith.constant dense<0.000000e+00> : vector<8x8xf32>
    %398 = tpu.matmul %397, %386, %cst_165 {dimension_numbers = #tpu.dot_dimension_numbers<[1], [0], [0], [1], [0, 0, 1, 1], [], []>} : vector<8x8xf32>, vector<8x8xf32>, vector<8x8xf32> -> vector<8x8xf32>
    %399 = vector.extract_strided_slice %345 {offsets = [0, 24], sizes = [8, 8], strides = [1, 1]} : vector<8x32xf32> to vector<8x8xf32>
    %cst_166 = arith.constant 0.353553385 : f32
    %400 = vector.broadcast %cst_166 : f32 to vector<8x8xf32>
    %401 = arith.mulf %399, %400 : vector<8x8xf32>
    %402 = vector.extract_strided_slice %346 {offsets = [0, 24], sizes = [8, 8], strides = [1, 1]} : vector<8x32xf32> to vector<8x8xf32>
    %403 = vector.extract_strided_slice %347 {offsets = [0, 24], sizes = [8, 8], strides = [1, 1]} : vector<8x32xf32> to vector<8x8xf32>
    %cst_167 = arith.constant dense<0.000000e+00> : vector<8x8xf32>
    %404 = tpu.matmul %401, %402, %cst_167 {dimension_numbers = #tpu.dot_dimension_numbers<[1], [1], [0], [0], [0, 0, 1, 0], [], []>} : vector<8x8xf32>, vector<8x8xf32>, vector<8x8xf32> -> vector<8x8xf32>
    %cst_168 = arith.constant dense<0xFF800000> : vector<8xf32>
    %405 = vector.multi_reduction <maximumf>, %404, %cst_168 [1] : vector<8x8xf32> to vector<8xf32>
    %406 = vector.shape_cast %405 : vector<8xf32> to vector<8x1xf32>
    %407 = vector.broadcast %406 : vector<8x1xf32> to vector<8x8xf32>
    %408 = arith.subf %404, %407 : vector<8x8xf32>
    %409 = math.exp %408 : vector<8x8xf32>
    %cst_169 = arith.constant dense<0.000000e+00> : vector<8xf32>
    %410 = vector.multi_reduction <add>, %409, %cst_169 [1] : vector<8x8xf32> to vector<8xf32>
    %411 = vector.shape_cast %410 : vector<8xf32> to vector<8x1xf32>
    %412 = tpu.reciprocal %411 : vector<8x1xf32> -> vector<8x1xf32>
    %413 = vector.broadcast %412 : vector<8x1xf32> to vector<8x8xf32>
    %414 = arith.mulf %409, %413 : vector<8x8xf32>
    %cst_170 = arith.constant dense<0.000000e+00> : vector<8x8xf32>
    %415 = tpu.matmul %414, %403, %cst_170 {dimension_numbers = #tpu.dot_dimension_numbers<[1], [0], [0], [1], [0, 0, 1, 1], [], []>} : vector<8x8xf32>, vector<8x8xf32>, vector<8x8xf32> -> vector<8x8xf32>
    %416 = tpu.concatenate %364, %381, %398, %415 in 1 : vector<8x8xf32>, vector<8x8xf32>, vector<8x8xf32>, vector<8x8xf32> -> vector<8x32xf32>
    %417 = tpu.concatenate %344, %416 in 0 : vector<8x32xf32>, vector<8x32xf32> -> vector<16x32xf32>
    %cst_171 = arith.constant dense<0.000000e+00> : vector<16x32xf32>
    %418 = tpu.matmul %417, %262, %cst_171 {dimension_numbers = #tpu.dot_dimension_numbers<[1], [0], [0], [1], [0, 0, 1, 1], [], []>} : vector<16x32xf32>, vector<32x32xf32>, vector<16x32xf32> -> vector<16x32xf32>
    %419 = vector.broadcast %263 : vector<1x32xf32> to vector<16x32xf32>
    %420 = arith.addf %418, %419 : vector<16x32xf32>
    %c1_172 = arith.constant 1 : index
    %c0_173 = arith.constant 0 : index
    %421 = vector.load %arg18[%c1_172, %c0_173] : memref<2x32xf32, #tpu.memory_space<vmem>>, vector<1x32xf32>
    %c1_174 = arith.constant 1 : index
    %c0_175 = arith.constant 0 : index
    %422 = vector.load %arg19[%c1_174, %c0_175] : memref<2x32xf32, #tpu.memory_space<vmem>>, vector<1x32xf32>
    %cst_176 = arith.constant dense<0.000000e+00> : vector<16xf32>
    %423 = vector.multi_reduction <add>, %420, %cst_176 [1] : vector<16x32xf32> to vector<16xf32>
    %424 = vector.shape_cast %423 : vector<16xf32> to vector<16x1xf32>
    %cst_177 = arith.constant 3.200000e+01 : f32
    %425 = vector.broadcast %cst_177 : f32 to vector<16x1xf32>
    %426 = arith.divf %424, %425 : vector<16x1xf32>
    %427 = vector.broadcast %426 : vector<16x1xf32> to vector<16x32xf32>
    %428 = arith.subf %420, %427 : vector<16x32xf32>
    %429 = arith.mulf %428, %428 : vector<16x32xf32>
    %cst_178 = arith.constant dense<0.000000e+00> : vector<16xf32>
    %430 = vector.multi_reduction <add>, %429, %cst_178 [1] : vector<16x32xf32> to vector<16xf32>
    %431 = vector.shape_cast %430 : vector<16xf32> to vector<16x1xf32>
    %cst_179 = arith.constant 3.200000e+01 : f32
    %432 = vector.broadcast %cst_179 : f32 to vector<16x1xf32>
    %433 = arith.divf %431, %432 : vector<16x1xf32>
    %434 = vector.broadcast %426 : vector<16x1xf32> to vector<16x32xf32>
    %435 = arith.subf %420, %434 : vector<16x32xf32>
    %cst_180 = arith.constant 9.99999974E-6 : f32
    %436 = vector.broadcast %cst_180 : f32 to vector<16x1xf32>
    %437 = arith.addf %433, %436 : vector<16x1xf32>
    %438 = math.rsqrt %437 : vector<16x1xf32>
    %439 = vector.broadcast %438 : vector<16x1xf32> to vector<16x32xf32>
    %440 = arith.mulf %435, %439 : vector<16x32xf32>
    %441 = vector.broadcast %421 : vector<1x32xf32> to vector<16x32xf32>
    %442 = arith.mulf %440, %441 : vector<16x32xf32>
    %443 = vector.broadcast %422 : vector<1x32xf32> to vector<16x32xf32>
    %444 = arith.addf %442, %443 : vector<16x32xf32>
    %445 = arith.addf %251, %444 : vector<16x32xf32>
    %c1_181 = arith.constant 1 : index
    %c0_182 = arith.constant 0 : index
    %c0_183 = arith.constant 0 : index
    %446 = vector.load %arg22[%c1_181, %c0_182, %c0_183] : memref<2x32x64xf32, #tpu.memory_space<vmem>>, vector<1x32x64xf32>
    %447 = vector.shape_cast %446 : vector<1x32x64xf32> to vector<32x64xf32>
    %c1_184 = arith.constant 1 : index
    %c0_185 = arith.constant 0 : index
    %448 = vector.load %arg23[%c1_184, %c0_185] : memref<2x64xf32, #tpu.memory_space<vmem>>, vector<1x64xf32>
    %c1_186 = arith.constant 1 : index
    %c0_187 = arith.constant 0 : index
    %c0_188 = arith.constant 0 : index
    %449 = vector.load %arg24[%c1_186, %c0_187, %c0_188] : memref<2x64x32xf32, #tpu.memory_space<vmem>>, vector<1x64x32xf32>
    %450 = vector.shape_cast %449 : vector<1x64x32xf32> to vector<64x32xf32>
    %c1_189 = arith.constant 1 : index
    %c0_190 = arith.constant 0 : index
    %451 = vector.load %arg25[%c1_189, %c0_190] : memref<2x32xf32, #tpu.memory_space<vmem>>, vector<1x32xf32>
    %cst_191 = arith.constant dense<0.000000e+00> : vector<16x64xf32>
    %452 = tpu.matmul %445, %447, %cst_191 {dimension_numbers = #tpu.dot_dimension_numbers<[1], [0], [0], [1], [0, 0, 1, 1], [], []>} : vector<16x32xf32>, vector<32x64xf32>, vector<16x64xf32> -> vector<16x64xf32>
    %453 = vector.broadcast %448 : vector<1x64xf32> to vector<16x64xf32>
    %454 = arith.addf %452, %453 : vector<16x64xf32>
    %cst_192 = arith.constant 0.000000e+00 : f32
    %455 = vector.broadcast %cst_192 : f32 to vector<16x64xf32>
    %456 = arith.maximumf %454, %455 : vector<16x64xf32>
    %cst_193 = arith.constant dense<0.000000e+00> : vector<16x32xf32>
    %457 = tpu.matmul %456, %450, %cst_193 {dimension_numbers = #tpu.dot_dimension_numbers<[1], [0], [0], [1], [0, 0, 1, 1], [], []>} : vector<16x64xf32>, vector<64x32xf32>, vector<16x32xf32> -> vector<16x32xf32>
    %458 = vector.broadcast %451 : vector<1x32xf32> to vector<16x32xf32>
    %459 = arith.addf %457, %458 : vector<16x32xf32>
    %c1_194 = arith.constant 1 : index
    %c0_195 = arith.constant 0 : index
    %460 = vector.load %arg20[%c1_194, %c0_195] : memref<2x32xf32, #tpu.memory_space<vmem>>, vector<1x32xf32>
    %c1_196 = arith.constant 1 : index
    %c0_197 = arith.constant 0 : index
    %461 = vector.load %arg21[%c1_196, %c0_197] : memref<2x32xf32, #tpu.memory_space<vmem>>, vector<1x32xf32>
    %cst_198 = arith.constant dense<0.000000e+00> : vector<16xf32>
    %462 = vector.multi_reduction <add>, %459, %cst_198 [1] : vector<16x32xf32> to vector<16xf32>
    %463 = vector.shape_cast %462 : vector<16xf32> to vector<16x1xf32>
    %cst_199 = arith.constant 3.200000e+01 : f32
    %464 = vector.broadcast %cst_199 : f32 to vector<16x1xf32>
    %465 = arith.divf %463, %464 : vector<16x1xf32>
    %466 = vector.broadcast %465 : vector<16x1xf32> to vector<16x32xf32>
    %467 = arith.subf %459, %466 : vector<16x32xf32>
    %468 = arith.mulf %467, %467 : vector<16x32xf32>
    %cst_200 = arith.constant dense<0.000000e+00> : vector<16xf32>
    %469 = vector.multi_reduction <add>, %468, %cst_200 [1] : vector<16x32xf32> to vector<16xf32>
    %470 = vector.shape_cast %469 : vector<16xf32> to vector<16x1xf32>
    %cst_201 = arith.constant 3.200000e+01 : f32
    %471 = vector.broadcast %cst_201 : f32 to vector<16x1xf32>
    %472 = arith.divf %470, %471 : vector<16x1xf32>
    %473 = vector.broadcast %465 : vector<16x1xf32> to vector<16x32xf32>
    %474 = arith.subf %459, %473 : vector<16x32xf32>
    %cst_202 = arith.constant 9.99999974E-6 : f32
    %475 = vector.broadcast %cst_202 : f32 to vector<16x1xf32>
    %476 = arith.addf %472, %475 : vector<16x1xf32>
    %477 = math.rsqrt %476 : vector<16x1xf32>
    %478 = vector.broadcast %477 : vector<16x1xf32> to vector<16x32xf32>
    %479 = arith.mulf %474, %478 : vector<16x32xf32>
    %480 = vector.broadcast %460 : vector<1x32xf32> to vector<16x32xf32>
    %481 = arith.mulf %479, %480 : vector<16x32xf32>
    %482 = vector.broadcast %461 : vector<1x32xf32> to vector<16x32xf32>
    %483 = arith.addf %481, %482 : vector<16x32xf32>
    %484 = arith.addf %445, %483 : vector<16x32xf32>
    %c0_203 = arith.constant 0 : index
    %c0_204 = arith.constant 0 : index
    %c0_205 = arith.constant 0 : index
    %485 = vector.load %arg26[%c0_203, %c0_204, %c0_205] : memref<2x32x32xf32, #tpu.memory_space<vmem>>, vector<1x32x32xf32>
    %486 = vector.shape_cast %485 : vector<1x32x32xf32> to vector<32x32xf32>
    %c0_206 = arith.constant 0 : index
    %c0_207 = arith.constant 0 : index
    %487 = vector.load %arg27[%c0_206, %c0_207] : memref<2x32xf32, #tpu.memory_space<vmem>>, vector<1x32xf32>
    %c0_208 = arith.constant 0 : index
    %c0_209 = arith.constant 0 : index
    %c0_210 = arith.constant 0 : index
    %488 = vector.load %arg28[%c0_208, %c0_209, %c0_210] : memref<2x32x32xf32, #tpu.memory_space<vmem>>, vector<1x32x32xf32>
    %489 = vector.shape_cast %488 : vector<1x32x32xf32> to vector<32x32xf32>
    %c0_211 = arith.constant 0 : index
    %c0_212 = arith.constant 0 : index
    %490 = vector.load %arg29[%c0_211, %c0_212] : memref<2x32xf32, #tpu.memory_space<vmem>>, vector<1x32xf32>
    %c0_213 = arith.constant 0 : index
    %c0_214 = arith.constant 0 : index
    %c0_215 = arith.constant 0 : index
    %491 = vector.load %arg30[%c0_213, %c0_214, %c0_215] : memref<2x32x32xf32, #tpu.memory_space<vmem>>, vector<1x32x32xf32>
    %492 = vector.shape_cast %491 : vector<1x32x32xf32> to vector<32x32xf32>
    %c0_216 = arith.constant 0 : index
    %c0_217 = arith.constant 0 : index
    %493 = vector.load %arg31[%c0_216, %c0_217] : memref<2x32xf32, #tpu.memory_space<vmem>>, vector<1x32xf32>
    %c0_218 = arith.constant 0 : index
    %c0_219 = arith.constant 0 : index
    %c0_220 = arith.constant 0 : index
    %494 = vector.load %arg32[%c0_218, %c0_219, %c0_220] : memref<2x32x32xf32, #tpu.memory_space<vmem>>, vector<1x32x32xf32>
    %495 = vector.shape_cast %494 : vector<1x32x32xf32> to vector<32x32xf32>
    %c0_221 = arith.constant 0 : index
    %c0_222 = arith.constant 0 : index
    %496 = vector.load %arg33[%c0_221, %c0_222] : memref<2x32xf32, #tpu.memory_space<vmem>>, vector<1x32xf32>
    %cst_223 = arith.constant dense<0.000000e+00> : vector<16x32xf32>
    %497 = tpu.matmul %15, %486, %cst_223 {dimension_numbers = #tpu.dot_dimension_numbers<[1], [0], [0], [1], [0, 0, 1, 1], [], []>} : vector<16x32xf32>, vector<32x32xf32>, vector<16x32xf32> -> vector<16x32xf32>
    %498 = vector.broadcast %487 : vector<1x32xf32> to vector<16x32xf32>
    %499 = arith.addf %497, %498 : vector<16x32xf32>
    %cst_224 = arith.constant dense<0.000000e+00> : vector<16x32xf32>
    %500 = tpu.matmul %15, %489, %cst_224 {dimension_numbers = #tpu.dot_dimension_numbers<[1], [0], [0], [1], [0, 0, 1, 1], [], []>} : vector<16x32xf32>, vector<32x32xf32>, vector<16x32xf32> -> vector<16x32xf32>
    %501 = vector.broadcast %490 : vector<1x32xf32> to vector<16x32xf32>
    %502 = arith.addf %500, %501 : vector<16x32xf32>
    %cst_225 = arith.constant dense<0.000000e+00> : vector<16x32xf32>
    %503 = tpu.matmul %15, %492, %cst_225 {dimension_numbers = #tpu.dot_dimension_numbers<[1], [0], [0], [1], [0, 0, 1, 1], [], []>} : vector<16x32xf32>, vector<32x32xf32>, vector<16x32xf32> -> vector<16x32xf32>
    %504 = vector.broadcast %493 : vector<1x32xf32> to vector<16x32xf32>
    %505 = arith.addf %503, %504 : vector<16x32xf32>
    %506 = vector.extract_strided_slice %499 {offsets = [0, 0], sizes = [8, 32], strides = [1, 1]} : vector<16x32xf32> to vector<8x32xf32>
    %507 = vector.extract_strided_slice %502 {offsets = [0, 0], sizes = [8, 32], strides = [1, 1]} : vector<16x32xf32> to vector<8x32xf32>
    %508 = vector.extract_strided_slice %505 {offsets = [0, 0], sizes = [8, 32], strides = [1, 1]} : vector<16x32xf32> to vector<8x32xf32>
    %509 = vector.extract_strided_slice %506 {offsets = [0, 0], sizes = [8, 8], strides = [1, 1]} : vector<8x32xf32> to vector<8x8xf32>
    %cst_226 = arith.constant 0.353553385 : f32
    %510 = vector.broadcast %cst_226 : f32 to vector<8x8xf32>
    %511 = arith.mulf %509, %510 : vector<8x8xf32>
    %512 = vector.extract_strided_slice %507 {offsets = [0, 0], sizes = [8, 8], strides = [1, 1]} : vector<8x32xf32> to vector<8x8xf32>
    %513 = vector.extract_strided_slice %508 {offsets = [0, 0], sizes = [8, 8], strides = [1, 1]} : vector<8x32xf32> to vector<8x8xf32>
    %cst_227 = arith.constant dense<0.000000e+00> : vector<8x8xf32>
    %514 = tpu.matmul %511, %512, %cst_227 {dimension_numbers = #tpu.dot_dimension_numbers<[1], [1], [0], [0], [0, 0, 1, 0], [], []>} : vector<8x8xf32>, vector<8x8xf32>, vector<8x8xf32> -> vector<8x8xf32>
    %cst_228 = arith.constant -1.000000e+09 : f32
    %515 = vector.broadcast %cst_228 : f32 to vector<8x8xf32>
    %516 = arith.select %18, %514, %515 : vector<8x8xi1>, vector<8x8xf32>
    %cst_229 = arith.constant dense<0xFF800000> : vector<8xf32>
    %517 = vector.multi_reduction <maximumf>, %516, %cst_229 [1] : vector<8x8xf32> to vector<8xf32>
    %518 = vector.shape_cast %517 : vector<8xf32> to vector<8x1xf32>
    %519 = vector.broadcast %518 : vector<8x1xf32> to vector<8x8xf32>
    %520 = arith.subf %516, %519 : vector<8x8xf32>
    %521 = math.exp %520 : vector<8x8xf32>
    %cst_230 = arith.constant dense<0.000000e+00> : vector<8xf32>
    %522 = vector.multi_reduction <add>, %521, %cst_230 [1] : vector<8x8xf32> to vector<8xf32>
    %523 = vector.shape_cast %522 : vector<8xf32> to vector<8x1xf32>
    %524 = tpu.reciprocal %523 : vector<8x1xf32> -> vector<8x1xf32>
    %525 = vector.broadcast %524 : vector<8x1xf32> to vector<8x8xf32>
    %526 = arith.mulf %521, %525 : vector<8x8xf32>
    %cst_231 = arith.constant dense<0.000000e+00> : vector<8x8xf32>
    %527 = tpu.matmul %526, %513, %cst_231 {dimension_numbers = #tpu.dot_dimension_numbers<[1], [0], [0], [1], [0, 0, 1, 1], [], []>} : vector<8x8xf32>, vector<8x8xf32>, vector<8x8xf32> -> vector<8x8xf32>
    %528 = vector.extract_strided_slice %506 {offsets = [0, 8], sizes = [8, 8], strides = [1, 1]} : vector<8x32xf32> to vector<8x8xf32>
    %cst_232 = arith.constant 0.353553385 : f32
    %529 = vector.broadcast %cst_232 : f32 to vector<8x8xf32>
    %530 = arith.mulf %528, %529 : vector<8x8xf32>
    %531 = vector.extract_strided_slice %507 {offsets = [0, 8], sizes = [8, 8], strides = [1, 1]} : vector<8x32xf32> to vector<8x8xf32>
    %532 = vector.extract_strided_slice %508 {offsets = [0, 8], sizes = [8, 8], strides = [1, 1]} : vector<8x32xf32> to vector<8x8xf32>
    %cst_233 = arith.constant dense<0.000000e+00> : vector<8x8xf32>
    %533 = tpu.matmul %530, %531, %cst_233 {dimension_numbers = #tpu.dot_dimension_numbers<[1], [1], [0], [0], [0, 0, 1, 0], [], []>} : vector<8x8xf32>, vector<8x8xf32>, vector<8x8xf32> -> vector<8x8xf32>
    %cst_234 = arith.constant -1.000000e+09 : f32
    %534 = vector.broadcast %cst_234 : f32 to vector<8x8xf32>
    %535 = arith.select %18, %533, %534 : vector<8x8xi1>, vector<8x8xf32>
    %cst_235 = arith.constant dense<0xFF800000> : vector<8xf32>
    %536 = vector.multi_reduction <maximumf>, %535, %cst_235 [1] : vector<8x8xf32> to vector<8xf32>
    %537 = vector.shape_cast %536 : vector<8xf32> to vector<8x1xf32>
    %538 = vector.broadcast %537 : vector<8x1xf32> to vector<8x8xf32>
    %539 = arith.subf %535, %538 : vector<8x8xf32>
    %540 = math.exp %539 : vector<8x8xf32>
    %cst_236 = arith.constant dense<0.000000e+00> : vector<8xf32>
    %541 = vector.multi_reduction <add>, %540, %cst_236 [1] : vector<8x8xf32> to vector<8xf32>
    %542 = vector.shape_cast %541 : vector<8xf32> to vector<8x1xf32>
    %543 = tpu.reciprocal %542 : vector<8x1xf32> -> vector<8x1xf32>
    %544 = vector.broadcast %543 : vector<8x1xf32> to vector<8x8xf32>
    %545 = arith.mulf %540, %544 : vector<8x8xf32>
    %cst_237 = arith.constant dense<0.000000e+00> : vector<8x8xf32>
    %546 = tpu.matmul %545, %532, %cst_237 {dimension_numbers = #tpu.dot_dimension_numbers<[1], [0], [0], [1], [0, 0, 1, 1], [], []>} : vector<8x8xf32>, vector<8x8xf32>, vector<8x8xf32> -> vector<8x8xf32>
    %547 = vector.extract_strided_slice %506 {offsets = [0, 16], sizes = [8, 8], strides = [1, 1]} : vector<8x32xf32> to vector<8x8xf32>
    %cst_238 = arith.constant 0.353553385 : f32
    %548 = vector.broadcast %cst_238 : f32 to vector<8x8xf32>
    %549 = arith.mulf %547, %548 : vector<8x8xf32>
    %550 = vector.extract_strided_slice %507 {offsets = [0, 16], sizes = [8, 8], strides = [1, 1]} : vector<8x32xf32> to vector<8x8xf32>
    %551 = vector.extract_strided_slice %508 {offsets = [0, 16], sizes = [8, 8], strides = [1, 1]} : vector<8x32xf32> to vector<8x8xf32>
    %cst_239 = arith.constant dense<0.000000e+00> : vector<8x8xf32>
    %552 = tpu.matmul %549, %550, %cst_239 {dimension_numbers = #tpu.dot_dimension_numbers<[1], [1], [0], [0], [0, 0, 1, 0], [], []>} : vector<8x8xf32>, vector<8x8xf32>, vector<8x8xf32> -> vector<8x8xf32>
    %cst_240 = arith.constant -1.000000e+09 : f32
    %553 = vector.broadcast %cst_240 : f32 to vector<8x8xf32>
    %554 = arith.select %18, %552, %553 : vector<8x8xi1>, vector<8x8xf32>
    %cst_241 = arith.constant dense<0xFF800000> : vector<8xf32>
    %555 = vector.multi_reduction <maximumf>, %554, %cst_241 [1] : vector<8x8xf32> to vector<8xf32>
    %556 = vector.shape_cast %555 : vector<8xf32> to vector<8x1xf32>
    %557 = vector.broadcast %556 : vector<8x1xf32> to vector<8x8xf32>
    %558 = arith.subf %554, %557 : vector<8x8xf32>
    %559 = math.exp %558 : vector<8x8xf32>
    %cst_242 = arith.constant dense<0.000000e+00> : vector<8xf32>
    %560 = vector.multi_reduction <add>, %559, %cst_242 [1] : vector<8x8xf32> to vector<8xf32>
    %561 = vector.shape_cast %560 : vector<8xf32> to vector<8x1xf32>
    %562 = tpu.reciprocal %561 : vector<8x1xf32> -> vector<8x1xf32>
    %563 = vector.broadcast %562 : vector<8x1xf32> to vector<8x8xf32>
    %564 = arith.mulf %559, %563 : vector<8x8xf32>
    %cst_243 = arith.constant dense<0.000000e+00> : vector<8x8xf32>
    %565 = tpu.matmul %564, %551, %cst_243 {dimension_numbers = #tpu.dot_dimension_numbers<[1], [0], [0], [1], [0, 0, 1, 1], [], []>} : vector<8x8xf32>, vector<8x8xf32>, vector<8x8xf32> -> vector<8x8xf32>
    %566 = vector.extract_strided_slice %506 {offsets = [0, 24], sizes = [8, 8], strides = [1, 1]} : vector<8x32xf32> to vector<8x8xf32>
    %cst_244 = arith.constant 0.353553385 : f32
    %567 = vector.broadcast %cst_244 : f32 to vector<8x8xf32>
    %568 = arith.mulf %566, %567 : vector<8x8xf32>
    %569 = vector.extract_strided_slice %507 {offsets = [0, 24], sizes = [8, 8], strides = [1, 1]} : vector<8x32xf32> to vector<8x8xf32>
    %570 = vector.extract_strided_slice %508 {offsets = [0, 24], sizes = [8, 8], strides = [1, 1]} : vector<8x32xf32> to vector<8x8xf32>
    %cst_245 = arith.constant dense<0.000000e+00> : vector<8x8xf32>
    %571 = tpu.matmul %568, %569, %cst_245 {dimension_numbers = #tpu.dot_dimension_numbers<[1], [1], [0], [0], [0, 0, 1, 0], [], []>} : vector<8x8xf32>, vector<8x8xf32>, vector<8x8xf32> -> vector<8x8xf32>
    %cst_246 = arith.constant -1.000000e+09 : f32
    %572 = vector.broadcast %cst_246 : f32 to vector<8x8xf32>
    %573 = arith.select %18, %571, %572 : vector<8x8xi1>, vector<8x8xf32>
    %cst_247 = arith.constant dense<0xFF800000> : vector<8xf32>
    %574 = vector.multi_reduction <maximumf>, %573, %cst_247 [1] : vector<8x8xf32> to vector<8xf32>
    %575 = vector.shape_cast %574 : vector<8xf32> to vector<8x1xf32>
    %576 = vector.broadcast %575 : vector<8x1xf32> to vector<8x8xf32>
    %577 = arith.subf %573, %576 : vector<8x8xf32>
    %578 = math.exp %577 : vector<8x8xf32>
    %cst_248 = arith.constant dense<0.000000e+00> : vector<8xf32>
    %579 = vector.multi_reduction <add>, %578, %cst_248 [1] : vector<8x8xf32> to vector<8xf32>
    %580 = vector.shape_cast %579 : vector<8xf32> to vector<8x1xf32>
    %581 = tpu.reciprocal %580 : vector<8x1xf32> -> vector<8x1xf32>
    %582 = vector.broadcast %581 : vector<8x1xf32> to vector<8x8xf32>
    %583 = arith.mulf %578, %582 : vector<8x8xf32>
    %cst_249 = arith.constant dense<0.000000e+00> : vector<8x8xf32>
    %584 = tpu.matmul %583, %570, %cst_249 {dimension_numbers = #tpu.dot_dimension_numbers<[1], [0], [0], [1], [0, 0, 1, 1], [], []>} : vector<8x8xf32>, vector<8x8xf32>, vector<8x8xf32> -> vector<8x8xf32>
    %585 = tpu.concatenate %527, %546, %565, %584 in 1 : vector<8x8xf32>, vector<8x8xf32>, vector<8x8xf32>, vector<8x8xf32> -> vector<8x32xf32>
    %586 = vector.extract_strided_slice %499 {offsets = [8, 0], sizes = [8, 32], strides = [1, 1]} : vector<16x32xf32> to vector<8x32xf32>
    %587 = vector.extract_strided_slice %502 {offsets = [8, 0], sizes = [8, 32], strides = [1, 1]} : vector<16x32xf32> to vector<8x32xf32>
    %588 = vector.extract_strided_slice %505 {offsets = [8, 0], sizes = [8, 32], strides = [1, 1]} : vector<16x32xf32> to vector<8x32xf32>
    %589 = vector.extract_strided_slice %586 {offsets = [0, 0], sizes = [8, 8], strides = [1, 1]} : vector<8x32xf32> to vector<8x8xf32>
    %cst_250 = arith.constant 0.353553385 : f32
    %590 = vector.broadcast %cst_250 : f32 to vector<8x8xf32>
    %591 = arith.mulf %589, %590 : vector<8x8xf32>
    %592 = vector.extract_strided_slice %587 {offsets = [0, 0], sizes = [8, 8], strides = [1, 1]} : vector<8x32xf32> to vector<8x8xf32>
    %593 = vector.extract_strided_slice %588 {offsets = [0, 0], sizes = [8, 8], strides = [1, 1]} : vector<8x32xf32> to vector<8x8xf32>
    %cst_251 = arith.constant dense<0.000000e+00> : vector<8x8xf32>
    %594 = tpu.matmul %591, %592, %cst_251 {dimension_numbers = #tpu.dot_dimension_numbers<[1], [1], [0], [0], [0, 0, 1, 0], [], []>} : vector<8x8xf32>, vector<8x8xf32>, vector<8x8xf32> -> vector<8x8xf32>
    %cst_252 = arith.constant -1.000000e+09 : f32
    %595 = vector.broadcast %cst_252 : f32 to vector<8x8xf32>
    %596 = arith.select %18, %594, %595 : vector<8x8xi1>, vector<8x8xf32>
    %cst_253 = arith.constant dense<0xFF800000> : vector<8xf32>
    %597 = vector.multi_reduction <maximumf>, %596, %cst_253 [1] : vector<8x8xf32> to vector<8xf32>
    %598 = vector.shape_cast %597 : vector<8xf32> to vector<8x1xf32>
    %599 = vector.broadcast %598 : vector<8x1xf32> to vector<8x8xf32>
    %600 = arith.subf %596, %599 : vector<8x8xf32>
    %601 = math.exp %600 : vector<8x8xf32>
    %cst_254 = arith.constant dense<0.000000e+00> : vector<8xf32>
    %602 = vector.multi_reduction <add>, %601, %cst_254 [1] : vector<8x8xf32> to vector<8xf32>
    %603 = vector.shape_cast %602 : vector<8xf32> to vector<8x1xf32>
    %604 = tpu.reciprocal %603 : vector<8x1xf32> -> vector<8x1xf32>
    %605 = vector.broadcast %604 : vector<8x1xf32> to vector<8x8xf32>
    %606 = arith.mulf %601, %605 : vector<8x8xf32>
    %cst_255 = arith.constant dense<0.000000e+00> : vector<8x8xf32>
    %607 = tpu.matmul %606, %593, %cst_255 {dimension_numbers = #tpu.dot_dimension_numbers<[1], [0], [0], [1], [0, 0, 1, 1], [], []>} : vector<8x8xf32>, vector<8x8xf32>, vector<8x8xf32> -> vector<8x8xf32>
    %608 = vector.extract_strided_slice %586 {offsets = [0, 8], sizes = [8, 8], strides = [1, 1]} : vector<8x32xf32> to vector<8x8xf32>
    %cst_256 = arith.constant 0.353553385 : f32
    %609 = vector.broadcast %cst_256 : f32 to vector<8x8xf32>
    %610 = arith.mulf %608, %609 : vector<8x8xf32>
    %611 = vector.extract_strided_slice %587 {offsets = [0, 8], sizes = [8, 8], strides = [1, 1]} : vector<8x32xf32> to vector<8x8xf32>
    %612 = vector.extract_strided_slice %588 {offsets = [0, 8], sizes = [8, 8], strides = [1, 1]} : vector<8x32xf32> to vector<8x8xf32>
    %cst_257 = arith.constant dense<0.000000e+00> : vector<8x8xf32>
    %613 = tpu.matmul %610, %611, %cst_257 {dimension_numbers = #tpu.dot_dimension_numbers<[1], [1], [0], [0], [0, 0, 1, 0], [], []>} : vector<8x8xf32>, vector<8x8xf32>, vector<8x8xf32> -> vector<8x8xf32>
    %cst_258 = arith.constant -1.000000e+09 : f32
    %614 = vector.broadcast %cst_258 : f32 to vector<8x8xf32>
    %615 = arith.select %18, %613, %614 : vector<8x8xi1>, vector<8x8xf32>
    %cst_259 = arith.constant dense<0xFF800000> : vector<8xf32>
    %616 = vector.multi_reduction <maximumf>, %615, %cst_259 [1] : vector<8x8xf32> to vector<8xf32>
    %617 = vector.shape_cast %616 : vector<8xf32> to vector<8x1xf32>
    %618 = vector.broadcast %617 : vector<8x1xf32> to vector<8x8xf32>
    %619 = arith.subf %615, %618 : vector<8x8xf32>
    %620 = math.exp %619 : vector<8x8xf32>
    %cst_260 = arith.constant dense<0.000000e+00> : vector<8xf32>
    %621 = vector.multi_reduction <add>, %620, %cst_260 [1] : vector<8x8xf32> to vector<8xf32>
    %622 = vector.shape_cast %621 : vector<8xf32> to vector<8x1xf32>
    %623 = tpu.reciprocal %622 : vector<8x1xf32> -> vector<8x1xf32>
    %624 = vector.broadcast %623 : vector<8x1xf32> to vector<8x8xf32>
    %625 = arith.mulf %620, %624 : vector<8x8xf32>
    %cst_261 = arith.constant dense<0.000000e+00> : vector<8x8xf32>
    %626 = tpu.matmul %625, %612, %cst_261 {dimension_numbers = #tpu.dot_dimension_numbers<[1], [0], [0], [1], [0, 0, 1, 1], [], []>} : vector<8x8xf32>, vector<8x8xf32>, vector<8x8xf32> -> vector<8x8xf32>
    %627 = vector.extract_strided_slice %586 {offsets = [0, 16], sizes = [8, 8], strides = [1, 1]} : vector<8x32xf32> to vector<8x8xf32>
    %cst_262 = arith.constant 0.353553385 : f32
    %628 = vector.broadcast %cst_262 : f32 to vector<8x8xf32>
    %629 = arith.mulf %627, %628 : vector<8x8xf32>
    %630 = vector.extract_strided_slice %587 {offsets = [0, 16], sizes = [8, 8], strides = [1, 1]} : vector<8x32xf32> to vector<8x8xf32>
    %631 = vector.extract_strided_slice %588 {offsets = [0, 16], sizes = [8, 8], strides = [1, 1]} : vector<8x32xf32> to vector<8x8xf32>
    %cst_263 = arith.constant dense<0.000000e+00> : vector<8x8xf32>
    %632 = tpu.matmul %629, %630, %cst_263 {dimension_numbers = #tpu.dot_dimension_numbers<[1], [1], [0], [0], [0, 0, 1, 0], [], []>} : vector<8x8xf32>, vector<8x8xf32>, vector<8x8xf32> -> vector<8x8xf32>
    %cst_264 = arith.constant -1.000000e+09 : f32
    %633 = vector.broadcast %cst_264 : f32 to vector<8x8xf32>
    %634 = arith.select %18, %632, %633 : vector<8x8xi1>, vector<8x8xf32>
    %cst_265 = arith.constant dense<0xFF800000> : vector<8xf32>
    %635 = vector.multi_reduction <maximumf>, %634, %cst_265 [1] : vector<8x8xf32> to vector<8xf32>
    %636 = vector.shape_cast %635 : vector<8xf32> to vector<8x1xf32>
    %637 = vector.broadcast %636 : vector<8x1xf32> to vector<8x8xf32>
    %638 = arith.subf %634, %637 : vector<8x8xf32>
    %639 = math.exp %638 : vector<8x8xf32>
    %cst_266 = arith.constant dense<0.000000e+00> : vector<8xf32>
    %640 = vector.multi_reduction <add>, %639, %cst_266 [1] : vector<8x8xf32> to vector<8xf32>
    %641 = vector.shape_cast %640 : vector<8xf32> to vector<8x1xf32>
    %642 = tpu.reciprocal %641 : vector<8x1xf32> -> vector<8x1xf32>
    %643 = vector.broadcast %642 : vector<8x1xf32> to vector<8x8xf32>
    %644 = arith.mulf %639, %643 : vector<8x8xf32>
    %cst_267 = arith.constant dense<0.000000e+00> : vector<8x8xf32>
    %645 = tpu.matmul %644, %631, %cst_267 {dimension_numbers = #tpu.dot_dimension_numbers<[1], [0], [0], [1], [0, 0, 1, 1], [], []>} : vector<8x8xf32>, vector<8x8xf32>, vector<8x8xf32> -> vector<8x8xf32>
    %646 = vector.extract_strided_slice %586 {offsets = [0, 24], sizes = [8, 8], strides = [1, 1]} : vector<8x32xf32> to vector<8x8xf32>
    %cst_268 = arith.constant 0.353553385 : f32
    %647 = vector.broadcast %cst_268 : f32 to vector<8x8xf32>
    %648 = arith.mulf %646, %647 : vector<8x8xf32>
    %649 = vector.extract_strided_slice %587 {offsets = [0, 24], sizes = [8, 8], strides = [1, 1]} : vector<8x32xf32> to vector<8x8xf32>
    %650 = vector.extract_strided_slice %588 {offsets = [0, 24], sizes = [8, 8], strides = [1, 1]} : vector<8x32xf32> to vector<8x8xf32>
    %cst_269 = arith.constant dense<0.000000e+00> : vector<8x8xf32>
    %651 = tpu.matmul %648, %649, %cst_269 {dimension_numbers = #tpu.dot_dimension_numbers<[1], [1], [0], [0], [0, 0, 1, 0], [], []>} : vector<8x8xf32>, vector<8x8xf32>, vector<8x8xf32> -> vector<8x8xf32>
    %cst_270 = arith.constant -1.000000e+09 : f32
    %652 = vector.broadcast %cst_270 : f32 to vector<8x8xf32>
    %653 = arith.select %18, %651, %652 : vector<8x8xi1>, vector<8x8xf32>
    %cst_271 = arith.constant dense<0xFF800000> : vector<8xf32>
    %654 = vector.multi_reduction <maximumf>, %653, %cst_271 [1] : vector<8x8xf32> to vector<8xf32>
    %655 = vector.shape_cast %654 : vector<8xf32> to vector<8x1xf32>
    %656 = vector.broadcast %655 : vector<8x1xf32> to vector<8x8xf32>
    %657 = arith.subf %653, %656 : vector<8x8xf32>
    %658 = math.exp %657 : vector<8x8xf32>
    %cst_272 = arith.constant dense<0.000000e+00> : vector<8xf32>
    %659 = vector.multi_reduction <add>, %658, %cst_272 [1] : vector<8x8xf32> to vector<8xf32>
    %660 = vector.shape_cast %659 : vector<8xf32> to vector<8x1xf32>
    %661 = tpu.reciprocal %660 : vector<8x1xf32> -> vector<8x1xf32>
    %662 = vector.broadcast %661 : vector<8x1xf32> to vector<8x8xf32>
    %663 = arith.mulf %658, %662 : vector<8x8xf32>
    %cst_273 = arith.constant dense<0.000000e+00> : vector<8x8xf32>
    %664 = tpu.matmul %663, %650, %cst_273 {dimension_numbers = #tpu.dot_dimension_numbers<[1], [0], [0], [1], [0, 0, 1, 1], [], []>} : vector<8x8xf32>, vector<8x8xf32>, vector<8x8xf32> -> vector<8x8xf32>
    %665 = tpu.concatenate %607, %626, %645, %664 in 1 : vector<8x8xf32>, vector<8x8xf32>, vector<8x8xf32>, vector<8x8xf32> -> vector<8x32xf32>
    %666 = tpu.concatenate %585, %665 in 0 : vector<8x32xf32>, vector<8x32xf32> -> vector<16x32xf32>
    %cst_274 = arith.constant dense<0.000000e+00> : vector<16x32xf32>
    %667 = tpu.matmul %666, %495, %cst_274 {dimension_numbers = #tpu.dot_dimension_numbers<[1], [0], [0], [1], [0, 0, 1, 1], [], []>} : vector<16x32xf32>, vector<32x32xf32>, vector<16x32xf32> -> vector<16x32xf32>
    %668 = vector.broadcast %496 : vector<1x32xf32> to vector<16x32xf32>
    %669 = arith.addf %667, %668 : vector<16x32xf32>
    %c0_275 = arith.constant 0 : index
    %c0_276 = arith.constant 0 : index
    %670 = vector.load %arg42[%c0_275, %c0_276] : memref<2x32xf32, #tpu.memory_space<vmem>>, vector<1x32xf32>
    %c0_277 = arith.constant 0 : index
    %c0_278 = arith.constant 0 : index
    %671 = vector.load %arg43[%c0_277, %c0_278] : memref<2x32xf32, #tpu.memory_space<vmem>>, vector<1x32xf32>
    %cst_279 = arith.constant dense<0.000000e+00> : vector<16xf32>
    %672 = vector.multi_reduction <add>, %669, %cst_279 [1] : vector<16x32xf32> to vector<16xf32>
    %673 = vector.shape_cast %672 : vector<16xf32> to vector<16x1xf32>
    %cst_280 = arith.constant 3.200000e+01 : f32
    %674 = vector.broadcast %cst_280 : f32 to vector<16x1xf32>
    %675 = arith.divf %673, %674 : vector<16x1xf32>
    %676 = vector.broadcast %675 : vector<16x1xf32> to vector<16x32xf32>
    %677 = arith.subf %669, %676 : vector<16x32xf32>
    %678 = arith.mulf %677, %677 : vector<16x32xf32>
    %cst_281 = arith.constant dense<0.000000e+00> : vector<16xf32>
    %679 = vector.multi_reduction <add>, %678, %cst_281 [1] : vector<16x32xf32> to vector<16xf32>
    %680 = vector.shape_cast %679 : vector<16xf32> to vector<16x1xf32>
    %cst_282 = arith.constant 3.200000e+01 : f32
    %681 = vector.broadcast %cst_282 : f32 to vector<16x1xf32>
    %682 = arith.divf %680, %681 : vector<16x1xf32>
    %683 = vector.broadcast %675 : vector<16x1xf32> to vector<16x32xf32>
    %684 = arith.subf %669, %683 : vector<16x32xf32>
    %cst_283 = arith.constant 9.99999974E-6 : f32
    %685 = vector.broadcast %cst_283 : f32 to vector<16x1xf32>
    %686 = arith.addf %682, %685 : vector<16x1xf32>
    %687 = math.rsqrt %686 : vector<16x1xf32>
    %688 = vector.broadcast %687 : vector<16x1xf32> to vector<16x32xf32>
    %689 = arith.mulf %684, %688 : vector<16x32xf32>
    %690 = vector.broadcast %670 : vector<1x32xf32> to vector<16x32xf32>
    %691 = arith.mulf %689, %690 : vector<16x32xf32>
    %692 = vector.broadcast %671 : vector<1x32xf32> to vector<16x32xf32>
    %693 = arith.addf %691, %692 : vector<16x32xf32>
    %694 = arith.addf %15, %693 : vector<16x32xf32>
    %c0_284 = arith.constant 0 : index
    %c0_285 = arith.constant 0 : index
    %c0_286 = arith.constant 0 : index
    %695 = vector.load %arg34[%c0_284, %c0_285, %c0_286] : memref<2x32x32xf32, #tpu.memory_space<vmem>>, vector<1x32x32xf32>
    %696 = vector.shape_cast %695 : vector<1x32x32xf32> to vector<32x32xf32>
    %c0_287 = arith.constant 0 : index
    %c0_288 = arith.constant 0 : index
    %697 = vector.load %arg35[%c0_287, %c0_288] : memref<2x32xf32, #tpu.memory_space<vmem>>, vector<1x32xf32>
    %c0_289 = arith.constant 0 : index
    %c0_290 = arith.constant 0 : index
    %c0_291 = arith.constant 0 : index
    %698 = vector.load %arg36[%c0_289, %c0_290, %c0_291] : memref<2x32x32xf32, #tpu.memory_space<vmem>>, vector<1x32x32xf32>
    %699 = vector.shape_cast %698 : vector<1x32x32xf32> to vector<32x32xf32>
    %c0_292 = arith.constant 0 : index
    %c0_293 = arith.constant 0 : index
    %700 = vector.load %arg37[%c0_292, %c0_293] : memref<2x32xf32, #tpu.memory_space<vmem>>, vector<1x32xf32>
    %c0_294 = arith.constant 0 : index
    %c0_295 = arith.constant 0 : index
    %c0_296 = arith.constant 0 : index
    %701 = vector.load %arg38[%c0_294, %c0_295, %c0_296] : memref<2x32x32xf32, #tpu.memory_space<vmem>>, vector<1x32x32xf32>
    %702 = vector.shape_cast %701 : vector<1x32x32xf32> to vector<32x32xf32>
    %c0_297 = arith.constant 0 : index
    %c0_298 = arith.constant 0 : index
    %703 = vector.load %arg39[%c0_297, %c0_298] : memref<2x32xf32, #tpu.memory_space<vmem>>, vector<1x32xf32>
    %c0_299 = arith.constant 0 : index
    %c0_300 = arith.constant 0 : index
    %c0_301 = arith.constant 0 : index
    %704 = vector.load %arg40[%c0_299, %c0_300, %c0_301] : memref<2x32x32xf32, #tpu.memory_space<vmem>>, vector<1x32x32xf32>
    %705 = vector.shape_cast %704 : vector<1x32x32xf32> to vector<32x32xf32>
    %c0_302 = arith.constant 0 : index
    %c0_303 = arith.constant 0 : index
    %706 = vector.load %arg41[%c0_302, %c0_303] : memref<2x32xf32, #tpu.memory_space<vmem>>, vector<1x32xf32>
    %cst_304 = arith.constant dense<0.000000e+00> : vector<16x32xf32>
    %707 = tpu.matmul %694, %696, %cst_304 {dimension_numbers = #tpu.dot_dimension_numbers<[1], [0], [0], [1], [0, 0, 1, 1], [], []>} : vector<16x32xf32>, vector<32x32xf32>, vector<16x32xf32> -> vector<16x32xf32>
    %708 = vector.broadcast %697 : vector<1x32xf32> to vector<16x32xf32>
    %709 = arith.addf %707, %708 : vector<16x32xf32>
    %cst_305 = arith.constant dense<0.000000e+00> : vector<16x32xf32>
    %710 = tpu.matmul %484, %699, %cst_305 {dimension_numbers = #tpu.dot_dimension_numbers<[1], [0], [0], [1], [0, 0, 1, 1], [], []>} : vector<16x32xf32>, vector<32x32xf32>, vector<16x32xf32> -> vector<16x32xf32>
    %711 = vector.broadcast %700 : vector<1x32xf32> to vector<16x32xf32>
    %712 = arith.addf %710, %711 : vector<16x32xf32>
    %cst_306 = arith.constant dense<0.000000e+00> : vector<16x32xf32>
    %713 = tpu.matmul %484, %702, %cst_306 {dimension_numbers = #tpu.dot_dimension_numbers<[1], [0], [0], [1], [0, 0, 1, 1], [], []>} : vector<16x32xf32>, vector<32x32xf32>, vector<16x32xf32> -> vector<16x32xf32>
    %714 = vector.broadcast %703 : vector<1x32xf32> to vector<16x32xf32>
    %715 = arith.addf %713, %714 : vector<16x32xf32>
    %716 = vector.extract_strided_slice %709 {offsets = [0, 0], sizes = [8, 32], strides = [1, 1]} : vector<16x32xf32> to vector<8x32xf32>
    %717 = vector.extract_strided_slice %712 {offsets = [0, 0], sizes = [8, 32], strides = [1, 1]} : vector<16x32xf32> to vector<8x32xf32>
    %718 = vector.extract_strided_slice %715 {offsets = [0, 0], sizes = [8, 32], strides = [1, 1]} : vector<16x32xf32> to vector<8x32xf32>
    %719 = vector.extract_strided_slice %716 {offsets = [0, 0], sizes = [8, 8], strides = [1, 1]} : vector<8x32xf32> to vector<8x8xf32>
    %cst_307 = arith.constant 0.353553385 : f32
    %720 = vector.broadcast %cst_307 : f32 to vector<8x8xf32>
    %721 = arith.mulf %719, %720 : vector<8x8xf32>
    %722 = vector.extract_strided_slice %717 {offsets = [0, 0], sizes = [8, 8], strides = [1, 1]} : vector<8x32xf32> to vector<8x8xf32>
    %723 = vector.extract_strided_slice %718 {offsets = [0, 0], sizes = [8, 8], strides = [1, 1]} : vector<8x32xf32> to vector<8x8xf32>
    %cst_308 = arith.constant dense<0.000000e+00> : vector<8x8xf32>
    %724 = tpu.matmul %721, %722, %cst_308 {dimension_numbers = #tpu.dot_dimension_numbers<[1], [1], [0], [0], [0, 0, 1, 0], [], []>} : vector<8x8xf32>, vector<8x8xf32>, vector<8x8xf32> -> vector<8x8xf32>
    %cst_309 = arith.constant dense<0xFF800000> : vector<8xf32>
    %725 = vector.multi_reduction <maximumf>, %724, %cst_309 [1] : vector<8x8xf32> to vector<8xf32>
    %726 = vector.shape_cast %725 : vector<8xf32> to vector<8x1xf32>
    %727 = vector.broadcast %726 : vector<8x1xf32> to vector<8x8xf32>
    %728 = arith.subf %724, %727 : vector<8x8xf32>
    %729 = math.exp %728 : vector<8x8xf32>
    %cst_310 = arith.constant dense<0.000000e+00> : vector<8xf32>
    %730 = vector.multi_reduction <add>, %729, %cst_310 [1] : vector<8x8xf32> to vector<8xf32>
    %731 = vector.shape_cast %730 : vector<8xf32> to vector<8x1xf32>
    %732 = tpu.reciprocal %731 : vector<8x1xf32> -> vector<8x1xf32>
    %733 = vector.broadcast %732 : vector<8x1xf32> to vector<8x8xf32>
    %734 = arith.mulf %729, %733 : vector<8x8xf32>
    %cst_311 = arith.constant dense<0.000000e+00> : vector<8x8xf32>
    %735 = tpu.matmul %734, %723, %cst_311 {dimension_numbers = #tpu.dot_dimension_numbers<[1], [0], [0], [1], [0, 0, 1, 1], [], []>} : vector<8x8xf32>, vector<8x8xf32>, vector<8x8xf32> -> vector<8x8xf32>
    %736 = vector.extract_strided_slice %716 {offsets = [0, 8], sizes = [8, 8], strides = [1, 1]} : vector<8x32xf32> to vector<8x8xf32>
    %cst_312 = arith.constant 0.353553385 : f32
    %737 = vector.broadcast %cst_312 : f32 to vector<8x8xf32>
    %738 = arith.mulf %736, %737 : vector<8x8xf32>
    %739 = vector.extract_strided_slice %717 {offsets = [0, 8], sizes = [8, 8], strides = [1, 1]} : vector<8x32xf32> to vector<8x8xf32>
    %740 = vector.extract_strided_slice %718 {offsets = [0, 8], sizes = [8, 8], strides = [1, 1]} : vector<8x32xf32> to vector<8x8xf32>
    %cst_313 = arith.constant dense<0.000000e+00> : vector<8x8xf32>
    %741 = tpu.matmul %738, %739, %cst_313 {dimension_numbers = #tpu.dot_dimension_numbers<[1], [1], [0], [0], [0, 0, 1, 0], [], []>} : vector<8x8xf32>, vector<8x8xf32>, vector<8x8xf32> -> vector<8x8xf32>
    %cst_314 = arith.constant dense<0xFF800000> : vector<8xf32>
    %742 = vector.multi_reduction <maximumf>, %741, %cst_314 [1] : vector<8x8xf32> to vector<8xf32>
    %743 = vector.shape_cast %742 : vector<8xf32> to vector<8x1xf32>
    %744 = vector.broadcast %743 : vector<8x1xf32> to vector<8x8xf32>
    %745 = arith.subf %741, %744 : vector<8x8xf32>
    %746 = math.exp %745 : vector<8x8xf32>
    %cst_315 = arith.constant dense<0.000000e+00> : vector<8xf32>
    %747 = vector.multi_reduction <add>, %746, %cst_315 [1] : vector<8x8xf32> to vector<8xf32>
    %748 = vector.shape_cast %747 : vector<8xf32> to vector<8x1xf32>
    %749 = tpu.reciprocal %748 : vector<8x1xf32> -> vector<8x1xf32>
    %750 = vector.broadcast %749 : vector<8x1xf32> to vector<8x8xf32>
    %751 = arith.mulf %746, %750 : vector<8x8xf32>
    %cst_316 = arith.constant dense<0.000000e+00> : vector<8x8xf32>
    %752 = tpu.matmul %751, %740, %cst_316 {dimension_numbers = #tpu.dot_dimension_numbers<[1], [0], [0], [1], [0, 0, 1, 1], [], []>} : vector<8x8xf32>, vector<8x8xf32>, vector<8x8xf32> -> vector<8x8xf32>
    %753 = vector.extract_strided_slice %716 {offsets = [0, 16], sizes = [8, 8], strides = [1, 1]} : vector<8x32xf32> to vector<8x8xf32>
    %cst_317 = arith.constant 0.353553385 : f32
    %754 = vector.broadcast %cst_317 : f32 to vector<8x8xf32>
    %755 = arith.mulf %753, %754 : vector<8x8xf32>
    %756 = vector.extract_strided_slice %717 {offsets = [0, 16], sizes = [8, 8], strides = [1, 1]} : vector<8x32xf32> to vector<8x8xf32>
    %757 = vector.extract_strided_slice %718 {offsets = [0, 16], sizes = [8, 8], strides = [1, 1]} : vector<8x32xf32> to vector<8x8xf32>
    %cst_318 = arith.constant dense<0.000000e+00> : vector<8x8xf32>
    %758 = tpu.matmul %755, %756, %cst_318 {dimension_numbers = #tpu.dot_dimension_numbers<[1], [1], [0], [0], [0, 0, 1, 0], [], []>} : vector<8x8xf32>, vector<8x8xf32>, vector<8x8xf32> -> vector<8x8xf32>
    %cst_319 = arith.constant dense<0xFF800000> : vector<8xf32>
    %759 = vector.multi_reduction <maximumf>, %758, %cst_319 [1] : vector<8x8xf32> to vector<8xf32>
    %760 = vector.shape_cast %759 : vector<8xf32> to vector<8x1xf32>
    %761 = vector.broadcast %760 : vector<8x1xf32> to vector<8x8xf32>
    %762 = arith.subf %758, %761 : vector<8x8xf32>
    %763 = math.exp %762 : vector<8x8xf32>
    %cst_320 = arith.constant dense<0.000000e+00> : vector<8xf32>
    %764 = vector.multi_reduction <add>, %763, %cst_320 [1] : vector<8x8xf32> to vector<8xf32>
    %765 = vector.shape_cast %764 : vector<8xf32> to vector<8x1xf32>
    %766 = tpu.reciprocal %765 : vector<8x1xf32> -> vector<8x1xf32>
    %767 = vector.broadcast %766 : vector<8x1xf32> to vector<8x8xf32>
    %768 = arith.mulf %763, %767 : vector<8x8xf32>
    %cst_321 = arith.constant dense<0.000000e+00> : vector<8x8xf32>
    %769 = tpu.matmul %768, %757, %cst_321 {dimension_numbers = #tpu.dot_dimension_numbers<[1], [0], [0], [1], [0, 0, 1, 1], [], []>} : vector<8x8xf32>, vector<8x8xf32>, vector<8x8xf32> -> vector<8x8xf32>
    %770 = vector.extract_strided_slice %716 {offsets = [0, 24], sizes = [8, 8], strides = [1, 1]} : vector<8x32xf32> to vector<8x8xf32>
    %cst_322 = arith.constant 0.353553385 : f32
    %771 = vector.broadcast %cst_322 : f32 to vector<8x8xf32>
    %772 = arith.mulf %770, %771 : vector<8x8xf32>
    %773 = vector.extract_strided_slice %717 {offsets = [0, 24], sizes = [8, 8], strides = [1, 1]} : vector<8x32xf32> to vector<8x8xf32>
    %774 = vector.extract_strided_slice %718 {offsets = [0, 24], sizes = [8, 8], strides = [1, 1]} : vector<8x32xf32> to vector<8x8xf32>
    %cst_323 = arith.constant dense<0.000000e+00> : vector<8x8xf32>
    %775 = tpu.matmul %772, %773, %cst_323 {dimension_numbers = #tpu.dot_dimension_numbers<[1], [1], [0], [0], [0, 0, 1, 0], [], []>} : vector<8x8xf32>, vector<8x8xf32>, vector<8x8xf32> -> vector<8x8xf32>
    %cst_324 = arith.constant dense<0xFF800000> : vector<8xf32>
    %776 = vector.multi_reduction <maximumf>, %775, %cst_324 [1] : vector<8x8xf32> to vector<8xf32>
    %777 = vector.shape_cast %776 : vector<8xf32> to vector<8x1xf32>
    %778 = vector.broadcast %777 : vector<8x1xf32> to vector<8x8xf32>
    %779 = arith.subf %775, %778 : vector<8x8xf32>
    %780 = math.exp %779 : vector<8x8xf32>
    %cst_325 = arith.constant dense<0.000000e+00> : vector<8xf32>
    %781 = vector.multi_reduction <add>, %780, %cst_325 [1] : vector<8x8xf32> to vector<8xf32>
    %782 = vector.shape_cast %781 : vector<8xf32> to vector<8x1xf32>
    %783 = tpu.reciprocal %782 : vector<8x1xf32> -> vector<8x1xf32>
    %784 = vector.broadcast %783 : vector<8x1xf32> to vector<8x8xf32>
    %785 = arith.mulf %780, %784 : vector<8x8xf32>
    %cst_326 = arith.constant dense<0.000000e+00> : vector<8x8xf32>
    %786 = tpu.matmul %785, %774, %cst_326 {dimension_numbers = #tpu.dot_dimension_numbers<[1], [0], [0], [1], [0, 0, 1, 1], [], []>} : vector<8x8xf32>, vector<8x8xf32>, vector<8x8xf32> -> vector<8x8xf32>
    %787 = tpu.concatenate %735, %752, %769, %786 in 1 : vector<8x8xf32>, vector<8x8xf32>, vector<8x8xf32>, vector<8x8xf32> -> vector<8x32xf32>
    %788 = vector.extract_strided_slice %709 {offsets = [8, 0], sizes = [8, 32], strides = [1, 1]} : vector<16x32xf32> to vector<8x32xf32>
    %789 = vector.extract_strided_slice %712 {offsets = [8, 0], sizes = [8, 32], strides = [1, 1]} : vector<16x32xf32> to vector<8x32xf32>
    %790 = vector.extract_strided_slice %715 {offsets = [8, 0], sizes = [8, 32], strides = [1, 1]} : vector<16x32xf32> to vector<8x32xf32>
    %791 = vector.extract_strided_slice %788 {offsets = [0, 0], sizes = [8, 8], strides = [1, 1]} : vector<8x32xf32> to vector<8x8xf32>
    %cst_327 = arith.constant 0.353553385 : f32
    %792 = vector.broadcast %cst_327 : f32 to vector<8x8xf32>
    %793 = arith.mulf %791, %792 : vector<8x8xf32>
    %794 = vector.extract_strided_slice %789 {offsets = [0, 0], sizes = [8, 8], strides = [1, 1]} : vector<8x32xf32> to vector<8x8xf32>
    %795 = vector.extract_strided_slice %790 {offsets = [0, 0], sizes = [8, 8], strides = [1, 1]} : vector<8x32xf32> to vector<8x8xf32>
    %cst_328 = arith.constant dense<0.000000e+00> : vector<8x8xf32>
    %796 = tpu.matmul %793, %794, %cst_328 {dimension_numbers = #tpu.dot_dimension_numbers<[1], [1], [0], [0], [0, 0, 1, 0], [], []>} : vector<8x8xf32>, vector<8x8xf32>, vector<8x8xf32> -> vector<8x8xf32>
    %cst_329 = arith.constant dense<0xFF800000> : vector<8xf32>
    %797 = vector.multi_reduction <maximumf>, %796, %cst_329 [1] : vector<8x8xf32> to vector<8xf32>
    %798 = vector.shape_cast %797 : vector<8xf32> to vector<8x1xf32>
    %799 = vector.broadcast %798 : vector<8x1xf32> to vector<8x8xf32>
    %800 = arith.subf %796, %799 : vector<8x8xf32>
    %801 = math.exp %800 : vector<8x8xf32>
    %cst_330 = arith.constant dense<0.000000e+00> : vector<8xf32>
    %802 = vector.multi_reduction <add>, %801, %cst_330 [1] : vector<8x8xf32> to vector<8xf32>
    %803 = vector.shape_cast %802 : vector<8xf32> to vector<8x1xf32>
    %804 = tpu.reciprocal %803 : vector<8x1xf32> -> vector<8x1xf32>
    %805 = vector.broadcast %804 : vector<8x1xf32> to vector<8x8xf32>
    %806 = arith.mulf %801, %805 : vector<8x8xf32>
    %cst_331 = arith.constant dense<0.000000e+00> : vector<8x8xf32>
    %807 = tpu.matmul %806, %795, %cst_331 {dimension_numbers = #tpu.dot_dimension_numbers<[1], [0], [0], [1], [0, 0, 1, 1], [], []>} : vector<8x8xf32>, vector<8x8xf32>, vector<8x8xf32> -> vector<8x8xf32>
    %808 = vector.extract_strided_slice %788 {offsets = [0, 8], sizes = [8, 8], strides = [1, 1]} : vector<8x32xf32> to vector<8x8xf32>
    %cst_332 = arith.constant 0.353553385 : f32
    %809 = vector.broadcast %cst_332 : f32 to vector<8x8xf32>
    %810 = arith.mulf %808, %809 : vector<8x8xf32>
    %811 = vector.extract_strided_slice %789 {offsets = [0, 8], sizes = [8, 8], strides = [1, 1]} : vector<8x32xf32> to vector<8x8xf32>
    %812 = vector.extract_strided_slice %790 {offsets = [0, 8], sizes = [8, 8], strides = [1, 1]} : vector<8x32xf32> to vector<8x8xf32>
    %cst_333 = arith.constant dense<0.000000e+00> : vector<8x8xf32>
    %813 = tpu.matmul %810, %811, %cst_333 {dimension_numbers = #tpu.dot_dimension_numbers<[1], [1], [0], [0], [0, 0, 1, 0], [], []>} : vector<8x8xf32>, vector<8x8xf32>, vector<8x8xf32> -> vector<8x8xf32>
    %cst_334 = arith.constant dense<0xFF800000> : vector<8xf32>
    %814 = vector.multi_reduction <maximumf>, %813, %cst_334 [1] : vector<8x8xf32> to vector<8xf32>
    %815 = vector.shape_cast %814 : vector<8xf32> to vector<8x1xf32>
    %816 = vector.broadcast %815 : vector<8x1xf32> to vector<8x8xf32>
    %817 = arith.subf %813, %816 : vector<8x8xf32>
    %818 = math.exp %817 : vector<8x8xf32>
    %cst_335 = arith.constant dense<0.000000e+00> : vector<8xf32>
    %819 = vector.multi_reduction <add>, %818, %cst_335 [1] : vector<8x8xf32> to vector<8xf32>
    %820 = vector.shape_cast %819 : vector<8xf32> to vector<8x1xf32>
    %821 = tpu.reciprocal %820 : vector<8x1xf32> -> vector<8x1xf32>
    %822 = vector.broadcast %821 : vector<8x1xf32> to vector<8x8xf32>
    %823 = arith.mulf %818, %822 : vector<8x8xf32>
    %cst_336 = arith.constant dense<0.000000e+00> : vector<8x8xf32>
    %824 = tpu.matmul %823, %812, %cst_336 {dimension_numbers = #tpu.dot_dimension_numbers<[1], [0], [0], [1], [0, 0, 1, 1], [], []>} : vector<8x8xf32>, vector<8x8xf32>, vector<8x8xf32> -> vector<8x8xf32>
    %825 = vector.extract_strided_slice %788 {offsets = [0, 16], sizes = [8, 8], strides = [1, 1]} : vector<8x32xf32> to vector<8x8xf32>
    %cst_337 = arith.constant 0.353553385 : f32
    %826 = vector.broadcast %cst_337 : f32 to vector<8x8xf32>
    %827 = arith.mulf %825, %826 : vector<8x8xf32>
    %828 = vector.extract_strided_slice %789 {offsets = [0, 16], sizes = [8, 8], strides = [1, 1]} : vector<8x32xf32> to vector<8x8xf32>
    %829 = vector.extract_strided_slice %790 {offsets = [0, 16], sizes = [8, 8], strides = [1, 1]} : vector<8x32xf32> to vector<8x8xf32>
    %cst_338 = arith.constant dense<0.000000e+00> : vector<8x8xf32>
    %830 = tpu.matmul %827, %828, %cst_338 {dimension_numbers = #tpu.dot_dimension_numbers<[1], [1], [0], [0], [0, 0, 1, 0], [], []>} : vector<8x8xf32>, vector<8x8xf32>, vector<8x8xf32> -> vector<8x8xf32>
    %cst_339 = arith.constant dense<0xFF800000> : vector<8xf32>
    %831 = vector.multi_reduction <maximumf>, %830, %cst_339 [1] : vector<8x8xf32> to vector<8xf32>
    %832 = vector.shape_cast %831 : vector<8xf32> to vector<8x1xf32>
    %833 = vector.broadcast %832 : vector<8x1xf32> to vector<8x8xf32>
    %834 = arith.subf %830, %833 : vector<8x8xf32>
    %835 = math.exp %834 : vector<8x8xf32>
    %cst_340 = arith.constant dense<0.000000e+00> : vector<8xf32>
    %836 = vector.multi_reduction <add>, %835, %cst_340 [1] : vector<8x8xf32> to vector<8xf32>
    %837 = vector.shape_cast %836 : vector<8xf32> to vector<8x1xf32>
    %838 = tpu.reciprocal %837 : vector<8x1xf32> -> vector<8x1xf32>
    %839 = vector.broadcast %838 : vector<8x1xf32> to vector<8x8xf32>
    %840 = arith.mulf %835, %839 : vector<8x8xf32>
    %cst_341 = arith.constant dense<0.000000e+00> : vector<8x8xf32>
    %841 = tpu.matmul %840, %829, %cst_341 {dimension_numbers = #tpu.dot_dimension_numbers<[1], [0], [0], [1], [0, 0, 1, 1], [], []>} : vector<8x8xf32>, vector<8x8xf32>, vector<8x8xf32> -> vector<8x8xf32>
    %842 = vector.extract_strided_slice %788 {offsets = [0, 24], sizes = [8, 8], strides = [1, 1]} : vector<8x32xf32> to vector<8x8xf32>
    %cst_342 = arith.constant 0.353553385 : f32
    %843 = vector.broadcast %cst_342 : f32 to vector<8x8xf32>
    %844 = arith.mulf %842, %843 : vector<8x8xf32>
    %845 = vector.extract_strided_slice %789 {offsets = [0, 24], sizes = [8, 8], strides = [1, 1]} : vector<8x32xf32> to vector<8x8xf32>
    %846 = vector.extract_strided_slice %790 {offsets = [0, 24], sizes = [8, 8], strides = [1, 1]} : vector<8x32xf32> to vector<8x8xf32>
    %cst_343 = arith.constant dense<0.000000e+00> : vector<8x8xf32>
    %847 = tpu.matmul %844, %845, %cst_343 {dimension_numbers = #tpu.dot_dimension_numbers<[1], [1], [0], [0], [0, 0, 1, 0], [], []>} : vector<8x8xf32>, vector<8x8xf32>, vector<8x8xf32> -> vector<8x8xf32>
    %cst_344 = arith.constant dense<0xFF800000> : vector<8xf32>
    %848 = vector.multi_reduction <maximumf>, %847, %cst_344 [1] : vector<8x8xf32> to vector<8xf32>
    %849 = vector.shape_cast %848 : vector<8xf32> to vector<8x1xf32>
    %850 = vector.broadcast %849 : vector<8x1xf32> to vector<8x8xf32>
    %851 = arith.subf %847, %850 : vector<8x8xf32>
    %852 = math.exp %851 : vector<8x8xf32>
    %cst_345 = arith.constant dense<0.000000e+00> : vector<8xf32>
    %853 = vector.multi_reduction <add>, %852, %cst_345 [1] : vector<8x8xf32> to vector<8xf32>
    %854 = vector.shape_cast %853 : vector<8xf32> to vector<8x1xf32>
    %855 = tpu.reciprocal %854 : vector<8x1xf32> -> vector<8x1xf32>
    %856 = vector.broadcast %855 : vector<8x1xf32> to vector<8x8xf32>
    %857 = arith.mulf %852, %856 : vector<8x8xf32>
    %cst_346 = arith.constant dense<0.000000e+00> : vector<8x8xf32>
    %858 = tpu.matmul %857, %846, %cst_346 {dimension_numbers = #tpu.dot_dimension_numbers<[1], [0], [0], [1], [0, 0, 1, 1], [], []>} : vector<8x8xf32>, vector<8x8xf32>, vector<8x8xf32> -> vector<8x8xf32>
    %859 = tpu.concatenate %807, %824, %841, %858 in 1 : vector<8x8xf32>, vector<8x8xf32>, vector<8x8xf32>, vector<8x8xf32> -> vector<8x32xf32>
    %860 = tpu.concatenate %787, %859 in 0 : vector<8x32xf32>, vector<8x32xf32> -> vector<16x32xf32>
    %cst_347 = arith.constant dense<0.000000e+00> : vector<16x32xf32>
    %861 = tpu.matmul %860, %705, %cst_347 {dimension_numbers = #tpu.dot_dimension_numbers<[1], [0], [0], [1], [0, 0, 1, 1], [], []>} : vector<16x32xf32>, vector<32x32xf32>, vector<16x32xf32> -> vector<16x32xf32>
    %862 = vector.broadcast %706 : vector<1x32xf32> to vector<16x32xf32>
    %863 = arith.addf %861, %862 : vector<16x32xf32>
    %c0_348 = arith.constant 0 : index
    %c0_349 = arith.constant 0 : index
    %864 = vector.load %arg44[%c0_348, %c0_349] : memref<2x32xf32, #tpu.memory_space<vmem>>, vector<1x32xf32>
    %c0_350 = arith.constant 0 : index
    %c0_351 = arith.constant 0 : index
    %865 = vector.load %arg45[%c0_350, %c0_351] : memref<2x32xf32, #tpu.memory_space<vmem>>, vector<1x32xf32>
    %cst_352 = arith.constant dense<0.000000e+00> : vector<16xf32>
    %866 = vector.multi_reduction <add>, %863, %cst_352 [1] : vector<16x32xf32> to vector<16xf32>
    %867 = vector.shape_cast %866 : vector<16xf32> to vector<16x1xf32>
    %cst_353 = arith.constant 3.200000e+01 : f32
    %868 = vector.broadcast %cst_353 : f32 to vector<16x1xf32>
    %869 = arith.divf %867, %868 : vector<16x1xf32>
    %870 = vector.broadcast %869 : vector<16x1xf32> to vector<16x32xf32>
    %871 = arith.subf %863, %870 : vector<16x32xf32>
    %872 = arith.mulf %871, %871 : vector<16x32xf32>
    %cst_354 = arith.constant dense<0.000000e+00> : vector<16xf32>
    %873 = vector.multi_reduction <add>, %872, %cst_354 [1] : vector<16x32xf32> to vector<16xf32>
    %874 = vector.shape_cast %873 : vector<16xf32> to vector<16x1xf32>
    %cst_355 = arith.constant 3.200000e+01 : f32
    %875 = vector.broadcast %cst_355 : f32 to vector<16x1xf32>
    %876 = arith.divf %874, %875 : vector<16x1xf32>
    %877 = vector.broadcast %869 : vector<16x1xf32> to vector<16x32xf32>
    %878 = arith.subf %863, %877 : vector<16x32xf32>
    %cst_356 = arith.constant 9.99999974E-6 : f32
    %879 = vector.broadcast %cst_356 : f32 to vector<16x1xf32>
    %880 = arith.addf %876, %879 : vector<16x1xf32>
    %881 = math.rsqrt %880 : vector<16x1xf32>
    %882 = vector.broadcast %881 : vector<16x1xf32> to vector<16x32xf32>
    %883 = arith.mulf %878, %882 : vector<16x32xf32>
    %884 = vector.broadcast %864 : vector<1x32xf32> to vector<16x32xf32>
    %885 = arith.mulf %883, %884 : vector<16x32xf32>
    %886 = vector.broadcast %865 : vector<1x32xf32> to vector<16x32xf32>
    %887 = arith.addf %885, %886 : vector<16x32xf32>
    %888 = arith.addf %694, %887 : vector<16x32xf32>
    %c0_357 = arith.constant 0 : index
    %c0_358 = arith.constant 0 : index
    %c0_359 = arith.constant 0 : index
    %889 = vector.load %arg48[%c0_357, %c0_358, %c0_359] : memref<2x32x64xf32, #tpu.memory_space<vmem>>, vector<1x32x64xf32>
    %890 = vector.shape_cast %889 : vector<1x32x64xf32> to vector<32x64xf32>
    %c0_360 = arith.constant 0 : index
    %c0_361 = arith.constant 0 : index
    %891 = vector.load %arg49[%c0_360, %c0_361] : memref<2x64xf32, #tpu.memory_space<vmem>>, vector<1x64xf32>
    %c0_362 = arith.constant 0 : index
    %c0_363 = arith.constant 0 : index
    %c0_364 = arith.constant 0 : index
    %892 = vector.load %arg50[%c0_362, %c0_363, %c0_364] : memref<2x64x32xf32, #tpu.memory_space<vmem>>, vector<1x64x32xf32>
    %893 = vector.shape_cast %892 : vector<1x64x32xf32> to vector<64x32xf32>
    %c0_365 = arith.constant 0 : index
    %c0_366 = arith.constant 0 : index
    %894 = vector.load %arg51[%c0_365, %c0_366] : memref<2x32xf32, #tpu.memory_space<vmem>>, vector<1x32xf32>
    %cst_367 = arith.constant dense<0.000000e+00> : vector<16x64xf32>
    %895 = tpu.matmul %888, %890, %cst_367 {dimension_numbers = #tpu.dot_dimension_numbers<[1], [0], [0], [1], [0, 0, 1, 1], [], []>} : vector<16x32xf32>, vector<32x64xf32>, vector<16x64xf32> -> vector<16x64xf32>
    %896 = vector.broadcast %891 : vector<1x64xf32> to vector<16x64xf32>
    %897 = arith.addf %895, %896 : vector<16x64xf32>
    %cst_368 = arith.constant 0.000000e+00 : f32
    %898 = vector.broadcast %cst_368 : f32 to vector<16x64xf32>
    %899 = arith.maximumf %897, %898 : vector<16x64xf32>
    %cst_369 = arith.constant dense<0.000000e+00> : vector<16x32xf32>
    %900 = tpu.matmul %899, %893, %cst_369 {dimension_numbers = #tpu.dot_dimension_numbers<[1], [0], [0], [1], [0, 0, 1, 1], [], []>} : vector<16x64xf32>, vector<64x32xf32>, vector<16x32xf32> -> vector<16x32xf32>
    %901 = vector.broadcast %894 : vector<1x32xf32> to vector<16x32xf32>
    %902 = arith.addf %900, %901 : vector<16x32xf32>
    %c0_370 = arith.constant 0 : index
    %c0_371 = arith.constant 0 : index
    %903 = vector.load %arg46[%c0_370, %c0_371] : memref<2x32xf32, #tpu.memory_space<vmem>>, vector<1x32xf32>
    %c0_372 = arith.constant 0 : index
    %c0_373 = arith.constant 0 : index
    %904 = vector.load %arg47[%c0_372, %c0_373] : memref<2x32xf32, #tpu.memory_space<vmem>>, vector<1x32xf32>
    %cst_374 = arith.constant dense<0.000000e+00> : vector<16xf32>
    %905 = vector.multi_reduction <add>, %902, %cst_374 [1] : vector<16x32xf32> to vector<16xf32>
    %906 = vector.shape_cast %905 : vector<16xf32> to vector<16x1xf32>
    %cst_375 = arith.constant 3.200000e+01 : f32
    %907 = vector.broadcast %cst_375 : f32 to vector<16x1xf32>
    %908 = arith.divf %906, %907 : vector<16x1xf32>
    %909 = vector.broadcast %908 : vector<16x1xf32> to vector<16x32xf32>
    %910 = arith.subf %902, %909 : vector<16x32xf32>
    %911 = arith.mulf %910, %910 : vector<16x32xf32>
    %cst_376 = arith.constant dense<0.000000e+00> : vector<16xf32>
    %912 = vector.multi_reduction <add>, %911, %cst_376 [1] : vector<16x32xf32> to vector<16xf32>
    %913 = vector.shape_cast %912 : vector<16xf32> to vector<16x1xf32>
    %cst_377 = arith.constant 3.200000e+01 : f32
    %914 = vector.broadcast %cst_377 : f32 to vector<16x1xf32>
    %915 = arith.divf %913, %914 : vector<16x1xf32>
    %916 = vector.broadcast %908 : vector<16x1xf32> to vector<16x32xf32>
    %917 = arith.subf %902, %916 : vector<16x32xf32>
    %cst_378 = arith.constant 9.99999974E-6 : f32
    %918 = vector.broadcast %cst_378 : f32 to vector<16x1xf32>
    %919 = arith.addf %915, %918 : vector<16x1xf32>
    %920 = math.rsqrt %919 : vector<16x1xf32>
    %921 = vector.broadcast %920 : vector<16x1xf32> to vector<16x32xf32>
    %922 = arith.mulf %917, %921 : vector<16x32xf32>
    %923 = vector.broadcast %903 : vector<1x32xf32> to vector<16x32xf32>
    %924 = arith.mulf %922, %923 : vector<16x32xf32>
    %925 = vector.broadcast %904 : vector<1x32xf32> to vector<16x32xf32>
    %926 = arith.addf %924, %925 : vector<16x32xf32>
    %927 = arith.addf %888, %926 : vector<16x32xf32>
    %c1_379 = arith.constant 1 : index
    %c0_380 = arith.constant 0 : index
    %c0_381 = arith.constant 0 : index
    %928 = vector.load %arg26[%c1_379, %c0_380, %c0_381] : memref<2x32x32xf32, #tpu.memory_space<vmem>>, vector<1x32x32xf32>
    %929 = vector.shape_cast %928 : vector<1x32x32xf32> to vector<32x32xf32>
    %c1_382 = arith.constant 1 : index
    %c0_383 = arith.constant 0 : index
    %930 = vector.load %arg27[%c1_382, %c0_383] : memref<2x32xf32, #tpu.memory_space<vmem>>, vector<1x32xf32>
    %c1_384 = arith.constant 1 : index
    %c0_385 = arith.constant 0 : index
    %c0_386 = arith.constant 0 : index
    %931 = vector.load %arg28[%c1_384, %c0_385, %c0_386] : memref<2x32x32xf32, #tpu.memory_space<vmem>>, vector<1x32x32xf32>
    %932 = vector.shape_cast %931 : vector<1x32x32xf32> to vector<32x32xf32>
    %c1_387 = arith.constant 1 : index
    %c0_388 = arith.constant 0 : index
    %933 = vector.load %arg29[%c1_387, %c0_388] : memref<2x32xf32, #tpu.memory_space<vmem>>, vector<1x32xf32>
    %c1_389 = arith.constant 1 : index
    %c0_390 = arith.constant 0 : index
    %c0_391 = arith.constant 0 : index
    %934 = vector.load %arg30[%c1_389, %c0_390, %c0_391] : memref<2x32x32xf32, #tpu.memory_space<vmem>>, vector<1x32x32xf32>
    %935 = vector.shape_cast %934 : vector<1x32x32xf32> to vector<32x32xf32>
    %c1_392 = arith.constant 1 : index
    %c0_393 = arith.constant 0 : index
    %936 = vector.load %arg31[%c1_392, %c0_393] : memref<2x32xf32, #tpu.memory_space<vmem>>, vector<1x32xf32>
    %c1_394 = arith.constant 1 : index
    %c0_395 = arith.constant 0 : index
    %c0_396 = arith.constant 0 : index
    %937 = vector.load %arg32[%c1_394, %c0_395, %c0_396] : memref<2x32x32xf32, #tpu.memory_space<vmem>>, vector<1x32x32xf32>
    %938 = vector.shape_cast %937 : vector<1x32x32xf32> to vector<32x32xf32>
    %c1_397 = arith.constant 1 : index
    %c0_398 = arith.constant 0 : index
    %939 = vector.load %arg33[%c1_397, %c0_398] : memref<2x32xf32, #tpu.memory_space<vmem>>, vector<1x32xf32>
    %cst_399 = arith.constant dense<0.000000e+00> : vector<16x32xf32>
    %940 = tpu.matmul %927, %929, %cst_399 {dimension_numbers = #tpu.dot_dimension_numbers<[1], [0], [0], [1], [0, 0, 1, 1], [], []>} : vector<16x32xf32>, vector<32x32xf32>, vector<16x32xf32> -> vector<16x32xf32>
    %941 = vector.broadcast %930 : vector<1x32xf32> to vector<16x32xf32>
    %942 = arith.addf %940, %941 : vector<16x32xf32>
    %cst_400 = arith.constant dense<0.000000e+00> : vector<16x32xf32>
    %943 = tpu.matmul %927, %932, %cst_400 {dimension_numbers = #tpu.dot_dimension_numbers<[1], [0], [0], [1], [0, 0, 1, 1], [], []>} : vector<16x32xf32>, vector<32x32xf32>, vector<16x32xf32> -> vector<16x32xf32>
    %944 = vector.broadcast %933 : vector<1x32xf32> to vector<16x32xf32>
    %945 = arith.addf %943, %944 : vector<16x32xf32>
    %cst_401 = arith.constant dense<0.000000e+00> : vector<16x32xf32>
    %946 = tpu.matmul %927, %935, %cst_401 {dimension_numbers = #tpu.dot_dimension_numbers<[1], [0], [0], [1], [0, 0, 1, 1], [], []>} : vector<16x32xf32>, vector<32x32xf32>, vector<16x32xf32> -> vector<16x32xf32>
    %947 = vector.broadcast %936 : vector<1x32xf32> to vector<16x32xf32>
    %948 = arith.addf %946, %947 : vector<16x32xf32>
    %949 = vector.extract_strided_slice %942 {offsets = [0, 0], sizes = [8, 32], strides = [1, 1]} : vector<16x32xf32> to vector<8x32xf32>
    %950 = vector.extract_strided_slice %945 {offsets = [0, 0], sizes = [8, 32], strides = [1, 1]} : vector<16x32xf32> to vector<8x32xf32>
    %951 = vector.extract_strided_slice %948 {offsets = [0, 0], sizes = [8, 32], strides = [1, 1]} : vector<16x32xf32> to vector<8x32xf32>
    %952 = vector.extract_strided_slice %949 {offsets = [0, 0], sizes = [8, 8], strides = [1, 1]} : vector<8x32xf32> to vector<8x8xf32>
    %cst_402 = arith.constant 0.353553385 : f32
    %953 = vector.broadcast %cst_402 : f32 to vector<8x8xf32>
    %954 = arith.mulf %952, %953 : vector<8x8xf32>
    %955 = vector.extract_strided_slice %950 {offsets = [0, 0], sizes = [8, 8], strides = [1, 1]} : vector<8x32xf32> to vector<8x8xf32>
    %956 = vector.extract_strided_slice %951 {offsets = [0, 0], sizes = [8, 8], strides = [1, 1]} : vector<8x32xf32> to vector<8x8xf32>
    %cst_403 = arith.constant dense<0.000000e+00> : vector<8x8xf32>
    %957 = tpu.matmul %954, %955, %cst_403 {dimension_numbers = #tpu.dot_dimension_numbers<[1], [1], [0], [0], [0, 0, 1, 0], [], []>} : vector<8x8xf32>, vector<8x8xf32>, vector<8x8xf32> -> vector<8x8xf32>
    %cst_404 = arith.constant -1.000000e+09 : f32
    %958 = vector.broadcast %cst_404 : f32 to vector<8x8xf32>
    %959 = arith.select %18, %957, %958 : vector<8x8xi1>, vector<8x8xf32>
    %cst_405 = arith.constant dense<0xFF800000> : vector<8xf32>
    %960 = vector.multi_reduction <maximumf>, %959, %cst_405 [1] : vector<8x8xf32> to vector<8xf32>
    %961 = vector.shape_cast %960 : vector<8xf32> to vector<8x1xf32>
    %962 = vector.broadcast %961 : vector<8x1xf32> to vector<8x8xf32>
    %963 = arith.subf %959, %962 : vector<8x8xf32>
    %964 = math.exp %963 : vector<8x8xf32>
    %cst_406 = arith.constant dense<0.000000e+00> : vector<8xf32>
    %965 = vector.multi_reduction <add>, %964, %cst_406 [1] : vector<8x8xf32> to vector<8xf32>
    %966 = vector.shape_cast %965 : vector<8xf32> to vector<8x1xf32>
    %967 = tpu.reciprocal %966 : vector<8x1xf32> -> vector<8x1xf32>
    %968 = vector.broadcast %967 : vector<8x1xf32> to vector<8x8xf32>
    %969 = arith.mulf %964, %968 : vector<8x8xf32>
    %cst_407 = arith.constant dense<0.000000e+00> : vector<8x8xf32>
    %970 = tpu.matmul %969, %956, %cst_407 {dimension_numbers = #tpu.dot_dimension_numbers<[1], [0], [0], [1], [0, 0, 1, 1], [], []>} : vector<8x8xf32>, vector<8x8xf32>, vector<8x8xf32> -> vector<8x8xf32>
    %971 = vector.extract_strided_slice %949 {offsets = [0, 8], sizes = [8, 8], strides = [1, 1]} : vector<8x32xf32> to vector<8x8xf32>
    %cst_408 = arith.constant 0.353553385 : f32
    %972 = vector.broadcast %cst_408 : f32 to vector<8x8xf32>
    %973 = arith.mulf %971, %972 : vector<8x8xf32>
    %974 = vector.extract_strided_slice %950 {offsets = [0, 8], sizes = [8, 8], strides = [1, 1]} : vector<8x32xf32> to vector<8x8xf32>
    %975 = vector.extract_strided_slice %951 {offsets = [0, 8], sizes = [8, 8], strides = [1, 1]} : vector<8x32xf32> to vector<8x8xf32>
    %cst_409 = arith.constant dense<0.000000e+00> : vector<8x8xf32>
    %976 = tpu.matmul %973, %974, %cst_409 {dimension_numbers = #tpu.dot_dimension_numbers<[1], [1], [0], [0], [0, 0, 1, 0], [], []>} : vector<8x8xf32>, vector<8x8xf32>, vector<8x8xf32> -> vector<8x8xf32>
    %cst_410 = arith.constant -1.000000e+09 : f32
    %977 = vector.broadcast %cst_410 : f32 to vector<8x8xf32>
    %978 = arith.select %18, %976, %977 : vector<8x8xi1>, vector<8x8xf32>
    %cst_411 = arith.constant dense<0xFF800000> : vector<8xf32>
    %979 = vector.multi_reduction <maximumf>, %978, %cst_411 [1] : vector<8x8xf32> to vector<8xf32>
    %980 = vector.shape_cast %979 : vector<8xf32> to vector<8x1xf32>
    %981 = vector.broadcast %980 : vector<8x1xf32> to vector<8x8xf32>
    %982 = arith.subf %978, %981 : vector<8x8xf32>
    %983 = math.exp %982 : vector<8x8xf32>
    %cst_412 = arith.constant dense<0.000000e+00> : vector<8xf32>
    %984 = vector.multi_reduction <add>, %983, %cst_412 [1] : vector<8x8xf32> to vector<8xf32>
    %985 = vector.shape_cast %984 : vector<8xf32> to vector<8x1xf32>
    %986 = tpu.reciprocal %985 : vector<8x1xf32> -> vector<8x1xf32>
    %987 = vector.broadcast %986 : vector<8x1xf32> to vector<8x8xf32>
    %988 = arith.mulf %983, %987 : vector<8x8xf32>
    %cst_413 = arith.constant dense<0.000000e+00> : vector<8x8xf32>
    %989 = tpu.matmul %988, %975, %cst_413 {dimension_numbers = #tpu.dot_dimension_numbers<[1], [0], [0], [1], [0, 0, 1, 1], [], []>} : vector<8x8xf32>, vector<8x8xf32>, vector<8x8xf32> -> vector<8x8xf32>
    %990 = vector.extract_strided_slice %949 {offsets = [0, 16], sizes = [8, 8], strides = [1, 1]} : vector<8x32xf32> to vector<8x8xf32>
    %cst_414 = arith.constant 0.353553385 : f32
    %991 = vector.broadcast %cst_414 : f32 to vector<8x8xf32>
    %992 = arith.mulf %990, %991 : vector<8x8xf32>
    %993 = vector.extract_strided_slice %950 {offsets = [0, 16], sizes = [8, 8], strides = [1, 1]} : vector<8x32xf32> to vector<8x8xf32>
    %994 = vector.extract_strided_slice %951 {offsets = [0, 16], sizes = [8, 8], strides = [1, 1]} : vector<8x32xf32> to vector<8x8xf32>
    %cst_415 = arith.constant dense<0.000000e+00> : vector<8x8xf32>
    %995 = tpu.matmul %992, %993, %cst_415 {dimension_numbers = #tpu.dot_dimension_numbers<[1], [1], [0], [0], [0, 0, 1, 0], [], []>} : vector<8x8xf32>, vector<8x8xf32>, vector<8x8xf32> -> vector<8x8xf32>
    %cst_416 = arith.constant -1.000000e+09 : f32
    %996 = vector.broadcast %cst_416 : f32 to vector<8x8xf32>
    %997 = arith.select %18, %995, %996 : vector<8x8xi1>, vector<8x8xf32>
    %cst_417 = arith.constant dense<0xFF800000> : vector<8xf32>
    %998 = vector.multi_reduction <maximumf>, %997, %cst_417 [1] : vector<8x8xf32> to vector<8xf32>
    %999 = vector.shape_cast %998 : vector<8xf32> to vector<8x1xf32>
    %1000 = vector.broadcast %999 : vector<8x1xf32> to vector<8x8xf32>
    %1001 = arith.subf %997, %1000 : vector<8x8xf32>
    %1002 = math.exp %1001 : vector<8x8xf32>
    %cst_418 = arith.constant dense<0.000000e+00> : vector<8xf32>
    %1003 = vector.multi_reduction <add>, %1002, %cst_418 [1] : vector<8x8xf32> to vector<8xf32>
    %1004 = vector.shape_cast %1003 : vector<8xf32> to vector<8x1xf32>
    %1005 = tpu.reciprocal %1004 : vector<8x1xf32> -> vector<8x1xf32>
    %1006 = vector.broadcast %1005 : vector<8x1xf32> to vector<8x8xf32>
    %1007 = arith.mulf %1002, %1006 : vector<8x8xf32>
    %cst_419 = arith.constant dense<0.000000e+00> : vector<8x8xf32>
    %1008 = tpu.matmul %1007, %994, %cst_419 {dimension_numbers = #tpu.dot_dimension_numbers<[1], [0], [0], [1], [0, 0, 1, 1], [], []>} : vector<8x8xf32>, vector<8x8xf32>, vector<8x8xf32> -> vector<8x8xf32>
    %1009 = vector.extract_strided_slice %949 {offsets = [0, 24], sizes = [8, 8], strides = [1, 1]} : vector<8x32xf32> to vector<8x8xf32>
    %cst_420 = arith.constant 0.353553385 : f32
    %1010 = vector.broadcast %cst_420 : f32 to vector<8x8xf32>
    %1011 = arith.mulf %1009, %1010 : vector<8x8xf32>
    %1012 = vector.extract_strided_slice %950 {offsets = [0, 24], sizes = [8, 8], strides = [1, 1]} : vector<8x32xf32> to vector<8x8xf32>
    %1013 = vector.extract_strided_slice %951 {offsets = [0, 24], sizes = [8, 8], strides = [1, 1]} : vector<8x32xf32> to vector<8x8xf32>
    %cst_421 = arith.constant dense<0.000000e+00> : vector<8x8xf32>
    %1014 = tpu.matmul %1011, %1012, %cst_421 {dimension_numbers = #tpu.dot_dimension_numbers<[1], [1], [0], [0], [0, 0, 1, 0], [], []>} : vector<8x8xf32>, vector<8x8xf32>, vector<8x8xf32> -> vector<8x8xf32>
    %cst_422 = arith.constant -1.000000e+09 : f32
    %1015 = vector.broadcast %cst_422 : f32 to vector<8x8xf32>
    %1016 = arith.select %18, %1014, %1015 : vector<8x8xi1>, vector<8x8xf32>
    %cst_423 = arith.constant dense<0xFF800000> : vector<8xf32>
    %1017 = vector.multi_reduction <maximumf>, %1016, %cst_423 [1] : vector<8x8xf32> to vector<8xf32>
    %1018 = vector.shape_cast %1017 : vector<8xf32> to vector<8x1xf32>
    %1019 = vector.broadcast %1018 : vector<8x1xf32> to vector<8x8xf32>
    %1020 = arith.subf %1016, %1019 : vector<8x8xf32>
    %1021 = math.exp %1020 : vector<8x8xf32>
    %cst_424 = arith.constant dense<0.000000e+00> : vector<8xf32>
    %1022 = vector.multi_reduction <add>, %1021, %cst_424 [1] : vector<8x8xf32> to vector<8xf32>
    %1023 = vector.shape_cast %1022 : vector<8xf32> to vector<8x1xf32>
    %1024 = tpu.reciprocal %1023 : vector<8x1xf32> -> vector<8x1xf32>
    %1025 = vector.broadcast %1024 : vector<8x1xf32> to vector<8x8xf32>
    %1026 = arith.mulf %1021, %1025 : vector<8x8xf32>
    %cst_425 = arith.constant dense<0.000000e+00> : vector<8x8xf32>
    %1027 = tpu.matmul %1026, %1013, %cst_425 {dimension_numbers = #tpu.dot_dimension_numbers<[1], [0], [0], [1], [0, 0, 1, 1], [], []>} : vector<8x8xf32>, vector<8x8xf32>, vector<8x8xf32> -> vector<8x8xf32>
    %1028 = tpu.concatenate %970, %989, %1008, %1027 in 1 : vector<8x8xf32>, vector<8x8xf32>, vector<8x8xf32>, vector<8x8xf32> -> vector<8x32xf32>
    %1029 = vector.extract_strided_slice %942 {offsets = [8, 0], sizes = [8, 32], strides = [1, 1]} : vector<16x32xf32> to vector<8x32xf32>
    %1030 = vector.extract_strided_slice %945 {offsets = [8, 0], sizes = [8, 32], strides = [1, 1]} : vector<16x32xf32> to vector<8x32xf32>
    %1031 = vector.extract_strided_slice %948 {offsets = [8, 0], sizes = [8, 32], strides = [1, 1]} : vector<16x32xf32> to vector<8x32xf32>
    %1032 = vector.extract_strided_slice %1029 {offsets = [0, 0], sizes = [8, 8], strides = [1, 1]} : vector<8x32xf32> to vector<8x8xf32>
    %cst_426 = arith.constant 0.353553385 : f32
    %1033 = vector.broadcast %cst_426 : f32 to vector<8x8xf32>
    %1034 = arith.mulf %1032, %1033 : vector<8x8xf32>
    %1035 = vector.extract_strided_slice %1030 {offsets = [0, 0], sizes = [8, 8], strides = [1, 1]} : vector<8x32xf32> to vector<8x8xf32>
    %1036 = vector.extract_strided_slice %1031 {offsets = [0, 0], sizes = [8, 8], strides = [1, 1]} : vector<8x32xf32> to vector<8x8xf32>
    %cst_427 = arith.constant dense<0.000000e+00> : vector<8x8xf32>
    %1037 = tpu.matmul %1034, %1035, %cst_427 {dimension_numbers = #tpu.dot_dimension_numbers<[1], [1], [0], [0], [0, 0, 1, 0], [], []>} : vector<8x8xf32>, vector<8x8xf32>, vector<8x8xf32> -> vector<8x8xf32>
    %cst_428 = arith.constant -1.000000e+09 : f32
    %1038 = vector.broadcast %cst_428 : f32 to vector<8x8xf32>
    %1039 = arith.select %18, %1037, %1038 : vector<8x8xi1>, vector<8x8xf32>
    %cst_429 = arith.constant dense<0xFF800000> : vector<8xf32>
    %1040 = vector.multi_reduction <maximumf>, %1039, %cst_429 [1] : vector<8x8xf32> to vector<8xf32>
    %1041 = vector.shape_cast %1040 : vector<8xf32> to vector<8x1xf32>
    %1042 = vector.broadcast %1041 : vector<8x1xf32> to vector<8x8xf32>
    %1043 = arith.subf %1039, %1042 : vector<8x8xf32>
    %1044 = math.exp %1043 : vector<8x8xf32>
    %cst_430 = arith.constant dense<0.000000e+00> : vector<8xf32>
    %1045 = vector.multi_reduction <add>, %1044, %cst_430 [1] : vector<8x8xf32> to vector<8xf32>
    %1046 = vector.shape_cast %1045 : vector<8xf32> to vector<8x1xf32>
    %1047 = tpu.reciprocal %1046 : vector<8x1xf32> -> vector<8x1xf32>
    %1048 = vector.broadcast %1047 : vector<8x1xf32> to vector<8x8xf32>
    %1049 = arith.mulf %1044, %1048 : vector<8x8xf32>
    %cst_431 = arith.constant dense<0.000000e+00> : vector<8x8xf32>
    %1050 = tpu.matmul %1049, %1036, %cst_431 {dimension_numbers = #tpu.dot_dimension_numbers<[1], [0], [0], [1], [0, 0, 1, 1], [], []>} : vector<8x8xf32>, vector<8x8xf32>, vector<8x8xf32> -> vector<8x8xf32>
    %1051 = vector.extract_strided_slice %1029 {offsets = [0, 8], sizes = [8, 8], strides = [1, 1]} : vector<8x32xf32> to vector<8x8xf32>
    %cst_432 = arith.constant 0.353553385 : f32
    %1052 = vector.broadcast %cst_432 : f32 to vector<8x8xf32>
    %1053 = arith.mulf %1051, %1052 : vector<8x8xf32>
    %1054 = vector.extract_strided_slice %1030 {offsets = [0, 8], sizes = [8, 8], strides = [1, 1]} : vector<8x32xf32> to vector<8x8xf32>
    %1055 = vector.extract_strided_slice %1031 {offsets = [0, 8], sizes = [8, 8], strides = [1, 1]} : vector<8x32xf32> to vector<8x8xf32>
    %cst_433 = arith.constant dense<0.000000e+00> : vector<8x8xf32>
    %1056 = tpu.matmul %1053, %1054, %cst_433 {dimension_numbers = #tpu.dot_dimension_numbers<[1], [1], [0], [0], [0, 0, 1, 0], [], []>} : vector<8x8xf32>, vector<8x8xf32>, vector<8x8xf32> -> vector<8x8xf32>
    %cst_434 = arith.constant -1.000000e+09 : f32
    %1057 = vector.broadcast %cst_434 : f32 to vector<8x8xf32>
    %1058 = arith.select %18, %1056, %1057 : vector<8x8xi1>, vector<8x8xf32>
    %cst_435 = arith.constant dense<0xFF800000> : vector<8xf32>
    %1059 = vector.multi_reduction <maximumf>, %1058, %cst_435 [1] : vector<8x8xf32> to vector<8xf32>
    %1060 = vector.shape_cast %1059 : vector<8xf32> to vector<8x1xf32>
    %1061 = vector.broadcast %1060 : vector<8x1xf32> to vector<8x8xf32>
    %1062 = arith.subf %1058, %1061 : vector<8x8xf32>
    %1063 = math.exp %1062 : vector<8x8xf32>
    %cst_436 = arith.constant dense<0.000000e+00> : vector<8xf32>
    %1064 = vector.multi_reduction <add>, %1063, %cst_436 [1] : vector<8x8xf32> to vector<8xf32>
    %1065 = vector.shape_cast %1064 : vector<8xf32> to vector<8x1xf32>
    %1066 = tpu.reciprocal %1065 : vector<8x1xf32> -> vector<8x1xf32>
    %1067 = vector.broadcast %1066 : vector<8x1xf32> to vector<8x8xf32>
    %1068 = arith.mulf %1063, %1067 : vector<8x8xf32>
    %cst_437 = arith.constant dense<0.000000e+00> : vector<8x8xf32>
    %1069 = tpu.matmul %1068, %1055, %cst_437 {dimension_numbers = #tpu.dot_dimension_numbers<[1], [0], [0], [1], [0, 0, 1, 1], [], []>} : vector<8x8xf32>, vector<8x8xf32>, vector<8x8xf32> -> vector<8x8xf32>
    %1070 = vector.extract_strided_slice %1029 {offsets = [0, 16], sizes = [8, 8], strides = [1, 1]} : vector<8x32xf32> to vector<8x8xf32>
    %cst_438 = arith.constant 0.353553385 : f32
    %1071 = vector.broadcast %cst_438 : f32 to vector<8x8xf32>
    %1072 = arith.mulf %1070, %1071 : vector<8x8xf32>
    %1073 = vector.extract_strided_slice %1030 {offsets = [0, 16], sizes = [8, 8], strides = [1, 1]} : vector<8x32xf32> to vector<8x8xf32>
    %1074 = vector.extract_strided_slice %1031 {offsets = [0, 16], sizes = [8, 8], strides = [1, 1]} : vector<8x32xf32> to vector<8x8xf32>
    %cst_439 = arith.constant dense<0.000000e+00> : vector<8x8xf32>
    %1075 = tpu.matmul %1072, %1073, %cst_439 {dimension_numbers = #tpu.dot_dimension_numbers<[1], [1], [0], [0], [0, 0, 1, 0], [], []>} : vector<8x8xf32>, vector<8x8xf32>, vector<8x8xf32> -> vector<8x8xf32>
    %cst_440 = arith.constant -1.000000e+09 : f32
    %1076 = vector.broadcast %cst_440 : f32 to vector<8x8xf32>
    %1077 = arith.select %18, %1075, %1076 : vector<8x8xi1>, vector<8x8xf32>
    %cst_441 = arith.constant dense<0xFF800000> : vector<8xf32>
    %1078 = vector.multi_reduction <maximumf>, %1077, %cst_441 [1] : vector<8x8xf32> to vector<8xf32>
    %1079 = vector.shape_cast %1078 : vector<8xf32> to vector<8x1xf32>
    %1080 = vector.broadcast %1079 : vector<8x1xf32> to vector<8x8xf32>
    %1081 = arith.subf %1077, %1080 : vector<8x8xf32>
    %1082 = math.exp %1081 : vector<8x8xf32>
    %cst_442 = arith.constant dense<0.000000e+00> : vector<8xf32>
    %1083 = vector.multi_reduction <add>, %1082, %cst_442 [1] : vector<8x8xf32> to vector<8xf32>
    %1084 = vector.shape_cast %1083 : vector<8xf32> to vector<8x1xf32>
    %1085 = tpu.reciprocal %1084 : vector<8x1xf32> -> vector<8x1xf32>
    %1086 = vector.broadcast %1085 : vector<8x1xf32> to vector<8x8xf32>
    %1087 = arith.mulf %1082, %1086 : vector<8x8xf32>
    %cst_443 = arith.constant dense<0.000000e+00> : vector<8x8xf32>
    %1088 = tpu.matmul %1087, %1074, %cst_443 {dimension_numbers = #tpu.dot_dimension_numbers<[1], [0], [0], [1], [0, 0, 1, 1], [], []>} : vector<8x8xf32>, vector<8x8xf32>, vector<8x8xf32> -> vector<8x8xf32>
    %1089 = vector.extract_strided_slice %1029 {offsets = [0, 24], sizes = [8, 8], strides = [1, 1]} : vector<8x32xf32> to vector<8x8xf32>
    %cst_444 = arith.constant 0.353553385 : f32
    %1090 = vector.broadcast %cst_444 : f32 to vector<8x8xf32>
    %1091 = arith.mulf %1089, %1090 : vector<8x8xf32>
    %1092 = vector.extract_strided_slice %1030 {offsets = [0, 24], sizes = [8, 8], strides = [1, 1]} : vector<8x32xf32> to vector<8x8xf32>
    %1093 = vector.extract_strided_slice %1031 {offsets = [0, 24], sizes = [8, 8], strides = [1, 1]} : vector<8x32xf32> to vector<8x8xf32>
    %cst_445 = arith.constant dense<0.000000e+00> : vector<8x8xf32>
    %1094 = tpu.matmul %1091, %1092, %cst_445 {dimension_numbers = #tpu.dot_dimension_numbers<[1], [1], [0], [0], [0, 0, 1, 0], [], []>} : vector<8x8xf32>, vector<8x8xf32>, vector<8x8xf32> -> vector<8x8xf32>
    %cst_446 = arith.constant -1.000000e+09 : f32
    %1095 = vector.broadcast %cst_446 : f32 to vector<8x8xf32>
    %1096 = arith.select %18, %1094, %1095 : vector<8x8xi1>, vector<8x8xf32>
    %cst_447 = arith.constant dense<0xFF800000> : vector<8xf32>
    %1097 = vector.multi_reduction <maximumf>, %1096, %cst_447 [1] : vector<8x8xf32> to vector<8xf32>
    %1098 = vector.shape_cast %1097 : vector<8xf32> to vector<8x1xf32>
    %1099 = vector.broadcast %1098 : vector<8x1xf32> to vector<8x8xf32>
    %1100 = arith.subf %1096, %1099 : vector<8x8xf32>
    %1101 = math.exp %1100 : vector<8x8xf32>
    %cst_448 = arith.constant dense<0.000000e+00> : vector<8xf32>
    %1102 = vector.multi_reduction <add>, %1101, %cst_448 [1] : vector<8x8xf32> to vector<8xf32>
    %1103 = vector.shape_cast %1102 : vector<8xf32> to vector<8x1xf32>
    %1104 = tpu.reciprocal %1103 : vector<8x1xf32> -> vector<8x1xf32>
    %1105 = vector.broadcast %1104 : vector<8x1xf32> to vector<8x8xf32>
    %1106 = arith.mulf %1101, %1105 : vector<8x8xf32>
    %cst_449 = arith.constant dense<0.000000e+00> : vector<8x8xf32>
    %1107 = tpu.matmul %1106, %1093, %cst_449 {dimension_numbers = #tpu.dot_dimension_numbers<[1], [0], [0], [1], [0, 0, 1, 1], [], []>} : vector<8x8xf32>, vector<8x8xf32>, vector<8x8xf32> -> vector<8x8xf32>
    %1108 = tpu.concatenate %1050, %1069, %1088, %1107 in 1 : vector<8x8xf32>, vector<8x8xf32>, vector<8x8xf32>, vector<8x8xf32> -> vector<8x32xf32>
    %1109 = tpu.concatenate %1028, %1108 in 0 : vector<8x32xf32>, vector<8x32xf32> -> vector<16x32xf32>
    %cst_450 = arith.constant dense<0.000000e+00> : vector<16x32xf32>
    %1110 = tpu.matmul %1109, %938, %cst_450 {dimension_numbers = #tpu.dot_dimension_numbers<[1], [0], [0], [1], [0, 0, 1, 1], [], []>} : vector<16x32xf32>, vector<32x32xf32>, vector<16x32xf32> -> vector<16x32xf32>
    %1111 = vector.broadcast %939 : vector<1x32xf32> to vector<16x32xf32>
    %1112 = arith.addf %1110, %1111 : vector<16x32xf32>
    %c1_451 = arith.constant 1 : index
    %c0_452 = arith.constant 0 : index
    %1113 = vector.load %arg42[%c1_451, %c0_452] : memref<2x32xf32, #tpu.memory_space<vmem>>, vector<1x32xf32>
    %c1_453 = arith.constant 1 : index
    %c0_454 = arith.constant 0 : index
    %1114 = vector.load %arg43[%c1_453, %c0_454] : memref<2x32xf32, #tpu.memory_space<vmem>>, vector<1x32xf32>
    %cst_455 = arith.constant dense<0.000000e+00> : vector<16xf32>
    %1115 = vector.multi_reduction <add>, %1112, %cst_455 [1] : vector<16x32xf32> to vector<16xf32>
    %1116 = vector.shape_cast %1115 : vector<16xf32> to vector<16x1xf32>
    %cst_456 = arith.constant 3.200000e+01 : f32
    %1117 = vector.broadcast %cst_456 : f32 to vector<16x1xf32>
    %1118 = arith.divf %1116, %1117 : vector<16x1xf32>
    %1119 = vector.broadcast %1118 : vector<16x1xf32> to vector<16x32xf32>
    %1120 = arith.subf %1112, %1119 : vector<16x32xf32>
    %1121 = arith.mulf %1120, %1120 : vector<16x32xf32>
    %cst_457 = arith.constant dense<0.000000e+00> : vector<16xf32>
    %1122 = vector.multi_reduction <add>, %1121, %cst_457 [1] : vector<16x32xf32> to vector<16xf32>
    %1123 = vector.shape_cast %1122 : vector<16xf32> to vector<16x1xf32>
    %cst_458 = arith.constant 3.200000e+01 : f32
    %1124 = vector.broadcast %cst_458 : f32 to vector<16x1xf32>
    %1125 = arith.divf %1123, %1124 : vector<16x1xf32>
    %1126 = vector.broadcast %1118 : vector<16x1xf32> to vector<16x32xf32>
    %1127 = arith.subf %1112, %1126 : vector<16x32xf32>
    %cst_459 = arith.constant 9.99999974E-6 : f32
    %1128 = vector.broadcast %cst_459 : f32 to vector<16x1xf32>
    %1129 = arith.addf %1125, %1128 : vector<16x1xf32>
    %1130 = math.rsqrt %1129 : vector<16x1xf32>
    %1131 = vector.broadcast %1130 : vector<16x1xf32> to vector<16x32xf32>
    %1132 = arith.mulf %1127, %1131 : vector<16x32xf32>
    %1133 = vector.broadcast %1113 : vector<1x32xf32> to vector<16x32xf32>
    %1134 = arith.mulf %1132, %1133 : vector<16x32xf32>
    %1135 = vector.broadcast %1114 : vector<1x32xf32> to vector<16x32xf32>
    %1136 = arith.addf %1134, %1135 : vector<16x32xf32>
    %1137 = arith.addf %927, %1136 : vector<16x32xf32>
    %c1_460 = arith.constant 1 : index
    %c0_461 = arith.constant 0 : index
    %c0_462 = arith.constant 0 : index
    %1138 = vector.load %arg34[%c1_460, %c0_461, %c0_462] : memref<2x32x32xf32, #tpu.memory_space<vmem>>, vector<1x32x32xf32>
    %1139 = vector.shape_cast %1138 : vector<1x32x32xf32> to vector<32x32xf32>
    %c1_463 = arith.constant 1 : index
    %c0_464 = arith.constant 0 : index
    %1140 = vector.load %arg35[%c1_463, %c0_464] : memref<2x32xf32, #tpu.memory_space<vmem>>, vector<1x32xf32>
    %c1_465 = arith.constant 1 : index
    %c0_466 = arith.constant 0 : index
    %c0_467 = arith.constant 0 : index
    %1141 = vector.load %arg36[%c1_465, %c0_466, %c0_467] : memref<2x32x32xf32, #tpu.memory_space<vmem>>, vector<1x32x32xf32>
    %1142 = vector.shape_cast %1141 : vector<1x32x32xf32> to vector<32x32xf32>
    %c1_468 = arith.constant 1 : index
    %c0_469 = arith.constant 0 : index
    %1143 = vector.load %arg37[%c1_468, %c0_469] : memref<2x32xf32, #tpu.memory_space<vmem>>, vector<1x32xf32>
    %c1_470 = arith.constant 1 : index
    %c0_471 = arith.constant 0 : index
    %c0_472 = arith.constant 0 : index
    %1144 = vector.load %arg38[%c1_470, %c0_471, %c0_472] : memref<2x32x32xf32, #tpu.memory_space<vmem>>, vector<1x32x32xf32>
    %1145 = vector.shape_cast %1144 : vector<1x32x32xf32> to vector<32x32xf32>
    %c1_473 = arith.constant 1 : index
    %c0_474 = arith.constant 0 : index
    %1146 = vector.load %arg39[%c1_473, %c0_474] : memref<2x32xf32, #tpu.memory_space<vmem>>, vector<1x32xf32>
    %c1_475 = arith.constant 1 : index
    %c0_476 = arith.constant 0 : index
    %c0_477 = arith.constant 0 : index
    %1147 = vector.load %arg40[%c1_475, %c0_476, %c0_477] : memref<2x32x32xf32, #tpu.memory_space<vmem>>, vector<1x32x32xf32>
    %1148 = vector.shape_cast %1147 : vector<1x32x32xf32> to vector<32x32xf32>
    %c1_478 = arith.constant 1 : index
    %c0_479 = arith.constant 0 : index
    %1149 = vector.load %arg41[%c1_478, %c0_479] : memref<2x32xf32, #tpu.memory_space<vmem>>, vector<1x32xf32>
    %cst_480 = arith.constant dense<0.000000e+00> : vector<16x32xf32>
    %1150 = tpu.matmul %1137, %1139, %cst_480 {dimension_numbers = #tpu.dot_dimension_numbers<[1], [0], [0], [1], [0, 0, 1, 1], [], []>} : vector<16x32xf32>, vector<32x32xf32>, vector<16x32xf32> -> vector<16x32xf32>
    %1151 = vector.broadcast %1140 : vector<1x32xf32> to vector<16x32xf32>
    %1152 = arith.addf %1150, %1151 : vector<16x32xf32>
    %cst_481 = arith.constant dense<0.000000e+00> : vector<16x32xf32>
    %1153 = tpu.matmul %484, %1142, %cst_481 {dimension_numbers = #tpu.dot_dimension_numbers<[1], [0], [0], [1], [0, 0, 1, 1], [], []>} : vector<16x32xf32>, vector<32x32xf32>, vector<16x32xf32> -> vector<16x32xf32>
    %1154 = vector.broadcast %1143 : vector<1x32xf32> to vector<16x32xf32>
    %1155 = arith.addf %1153, %1154 : vector<16x32xf32>
    %cst_482 = arith.constant dense<0.000000e+00> : vector<16x32xf32>
    %1156 = tpu.matmul %484, %1145, %cst_482 {dimension_numbers = #tpu.dot_dimension_numbers<[1], [0], [0], [1], [0, 0, 1, 1], [], []>} : vector<16x32xf32>, vector<32x32xf32>, vector<16x32xf32> -> vector<16x32xf32>
    %1157 = vector.broadcast %1146 : vector<1x32xf32> to vector<16x32xf32>
    %1158 = arith.addf %1156, %1157 : vector<16x32xf32>
    %1159 = vector.extract_strided_slice %1152 {offsets = [0, 0], sizes = [8, 32], strides = [1, 1]} : vector<16x32xf32> to vector<8x32xf32>
    %1160 = vector.extract_strided_slice %1155 {offsets = [0, 0], sizes = [8, 32], strides = [1, 1]} : vector<16x32xf32> to vector<8x32xf32>
    %1161 = vector.extract_strided_slice %1158 {offsets = [0, 0], sizes = [8, 32], strides = [1, 1]} : vector<16x32xf32> to vector<8x32xf32>
    %1162 = vector.extract_strided_slice %1159 {offsets = [0, 0], sizes = [8, 8], strides = [1, 1]} : vector<8x32xf32> to vector<8x8xf32>
    %cst_483 = arith.constant 0.353553385 : f32
    %1163 = vector.broadcast %cst_483 : f32 to vector<8x8xf32>
    %1164 = arith.mulf %1162, %1163 : vector<8x8xf32>
    %1165 = vector.extract_strided_slice %1160 {offsets = [0, 0], sizes = [8, 8], strides = [1, 1]} : vector<8x32xf32> to vector<8x8xf32>
    %1166 = vector.extract_strided_slice %1161 {offsets = [0, 0], sizes = [8, 8], strides = [1, 1]} : vector<8x32xf32> to vector<8x8xf32>
    %cst_484 = arith.constant dense<0.000000e+00> : vector<8x8xf32>
    %1167 = tpu.matmul %1164, %1165, %cst_484 {dimension_numbers = #tpu.dot_dimension_numbers<[1], [1], [0], [0], [0, 0, 1, 0], [], []>} : vector<8x8xf32>, vector<8x8xf32>, vector<8x8xf32> -> vector<8x8xf32>
    %cst_485 = arith.constant dense<0xFF800000> : vector<8xf32>
    %1168 = vector.multi_reduction <maximumf>, %1167, %cst_485 [1] : vector<8x8xf32> to vector<8xf32>
    %1169 = vector.shape_cast %1168 : vector<8xf32> to vector<8x1xf32>
    %1170 = vector.broadcast %1169 : vector<8x1xf32> to vector<8x8xf32>
    %1171 = arith.subf %1167, %1170 : vector<8x8xf32>
    %1172 = math.exp %1171 : vector<8x8xf32>
    %cst_486 = arith.constant dense<0.000000e+00> : vector<8xf32>
    %1173 = vector.multi_reduction <add>, %1172, %cst_486 [1] : vector<8x8xf32> to vector<8xf32>
    %1174 = vector.shape_cast %1173 : vector<8xf32> to vector<8x1xf32>
    %1175 = tpu.reciprocal %1174 : vector<8x1xf32> -> vector<8x1xf32>
    %1176 = vector.broadcast %1175 : vector<8x1xf32> to vector<8x8xf32>
    %1177 = arith.mulf %1172, %1176 : vector<8x8xf32>
    %cst_487 = arith.constant dense<0.000000e+00> : vector<8x8xf32>
    %1178 = tpu.matmul %1177, %1166, %cst_487 {dimension_numbers = #tpu.dot_dimension_numbers<[1], [0], [0], [1], [0, 0, 1, 1], [], []>} : vector<8x8xf32>, vector<8x8xf32>, vector<8x8xf32> -> vector<8x8xf32>
    %1179 = vector.extract_strided_slice %1159 {offsets = [0, 8], sizes = [8, 8], strides = [1, 1]} : vector<8x32xf32> to vector<8x8xf32>
    %cst_488 = arith.constant 0.353553385 : f32
    %1180 = vector.broadcast %cst_488 : f32 to vector<8x8xf32>
    %1181 = arith.mulf %1179, %1180 : vector<8x8xf32>
    %1182 = vector.extract_strided_slice %1160 {offsets = [0, 8], sizes = [8, 8], strides = [1, 1]} : vector<8x32xf32> to vector<8x8xf32>
    %1183 = vector.extract_strided_slice %1161 {offsets = [0, 8], sizes = [8, 8], strides = [1, 1]} : vector<8x32xf32> to vector<8x8xf32>
    %cst_489 = arith.constant dense<0.000000e+00> : vector<8x8xf32>
    %1184 = tpu.matmul %1181, %1182, %cst_489 {dimension_numbers = #tpu.dot_dimension_numbers<[1], [1], [0], [0], [0, 0, 1, 0], [], []>} : vector<8x8xf32>, vector<8x8xf32>, vector<8x8xf32> -> vector<8x8xf32>
    %cst_490 = arith.constant dense<0xFF800000> : vector<8xf32>
    %1185 = vector.multi_reduction <maximumf>, %1184, %cst_490 [1] : vector<8x8xf32> to vector<8xf32>
    %1186 = vector.shape_cast %1185 : vector<8xf32> to vector<8x1xf32>
    %1187 = vector.broadcast %1186 : vector<8x1xf32> to vector<8x8xf32>
    %1188 = arith.subf %1184, %1187 : vector<8x8xf32>
    %1189 = math.exp %1188 : vector<8x8xf32>
    %cst_491 = arith.constant dense<0.000000e+00> : vector<8xf32>
    %1190 = vector.multi_reduction <add>, %1189, %cst_491 [1] : vector<8x8xf32> to vector<8xf32>
    %1191 = vector.shape_cast %1190 : vector<8xf32> to vector<8x1xf32>
    %1192 = tpu.reciprocal %1191 : vector<8x1xf32> -> vector<8x1xf32>
    %1193 = vector.broadcast %1192 : vector<8x1xf32> to vector<8x8xf32>
    %1194 = arith.mulf %1189, %1193 : vector<8x8xf32>
    %cst_492 = arith.constant dense<0.000000e+00> : vector<8x8xf32>
    %1195 = tpu.matmul %1194, %1183, %cst_492 {dimension_numbers = #tpu.dot_dimension_numbers<[1], [0], [0], [1], [0, 0, 1, 1], [], []>} : vector<8x8xf32>, vector<8x8xf32>, vector<8x8xf32> -> vector<8x8xf32>
    %1196 = vector.extract_strided_slice %1159 {offsets = [0, 16], sizes = [8, 8], strides = [1, 1]} : vector<8x32xf32> to vector<8x8xf32>
    %cst_493 = arith.constant 0.353553385 : f32
    %1197 = vector.broadcast %cst_493 : f32 to vector<8x8xf32>
    %1198 = arith.mulf %1196, %1197 : vector<8x8xf32>
    %1199 = vector.extract_strided_slice %1160 {offsets = [0, 16], sizes = [8, 8], strides = [1, 1]} : vector<8x32xf32> to vector<8x8xf32>
    %1200 = vector.extract_strided_slice %1161 {offsets = [0, 16], sizes = [8, 8], strides = [1, 1]} : vector<8x32xf32> to vector<8x8xf32>
    %cst_494 = arith.constant dense<0.000000e+00> : vector<8x8xf32>
    %1201 = tpu.matmul %1198, %1199, %cst_494 {dimension_numbers = #tpu.dot_dimension_numbers<[1], [1], [0], [0], [0, 0, 1, 0], [], []>} : vector<8x8xf32>, vector<8x8xf32>, vector<8x8xf32> -> vector<8x8xf32>
    %cst_495 = arith.constant dense<0xFF800000> : vector<8xf32>
    %1202 = vector.multi_reduction <maximumf>, %1201, %cst_495 [1] : vector<8x8xf32> to vector<8xf32>
    %1203 = vector.shape_cast %1202 : vector<8xf32> to vector<8x1xf32>
    %1204 = vector.broadcast %1203 : vector<8x1xf32> to vector<8x8xf32>
    %1205 = arith.subf %1201, %1204 : vector<8x8xf32>
    %1206 = math.exp %1205 : vector<8x8xf32>
    %cst_496 = arith.constant dense<0.000000e+00> : vector<8xf32>
    %1207 = vector.multi_reduction <add>, %1206, %cst_496 [1] : vector<8x8xf32> to vector<8xf32>
    %1208 = vector.shape_cast %1207 : vector<8xf32> to vector<8x1xf32>
    %1209 = tpu.reciprocal %1208 : vector<8x1xf32> -> vector<8x1xf32>
    %1210 = vector.broadcast %1209 : vector<8x1xf32> to vector<8x8xf32>
    %1211 = arith.mulf %1206, %1210 : vector<8x8xf32>
    %cst_497 = arith.constant dense<0.000000e+00> : vector<8x8xf32>
    %1212 = tpu.matmul %1211, %1200, %cst_497 {dimension_numbers = #tpu.dot_dimension_numbers<[1], [0], [0], [1], [0, 0, 1, 1], [], []>} : vector<8x8xf32>, vector<8x8xf32>, vector<8x8xf32> -> vector<8x8xf32>
    %1213 = vector.extract_strided_slice %1159 {offsets = [0, 24], sizes = [8, 8], strides = [1, 1]} : vector<8x32xf32> to vector<8x8xf32>
    %cst_498 = arith.constant 0.353553385 : f32
    %1214 = vector.broadcast %cst_498 : f32 to vector<8x8xf32>
    %1215 = arith.mulf %1213, %1214 : vector<8x8xf32>
    %1216 = vector.extract_strided_slice %1160 {offsets = [0, 24], sizes = [8, 8], strides = [1, 1]} : vector<8x32xf32> to vector<8x8xf32>
    %1217 = vector.extract_strided_slice %1161 {offsets = [0, 24], sizes = [8, 8], strides = [1, 1]} : vector<8x32xf32> to vector<8x8xf32>
    %cst_499 = arith.constant dense<0.000000e+00> : vector<8x8xf32>
    %1218 = tpu.matmul %1215, %1216, %cst_499 {dimension_numbers = #tpu.dot_dimension_numbers<[1], [1], [0], [0], [0, 0, 1, 0], [], []>} : vector<8x8xf32>, vector<8x8xf32>, vector<8x8xf32> -> vector<8x8xf32>
    %cst_500 = arith.constant dense<0xFF800000> : vector<8xf32>
    %1219 = vector.multi_reduction <maximumf>, %1218, %cst_500 [1] : vector<8x8xf32> to vector<8xf32>
    %1220 = vector.shape_cast %1219 : vector<8xf32> to vector<8x1xf32>
    %1221 = vector.broadcast %1220 : vector<8x1xf32> to vector<8x8xf32>
    %1222 = arith.subf %1218, %1221 : vector<8x8xf32>
    %1223 = math.exp %1222 : vector<8x8xf32>
    %cst_501 = arith.constant dense<0.000000e+00> : vector<8xf32>
    %1224 = vector.multi_reduction <add>, %1223, %cst_501 [1] : vector<8x8xf32> to vector<8xf32>
    %1225 = vector.shape_cast %1224 : vector<8xf32> to vector<8x1xf32>
    %1226 = tpu.reciprocal %1225 : vector<8x1xf32> -> vector<8x1xf32>
    %1227 = vector.broadcast %1226 : vector<8x1xf32> to vector<8x8xf32>
    %1228 = arith.mulf %1223, %1227 : vector<8x8xf32>
    %cst_502 = arith.constant dense<0.000000e+00> : vector<8x8xf32>
    %1229 = tpu.matmul %1228, %1217, %cst_502 {dimension_numbers = #tpu.dot_dimension_numbers<[1], [0], [0], [1], [0, 0, 1, 1], [], []>} : vector<8x8xf32>, vector<8x8xf32>, vector<8x8xf32> -> vector<8x8xf32>
    %1230 = tpu.concatenate %1178, %1195, %1212, %1229 in 1 : vector<8x8xf32>, vector<8x8xf32>, vector<8x8xf32>, vector<8x8xf32> -> vector<8x32xf32>
    %1231 = vector.extract_strided_slice %1152 {offsets = [8, 0], sizes = [8, 32], strides = [1, 1]} : vector<16x32xf32> to vector<8x32xf32>
    %1232 = vector.extract_strided_slice %1155 {offsets = [8, 0], sizes = [8, 32], strides = [1, 1]} : vector<16x32xf32> to vector<8x32xf32>
    %1233 = vector.extract_strided_slice %1158 {offsets = [8, 0], sizes = [8, 32], strides = [1, 1]} : vector<16x32xf32> to vector<8x32xf32>
    %1234 = vector.extract_strided_slice %1231 {offsets = [0, 0], sizes = [8, 8], strides = [1, 1]} : vector<8x32xf32> to vector<8x8xf32>
    %cst_503 = arith.constant 0.353553385 : f32
    %1235 = vector.broadcast %cst_503 : f32 to vector<8x8xf32>
    %1236 = arith.mulf %1234, %1235 : vector<8x8xf32>
    %1237 = vector.extract_strided_slice %1232 {offsets = [0, 0], sizes = [8, 8], strides = [1, 1]} : vector<8x32xf32> to vector<8x8xf32>
    %1238 = vector.extract_strided_slice %1233 {offsets = [0, 0], sizes = [8, 8], strides = [1, 1]} : vector<8x32xf32> to vector<8x8xf32>
    %cst_504 = arith.constant dense<0.000000e+00> : vector<8x8xf32>
    %1239 = tpu.matmul %1236, %1237, %cst_504 {dimension_numbers = #tpu.dot_dimension_numbers<[1], [1], [0], [0], [0, 0, 1, 0], [], []>} : vector<8x8xf32>, vector<8x8xf32>, vector<8x8xf32> -> vector<8x8xf32>
    %cst_505 = arith.constant dense<0xFF800000> : vector<8xf32>
    %1240 = vector.multi_reduction <maximumf>, %1239, %cst_505 [1] : vector<8x8xf32> to vector<8xf32>
    %1241 = vector.shape_cast %1240 : vector<8xf32> to vector<8x1xf32>
    %1242 = vector.broadcast %1241 : vector<8x1xf32> to vector<8x8xf32>
    %1243 = arith.subf %1239, %1242 : vector<8x8xf32>
    %1244 = math.exp %1243 : vector<8x8xf32>
    %cst_506 = arith.constant dense<0.000000e+00> : vector<8xf32>
    %1245 = vector.multi_reduction <add>, %1244, %cst_506 [1] : vector<8x8xf32> to vector<8xf32>
    %1246 = vector.shape_cast %1245 : vector<8xf32> to vector<8x1xf32>
    %1247 = tpu.reciprocal %1246 : vector<8x1xf32> -> vector<8x1xf32>
    %1248 = vector.broadcast %1247 : vector<8x1xf32> to vector<8x8xf32>
    %1249 = arith.mulf %1244, %1248 : vector<8x8xf32>
    %cst_507 = arith.constant dense<0.000000e+00> : vector<8x8xf32>
    %1250 = tpu.matmul %1249, %1238, %cst_507 {dimension_numbers = #tpu.dot_dimension_numbers<[1], [0], [0], [1], [0, 0, 1, 1], [], []>} : vector<8x8xf32>, vector<8x8xf32>, vector<8x8xf32> -> vector<8x8xf32>
    %1251 = vector.extract_strided_slice %1231 {offsets = [0, 8], sizes = [8, 8], strides = [1, 1]} : vector<8x32xf32> to vector<8x8xf32>
    %cst_508 = arith.constant 0.353553385 : f32
    %1252 = vector.broadcast %cst_508 : f32 to vector<8x8xf32>
    %1253 = arith.mulf %1251, %1252 : vector<8x8xf32>
    %1254 = vector.extract_strided_slice %1232 {offsets = [0, 8], sizes = [8, 8], strides = [1, 1]} : vector<8x32xf32> to vector<8x8xf32>
    %1255 = vector.extract_strided_slice %1233 {offsets = [0, 8], sizes = [8, 8], strides = [1, 1]} : vector<8x32xf32> to vector<8x8xf32>
    %cst_509 = arith.constant dense<0.000000e+00> : vector<8x8xf32>
    %1256 = tpu.matmul %1253, %1254, %cst_509 {dimension_numbers = #tpu.dot_dimension_numbers<[1], [1], [0], [0], [0, 0, 1, 0], [], []>} : vector<8x8xf32>, vector<8x8xf32>, vector<8x8xf32> -> vector<8x8xf32>
    %cst_510 = arith.constant dense<0xFF800000> : vector<8xf32>
    %1257 = vector.multi_reduction <maximumf>, %1256, %cst_510 [1] : vector<8x8xf32> to vector<8xf32>
    %1258 = vector.shape_cast %1257 : vector<8xf32> to vector<8x1xf32>
    %1259 = vector.broadcast %1258 : vector<8x1xf32> to vector<8x8xf32>
    %1260 = arith.subf %1256, %1259 : vector<8x8xf32>
    %1261 = math.exp %1260 : vector<8x8xf32>
    %cst_511 = arith.constant dense<0.000000e+00> : vector<8xf32>
    %1262 = vector.multi_reduction <add>, %1261, %cst_511 [1] : vector<8x8xf32> to vector<8xf32>
    %1263 = vector.shape_cast %1262 : vector<8xf32> to vector<8x1xf32>
    %1264 = tpu.reciprocal %1263 : vector<8x1xf32> -> vector<8x1xf32>
    %1265 = vector.broadcast %1264 : vector<8x1xf32> to vector<8x8xf32>
    %1266 = arith.mulf %1261, %1265 : vector<8x8xf32>
    %cst_512 = arith.constant dense<0.000000e+00> : vector<8x8xf32>
    %1267 = tpu.matmul %1266, %1255, %cst_512 {dimension_numbers = #tpu.dot_dimension_numbers<[1], [0], [0], [1], [0, 0, 1, 1], [], []>} : vector<8x8xf32>, vector<8x8xf32>, vector<8x8xf32> -> vector<8x8xf32>
    %1268 = vector.extract_strided_slice %1231 {offsets = [0, 16], sizes = [8, 8], strides = [1, 1]} : vector<8x32xf32> to vector<8x8xf32>
    %cst_513 = arith.constant 0.353553385 : f32
    %1269 = vector.broadcast %cst_513 : f32 to vector<8x8xf32>
    %1270 = arith.mulf %1268, %1269 : vector<8x8xf32>
    %1271 = vector.extract_strided_slice %1232 {offsets = [0, 16], sizes = [8, 8], strides = [1, 1]} : vector<8x32xf32> to vector<8x8xf32>
    %1272 = vector.extract_strided_slice %1233 {offsets = [0, 16], sizes = [8, 8], strides = [1, 1]} : vector<8x32xf32> to vector<8x8xf32>
    %cst_514 = arith.constant dense<0.000000e+00> : vector<8x8xf32>
    %1273 = tpu.matmul %1270, %1271, %cst_514 {dimension_numbers = #tpu.dot_dimension_numbers<[1], [1], [0], [0], [0, 0, 1, 0], [], []>} : vector<8x8xf32>, vector<8x8xf32>, vector<8x8xf32> -> vector<8x8xf32>
    %cst_515 = arith.constant dense<0xFF800000> : vector<8xf32>
    %1274 = vector.multi_reduction <maximumf>, %1273, %cst_515 [1] : vector<8x8xf32> to vector<8xf32>
    %1275 = vector.shape_cast %1274 : vector<8xf32> to vector<8x1xf32>
    %1276 = vector.broadcast %1275 : vector<8x1xf32> to vector<8x8xf32>
    %1277 = arith.subf %1273, %1276 : vector<8x8xf32>
    %1278 = math.exp %1277 : vector<8x8xf32>
    %cst_516 = arith.constant dense<0.000000e+00> : vector<8xf32>
    %1279 = vector.multi_reduction <add>, %1278, %cst_516 [1] : vector<8x8xf32> to vector<8xf32>
    %1280 = vector.shape_cast %1279 : vector<8xf32> to vector<8x1xf32>
    %1281 = tpu.reciprocal %1280 : vector<8x1xf32> -> vector<8x1xf32>
    %1282 = vector.broadcast %1281 : vector<8x1xf32> to vector<8x8xf32>
    %1283 = arith.mulf %1278, %1282 : vector<8x8xf32>
    %cst_517 = arith.constant dense<0.000000e+00> : vector<8x8xf32>
    %1284 = tpu.matmul %1283, %1272, %cst_517 {dimension_numbers = #tpu.dot_dimension_numbers<[1], [0], [0], [1], [0, 0, 1, 1], [], []>} : vector<8x8xf32>, vector<8x8xf32>, vector<8x8xf32> -> vector<8x8xf32>
    %1285 = vector.extract_strided_slice %1231 {offsets = [0, 24], sizes = [8, 8], strides = [1, 1]} : vector<8x32xf32> to vector<8x8xf32>
    %cst_518 = arith.constant 0.353553385 : f32
    %1286 = vector.broadcast %cst_518 : f32 to vector<8x8xf32>
    %1287 = arith.mulf %1285, %1286 : vector<8x8xf32>
    %1288 = vector.extract_strided_slice %1232 {offsets = [0, 24], sizes = [8, 8], strides = [1, 1]} : vector<8x32xf32> to vector<8x8xf32>
    %1289 = vector.extract_strided_slice %1233 {offsets = [0, 24], sizes = [8, 8], strides = [1, 1]} : vector<8x32xf32> to vector<8x8xf32>
    %cst_519 = arith.constant dense<0.000000e+00> : vector<8x8xf32>
    %1290 = tpu.matmul %1287, %1288, %cst_519 {dimension_numbers = #tpu.dot_dimension_numbers<[1], [1], [0], [0], [0, 0, 1, 0], [], []>} : vector<8x8xf32>, vector<8x8xf32>, vector<8x8xf32> -> vector<8x8xf32>
    %cst_520 = arith.constant dense<0xFF800000> : vector<8xf32>
    %1291 = vector.multi_reduction <maximumf>, %1290, %cst_520 [1] : vector<8x8xf32> to vector<8xf32>
    %1292 = vector.shape_cast %1291 : vector<8xf32> to vector<8x1xf32>
    %1293 = vector.broadcast %1292 : vector<8x1xf32> to vector<8x8xf32>
    %1294 = arith.subf %1290, %1293 : vector<8x8xf32>
    %1295 = math.exp %1294 : vector<8x8xf32>
    %cst_521 = arith.constant dense<0.000000e+00> : vector<8xf32>
    %1296 = vector.multi_reduction <add>, %1295, %cst_521 [1] : vector<8x8xf32> to vector<8xf32>
    %1297 = vector.shape_cast %1296 : vector<8xf32> to vector<8x1xf32>
    %1298 = tpu.reciprocal %1297 : vector<8x1xf32> -> vector<8x1xf32>
    %1299 = vector.broadcast %1298 : vector<8x1xf32> to vector<8x8xf32>
    %1300 = arith.mulf %1295, %1299 : vector<8x8xf32>
    %cst_522 = arith.constant dense<0.000000e+00> : vector<8x8xf32>
    %1301 = tpu.matmul %1300, %1289, %cst_522 {dimension_numbers = #tpu.dot_dimension_numbers<[1], [0], [0], [1], [0, 0, 1, 1], [], []>} : vector<8x8xf32>, vector<8x8xf32>, vector<8x8xf32> -> vector<8x8xf32>
    %1302 = tpu.concatenate %1250, %1267, %1284, %1301 in 1 : vector<8x8xf32>, vector<8x8xf32>, vector<8x8xf32>, vector<8x8xf32> -> vector<8x32xf32>
    %1303 = tpu.concatenate %1230, %1302 in 0 : vector<8x32xf32>, vector<8x32xf32> -> vector<16x32xf32>
    %cst_523 = arith.constant dense<0.000000e+00> : vector<16x32xf32>
    %1304 = tpu.matmul %1303, %1148, %cst_523 {dimension_numbers = #tpu.dot_dimension_numbers<[1], [0], [0], [1], [0, 0, 1, 1], [], []>} : vector<16x32xf32>, vector<32x32xf32>, vector<16x32xf32> -> vector<16x32xf32>
    %1305 = vector.broadcast %1149 : vector<1x32xf32> to vector<16x32xf32>
    %1306 = arith.addf %1304, %1305 : vector<16x32xf32>
    %c1_524 = arith.constant 1 : index
    %c0_525 = arith.constant 0 : index
    %1307 = vector.load %arg44[%c1_524, %c0_525] : memref<2x32xf32, #tpu.memory_space<vmem>>, vector<1x32xf32>
    %c1_526 = arith.constant 1 : index
    %c0_527 = arith.constant 0 : index
    %1308 = vector.load %arg45[%c1_526, %c0_527] : memref<2x32xf32, #tpu.memory_space<vmem>>, vector<1x32xf32>
    %cst_528 = arith.constant dense<0.000000e+00> : vector<16xf32>
    %1309 = vector.multi_reduction <add>, %1306, %cst_528 [1] : vector<16x32xf32> to vector<16xf32>
    %1310 = vector.shape_cast %1309 : vector<16xf32> to vector<16x1xf32>
    %cst_529 = arith.constant 3.200000e+01 : f32
    %1311 = vector.broadcast %cst_529 : f32 to vector<16x1xf32>
    %1312 = arith.divf %1310, %1311 : vector<16x1xf32>
    %1313 = vector.broadcast %1312 : vector<16x1xf32> to vector<16x32xf32>
    %1314 = arith.subf %1306, %1313 : vector<16x32xf32>
    %1315 = arith.mulf %1314, %1314 : vector<16x32xf32>
    %cst_530 = arith.constant dense<0.000000e+00> : vector<16xf32>
    %1316 = vector.multi_reduction <add>, %1315, %cst_530 [1] : vector<16x32xf32> to vector<16xf32>
    %1317 = vector.shape_cast %1316 : vector<16xf32> to vector<16x1xf32>
    %cst_531 = arith.constant 3.200000e+01 : f32
    %1318 = vector.broadcast %cst_531 : f32 to vector<16x1xf32>
    %1319 = arith.divf %1317, %1318 : vector<16x1xf32>
    %1320 = vector.broadcast %1312 : vector<16x1xf32> to vector<16x32xf32>
    %1321 = arith.subf %1306, %1320 : vector<16x32xf32>
    %cst_532 = arith.constant 9.99999974E-6 : f32
    %1322 = vector.broadcast %cst_532 : f32 to vector<16x1xf32>
    %1323 = arith.addf %1319, %1322 : vector<16x1xf32>
    %1324 = math.rsqrt %1323 : vector<16x1xf32>
    %1325 = vector.broadcast %1324 : vector<16x1xf32> to vector<16x32xf32>
    %1326 = arith.mulf %1321, %1325 : vector<16x32xf32>
    %1327 = vector.broadcast %1307 : vector<1x32xf32> to vector<16x32xf32>
    %1328 = arith.mulf %1326, %1327 : vector<16x32xf32>
    %1329 = vector.broadcast %1308 : vector<1x32xf32> to vector<16x32xf32>
    %1330 = arith.addf %1328, %1329 : vector<16x32xf32>
    %1331 = arith.addf %1137, %1330 : vector<16x32xf32>
    %c1_533 = arith.constant 1 : index
    %c0_534 = arith.constant 0 : index
    %c0_535 = arith.constant 0 : index
    %1332 = vector.load %arg48[%c1_533, %c0_534, %c0_535] : memref<2x32x64xf32, #tpu.memory_space<vmem>>, vector<1x32x64xf32>
    %1333 = vector.shape_cast %1332 : vector<1x32x64xf32> to vector<32x64xf32>
    %c1_536 = arith.constant 1 : index
    %c0_537 = arith.constant 0 : index
    %1334 = vector.load %arg49[%c1_536, %c0_537] : memref<2x64xf32, #tpu.memory_space<vmem>>, vector<1x64xf32>
    %c1_538 = arith.constant 1 : index
    %c0_539 = arith.constant 0 : index
    %c0_540 = arith.constant 0 : index
    %1335 = vector.load %arg50[%c1_538, %c0_539, %c0_540] : memref<2x64x32xf32, #tpu.memory_space<vmem>>, vector<1x64x32xf32>
    %1336 = vector.shape_cast %1335 : vector<1x64x32xf32> to vector<64x32xf32>
    %c1_541 = arith.constant 1 : index
    %c0_542 = arith.constant 0 : index
    %1337 = vector.load %arg51[%c1_541, %c0_542] : memref<2x32xf32, #tpu.memory_space<vmem>>, vector<1x32xf32>
    %cst_543 = arith.constant dense<0.000000e+00> : vector<16x64xf32>
    %1338 = tpu.matmul %1331, %1333, %cst_543 {dimension_numbers = #tpu.dot_dimension_numbers<[1], [0], [0], [1], [0, 0, 1, 1], [], []>} : vector<16x32xf32>, vector<32x64xf32>, vector<16x64xf32> -> vector<16x64xf32>
    %1339 = vector.broadcast %1334 : vector<1x64xf32> to vector<16x64xf32>
    %1340 = arith.addf %1338, %1339 : vector<16x64xf32>
    %cst_544 = arith.constant 0.000000e+00 : f32
    %1341 = vector.broadcast %cst_544 : f32 to vector<16x64xf32>
    %1342 = arith.maximumf %1340, %1341 : vector<16x64xf32>
    %cst_545 = arith.constant dense<0.000000e+00> : vector<16x32xf32>
    %1343 = tpu.matmul %1342, %1336, %cst_545 {dimension_numbers = #tpu.dot_dimension_numbers<[1], [0], [0], [1], [0, 0, 1, 1], [], []>} : vector<16x64xf32>, vector<64x32xf32>, vector<16x32xf32> -> vector<16x32xf32>
    %1344 = vector.broadcast %1337 : vector<1x32xf32> to vector<16x32xf32>
    %1345 = arith.addf %1343, %1344 : vector<16x32xf32>
    %c1_546 = arith.constant 1 : index
    %c0_547 = arith.constant 0 : index
    %1346 = vector.load %arg46[%c1_546, %c0_547] : memref<2x32xf32, #tpu.memory_space<vmem>>, vector<1x32xf32>
    %c1_548 = arith.constant 1 : index
    %c0_549 = arith.constant 0 : index
    %1347 = vector.load %arg47[%c1_548, %c0_549] : memref<2x32xf32, #tpu.memory_space<vmem>>, vector<1x32xf32>
    %cst_550 = arith.constant dense<0.000000e+00> : vector<16xf32>
    %1348 = vector.multi_reduction <add>, %1345, %cst_550 [1] : vector<16x32xf32> to vector<16xf32>
    %1349 = vector.shape_cast %1348 : vector<16xf32> to vector<16x1xf32>
    %cst_551 = arith.constant 3.200000e+01 : f32
    %1350 = vector.broadcast %cst_551 : f32 to vector<16x1xf32>
    %1351 = arith.divf %1349, %1350 : vector<16x1xf32>
    %1352 = vector.broadcast %1351 : vector<16x1xf32> to vector<16x32xf32>
    %1353 = arith.subf %1345, %1352 : vector<16x32xf32>
    %1354 = arith.mulf %1353, %1353 : vector<16x32xf32>
    %cst_552 = arith.constant dense<0.000000e+00> : vector<16xf32>
    %1355 = vector.multi_reduction <add>, %1354, %cst_552 [1] : vector<16x32xf32> to vector<16xf32>
    %1356 = vector.shape_cast %1355 : vector<16xf32> to vector<16x1xf32>
    %cst_553 = arith.constant 3.200000e+01 : f32
    %1357 = vector.broadcast %cst_553 : f32 to vector<16x1xf32>
    %1358 = arith.divf %1356, %1357 : vector<16x1xf32>
    %1359 = vector.broadcast %1351 : vector<16x1xf32> to vector<16x32xf32>
    %1360 = arith.subf %1345, %1359 : vector<16x32xf32>
    %cst_554 = arith.constant 9.99999974E-6 : f32
    %1361 = vector.broadcast %cst_554 : f32 to vector<16x1xf32>
    %1362 = arith.addf %1358, %1361 : vector<16x1xf32>
    %1363 = math.rsqrt %1362 : vector<16x1xf32>
    %1364 = vector.broadcast %1363 : vector<16x1xf32> to vector<16x32xf32>
    %1365 = arith.mulf %1360, %1364 : vector<16x32xf32>
    %1366 = vector.broadcast %1346 : vector<1x32xf32> to vector<16x32xf32>
    %1367 = arith.mulf %1365, %1366 : vector<16x32xf32>
    %1368 = vector.broadcast %1347 : vector<1x32xf32> to vector<16x32xf32>
    %1369 = arith.addf %1367, %1368 : vector<16x32xf32>
    %1370 = arith.addf %1331, %1369 : vector<16x32xf32>
    %c0_555 = arith.constant 0 : index
    %c0_556 = arith.constant 0 : index
    %1371 = vector.load %arg8[%c0_555, %c0_556] : memref<32x3xf32, #tpu.memory_space<vmem>>, vector<32x3xf32>
    %cst_557 = arith.constant dense<0.000000e+00> : vector<16x3xf32>
    %1372 = tpu.matmul %1370, %1371, %cst_557 {dimension_numbers = #tpu.dot_dimension_numbers<[1], [0], [0], [1], [0, 0, 1, 1], [], []>} : vector<16x32xf32>, vector<32x3xf32>, vector<16x3xf32> -> vector<16x3xf32>
    %c0_558 = arith.constant 0 : index
    %c0_559 = arith.constant 0 : index
    %1373 = vector.load %arg9[%c0_558, %c0_559] : memref<1x3xf32, #tpu.memory_space<vmem>>, vector<1x3xf32>
    %1374 = vector.broadcast %1373 : vector<1x3xf32> to vector<16x3xf32>
    %1375 = arith.addf %1372, %1374 : vector<16x3xf32>
    %c0_560 = arith.constant 0 : index
    %c0_561 = arith.constant 0 : index
    %1376 = vector.load %arg52[%c0_560, %c0_561] : memref<16x3xf32, #tpu.memory_space<vmem>>, vector<16x3xf32>
    tpu.vector_store %arg52[%c0_560, %c0_561], %1375 {strides = array<i32>} : memref<16x3xf32, #tpu.memory_space<vmem>>, vector<16x3xf32>,
    return
  }
  func.func @transform_0(%arg0: i32) -> (i32, i32) {
    %c0_i32 = arith.constant 0 : i32
    %c0_i32_0 = arith.constant 0 : i32
    %c0_i32_1 = arith.constant 0 : i32
    return %c0_i32, %c0_i32_0 : i32, i32
  }
  func.func @transform_1(%arg0: i32) -> (i32, i32) {
    %c0_i32 = arith.constant 0 : i32
    %c0_i32_0 = arith.constant 0 : i32
    %c0_i32_1 = arith.constant 0 : i32
    return %c0_i32, %c0_i32_0 : i32, i32
  }
  func.func @transform_2(%arg0: i32) -> (i32, i32) {
    %c0_i32 = arith.constant 0 : i32
    %c0_i32_0 = arith.constant 0 : i32
    %c0_i32_1 = arith.constant 0 : i32
    return %c0_i32, %c0_i32_0 : i32, i32
  }
  func.func @transform_3(%arg0: i32) -> (i32, i32) {
    %c0_i32 = arith.constant 0 : i32
    %c0_i32_0 = arith.constant 0 : i32
    %c0_i32_1 = arith.constant 0 : i32
    return %c0_i32, %c0_i32_0 : i32, i32
  }
  func.func @transform_4(%arg0: i32) -> (i32, i32) {
    %c0_i32 = arith.constant 0 : i32
    %c0_i32_0 = arith.constant 0 : i32
    %c0_i32_1 = arith.constant 0 : i32
    return %c0_i32, %c0_i32_0 : i32, i32
  }
  func.func @transform_5(%arg0: i32) -> (i32, i32) {
    %c0_i32 = arith.constant 0 : i32
    %c0_i32_0 = arith.constant 0 : i32
    %c0_i32_1 = arith.constant 0 : i32
    return %c0_i32, %c0_i32_0 : i32, i32
  }
  func.func @transform_6(%arg0: i32) -> (i32, i32) {
    %c0_i32 = arith.constant 0 : i32
    %c0_i32_0 = arith.constant 0 : i32
    %c0_i32_1 = arith.constant 0 : i32
    return %c0_i32, %c0_i32_0 : i32, i32
  }
  func.func @transform_7(%arg0: i32) -> (i32, i32) {
    %c0_i32 = arith.constant 0 : i32
    %c0_i32_0 = arith.constant 0 : i32
    %c0_i32_1 = arith.constant 0 : i32
    return %c0_i32, %c0_i32_0 : i32, i32
  }
  func.func @transform_8(%arg0: i32) -> (i32, i32) {
    %c0_i32 = arith.constant 0 : i32
    %c0_i32_0 = arith.constant 0 : i32
    %c0_i32_1 = arith.constant 0 : i32
    return %c0_i32, %c0_i32_0 : i32, i32
  }
  func.func @transform_9(%arg0: i32) -> (i32, i32, i32) {
    %c0_i32 = arith.constant 0 : i32
    %c0_i32_0 = arith.constant 0 : i32
    %c0_i32_1 = arith.constant 0 : i32
    %c0_i32_2 = arith.constant 0 : i32
    return %c0_i32, %c0_i32_0, %c0_i32_1 : i32, i32, i32
  }
  func.func @transform_10(%arg0: i32) -> (i32, i32) {
    %c0_i32 = arith.constant 0 : i32
    %c0_i32_0 = arith.constant 0 : i32
    %c0_i32_1 = arith.constant 0 : i32
    return %c0_i32, %c0_i32_0 : i32, i32
  }
  func.func @transform_11(%arg0: i32) -> (i32, i32, i32) {
    %c0_i32 = arith.constant 0 : i32
    %c0_i32_0 = arith.constant 0 : i32
    %c0_i32_1 = arith.constant 0 : i32
    %c0_i32_2 = arith.constant 0 : i32
    return %c0_i32, %c0_i32_0, %c0_i32_1 : i32, i32, i32
  }
  func.func @transform_12(%arg0: i32) -> (i32, i32) {
    %c0_i32 = arith.constant 0 : i32
    %c0_i32_0 = arith.constant 0 : i32
    %c0_i32_1 = arith.constant 0 : i32
    return %c0_i32, %c0_i32_0 : i32, i32
  }
  func.func @transform_13(%arg0: i32) -> (i32, i32, i32) {
    %c0_i32 = arith.constant 0 : i32
    %c0_i32_0 = arith.constant 0 : i32
    %c0_i32_1 = arith.constant 0 : i32
    %c0_i32_2 = arith.constant 0 : i32
    return %c0_i32, %c0_i32_0, %c0_i32_1 : i32, i32, i32
  }
  func.func @transform_14(%arg0: i32) -> (i32, i32) {
    %c0_i32 = arith.constant 0 : i32
    %c0_i32_0 = arith.constant 0 : i32
    %c0_i32_1 = arith.constant 0 : i32
    return %c0_i32, %c0_i32_0 : i32, i32
  }
  func.func @transform_15(%arg0: i32) -> (i32, i32, i32) {
    %c0_i32 = arith.constant 0 : i32
    %c0_i32_0 = arith.constant 0 : i32
    %c0_i32_1 = arith.constant 0 : i32
    %c0_i32_2 = arith.constant 0 : i32
    return %c0_i32, %c0_i32_0, %c0_i32_1 : i32, i32, i32
  }
  func.func @transform_16(%arg0: i32) -> (i32, i32) {
    %c0_i32 = arith.constant 0 : i32
    %c0_i32_0 = arith.constant 0 : i32
    %c0_i32_1 = arith.constant 0 : i32
    return %c0_i32, %c0_i32_0 : i32, i32
  }
  func.func @transform_17(%arg0: i32) -> (i32, i32) {
    %c0_i32 = arith.constant 0 : i32
    %c0_i32_0 = arith.constant 0 : i32
    %c0_i32_1 = arith.constant 0 : i32
    return %c0_i32, %c0_i32_0 : i32, i32
  }
  func.func @transform_18(%arg0: i32) -> (i32, i32) {
    %c0_i32 = arith.constant 0 : i32
    %c0_i32_0 = arith.constant 0 : i32
    %c0_i32_1 = arith.constant 0 : i32
    return %c0_i32, %c0_i32_0 : i32, i32
  }
  func.func @transform_19(%arg0: i32) -> (i32, i32) {
    %c0_i32 = arith.constant 0 : i32
    %c0_i32_0 = arith.constant 0 : i32
    %c0_i32_1 = arith.constant 0 : i32
    return %c0_i32, %c0_i32_0 : i32, i32
  }
  func.func @transform_20(%arg0: i32) -> (i32, i32) {
    %c0_i32 = arith.constant 0 : i32
    %c0_i32_0 = arith.constant 0 : i32
    %c0_i32_1 = arith.constant 0 : i32
    return %c0_i32, %c0_i32_0 : i32, i32
  }
  func.func @transform_21(%arg0: i32) -> (i32, i32, i32) {
    %c0_i32 = arith.constant 0 : i32
    %c0_i32_0 = arith.constant 0 : i32
    %c0_i32_1 = arith.constant 0 : i32
    %c0_i32_2 = arith.constant 0 : i32
    return %c0_i32, %c0_i32_0, %c0_i32_1 : i32, i32, i32
  }
  func.func @transform_22(%arg0: i32) -> (i32, i32) {
    %c0_i32 = arith.constant 0 : i32
    %c0_i32_0 = arith.constant 0 : i32
    %c0_i32_1 = arith.constant 0 : i32
    return %c0_i32, %c0_i32_0 : i32, i32
  }
  func.func @transform_23(%arg0: i32) -> (i32, i32, i32) {
    %c0_i32 = arith.constant 0 : i32
    %c0_i32_0 = arith.constant 0 : i32
    %c0_i32_1 = arith.constant 0 : i32
    %c0_i32_2 = arith.constant 0 : i32
    return %c0_i32, %c0_i32_0, %c0_i32_1 : i32, i32, i32
  }
  func.func @transform_24(%arg0: i32) -> (i32, i32) {
    %c0_i32 = arith.constant 0 : i32
    %c0_i32_0 = arith.constant 0 : i32
    %c0_i32_1 = arith.constant 0 : i32
    return %c0_i32, %c0_i32_0 : i32, i32
  }
  func.func @transform_25(%arg0: i32) -> (i32, i32, i32) {
    %c0_i32 = arith.constant 0 : i32
    %c0_i32_0 = arith.constant 0 : i32
    %c0_i32_1 = arith.constant 0 : i32
    %c0_i32_2 = arith.constant 0 : i32
    return %c0_i32, %c0_i32_0, %c0_i32_1 : i32, i32, i32
  }
  func.func @transform_26(%arg0: i32) -> (i32, i32) {
    %c0_i32 = arith.constant 0 : i32
    %c0_i32_0 = arith.constant 0 : i32
    %c0_i32_1 = arith.constant 0 : i32
    return %c0_i32, %c0_i32_0 : i32, i32
  }
  func.func @transform_27(%arg0: i32) -> (i32, i32, i32) {
    %c0_i32 = arith.constant 0 : i32
    %c0_i32_0 = arith.constant 0 : i32
    %c0_i32_1 = arith.constant 0 : i32
    %c0_i32_2 = arith.constant 0 : i32
    return %c0_i32, %c0_i32_0, %c0_i32_1 : i32, i32, i32
  }
  func.func @transform_28(%arg0: i32) -> (i32, i32) {
    %c0_i32 = arith.constant 0 : i32
    %c0_i32_0 = arith.constant 0 : i32
    %c0_i32_1 = arith.constant 0 : i32
    return %c0_i32, %c0_i32_0 : i32, i32
  }
  func.func @transform_29(%arg0: i32) -> (i32, i32, i32) {
    %c0_i32 = arith.constant 0 : i32
    %c0_i32_0 = arith.constant 0 : i32
    %c0_i32_1 = arith.constant 0 : i32
    %c0_i32_2 = arith.constant 0 : i32
    return %c0_i32, %c0_i32_0, %c0_i32_1 : i32, i32, i32
  }
  func.func @transform_30(%arg0: i32) -> (i32, i32) {
    %c0_i32 = arith.constant 0 : i32
    %c0_i32_0 = arith.constant 0 : i32
    %c0_i32_1 = arith.constant 0 : i32
    return %c0_i32, %c0_i32_0 : i32, i32
  }
  func.func @transform_31(%arg0: i32) -> (i32, i32, i32) {
    %c0_i32 = arith.constant 0 : i32
    %c0_i32_0 = arith.constant 0 : i32
    %c0_i32_1 = arith.constant 0 : i32
    %c0_i32_2 = arith.constant 0 : i32
    return %c0_i32, %c0_i32_0, %c0_i32_1 : i32, i32, i32
  }
  func.func @transform_32(%arg0: i32) -> (i32, i32) {
    %c0_i32 = arith.constant 0 : i32
    %c0_i32_0 = arith.constant 0 : i32
    %c0_i32_1 = arith.constant 0 : i32
    return %c0_i32, %c0_i32_0 : i32, i32
  }
  func.func @transform_33(%arg0: i32) -> (i32, i32, i32) {
    %c0_i32 = arith.constant 0 : i32
    %c0_i32_0 = arith.constant 0 : i32
    %c0_i32_1 = arith.constant 0 : i32
    %c0_i32_2 = arith.constant 0 : i32
    return %c0_i32, %c0_i32_0, %c0_i32_1 : i32, i32, i32
  }
  func.func @transform_34(%arg0: i32) -> (i32, i32) {
    %c0_i32 = arith.constant 0 : i32
    %c0_i32_0 = arith.constant 0 : i32
    %c0_i32_1 = arith.constant 0 : i32
    return %c0_i32, %c0_i32_0 : i32, i32
  }
  func.func @transform_35(%arg0: i32) -> (i32, i32, i32) {
    %c0_i32 = arith.constant 0 : i32
    %c0_i32_0 = arith.constant 0 : i32
    %c0_i32_1 = arith.constant 0 : i32
    %c0_i32_2 = arith.constant 0 : i32
    return %c0_i32, %c0_i32_0, %c0_i32_1 : i32, i32, i32
  }
  func.func @transform_36(%arg0: i32) -> (i32, i32) {
    %c0_i32 = arith.constant 0 : i32
    %c0_i32_0 = arith.constant 0 : i32
    %c0_i32_1 = arith.constant 0 : i32
    return %c0_i32, %c0_i32_0 : i32, i32
  }
  func.func @transform_37(%arg0: i32) -> (i32, i32, i32) {
    %c0_i32 = arith.constant 0 : i32
    %c0_i32_0 = arith.constant 0 : i32
    %c0_i32_1 = arith.constant 0 : i32
    %c0_i32_2 = arith.constant 0 : i32
    return %c0_i32, %c0_i32_0, %c0_i32_1 : i32, i32, i32
  }
  func.func @transform_38(%arg0: i32) -> (i32, i32) {
    %c0_i32 = arith.constant 0 : i32
    %c0_i32_0 = arith.constant 0 : i32
    %c0_i32_1 = arith.constant 0 : i32
    return %c0_i32, %c0_i32_0 : i32, i32
  }
  func.func @transform_39(%arg0: i32) -> (i32, i32, i32) {
    %c0_i32 = arith.constant 0 : i32
    %c0_i32_0 = arith.constant 0 : i32
    %c0_i32_1 = arith.constant 0 : i32
    %c0_i32_2 = arith.constant 0 : i32
    return %c0_i32, %c0_i32_0, %c0_i32_1 : i32, i32, i32
  }
  func.func @transform_40(%arg0: i32) -> (i32, i32) {
    %c0_i32 = arith.constant 0 : i32
    %c0_i32_0 = arith.constant 0 : i32
    %c0_i32_1 = arith.constant 0 : i32
    return %c0_i32, %c0_i32_0 : i32, i32
  }
  func.func @transform_41(%arg0: i32) -> (i32, i32) {
    %c0_i32 = arith.constant 0 : i32
    %c0_i32_0 = arith.constant 0 : i32
    %c0_i32_1 = arith.constant 0 : i32
    return %c0_i32, %c0_i32_0 : i32, i32
  }
  func.func @transform_42(%arg0: i32) -> (i32, i32) {
    %c0_i32 = arith.constant 0 : i32
    %c0_i32_0 = arith.constant 0 : i32
    %c0_i32_1 = arith.constant 0 : i32
    return %c0_i32, %c0_i32_0 : i32, i32
  }
  func.func @transform_43(%arg0: i32) -> (i32, i32) {
    %c0_i32 = arith.constant 0 : i32
    %c0_i32_0 = arith.constant 0 : i32
    %c0_i32_1 = arith.constant 0 : i32
    return %c0_i32, %c0_i32_0 : i32, i32
  }
  func.func @transform_44(%arg0: i32) -> (i32, i32) {
    %c0_i32 = arith.constant 0 : i32
    %c0_i32_0 = arith.constant 0 : i32
    %c0_i32_1 = arith.constant 0 : i32
    return %c0_i32, %c0_i32_0 : i32, i32
  }
  func.func @transform_45(%arg0: i32) -> (i32, i32) {
    %c0_i32 = arith.constant 0 : i32
    %c0_i32_0 = arith.constant 0 : i32
    %c0_i32_1 = arith.constant 0 : i32
    return %c0_i32, %c0_i32_0 : i32, i32
  }
  func.func @transform_46(%arg0: i32) -> (i32, i32) {
    %c0_i32 = arith.constant 0 : i32
    %c0_i32_0 = arith.constant 0 : i32
    %c0_i32_1 = arith.constant 0 : i32
    return %c0_i32, %c0_i32_0 : i32, i32
  }
  func.func @transform_47(%arg0: i32) -> (i32, i32, i32) {
    %c0_i32 = arith.constant 0 : i32
    %c0_i32_0 = arith.constant 0 : i32
    %c0_i32_1 = arith.constant 0 : i32
    %c0_i32_2 = arith.constant 0 : i32
    return %c0_i32, %c0_i32_0, %c0_i32_1 : i32, i32, i32
  }
  func.func @transform_48(%arg0: i32) -> (i32, i32) {
    %c0_i32 = arith.constant 0 : i32
    %c0_i32_0 = arith.constant 0 : i32
    %c0_i32_1 = arith.constant 0 : i32
    return %c0_i32, %c0_i32_0 : i32, i32
  }
  func.func @transform_49(%arg0: i32) -> (i32, i32, i32) {
    %c0_i32 = arith.constant 0 : i32
    %c0_i32_0 = arith.constant 0 : i32
    %c0_i32_1 = arith.constant 0 : i32
    %c0_i32_2 = arith.constant 0 : i32
    return %c0_i32, %c0_i32_0, %c0_i32_1 : i32, i32, i32
  }
  func.func @transform_50(%arg0: i32) -> (i32, i32) {
    %c0_i32 = arith.constant 0 : i32
    %c0_i32_0 = arith.constant 0 : i32
    %c0_i32_1 = arith.constant 0 : i32
    return %c0_i32, %c0_i32_0 : i32, i32
  }
  func.func @transform_51(%arg0: i32) -> (i32, i32) {
    %c0_i32 = arith.constant 0 : i32
    %c0_i32_0 = arith.constant 0 : i32
    %c0_i32_1 = arith.constant 0 : i32
    return %c0_i32, %c0_i32_0 : i32, i32
  }
}

</mosaic_0001>

<bundles_post_ra>
// kernel: pallas_transformer_forward.1
= control target key start
LH: loop header
LB: loop body
LE: loop exit
PB: predicated region body
PF: predicated region fallthrough
CT: control target
= control target key end

     0   :  { %s7651_s6 = smov 1   ;;  %s7652_s10 = smov 2   ;;  %s9457_s0 = inlined_call_operand.smem [shape: u32[52], index: -1, kind: input, shape index: {}] }
   0x1   :  { %s7745_s5 = sld [smem:[%s9457_s0]]   ;;  %s7653_s14 = smov 3  }
   0x2   :  { %s7750_s9 = sld [smem:[%s9457_s0 + %s7651_s6]]   ;;  %s7654_s18 = smov 4  }
   0x3   :  { %s7755_s13 = sld [smem:[%s9457_s0 + %s7652_s10]]   ;;  %s7655_s22 = smov 5  }
   0x4   :  { %s7760_s17 = sld [smem:[%s9457_s0 + %s7653_s14]]   ;;  %s7656_s26 = smov 6  }
   0x5   :  { %s7765_s21 = sld [smem:[%s9457_s0 + %s7654_s18]]   ;;  %s7657_s30 = smov 7  }
   0x6   :  { %s7770_s25 = sld [smem:[%s9457_s0 + %s7655_s22]]   ;;  %s7658_s4 = smov 8  }
   0x7   :  { %9487 = sst [smem:[#allocation57_spill]] %s7745_s5  ;;  %s7659_s10 = smov 9  }
   0x8   :  { %9488 = sst [smem:[#allocation58_spill]] %s7750_s9  ;;  %s7660_s15 = smov 10  }
   0x9   :  { %9489 = sst [smem:[#allocation59_spill]] %s7755_s13  ;;  %s7661_s20 = smov 11  }
   0xa   :  { %9490 = sst [smem:[#allocation60_spill]] %s7760_s17  ;;  %s7663_s1 = smov 13  }
   0xb   :  { %9491 = sst [smem:[#allocation61_spill]] %s7765_s21  ;;  %s7664_s7 = smov 14  }
   0xc   :  { %9492 = sst [smem:[#allocation62_spill]] %s7770_s25  ;;  %s7666_s22 = smov 16  }
   0xd   :  { %s7775_s29 = sld [smem:[%s9457_s0 + %s7656_s26]]   ;;  %s7662_s26 = smov 12  }
   0xe   :  { %s7780_s3 = sld [smem:[%s9457_s0 + %s7657_s30]]   ;;  %s7667_s28 = smov 17  }
   0xf   :  { %s7785_s8 = sld [smem:[%s9457_s0 + %s7658_s4]]  }
  0x10   :  { %s7790_s14 = sld [smem:[%s9457_s0 + %s7659_s10]]  }
  0x11   :  { %s7795_s19 = sld [smem:[%s9457_s0 + %s7660_s15]]   ;;  %s7665_s15 = smov 15  }
  0x12   :  { %s7800_s24 = sld [smem:[%s9457_s0 + %s7661_s20]]  }
  0x13   :  { %9493 = sst [smem:[#allocation63_spill]] %s7775_s29 }
  0x14   :  { %9494 = sst [smem:[#allocation64_spill]] %s7780_s3 }
  0x15   :  { %9495 = sst [smem:[#allocation65_spill]] %s7785_s8 }
  0x16   :  { %9496 = sst [smem:[#allocation66_spill]] %s7790_s14 }
  0x17   :  { %9497 = sst [smem:[#allocation67_spill]] %s7795_s19 }
  0x18   :  { %9498 = sst [smem:[#allocation68_spill]] %s7800_s24 }
  0x19   :  { %s7805_s30 = sld [smem:[%s9457_s0 + %s7662_s26]]  }
  0x1a   :  { %s7810_s6 = sld [smem:[%s9457_s0 + %s7663_s1]]  }
  0x1b   :  { %s7815_s12 = sld [smem:[%s9457_s0 + %s7664_s7]]   ;;  %s7668_s7 = smov 18  }
  0x1c   :  { %s7820_s20 = sld [smem:[%s9457_s0 + %s7665_s15]]   ;;  %s7669_s15 = smov 19  }
  0x1d   :  { %s7825_s27 = sld [smem:[%s9457_s0 + %s7666_s22]]   ;;  %s7670_s22 = smov 20  }
  0x1e   :  { %s7830_s4 = sld [smem:[%s9457_s0 + %s7667_s28]]   ;;  %s7671_s28 = smov 21  }
  0x1f   :  { %9499 = sst [smem:[#allocation69_spill]] %s7805_s30 }
  0x20   :  { %9500 = sst [smem:[#allocation70_spill]] %s7810_s6 }
  0x21   :  { %9501 = sst [smem:[#allocation71_spill]] %s7815_s12 }
  0x22   :  { %9502 = sst [smem:[#allocation72_spill]] %s7820_s20 }
  0x23   :  { %9503 = sst [smem:[#allocation73_spill]] %s7825_s27 }
  0x24   :  { %9504 = sst [smem:[#allocation74_spill]] %s7830_s4 }
  0x25   :  { %s7835_s8 = sld [smem:[%s9457_s0 + %s7668_s7]]   ;;  %s7672_s7 = smov 22  }
  0x26   :  { %s7840_s3 = sld [smem:[%s9457_s0 + %s7669_s15]]   ;;  %s7673_s15 = smov 23  }
  0x27   :  { %s7845_s25 = sld [smem:[%s9457_s0 + %s7670_s22]]   ;;  %s7674_s22 = smov 24  }
  0x28   :  { %s7850_s4 = sld [smem:[%s9457_s0 + %s7671_s28]]   ;;  %s7675_s28 = smov 25  }
  0x2b   :  { %9505 = sst [smem:[#allocation75_spill]] %s7835_s8 }
  0x2c   :  { %9506 = sst [smem:[#allocation76_spill]] %s7840_s3 }
  0x2d   :  { %9507 = sst [smem:[#allocation77_spill]] %s7845_s25 }
  0x2e   :  { %9508 = sst [smem:[#allocation78_spill]] %s7850_s4 }
  0x2f   :  { %s7855_s8 = sld [smem:[%s9457_s0 + %s7672_s7]]   ;;  %s7676_s7 = smov 26  }
  0x30   :  { %s7860_s3 = sld [smem:[%s9457_s0 + %s7673_s15]]   ;;  %s7677_s15 = smov 27  }
  0x31   :  { %s7865_s25 = sld [smem:[%s9457_s0 + %s7674_s22]]   ;;  %s7678_s22 = smov 28  }
  0x32   :  { %s7870_s4 = sld [smem:[%s9457_s0 + %s7675_s28]]   ;;  %s7679_s28 = smov 29  }
  0x33   :  { %s7875_s27 = sld [smem:[%s9457_s0 + %s7676_s7]]   ;;  %s7680_s7 = smov 30  }
  0x34   :  { %s7885_s20 = sld [smem:[%s9457_s0 + %s7678_s22]]   ;;  %s7682_s22 = smov 32  }
  0x35   :  { %s7890_s19 = sld [smem:[%s9457_s0 + %s7679_s28]]   ;;  %s7683_s28 = smov 33  }
  0x36   :  { %9509 = sst [smem:[#allocation79_spill]] %s7860_s3 }
  0x37   :  { %s7880_s3 = sld [smem:[%s9457_s0 + %s7677_s15]]   ;;  %s7681_s15 = smov 31  }
  0x38   :  { %s7895_s12 = sld [smem:[%s9457_s0 + %s7680_s7]]   ;;  %s7684_s7 = smov 34  }
  0x39   :  { %s7900_s30 = sld [smem:[%s9457_s0 + %s7681_s15]]   ;;  %s7685_s15 = smov 35  }
  0x3a   :  { %s7905_s29 = sld [smem:[%s9457_s0 + %s7682_s22]]   ;;  %s7686_s22 = smov 36  }
  0x3b   :  { %9511 = sst [smem:[#allocation81_spill]] %s7890_s19 }
  0x3c   :  { %s7910_s17 = sld [smem:[%s9457_s0 + %s7683_s28]]   ;;  %s7687_s28 = smov 37  }
  0x3d   :  { %9510 = sst [smem:[#allocation80_spill]] %s7880_s3 }
  0x3e   :  { %s7915_s6 = sld [smem:[%s9457_s0 + %s7684_s7]]   ;;  %s7688_s7 = smov 38  }
  0x3f   :  { %9512 = sst [smem:[#allocation82_spill]] %s7900_s30 }
  0x40   :  { %s7920_s24 = sld [smem:[%s9457_s0 + %s7685_s15]]   ;;  %s7689_s15 = smov 39  }
  0x41   :  { %s7925_s14 = sld [smem:[%s9457_s0 + %s7686_s22]]   ;;  %s7690_s22 = smov 40  }
  0x42   :  { %9513 = sst [smem:[#allocation83_spill]] %s7910_s17 }
  0x43   :  { %s7930_s9 = sld [smem:[%s9457_s0 + %s7687_s28]]   ;;  %s7691_s28 = smov 41  }
  0x44   :  { %s7935_s21 = sld [smem:[%s9457_s0 + %s7688_s7]]   ;;  %s7692_s7 = smov 42  }
  0x45   :  { %s7940_s5 = sld [smem:[%s9457_s0 + %s7689_s15]]   ;;  %s7693_s15 = smov 43  }
  0x46   :  { %9514 = sst [smem:[#allocation84_spill]] %s7920_s24 }
  0x47   :  { %s7945_s13 = sld [smem:[%s9457_s0 + %s7690_s22]]   ;;  %s7694_s22 = smov 44  }
  0x48   :  { %s7955_s24 = sld [smem:[%s9457_s0 + %s7692_s7]]   ;;  %s7696_s7 = smov 46  }
  0x49   :  { %9515 = sst [smem:[#allocation85_spill]] %s7930_s9 }
  0x4a   :  { %s7950_s9 = sld [smem:[%s9457_s0 + %s7691_s28]]   ;;  %s7695_s28 = smov 45  }
  0x4b   :  { %9516 = sst [smem:[#allocation86_spill]] %s7940_s5 }
  0x4c   :  { %s7960_s5 = sld [smem:[%s9457_s0 + %s7693_s15]]   ;;  %s7697_s15 = smov 47  }
  0x4d   :  { %s7965_s17 = sld [smem:[%s9457_s0 + %s7694_s22]]   ;;  %s7698_s22 = smov 48  }
  0x4e   :  { %s7975_s30 = sld [smem:[%s9457_s0 + %s7696_s7]]   ;;  %s7700_s7 = smov 50  }
  0x4f   :  { %s7985_s19 = sld [smem:[%s9457_s0 + %s7698_s22]]  }
  0x50   :  { %9517 = sst [smem:[#allocation87_spill]] %s7950_s9 }
  0x51   :  { %s7970_s9 = sld [smem:[%s9457_s0 + %s7695_s28]]   ;;  %s7699_s28 = smov 49  }
  0x52   :  { %9518 = sst [smem:[#allocation88_spill]] %s7960_s5 }
  0x53   :  { %s7980_s5 = sld [smem:[%s9457_s0 + %s7697_s15]]   ;;  %s7701_s15 = smov 51  }
  0x54   :  { %s7995_s3 = sld [smem:[%s9457_s0 + %s7700_s7]]  }
  0x57   :  { %9519 = sst [smem:[#allocation89_spill]] %s7970_s9 }
  0x58   :  { %s7990_s9 = sld [smem:[%s9457_s0 + %s7699_s28]]  }
  0x59   :  { %9520 = sst [smem:[#allocation90_spill]] %s7980_s5 }
  0x5a   :  { %s8000_s5 = sld [smem:[%s9457_s0 + %s7701_s15]]  }
  0x5b   :  { %108 = vsyncpa [#allocation3], 0 }
  0x5c   :  { %109 = vsyncpa [#allocation5], 0 }
  0x5d   :  { %110 = vsyncpa [#allocation8], 0 }
  0x5e   :  { %111 = vsyncpa [#allocation11], 0 }
  0x5f   :  { %112 = vsyncpa [#allocation14], 0 }
  0x60   :  { %113 = vsyncpa [#allocation17], 0 }
  0x61   :  { %114 = vsyncpa [#allocation20], 0 }
  0x62   :  { %115 = vsyncpa [#allocation23], 0 }
  0x63   :  { %116 = vsyncpa [#allocation26], 0 }
  0x64   :  { %117 = vsyncpa [#allocation29], 0 }
  0x65   :  { %118 = vsyncpa [#allocation32], 0 }
  0x66   :  { %119 = vsyncpa [#allocation35], 0 }
  0x67   :  { %120 = vsyncpa [#allocation38], 0  ;;  %s184_s22 = sshll.u32 %s7865_s25, 4  ;;  %s185_s22 = int_to_ptr.hbm [resolvable:$true] %s184_s22 }
  0x68   :  { %121 = vsyncpa [#allocation41], 0  ;;  %s7702_s0 = smov [#allocation4]   ;;  %s208_s26 = sshll.u32 %s7875_s27, 4  ;;  %s209_s26 = int_to_ptr.hbm [resolvable:$true] %s208_s26 }
  0x69   :  { %s186_s23 = sshll.u32 %s7702_s0, 4  ;;  %s6975_s28 = sshra.s32 %s185_s22, 4  ;;  %s187_s23 = int_to_ptr.vmem [resolvable:$true] %s186_s23  ;;  %s6976_s28 = int_to_ptr.hbm [resolvable:$true] %s6975_s28 }
  0x6a   :  { %s6977_s1 = scalar_lea.hbm %s6976_s28, 2  ;;  %s6979_s2 = scalar_lea.hbm %s7865_s25, 2 }
  0x6b   :  { %p6978_p0 = scmp.ne.s32.totalorder %s6976_s28, %s6977_s1  ;;  %p6980_p1 = scmp.lt.s32.totalorder %s6976_s28, %s7865_s25 }
  0x6c   :  { %p6981_p2 = scmp.lt.s32.totalorder %s6979_s2, %s6977_s1 }
  0x6e   :  { %p6982_p3 = por %p6981_p2, %p6980_p1 }
  0x70   :  { %p6983_p4 = pnand %p6982_p3, %p6978_p0 }
  0x72   :  { %6986 = shalt.err (!%p6983_p4)
}
  0x73   :  { %189 = dma.hbm_to_vmem [thread:$0]  %s185_s22, 32, %s187_s23, [#allocation5]  }
  0x74   :  { %s7703_s7 = smov [#allocation7]   ;;  %s232_s11 = sshll.u32 %s7885_s20, 4  ;;  %s233_s11 = int_to_ptr.hbm [resolvable:$true] %s232_s11 }
  0x75   :  { %s210_s10 = sshll.u32 %s7703_s7, 4  ;;  %s6999_s15 = sshra.s32 %s209_s26, 4  ;;  %s211_s10 = int_to_ptr.vmem [resolvable:$true] %s210_s10  ;;  %s7000_s15 = int_to_ptr.hbm [resolvable:$true] %s6999_s15 }
  0x76   :  { %s7001_s16 = scalar_lea.hbm %s7000_s15, 2  ;;  %s7003_s18 = scalar_lea.hbm %s7875_s27, 2 }
  0x77   :  { %p7002_p5 = scmp.ne.s32.totalorder %s7000_s15, %s7001_s16  ;;  %p7004_p6 = scmp.lt.s32.totalorder %s7000_s15, %s7875_s27 }
  0x78   :  { %p7005_p7 = scmp.lt.s32.totalorder %s7003_s18, %s7001_s16 }
  0x7a   :  { %p7006_p8 = por %p7005_p7, %p7004_p6 }
  0x7c   :  { %p7007_p9 = pnand %p7006_p8, %p7002_p5 }
  0x7e   :  { %7010 = shalt.err (!%p7007_p9)
}
  0x7f   :  { %213 = dma.hbm_to_vmem [thread:$0]  %s209_s26, 32, %s211_s10, [#allocation8]  }
  0x80   :  { %s256_s25 = sshll.u32 %s7895_s12, 4  ;;  %s7704_s22 = smov [#allocation10]   ;;  %s257_s25 = int_to_ptr.hbm [resolvable:$true] %s256_s25 }
  0x81   :  { %s234_s0 = sshll.u32 %s7704_s22, 4  ;;  %s7023_s23 = sshra.s32 %s233_s11, 4  ;;  %s235_s0 = int_to_ptr.vmem [resolvable:$true] %s234_s0  ;;  %s7024_s23 = int_to_ptr.hbm [resolvable:$true] %s7023_s23 }
  0x82   :  { %s7025_s28 = scalar_lea.hbm %s7024_s23, 2  ;;  %s7027_s1 = scalar_lea.hbm %s7885_s20, 2 }
  0x83   :  { %p7026_p10 = scmp.ne.s32.totalorder %s7024_s23, %s7025_s28  ;;  %p7028_p11 = scmp.lt.s32.totalorder %s7024_s23, %s7885_s20 }
  0x84   :  { %p7029_p12 = scmp.lt.s32.totalorder %s7027_s1, %s7025_s28 }
  0x86   :  { %p7030_p13 = por %p7029_p12, %p7028_p11 }
  0x88   :  { %p7031_p0 = pnand %p7030_p13, %p7026_p10 }
  0x8a   :  { %7034 = shalt.err (!%p7031_p0)
}
  0x8b   :  { %237 = dma.hbm_to_vmem [thread:$0]  %s233_s11, 32, %s235_s0, [#allocation11]  }
  0x8c   :  { %s7705_s27 = smov [#allocation13]   ;;  %s280_s2 = sshll.u32 %s7905_s29, 4  ;;  %s281_s2 = int_to_ptr.hbm [resolvable:$true] %s280_s2 }
  0x8d   :  { %s258_s26 = sshll.u32 %s7705_s27, 4  ;;  %s7047_s7 = sshra.s32 %s257_s25, 4  ;;  %s259_s26 = int_to_ptr.vmem [resolvable:$true] %s258_s26  ;;  %s7048_s7 = int_to_ptr.hbm [resolvable:$true] %s7047_s7 }
  0x8e   :  { %s7049_s10 = scalar_lea.hbm %s7048_s7, 2  ;;  %s7051_s15 = scalar_lea.hbm %s7895_s12, 2 }
  0x8f   :  { %p7050_p1 = scmp.ne.s32.totalorder %s7048_s7, %s7049_s10  ;;  %p7052_p2 = scmp.lt.s32.totalorder %s7048_s7, %s7895_s12 }
  0x90   :  { %p7053_p3 = scmp.lt.s32.totalorder %s7051_s15, %s7049_s10 }
  0x92   :  { %p7054_p4 = por %p7053_p3, %p7052_p2 }
  0x94   :  { %p7055_p5 = pnand %p7054_p4, %p7050_p1 }
  0x96   :  { %7058 = shalt.err (!%p7055_p5)
}
  0x97   :  { %261 = dma.hbm_to_vmem [thread:$0]  %s257_s25, 32, %s259_s26, [#allocation14]  }
  0x98   :  { %s304_s20 = sshll.u32 %s7915_s6, 4  ;;  %s7706_s11 = smov [#allocation16]   ;;  %s305_s20 = int_to_ptr.hbm [resolvable:$true] %s304_s20 }
  0x99   :  { %s282_s16 = sshll.u32 %s7706_s11, 4  ;;  %s7071_s18 = sshra.s32 %s281_s2, 4  ;;  %s283_s16 = int_to_ptr.vmem [resolvable:$true] %s282_s16  ;;  %s7072_s18 = int_to_ptr.hbm [resolvable:$true] %s7071_s18 }
  0x9a   :  { %s7073_s22 = scalar_lea.hbm %s7072_s18, 2  ;;  %s7075_s0 = scalar_lea.hbm %s7905_s29, 2 }
  0x9b   :  { %p7074_p6 = scmp.ne.s32.totalorder %s7072_s18, %s7073_s22  ;;  %p7076_p7 = scmp.lt.s32.totalorder %s7072_s18, %s7905_s29 }
  0x9c   :  { %p7077_p8 = scmp.lt.s32.totalorder %s7075_s0, %s7073_s22 }
  0x9e   :  { %p7078_p9 = por %p7077_p8, %p7076_p7 }
  0xa0   :  { %p7079_p10 = pnand %p7078_p9, %p7074_p6 }
  0xa2   :  { %7082 = shalt.err (!%p7079_p10)
}
  0xa3   :  { %285 = dma.hbm_to_vmem [thread:$0]  %s281_s2, 32, %s283_s16, [#allocation17]  }
  0xa4   :  { %s7707_s12 = smov [#allocation19]   ;;  %s328_s23 = sshll.u32 %s7925_s14, 4  ;;  %s329_s23 = int_to_ptr.hbm [resolvable:$true] %s328_s23 }
  0xa5   :  { %s306_s25 = sshll.u32 %s7707_s12, 4  ;;  %s7095_s28 = sshra.s32 %s305_s20, 4  ;;  %s307_s25 = int_to_ptr.vmem [resolvable:$true] %s306_s25  ;;  %s7096_s28 = int_to_ptr.hbm [resolvable:$true] %s7095_s28 }
  0xa6   :  { %s7097_s1 = scalar_lea.hbm %s7096_s28, 2  ;;  %s7099_s27 = scalar_lea.hbm %s7915_s6, 2 }
  0xa7   :  { %p7098_p11 = scmp.ne.s32.totalorder %s7096_s28, %s7097_s1  ;;  %p7100_p12 = scmp.lt.s32.totalorder %s7096_s28, %s7915_s6 }
  0xa8   :  { %p7101_p13 = scmp.lt.s32.totalorder %s7099_s27, %s7097_s1 }
  0xaa   :  { %p7102_p0 = por %p7101_p13, %p7100_p12 }
  0xac   :  { %p7103_p1 = pnand %p7102_p0, %p7098_p11 }
  0xae   :  { %7106 = shalt.err (!%p7103_p1)
}
  0xaf   :  { %309 = dma.hbm_to_vmem [thread:$0]  %s305_s20, 32, %s307_s25, [#allocation20]  }
  0xb0   :  { %s352_s29 = sshll.u32 %s7935_s21, 4  ;;  %s7708_s26 = smov [#allocation22]   ;;  %s353_s29 = int_to_ptr.hbm [resolvable:$true] %s352_s29 }
  0xb1   :  { %s330_s2 = sshll.u32 %s7708_s26, 4  ;;  %s7119_s7 = sshra.s32 %s329_s23, 4  ;;  %s331_s2 = int_to_ptr.vmem [resolvable:$true] %s330_s2  ;;  %s7120_s7 = int_to_ptr.hbm [resolvable:$true] %s7119_s7 }
  0xb2   :  { %s7121_s10 = scalar_lea.hbm %s7120_s7, 2  ;;  %s7123_s15 = scalar_lea.hbm %s7925_s14, 2 }
  0xb3   :  { %p7122_p2 = scmp.ne.s32.totalorder %s7120_s7, %s7121_s10  ;;  %p7124_p3 = scmp.lt.s32.totalorder %s7120_s7, %s7925_s14 }
  0xb4   :  { %p7125_p4 = scmp.lt.s32.totalorder %s7123_s15, %s7121_s10 }
  0xb6   :  { %p7126_p5 = por %p7125_p4, %p7124_p3 }
  0xb8   :  { %p7127_p6 = pnand %p7126_p5, %p7122_p2 }
  0xba   :  { %7130 = shalt.err (!%p7127_p6)
}
  0xbb   :  { %333 = dma.hbm_to_vmem [thread:$0]  %s329_s23, 32, %s331_s2, [#allocation23]  }
  0xbc   :  { %s7709_s6 = smov [#allocation25]   ;;  %s376_s11 = sshll.u32 %s7945_s13, 4  ;;  %s377_s11 = int_to_ptr.hbm [resolvable:$true] %s376_s11 }
  0xbd   :  { %s354_s20 = sshll.u32 %s7709_s6, 4  ;;  %s7143_s16 = sshra.s32 %s353_s29, 4  ;;  %s355_s20 = int_to_ptr.vmem [resolvable:$true] %s354_s20  ;;  %s7144_s16 = int_to_ptr.hbm [resolvable:$true] %s7143_s16 }
  0xbe   :  { %s7145_s18 = scalar_lea.hbm %s7144_s16, 2  ;;  %s7147_s22 = scalar_lea.hbm %s7935_s21, 2 }
  0xbf   :  { %p7146_p7 = scmp.ne.s32.totalorder %s7144_s16, %s7145_s18  ;;  %p7148_p8 = scmp.lt.s32.totalorder %s7144_s16, %s7935_s21 }
  0xc0   :  { %p7149_p9 = scmp.lt.s32.totalorder %s7147_s22, %s7145_s18 }
  0xc2   :  { %p7150_p10 = por %p7149_p9, %p7148_p8 }
  0xc4   :  { %p7151_p11 = pnand %p7150_p10, %p7146_p7 }
  0xc6   :  { %7154 = shalt.err (!%p7151_p11)
}
  0xc7   :  { %357 = dma.hbm_to_vmem [thread:$0]  %s353_s29, 32, %s355_s20, [#allocation26]  }
  0xc8   :  { %s398_s14 = sshll.u32 %s7955_s24, 4  ;;  %s7710_s0 = smov [#allocation28]   ;;  %s399_s14 = int_to_ptr.hbm [resolvable:$true] %s398_s14 }
  0xc9   :  { %s378_s12 = sshll.u32 %s7710_s0, 4  ;;  %s7167_s25 = sshra.s32 %s377_s11, 4  ;;  %s379_s12 = int_to_ptr.vmem [resolvable:$true] %s378_s12  ;;  %s7168_s25 = int_to_ptr.hbm [resolvable:$true] %s7167_s25 }
  0xca   :  { %s7169_s23 = scalar_lea.hbm %s7168_s25, 2  ;;  %s7171_s28 = scalar_lea.hbm %s7945_s13, 2 }
  0xcb   :  { %p7170_p12 = scmp.ne.s32.totalorder %s7168_s25, %s7169_s23  ;;  %p7172_p13 = scmp.lt.s32.totalorder %s7168_s25, %s7945_s13 }
  0xcc   :  { %p7173_p0 = scmp.lt.s32.totalorder %s7171_s28, %s7169_s23 }
  0xce   :  { %p7174_p1 = por %p7173_p0, %p7172_p13 }
  0xd0   :  { %p7175_p2 = pnand %p7174_p1, %p7170_p12 }
  0xd2   :  { %7178 = shalt.err (!%p7175_p2)
}
  0xd3   :  { %381 = dma.hbm_to_vmem [thread:$0]  %s377_s11, 32, %s379_s12, [#allocation29]  }
  0xd4   :  { %s7711_s21 = smov [#allocation31]   ;;  %s420_s27 = sshll.u32 %s7965_s17, 4  ;;  %s421_s27 = int_to_ptr.hbm [resolvable:$true] %s420_s27 }
  0xd5   :  { %s400_s1 = sshll.u32 %s7711_s21, 4  ;;  %s7191_s29 = sshra.s32 %s399_s14, 4  ;;  %s401_s1 = int_to_ptr.vmem [resolvable:$true] %s400_s1  ;;  %s7192_s29 = int_to_ptr.hbm [resolvable:$true] %s7191_s29 }
  0xd6   :  { %s7193_s26 = scalar_lea.hbm %s7192_s29, 2  ;;  %s7195_s2 = scalar_lea.hbm %s7955_s24, 2 }
  0xd7   :  { %p7194_p3 = scmp.ne.s32.totalorder %s7192_s29, %s7193_s26  ;;  %p7196_p4 = scmp.lt.s32.totalorder %s7192_s29, %s7955_s24 }
  0xd8   :  { %p7197_p5 = scmp.lt.s32.totalorder %s7195_s2, %s7193_s26 }
  0xda   :  { %p7198_p6 = por %p7197_p5, %p7196_p4 }
  0xdc   :  { %p7199_p7 = pnand %p7198_p6, %p7194_p3 }
  0xde   :  { %7202 = shalt.err (!%p7199_p7)
}
  0xdf   :  { %403 = dma.hbm_to_vmem [thread:$0]  %s399_s14, 32, %s401_s1, [#allocation32]  }
  0xe0   :  { %s442_s13 = sshll.u32 %s7975_s30, 4  ;;  %s7712_s7 = smov [#allocation34]   ;;  %s443_s13 = int_to_ptr.hbm [resolvable:$true] %s442_s13 }
  0xe1   :  { %s422_s10 = sshll.u32 %s7712_s7, 4  ;;  %s7215_s15 = sshra.s32 %s421_s27, 4  ;;  %s423_s10 = int_to_ptr.vmem [resolvable:$true] %s422_s10  ;;  %s7216_s15 = int_to_ptr.hbm [resolvable:$true] %s7215_s15 }
  0xe2   :  { %s7217_s6 = scalar_lea.hbm %s7216_s15, 2  ;;  %s7219_s20 = scalar_lea.hbm %s7965_s17, 2 }
  0xe3   :  { %p7218_p8 = scmp.ne.s32.totalorder %s7216_s15, %s7217_s6  ;;  %p7220_p9 = scmp.lt.s32.totalorder %s7216_s15, %s7965_s17 }
  0xe4   :  { %p7221_p10 = scmp.lt.s32.totalorder %s7219_s20, %s7217_s6 }
  0xe6   :  { %p7222_p11 = por %p7221_p10, %p7220_p9 }
  0xe8   :  { %p7223_p12 = pnand %p7222_p11, %p7218_p8 }
  0xea   :  { %7226 = shalt.err (!%p7223_p12)
}
  0xeb   :  { %425 = dma.hbm_to_vmem [thread:$0]  %s421_s27, 32, %s423_s10, [#allocation35]  }
  0xec   :  { %s7713_s24 = smov [#allocation37]   ;;  %s466_s16 = sshll.u32 %s7985_s19, 4  ;;  %s467_s16 = int_to_ptr.hbm [resolvable:$true] %s466_s16 }
  0xed   :  { %s444_s11 = sshll.u32 %s7713_s24, 4  ;;  %s7239_s18 = sshra.s32 %s443_s13, 4  ;;  %s445_s11 = int_to_ptr.vmem [resolvable:$true] %s444_s11  ;;  %s7240_s18 = int_to_ptr.hbm [resolvable:$true] %s7239_s18 }
  0xee   :  { %s7241_s22 = scalar_lea.hbm %s7240_s18, 2  ;;  %s7243_s14 = scalar_lea.hbm %s7975_s30, 2 }
  0xef   :  { %p7242_p13 = scmp.ne.s32.totalorder %s7240_s18, %s7241_s22  ;;  %p7244_p0 = scmp.lt.s32.totalorder %s7240_s18, %s7975_s30 }
  0xf0   :  { %p7245_p1 = scmp.lt.s32.totalorder %s7243_s14, %s7241_s22 }
  0xf2   :  { %p7246_p2 = por %p7245_p1, %p7244_p0 }
  0xf4   :  { %p7247_p3 = pnand %p7246_p2, %p7242_p13 }
  0xf6   :  { %7250 = shalt.err (!%p7247_p3)
}
  0xf7   :  { %447 = dma.hbm_to_vmem [thread:$0]  %s443_s13, 32, %s445_s11, [#allocation38]  }
  0xf8   :  { %s171_s17 = sshll.u32 %s7855_s8, 4  ;;  %s7714_s0 = smov [#allocation40]   ;;  %s172_s17 = int_to_ptr.hbm [resolvable:$true] %s171_s17 }
  0xf9   :  { %s468_s12 = sshll.u32 %s7714_s0, 4  ;;  %s7263_s25 = sshra.s32 %s467_s16, 4  ;;  %s469_s12 = int_to_ptr.vmem [resolvable:$true] %s468_s12  ;;  %s7264_s25 = int_to_ptr.hbm [resolvable:$true] %s7263_s25 }
  0xfa   :  { %s7265_s23 = scalar_lea.hbm %s7264_s25, 2  ;;  %s7267_s28 = scalar_lea.hbm %s7985_s19, 2 }
  0xfb   :  { %p7266_p4 = scmp.ne.s32.totalorder %s7264_s25, %s7265_s23  ;;  %p7268_p5 = scmp.lt.s32.totalorder %s7264_s25, %s7985_s19 }
  0xfc   :  { %p7269_p6 = scmp.lt.s32.totalorder %s7267_s28, %s7265_s23 }
  0xfe   :  { %p7270_p7 = por %p7269_p6, %p7268_p5 }
 0x100   :  { %p7271_p8 = pnand %p7270_p7, %p7266_p4 }
 0x102   :  { %7274 = shalt.err (!%p7271_p8)
}
 0x103   :  { %471 = dma.hbm_to_vmem [thread:$0]  %s467_s16, 32, %s469_s12, [#allocation41]  }
 0x104   :  { %s7715_s30 = smov [#allocation2]   ;;  %s194_s1 = sshll.u32 %s7870_s4, 4  ;;  %s8043_s1 = int_to_ptr.hbm [resolvable:$true] %s194_s1 }
 0x105   :  { %s173_s21 = sshll.u32 %s7715_s30, 4  ;;  %s7287_s27 = sshra.s32 %s172_s17, 4  ;;  %s174_s21 = int_to_ptr.vmem [resolvable:$true] %s173_s21  ;;  %s7288_s27 = int_to_ptr.hbm [resolvable:$true] %s7287_s27 }
 0x106   :  { %s7289_s29 = scalar_lea.hbm %s7288_s27, 2  ;;  %s7291_s26 = scalar_lea.hbm %s7855_s8, 2 }
 0x107   :  { %p7290_p9 = scmp.ne.s32.totalorder %s7288_s27, %s7289_s29  ;;  %p7292_p10 = scmp.lt.s32.totalorder %s7288_s27, %s7855_s8 }
 0x108   :  { %p7293_p11 = scmp.lt.s32.totalorder %s7291_s26, %s7289_s29 }
 0x10a   :  { %p7294_p12 = por %p7293_p11, %p7292_p10 }
 0x10c   :  { %p7295_p13 = pnand %p7294_p12, %p7290_p9 }
 0x10e   :  { %7298 = shalt.err (!%p7295_p13)
}
 0x10f   :  { %176 = dma.hbm_to_vmem [thread:$0]  %s172_s17, 32, %s174_s21, [#allocation3]  }
 0x110   :  { %s9521_s19 = sld [smem:[#allocation80_spill]]  ;;  %s7716_s2 = smov [#allocation6]  }
 0x111   :  { %s196_s13 = sshll.u32 %s7716_s2, 4  ;;  %s7311_s10 = sshra.s32 %s8043_s1, 4  ;;  %s197_s13 = int_to_ptr.vmem [resolvable:$true] %s196_s13  ;;  %s7312_s10 = int_to_ptr.hbm [resolvable:$true] %s7311_s10 }
 0x112   :  { %s7313_s15 = scalar_lea.hbm %s7312_s10, 64  ;;  %s7315_s6 = scalar_lea.hbm %s7870_s4, 64 }
 0x113   :  { %p7314_p0 = scmp.ne.s32.totalorder %s7312_s10, %s7313_s15  ;;  %p7316_p1 = scmp.lt.s32.totalorder %s7312_s10, %s7870_s4 }
 0x114   :  { %p7317_p2 = scmp.lt.s32.totalorder %s7315_s6, %s7313_s15 }
 0x116   :  { %s218_s7 = sshll.u32 %s9521_s19, 4  ;;  %p7318_p3 = por %p7317_p2, %p7316_p1  ;;  %s219_s7 = int_to_ptr.hbm [resolvable:$true] %s218_s7 }
 0x118   :  { %p7319_p4 = pnand %p7318_p3, %p7314_p0 }
 0x11a   :  { %7322 = shalt.err (!%p7319_p4)
}
 0x11b   :  { %s7717_s8 = smov 128   ;;  %s9522_s20 = sld [smem:[#allocation81_spill]] }
 0x11c   :  { %s7718_s24 = smov 8   ;;  %s7719_s11 = smov [#allocation9]  }
 0x11d   :  { %202 = dma.hbm_to_vmem [thread:$0]  %s8043_s1, 1024, %s197_s13, [#allocation5], %s7717_s8, %s7717_s8, %s7718_s24  }
 0x11e   :  { %s220_s16 = sshll.u32 %s7719_s11, 4  ;;  %s7335_s4 = sshra.s32 %s219_s7, 4  ;;  %s221_s16 = int_to_ptr.vmem [resolvable:$true] %s220_s16  ;;  %s7336_s4 = int_to_ptr.hbm [resolvable:$true] %s7335_s4 }
 0x11f   :  { %s7337_s22 = scalar_lea.hbm %s7336_s4, 64  ;;  %s7339_s14 = scalar_lea.hbm %s9521_s19, 64 }
 0x120   :  { %p7338_p5 = scmp.ne.s32.totalorder %s7336_s4, %s7337_s22  ;;  %p7340_p6 = scmp.lt.s32.totalorder %s7336_s4, %s9521_s19 }
 0x121   :  { %s242_s18 = sshll.u32 %s9522_s20, 4  ;;  %p7341_p7 = scmp.lt.s32.totalorder %s7339_s14, %s7337_s22  ;;  %s8056_s18 = int_to_ptr.hbm [resolvable:$true] %s242_s18 }
 0x123   :  { %p7342_p8 = por %p7341_p7, %p7340_p6 }
 0x125   :  { %p7343_p9 = pnand %p7342_p8, %p7338_p5 }
 0x127   :  { %7346 = shalt.err (!%p7343_p9)
}
 0x128   :  { %s9523_s17 = sld [smem:[#allocation82_spill]]  ;;  %s7720_s12 = smov [#allocation12]  }
 0x129   :  { %226 = dma.hbm_to_vmem [thread:$0]  %s219_s7, 1024, %s221_s16, [#allocation8], %s7717_s8, %s7717_s8, %s7718_s24  }
 0x12a   :  { %s244_s25 = sshll.u32 %s7720_s12, 4  ;;  %s7359_s23 = sshra.s32 %s8056_s18, 4  ;;  %s245_s25 = int_to_ptr.vmem [resolvable:$true] %s244_s25  ;;  %s7360_s23 = int_to_ptr.hbm [resolvable:$true] %s7359_s23 }
 0x12b   :  { %s7361_s28 = scalar_lea.hbm %s7360_s23, 64  ;;  %s7363_s30 = scalar_lea.hbm %s9522_s20, 64 }
 0x12c   :  { %p7362_p10 = scmp.ne.s32.totalorder %s7360_s23, %s7361_s28  ;;  %p7364_p11 = scmp.lt.s32.totalorder %s7360_s23, %s9522_s20 }
 0x12d   :  { %p7365_p12 = scmp.lt.s32.totalorder %s7363_s30, %s7361_s28 }
 0x12e   :  { %s266_s0 = sshll.u32 %s9523_s17, 4  ;;  %s8064_s0 = int_to_ptr.hbm [resolvable:$true] %s266_s0 }
 0x12f   :  { %p7366_p13 = por %p7365_p12, %p7364_p11 }
 0x131   :  { %p7367_p0 = pnand %p7366_p13, %p7362_p10 }
 0x133   :  { %7370 = shalt.err (!%p7367_p0)
}
 0x134   :  { %s9524_s21 = sld [smem:[#allocation83_spill]]  ;;  %s7721_s1 = smov [#allocation15]  }
 0x135   :  { %250 = dma.hbm_to_vmem [thread:$0]  %s8056_s18, 1024, %s245_s25, [#allocation11], %s7717_s8, %s7717_s8, %s7718_s24  }
 0x136   :  { %s268_s27 = sshll.u32 %s7721_s1, 4  ;;  %s7383_s26 = sshra.s32 %s8064_s0, 4  ;;  %s269_s27 = int_to_ptr.vmem [resolvable:$true] %s268_s27  ;;  %s7384_s26 = int_to_ptr.hbm [resolvable:$true] %s7383_s26 }
 0x137   :  { %s7385_s19 = scalar_lea.hbm %s7384_s26, 64  ;;  %s7387_s2 = scalar_lea.hbm %s9523_s17, 64 }
 0x138   :  { %p7386_p1 = scmp.ne.s32.totalorder %s7384_s26, %s7385_s19  ;;  %p7388_p2 = scmp.lt.s32.totalorder %s7384_s26, %s9523_s17 }
 0x139   :  { %p7389_p3 = scmp.lt.s32.totalorder %s7387_s2, %s7385_s19 }
 0x13a   :  { %s290_s29 = sshll.u32 %s9524_s21, 4  ;;  %s8074_s29 = int_to_ptr.hbm [resolvable:$true] %s290_s29 }
 0x13b   :  { %p7390_p4 = por %p7389_p3, %p7388_p2 }
 0x13d   :  { %p7391_p5 = pnand %p7390_p4, %p7386_p1 }
 0x13f   :  { %7394 = shalt.err (!%p7391_p5)
}
 0x140   :  { %s9525_s13 = sld [smem:[#allocation84_spill]]  ;;  %s7722_s10 = smov [#allocation18]  }
 0x141   :  { %274 = dma.hbm_to_vmem [thread:$0]  %s8064_s0, 1024, %s269_s27, [#allocation14], %s7717_s8, %s7717_s8, %s7718_s24  }
 0x142   :  { %s292_s15 = sshll.u32 %s7722_s10, 4  ;;  %s7407_s6 = sshra.s32 %s8074_s29, 4  ;;  %s293_s15 = int_to_ptr.vmem [resolvable:$true] %s292_s15  ;;  %s7408_s6 = int_to_ptr.hbm [resolvable:$true] %s7407_s6 }
 0x143   :  { %s7409_s20 = scalar_lea.hbm %s7408_s6, 64  ;;  %s7411_s11 = scalar_lea.hbm %s9524_s21, 64 }
 0x144   :  { %p7410_p6 = scmp.ne.s32.totalorder %s7408_s6, %s7409_s20  ;;  %p7412_p7 = scmp.lt.s32.totalorder %s7408_s6, %s9524_s21 }
 0x145   :  { %p7413_p8 = scmp.lt.s32.totalorder %s7411_s11, %s7409_s20 }
 0x146   :  { %s314_s7 = sshll.u32 %s9525_s13, 4  ;;  %s8084_s7 = int_to_ptr.hbm [resolvable:$true] %s314_s7 }
 0x147   :  { %p7414_p9 = por %p7413_p8, %p7412_p7 }
 0x149   :  { %p7415_p10 = pnand %p7414_p9, %p7410_p6 }
 0x14b   :  { %7418 = shalt.err (!%p7415_p10)
}
 0x14c   :  { %s9526_s16 = sld [smem:[#allocation85_spill]]  ;;  %s7723_s18 = smov [#allocation21]  }
 0x14d   :  { %298 = dma.hbm_to_vmem [thread:$0]  %s8074_s29, 1024, %s293_s15, [#allocation17], %s7717_s8, %s7717_s8, %s7718_s24  }
 0x14e   :  { %s316_s4 = sshll.u32 %s7723_s18, 4  ;;  %s7431_s14 = sshra.s32 %s8084_s7, 4  ;;  %s317_s4 = int_to_ptr.vmem [resolvable:$true] %s316_s4  ;;  %s7432_s14 = int_to_ptr.hbm [resolvable:$true] %s7431_s14 }
 0x14f   :  { %s7433_s17 = scalar_lea.hbm %s7432_s14, 64  ;;  %s7435_s0 = scalar_lea.hbm %s9525_s13, 64 }
 0x150   :  { %p7434_p11 = scmp.ne.s32.totalorder %s7432_s14, %s7433_s17  ;;  %p7436_p12 = scmp.lt.s32.totalorder %s7432_s14, %s9525_s13 }
 0x151   :  { %p7437_p13 = scmp.lt.s32.totalorder %s7435_s0, %s7433_s17 }
 0x152   :  { %s338_s22 = sshll.u32 %s9526_s16, 4  ;;  %s8094_s22 = int_to_ptr.hbm [resolvable:$true] %s338_s22 }
 0x153   :  { %p7438_p0 = por %p7437_p13, %p7436_p12 }
 0x155   :  { %p7439_p1 = pnand %p7438_p0, %p7434_p11 }
 0x157   :  { %7442 = shalt.err (!%p7439_p1)
}
 0x158   :  { %s9527_s12 = sld [smem:[#allocation86_spill]]  ;;  %s7724_s23 = smov [#allocation24]  }
 0x159   :  { %322 = dma.hbm_to_vmem [thread:$0]  %s8084_s7, 1024, %s317_s4, [#allocation20], %s7717_s8, %s7717_s8, %s7718_s24  }
 0x15a   :  { %s340_s28 = sshll.u32 %s7724_s23, 4  ;;  %s7455_s30 = sshra.s32 %s8094_s22, 4  ;;  %s341_s28 = int_to_ptr.vmem [resolvable:$true] %s340_s28  ;;  %s7456_s30 = int_to_ptr.hbm [resolvable:$true] %s7455_s30 }
 0x15b   :  { %s7457_s21 = scalar_lea.hbm %s7456_s30, 64  ;;  %s7459_s1 = scalar_lea.hbm %s9526_s16, 64 }
 0x15c   :  { %p7458_p2 = scmp.ne.s32.totalorder %s7456_s30, %s7457_s21  ;;  %p7460_p3 = scmp.lt.s32.totalorder %s7456_s30, %s9526_s16 }
 0x15d   :  { %p7461_p4 = scmp.lt.s32.totalorder %s7459_s1, %s7457_s21 }
 0x15e   :  { %s362_s25 = sshll.u32 %s9527_s12, 4  ;;  %s8104_s25 = int_to_ptr.hbm [resolvable:$true] %s362_s25 }
 0x15f   :  { %p7462_p5 = por %p7461_p4, %p7460_p3 }
 0x161   :  { %p7463_p6 = pnand %p7462_p5, %p7458_p2 }
 0x163   :  { %7466 = shalt.err (!%p7463_p6)
}
 0x164   :  { %s9528_s27 = sld [smem:[#allocation87_spill]]  ;;  %s7725_s29 = smov [#allocation27]  }
 0x165   :  { %346 = dma.hbm_to_vmem [thread:$0]  %s8094_s22, 1024, %s341_s28, [#allocation23], %s7717_s8, %s7717_s8, %s7718_s24  }
 0x166   :  { %s364_s26 = sshll.u32 %s7725_s29, 4  ;;  %s7479_s2 = sshra.s32 %s8104_s25, 4  ;;  %s365_s26 = int_to_ptr.vmem [resolvable:$true] %s364_s26  ;;  %s7480_s2 = int_to_ptr.hbm [resolvable:$true] %s7479_s2 }
 0x167   :  { %s7481_s13 = scalar_lea.hbm %s7480_s2, 64  ;;  %s7483_s7 = scalar_lea.hbm %s9527_s12, 64 }
 0x168   :  { %p7482_p7 = scmp.ne.s32.totalorder %s7480_s2, %s7481_s13  ;;  %p7484_p8 = scmp.lt.s32.totalorder %s7480_s2, %s9527_s12 }
 0x169   :  { %p7485_p9 = scmp.lt.s32.totalorder %s7483_s7, %s7481_s13 }
 0x16a   :  { %s387_s19 = sshll.u32 %s9528_s27, 4  ;;  %s388_s19 = int_to_ptr.hbm [resolvable:$true] %s387_s19 }
 0x16b   :  { %p7486_p10 = por %p7485_p9, %p7484_p8 }
 0x16d   :  { %p7487_p11 = pnand %p7486_p10, %p7482_p7 }
 0x16f   :  { %7490 = shalt.err (!%p7487_p11)
}
 0x170   :  { %s9529_s10 = sld [smem:[#allocation88_spill]]  ;;  %s7726_s6 = smov [#allocation30]  }
 0x171   :  { %370 = dma.hbm_to_vmem [thread:$0]  %s8104_s25, 1024, %s365_s26, [#allocation26], %s7717_s8, %s7717_s8, %s7718_s24  }
 0x172   :  { %s389_s20 = sshll.u32 %s7726_s6, 4  ;;  %s7503_s11 = sshra.s32 %s388_s19, 4  ;;  %s390_s20 = int_to_ptr.vmem [resolvable:$true] %s389_s20  ;;  %s7504_s11 = int_to_ptr.hbm [resolvable:$true] %s7503_s11 }
 0x173   :  { %s7505_s16 = scalar_lea.hbm %s7504_s11, 2  ;;  %s7507_s18 = scalar_lea.hbm %s9528_s27, 2 }
 0x174   :  { %p7506_p12 = scmp.ne.s32.totalorder %s7504_s11, %s7505_s16  ;;  %p7508_p13 = scmp.lt.s32.totalorder %s7504_s11, %s9528_s27 }
 0x175   :  { %p7509_p0 = scmp.lt.s32.totalorder %s7507_s18, %s7505_s16 }
 0x176   :  { %s409_s15 = sshll.u32 %s9529_s10, 4  ;;  %s410_s15 = int_to_ptr.hbm [resolvable:$true] %s409_s15 }
 0x177   :  { %p7510_p1 = por %p7509_p0, %p7508_p13 }
 0x179   :  { %p7511_p2 = pnand %p7510_p1, %p7506_p12 }
 0x17b   :  { %7514 = shalt.err (!%p7511_p2)
}
 0x17c   :  { %392 = dma.hbm_to_vmem [thread:$0]  %s388_s19, 32, %s390_s20, [#allocation29]  }
 0x17d   :  { %s9530_s4 = sld [smem:[#allocation89_spill]]  ;;  %s7727_s22 = smov [#allocation33]  }
 0x17e   :  { %s411_s14 = sshll.u32 %s7727_s22, 4  ;;  %s7527_s0 = sshra.s32 %s410_s15, 4  ;;  %s412_s14 = int_to_ptr.vmem [resolvable:$true] %s411_s14  ;;  %s7528_s0 = int_to_ptr.hbm [resolvable:$true] %s7527_s0 }
 0x17f   :  { %s7529_s12 = scalar_lea.hbm %s7528_s0, 2  ;;  %s7531_s25 = scalar_lea.hbm %s9529_s10, 2 }
 0x180   :  { %p7530_p3 = scmp.ne.s32.totalorder %s7528_s0, %s7529_s12  ;;  %p7532_p4 = scmp.lt.s32.totalorder %s7528_s0, %s9529_s10 }
 0x181   :  { %p7533_p5 = scmp.lt.s32.totalorder %s7531_s25, %s7529_s12 }
 0x183   :  { %s431_s17 = sshll.u32 %s9530_s4, 4  ;;  %p7534_p6 = por %p7533_p5, %p7532_p4  ;;  %s432_s17 = int_to_ptr.hbm [resolvable:$true] %s431_s17 }
 0x185   :  { %p7535_p7 = pnand %p7534_p6, %p7530_p3 }
 0x187   :  { %7538 = shalt.err (!%p7535_p7)
}
 0x188   :  { %414 = dma.hbm_to_vmem [thread:$0]  %s410_s15, 32, %s412_s14, [#allocation32]  }
 0x189   :  { %s9531_s23 = sld [smem:[#allocation90_spill]]  ;;  %s7728_s30 = smov [#allocation36]  }
 0x18a   :  { %s433_s21 = sshll.u32 %s7728_s30, 4  ;;  %s7551_s1 = sshra.s32 %s432_s17, 4  ;;  %s434_s21 = int_to_ptr.vmem [resolvable:$true] %s433_s21  ;;  %s7552_s1 = int_to_ptr.hbm [resolvable:$true] %s7551_s1 }
 0x18b   :  { %s7553_s27 = scalar_lea.hbm %s7552_s1, 2  ;;  %s7555_s29 = scalar_lea.hbm %s9530_s4, 2 }
 0x18c   :  { %p7554_p8 = scmp.ne.s32.totalorder %s7552_s1, %s7553_s27  ;;  %p7556_p9 = scmp.lt.s32.totalorder %s7552_s1, %s9530_s4 }
 0x18d   :  { %p7557_p10 = scmp.lt.s32.totalorder %s7555_s29, %s7553_s27 }
 0x18f   :  { %s452_s28 = sshll.u32 %s9531_s23, 4  ;;  %p7558_p11 = por %p7557_p10, %p7556_p9  ;;  %s8128_s28 = int_to_ptr.hbm [resolvable:$true] %s452_s28 }
 0x191   :  { %p7559_p12 = pnand %p7558_p11, %p7554_p8 }
 0x193   :  { %7562 = shalt.err (!%p7559_p12)
}
 0x194   :  { %436 = dma.hbm_to_vmem [thread:$0]  %s432_s17, 32, %s434_s21, [#allocation35]  }
 0x195   :  { %s7729_s26 = smov [#allocation39]   ;;  %s479_s2 = sshll.u32 %s7995_s3, 4  ;;  %s480_s2 = int_to_ptr.hbm [resolvable:$true] %s479_s2 }
 0x196   :  { %s454_s19 = sshll.u32 %s7729_s26, 4  ;;  %s7575_s13 = sshra.s32 %s8128_s28, 4  ;;  %s455_s19 = int_to_ptr.vmem [resolvable:$true] %s454_s19  ;;  %s7576_s13 = int_to_ptr.hbm [resolvable:$true] %s7575_s13 }
 0x197   :  { %s7577_s7 = scalar_lea.hbm %s7576_s13, 64  ;;  %s7579_s10 = scalar_lea.hbm %s9531_s23, 64 }
 0x198   :  { %p7578_p13 = scmp.ne.s32.totalorder %s7576_s13, %s7577_s7  ;;  %p7580_p0 = scmp.lt.s32.totalorder %s7576_s13, %s9531_s23 }
 0x199   :  { %p7581_p1 = scmp.lt.s32.totalorder %s7579_s10, %s7577_s7 }
 0x19b   :  { %p7582_p2 = por %p7581_p1, %p7580_p0 }
 0x19d   :  { %p7583_p3 = pnand %p7582_p2, %p7578_p13 }
 0x19f   :  { %7586 = shalt.err (!%p7583_p3)
}
 0x1a0   :  { %460 = dma.hbm_to_vmem [thread:$0]  %s8128_s28, 1024, %s455_s19, [#allocation38], %s7717_s8, %s7717_s8, %s7718_s24  }
 0x1a1   :  { %s7730_s15 = smov [#allocation42]   ;;  %s7599_s20 = sshra.s32 %s480_s2, 4  ;;  %s7600_s20 = int_to_ptr.hbm [resolvable:$true] %s7599_s20 }
 0x1a2   :  { %s481_s6 = sshll.u32 %s7730_s15, 4  ;;  %s7601_s11 = scalar_lea.hbm %s7600_s20, 2  ;;  %s482_s6 = int_to_ptr.vmem [resolvable:$true] %s481_s6 }
 0x1a3   :  { %p7602_p4 = scmp.ne.s32.totalorder %s7600_s20, %s7601_s11  ;;  %s7603_s16 = scalar_lea.hbm %s7995_s3, 2 }
 0x1a4   :  { %p7604_p5 = scmp.lt.s32.totalorder %s7600_s20, %s7995_s3  ;;  %p7605_p6 = scmp.lt.s32.totalorder %s7603_s16, %s7601_s11 }
 0x1a6   :  { %p7606_p7 = por %p7605_p6, %p7604_p5 }
 0x1a8   :  { %p7607_p8 = pnand %p7606_p7, %p7602_p4 }
 0x1aa   :  { %7610 = shalt.err (!%p7607_p8)
}
 0x1ab   :  { %484 = dma.hbm_to_vmem [thread:$0]  %s480_s2, 32, %s482_s6, [#allocation41]  }
 0x1ac   :  { %7623 = dma.done.wait [#allocation3], 32  }
 0x1ad   :  { %7624 = vsyncadd [#allocation3], 4294967264 }
 0x1ae   :  { %7625 = dma.done.wait [#allocation5], 1056  }
 0x1af   :  { %7626 = vsyncadd [#allocation5], 4294966240 }
 0x1b0   :  { %7627 = dma.done.wait [#allocation8], 1056  }
 0x1b1   :  { %7628 = vsyncadd [#allocation8], 4294966240 }
 0x1b2   :  { %7629 = dma.done.wait [#allocation11], 1056  }
 0x1b3   :  { %7630 = vsyncadd [#allocation11], 4294966240 }
 0x1b4   :  { %7631 = dma.done.wait [#allocation14], 1056  }
 0x1b5   :  { %7632 = vsyncadd [#allocation14], 4294966240 }
 0x1b6   :  { %7633 = dma.done.wait [#allocation17], 1056  }
 0x1b7   :  { %7634 = vsyncadd [#allocation17], 4294966240 }
 0x1b8   :  { %7635 = dma.done.wait [#allocation20], 1056  }
 0x1b9   :  { %7636 = vsyncadd [#allocation20], 4294966240 }
 0x1ba   :  { %7637 = dma.done.wait [#allocation23], 1056  }
 0x1bb   :  { %7638 = vsyncadd [#allocation23], 4294966240 }
 0x1bc   :  { %7639 = dma.done.wait [#allocation26], 1056  }
 0x1bd   :  { %7640 = vsyncadd [#allocation26], 4294966240 }
 0x1be   :  { %7641 = dma.done.wait [#allocation29], 64  }
 0x1bf   :  { %7642 = vsyncadd [#allocation29], 4294967232 }
 0x1c0   :  { %7643 = dma.done.wait [#allocation32], 64  }
 0x1c1   :  { %7644 = vsyncadd [#allocation32], 4294967232 }
 0x1c2   :  { %7645 = dma.done.wait [#allocation35], 64  }
 0x1c3   :  { %7646 = vsyncadd [#allocation35], 4294967232 }
 0x1c4   :  { %7647 = dma.done.wait [#allocation38], 1056  }
 0x1c5   :  { %7648 = vsyncadd [#allocation38], 4294966240 }
 0x1c6   :  { %7649 = dma.done.wait [#allocation41], 64  }
 0x1c7   :  { %7650 = vsyncadd [#allocation41], 4294967232  ;;  %s9532_s3 = sld [smem:[#allocation59_spill]]  ;;  %vm608_vm0 = vcmask 1041408   ;;  %vm651_vm1 = vcmask 1042432   ;;  %vm601_vm2 = vcmask 15360  }
 0x1c8   :  { %s9533_s8 = sld [smem:[#allocation57_spill]]  ;;  %vm644_vm3 = vcmask 23552   ;;  %vm706_vm4 = vcmask 261120   ;;  %vm785_vm5 = vcmask 64512   ;;  %s7731_s30 = smov 120  }
 0x1c9   :  { %s9534_s18 = sld [smem:[#allocation61_spill]]  ;;  %s7732_s21 = smov 112  }
 0x1ca   :  { %s9535_s4 = sld [smem:[#allocation58_spill]]  ;;  %s7733_s1 = smov 104  }
 0x1cb   :  { %s9536_s22 = sld [smem:[#allocation66_spill]]  ;;  %s7734_s29 = smov 16  }
 0x1cc   :  { %s9537_s14 = sld [smem:[#allocation68_spill]]  ;;  %s7735_s26 = smov 24  }
 0x1cd   :  { %s9538_s17 = sld [smem:[#allocation70_spill]]  ;;  %v596_v0 = vld [vmem:[%s9532_s3] sm:$0x3] }
 0x1ce   :  { %v594_v1 = vld [vmem:[%s9533_s8] sm:$0xff]  ;;  %6343 = vmatpush.msk.msra.mxu0 %vm608_vm0, %v596_v0  ;;  %v595_v7 = vld [vmem:[%s9533_s8 + $0x8] sm:$0xff]  ;;  %s9539_s0 = sld [smem:[#allocation60_spill]] }
 0x1cf   :  { %v639_v2 = vld [vmem:[%s9534_s18] sm:$0x7]  ;;  %6344 = vmatmul.msk.f32.vlgmr.msra.gmra.mxu0 %vm601_vm2, %v594_v1  ;;  %s9540_s12 = sld [smem:[#allocation63_spill]] }
 0x1d0   :  { %6346 = vmatpush.msk.msra.mxu1 %vm651_vm1, %v639_v2  ;;  %v637_v3 = vld [vmem:[%s9535_s4] sm:$0xff]  ;;  %v638_v8 = vld [vmem:[%s9535_s4 + $0x8] sm:$0xff]  ;;  %s9541_s25 = sld [smem:[#allocation69_spill]] }
 0x1d1   :  { %6347 = vmatmul.msk.f32.vlgmr.msra.gmra.mxu1 %vm644_vm3, %v637_v3  ;;  %v688_v4 = vld [vmem:[%s9536_s22 + $0x18] sm:$0xff]  ;;  %v687_v9 = vld [vmem:[%s9536_s22 + $0x10] sm:$0xff]  ;;  %v686_v12 = vld [vmem:[%s9536_s22 + $0x8] sm:$0xff]  ;;  %s9542_s23 = sld [smem:[#allocation71_spill]] }
 0x1d2   :  { %v693_v5 = vld [vmem:[%s9537_s14 + $0x18] sm:$0xff]  ;;  %725 = vmatpush.msra.mxu2 %v688_v4  ;;  %v692_v10 = vld [vmem:[%s9537_s14 + $0x10] sm:$0xff]  ;;  %v691_v13 = vld [vmem:[%s9537_s14 + $0x8] sm:$0xff]  ;;  %s9543_s28 = sld [smem:[#allocation67_spill]] }
 0x1d3   :  { %v698_v6 = vld [vmem:[%s9538_s17 + $0x18] sm:$0xff]  ;;  %749 = vmatpush.msrb.mxu1 %v693_v5  ;;  %6595 = vmatpush.msra.mxu3 %v693_v5  ;;  %v697_v11 = vld [vmem:[%s9538_s17 + $0x10] sm:$0xff]  ;;  %v696_v14 = vld [vmem:[%s9538_s17 + $0x8] sm:$0xff]  ;;  %s9546_s27 = sld [smem:[#allocation72_spill]] }
 0x1d4   :  { %773 = vmatpush.msrb.mxu0 %v698_v6  ;;  %726 = vmatpush.msra.mxu2 %v687_v9  ;;  %v685_v15 = vld [vmem:[%s9536_s22] sm:$0xff]  ;;  %s9547_s19 = sld [smem:[#allocation73_spill]] }
 0x1d5   :  { %750 = vmatpush.msrb.mxu1 %v692_v10  ;;  %6596 = vmatpush.msra.mxu3 %v692_v10  ;;  %v690_v16 = vld [vmem:[%s9537_s14] sm:$0xff]  ;;  %s9548_s2 = sld [smem:[#allocation78_spill]] }
 0x1d6   :  { %774 = vmatpush.msrb.mxu0 %v697_v11  ;;  %727 = vmatpush.msra.mxu2 %v686_v12  ;;  %v695_v17 = vld [vmem:[%s9538_s17] sm:$0xff]  ;;  %s9549_s13 = sld [smem:[#allocation79_spill]] }
 0x1d7   :  { %6345 = vmatmul.msk.f32.gmra.mxu0 %vm601_vm2, %v595_v7  ;;  %751 = vmatpush.msrb.mxu1 %v691_v13  ;;  %v6685_v18 = vld [vmem:[%s9539_s0] ss:$0 sm:$0xff]  ;;  %s9550_s7 = sld [smem:[#allocation74_spill]] }
 0x1d8   :  { %775 = vmatpush.msrb.mxu0 %v696_v14  ;;  %6597 = vmatpush.msra.mxu3 %v691_v13  ;;  %v593_v19 = vld [vmem:[%s9540_s12] sm:$0xff]  ;;  %s9551_s10 = sld [smem:[#allocation75_spill]] }
 0x1d9   :  { %6348 = vmatmul.msk.f32.gmra.mxu1 %vm644_vm3, %v638_v8  ;;  %728 = vmatpush.msra.mxu2 %v685_v15  ;;  %v6687_v28 = vld [vmem:[%s9541_s25] ss:$0 sm:$0xff]  ;;  %s9552_s15 = sld [smem:[#allocation76_spill]] }
 0x1da   :  { %752 = vmatpush.msrb.mxu1 %v690_v16  ;;  %776 = vmatpush.msrb.mxu0 %v695_v17  ;;  %v8188_v29 = vld [vmem:[%s9542_s23] ss:$0 sm:$0xff]  ;;  %s9553_s6 = sld [smem:[#allocation77_spill]] }
 0x1db   :  { %6598 = vmatpush.msra.mxu3 %v690_v16  ;;  %v6689_v34 = vld [vmem:[%s9543_s28] ss:$0 sm:$0xff]  ;;  %s9558_s20 = sld [smem:[#allocation62_spill]] }
 0x24c   :  { %v629_v20 = vpop.f32.mrf.mxu0 }
 0x24d   :  { %v630_v21 = vadd.f32 %v6685_v18, %v629_v20 }
 0x24e   :  { %v8182_v26 = vpop.f32.mrf.mxu1 }
 0x24f   :  { %v8166_v22 = vadd.f32 %v630_v21, %v593_v19 }
 0x251   :  { %6349 = vmatmul.msk.f32.vlgmr.msra.gmra.mxu2 %vm706_vm4, %v8166_v22  ;;  %6351 = vmatmul.msk.f32.vlgmr.msrb.gmra.mxu1 %vm706_vm4, %v8166_v22 }
 0x252   :  { %6353 = vmatmul.msk.f32.vlgmr.msrb.gmra.mxu0 %vm706_vm4, %v8166_v22 }
 0x254   :  { %v632_v23 = vpop.f32.mrf.mxu0 }
 0x255   :  { %v633_v24 = vadd.f32 %v6685_v18, %v632_v23 }
 0x256   :  { %v8184_v27 = vpop.f32.mrf.mxu1 }
 0x257   :  { %v8174_v25 = vadd.f32 %v633_v24, %v593_v19 }
 0x259   :  { %6350 = vmatmul.msk.f32.gmra.mxu2 %vm706_vm4, %v8174_v25  ;;  %6352 = vmatmul.msk.f32.vlgmr.msra.gmra.mxu3 %vm706_vm4, %v8174_v25 }
 0x25a   :  { %6354 = vmatmul.msk.f32.gmra.mxu0 %vm706_vm4, %v8174_v25 }
 0x2ce   :  { %v754_v30 = vpop.f32.mrf.mxu1 }
 0x2cf   :  { %v755_v31 = vadd.f32 %v6687_v28, %v754_v30  ;;  %v778_v32 = vpop.f32.mrf.mxu0 }
 0x2d0   :  { %v8191_v33 = vadd.f32 %v8188_v29, %v778_v32 }
 0x2d1   :  { %861 = vrot.lane.b32.xlu1 %v755_v31, %s7731_s30  ;;  %6355 = vmatpush.xpose.msk.msra.mxu1 %vm785_vm5, %v755_v31 }
 0x2d2   :  { %854 = vmatpush.msrb.mxu2 %v8191_v33 }
 0x2d4   :  { %v730_v35 = vpop.f32.mrf.mxu2 }
 0x2d5   :  { %v731_v36 = vadd.f32 %v6689_v34, %v730_v35 }
 0x2d7   :  { %v784_v37 = vmul.f32 0.35355338, %v731_v36  ;;  %v8227_v12 = vpop.f32.mrf.mxu0 }
 0x2d9   :  { %940 = vrot.lane.b32.xlu1 %v755_v31, %s7732_s21  ;;  %859 = vrot.lane.b32.xlu2 %v784_v37, %s7731_s30 }
 0x2da   :  { %6356 = vmatmul.msk.f32.vlgmr.msra.gmra.mxu1 %vm785_vm5, %v784_v37 }
 0x2dc   :  { %v733_v38 = vpop.f32.mrf.mxu2  ;;  %v757_v39 = vpop.f32.mrf.mxu3 }
 0x2dd   :  { %v734_v40 = vadd.f32 %v6689_v34, %v733_v38  ;;  %v758_v41 = vadd.f32 %v6687_v28, %v757_v39 }
 0x2df   :  { %v1111_v42 = vmul.f32 0.35355338, %v734_v40 }
 0x2e1   :  { %1016 = vrot.lane.b32.xlu1 %v784_v37, %s7733_s1  ;;  %938 = vrot.lane.b32.xlu2 %v784_v37, %s7732_s21 }
 0x2e9   :  { %1266 = vrot.lane.b32.xlu2 %v758_v41, %s7732_s21  ;;  %1264 = vrot.lane.b32.xlu1 %v1111_v42, %s7732_s21 }
 0x2f1   :  { %1187 = vrot.lane.b32.xlu2 %v758_v41, %s7731_s30  ;;  %1185 = vrot.lane.b32.xlu1 %v1111_v42, %s7731_s30 }
 0x2f9   :  { %1344 = vrot.lane.b32.xlu2 %v758_v41, %s7733_s1 }
 0x333   :  { %v860_v44 = vpop.permute.xlu2 %859 }
 0x33b   :  { %v939_v55 = vpop.permute.xlu2 %938 }
 0x343   :  { %v862_v43 = vpop.permute.xlu1 %861  ;;  %v1267_v57 = vpop.permute.xlu2 %1266 }
 0x344   :  { %6358 = vmatpush.xpose.msk.msrb.mxu3 %vm785_vm5, %v862_v43 }
 0x347   :  { %6359 = vmatmul.msk.f32.vlgmr.msrb.gmra.mxu3 %vm785_vm5, %v860_v44 }
 0x34b   :  { %v941_v45 = vpop.permute.xlu1 %940  ;;  %v1188_v1 = vpop.permute.xlu2 %1187 }
 0x34c   :  { %6361 = vmatpush.xpose.msk.msra.mxu2 %vm785_vm5, %v941_v45 }
 0x353   :  { %v1017_v62 = vpop.permute.xlu1 %1016  ;;  %v1345_v9 = vpop.permute.xlu2 %1344 }
 0x357   :  { %v809_v46 = vpop.f32.mrf.mxu1 }
 0x358   :  { %v812_v47 = vsel %vm785_vm5, %v809_v46, -inf }
 0x359   :  { %813 = vmax.xlane.f32.xlu0 %v812_v47 }
 0x35b   :  { %v1265_v8 = vpop.permute.xlu1 %1264 }
 0x363   :  { %v1186_v10 = vpop.permute.xlu1 %1185 }
 0x3ca   :  { %v884_v48 = vpop.f32.mrf.mxu3 }
 0x3cb   :  { %v887_v49 = vsel %vm785_vm5, %v884_v48, -inf }
 0x3cc   :  { %v814_v50 = vpop.xlane.xlu0 %813  ;;  %888 = vmax.xlane.f32.xlu1 %v887_v49 }
 0x3cd   :  { %v815_v51 = vsub.f32 %v809_v46, %v814_v50 }
 0x3cf   :  { %v816_v52 = vmul.f32 1.442695, %v815_v51 }
 0x3d1   :  { %6740 = vpow2.f32 %v816_v52 }
 0x3d7   :  { %v6741_v53 = vpop.eup %6740 }
 0x3d8   :  { %v818_v54 = vsel %vm785_vm5, %v6741_v53, 0.0 }
 0x3d9   :  { %819 = vadd.xlane.f32.xlu0 %v818_v54 }
 0x3ed   :  { %1018 = vrot.lane.b32.xlu0 %v755_v31, %s7733_s1 }
 0x3f5   :  { %1342 = vrot.lane.b32.xlu0 %v1111_v42, %s7733_s1 }
 0x43f   :  { %v889_v13 = vpop.xlane.xlu1 %888 }
 0x440   :  { %v890_v14 = vsub.f32 %v884_v48, %v889_v13 }
 0x442   :  { %v891_v18 = vmul.f32 1.442695, %v890_v14 }
 0x44c   :  { %v820_v56 = vpop.xlane.xlu0 %819 }
 0x44d   :  { %6742 = vrcp.f32 %v820_v56  ;;  %v832_v61 = vand.u32 2147483648, %v820_v56  ;;  %v830_v0 = vand.u32 2147483647, %v820_v56  ;;  %vm826_vm7 = vweird.f32 %v820_v56 }
 0x44e   :  { %6744 = vpow2.f32 %v891_v18 }
 0x44f   :  { %v833_v3 = vor.u32 1.1754944e-38, %v832_v61  ;;  %vm831_vm9 = vcmp.eq.f32.partialorder %v830_v0, 8.507059e+37 }
 0x453   :  { %v6743_v58 = vpop.eup %6742 }
 0x454   :  { %v822_v59 = vmul.f32 %v6743_v58, %v820_v56  ;;  %vm827_vm6 = vweird.f32 %v6743_v58  ;;  %v6745_v24 = vpop.eup %6744 }
 0x455   :  { %vm828_vm8 = vmor %vm826_vm7, %vm827_vm6  ;;  %v893_v28 = vsel %vm785_vm5, %v6745_v24, 0.0 }
 0x456   :  { %v823_v60 = vsub.f32 1.0, %v822_v59 }
 0x458   :  { %v824_v63 = vmul.f32 %v6743_v58, %v823_v60 }
 0x45a   :  { %v825_v2 = vadd.f32 %v6743_v58, %v824_v63 }
 0x45c   :  { %v829_v4 = vsel %vm828_vm8, %v6743_v58, %v825_v2 }
 0x45d   :  { %v834_v5 = vsel %vm831_vm9, %v833_v3, %v829_v4 }
 0x45e   :  { %v835_v6 = vmul.f32 %v6741_v53, %v834_v5 }
 0x45f   :  { %v1019_v7 = vpop.permute.xlu0 %1018 }
 0x460   :  { %6357 = vmatmul.msk.f32.vlgmr.msrb.gmra.mxu2 %vm785_vm5, %v835_v6  ;;  %6364 = vmatpush.xpose.msk.msra.mxu0 %vm785_vm5, %v1019_v7  ;;  %v782_v7 = vadd.f32 %v8188_v29, %v8227_v12 }
 0x461   :  { %6367 = vmatpush.xpose.msk.msrb.mxu2 %vm785_vm5, %v758_v41 }
 0x463   :  { %6365 = vmatmul.msk.f32.vlgmr.msra.gmra.mxu0 %vm785_vm5, %v1017_v62 }
 0x464   :  { %6370 = vmatpush.xpose.msk.msrb.mxu0 %vm785_vm5, %v1188_v1 }
 0x467   :  { %v1343_v11 = vpop.permute.xlu0 %1342 }
 0x468   :  { %6376 = vmatpush.xpose.msk.msra.mxu0 %vm785_vm5, %v1345_v9  ;;  %6362 = vmatmul.msk.f32.vlgmr.msra.gmra.mxu2 %vm785_vm5, %v939_v55 }
 0x469   :  { %6373 = vmatpush.xpose.msk.msra.mxu2 %vm785_vm5, %v1267_v57 }
 0x46b   :  { %6371 = vmatmul.msk.f32.vlgmr.msrb.gmra.mxu0 %vm785_vm5, %v1186_v10 }
 0x470   :  { %6368 = vmatmul.msk.f32.vlgmr.msrb.gmra.mxu2 %vm785_vm5, %v1111_v42 }
 0x473   :  { %6377 = vmatmul.msk.f32.vlgmr.msra.gmra.mxu0 %vm785_vm5, %v1343_v11 }
 0x478   :  { %6374 = vmatmul.msk.f32.vlgmr.msra.gmra.mxu2 %vm785_vm5, %v1265_v8 }
 0x4e0   :  { %v1041_v15 = vpop.f32.mrf.mxu0 }
 0x4e1   :  { %v1044_v16 = vsel %vm785_vm5, %v1041_v15, -inf }
 0x4e2   :  { %1045 = vmax.xlane.f32.xlu0 %v1044_v16 }
 0x4e3   :  { %v8230_v17 = vpop.f32.mrf.mxu2 }
 0x4e8   :  { %v1210_v19 = vpop.f32.mrf.mxu0 }
 0x4e9   :  { %v1213_v20 = vsel %vm785_vm5, %v1210_v19, -inf }
 0x4ea   :  { %1214 = vmax.xlane.f32.xlu1 %v1213_v20 }
 0x4eb   :  { %v8233_v21 = vpop.f32.mrf.mxu2 }
 0x4ec   :  { %v966_v23 = vsel %vm785_vm5, %v8233_v21, -inf }
 0x4ed   :  { %967 = vmax.xlane.f32.xlu2 %v966_v23 }
 0x4f0   :  { %v1367_v32 = vpop.f32.mrf.mxu0 }
 0x4f1   :  { %v1370_v34 = vsel %vm785_vm5, %v1367_v32, -inf }
 0x4f2   :  { %894 = vadd.xlane.f32.xlu1 %v893_v28 }
 0x4f3   :  { %v1135_v30 = vpop.f32.mrf.mxu2 }
 0x4f4   :  { %v1138_v31 = vsel %vm785_vm5, %v1135_v30, -inf }
 0x4f5   :  { %1139 = vmax.xlane.f32.xlu2 %v1138_v31 }
 0x4fb   :  { %v1289_v52 = vpop.f32.mrf.mxu2 }
 0x4fc   :  { %v1292_v57 = vsel %vm785_vm5, %v1289_v52, -inf }
 0x4fd   :  { %1371 = vmax.xlane.f32.xlu2 %v1370_v34 }
 0x50b   :  { %912 = vrot.lane.b32.xlu1 %v8191_v33, %s7731_s30 }
 0x555   :  { %v1046_v35 = vpop.xlane.xlu0 %1045 }
 0x556   :  { %v1047_v36 = vsub.f32 %v1041_v15, %v1046_v35 }
 0x558   :  { %v1048_v37 = vmul.f32 1.442695, %v1047_v36 }
 0x55a   :  { %6746 = vpow2.f32 %v1048_v37 }
 0x55d   :  { %v1215_v38 = vpop.xlane.xlu1 %1214 }
 0x55e   :  { %v1216_v39 = vsub.f32 %v1210_v19, %v1215_v38 }
 0x560   :  { %v8242_v40 = vpop.eup %6746  ;;  %v1217_v41 = vmul.f32 1.442695, %v1216_v39  ;;  %v968_v42 = vpop.xlane.xlu2 %967 }
 0x561   :  { %v1050_v43 = vsel %vm785_vm5, %v8242_v40, 0.0  ;;  %v969_v8 = vsub.f32 %v8233_v21, %v968_v42 }
 0x562   :  { %6748 = vpow2.f32 %v1217_v41  ;;  %1051 = vadd.xlane.f32.xlu2 %v1050_v43 }
 0x563   :  { %v970_v9 = vmul.f32 1.442695, %v969_v8 }
 0x565   :  { %v895_v44 = vpop.xlane.xlu1 %894 }
 0x566   :  { %6750 = vrcp.f32 %v895_v44  ;;  %v907_v61 = vand.u32 2147483648, %v895_v44  ;;  %vm901_vm11 = vweird.f32 %v895_v44  ;;  %v905_v63 = vand.u32 2147483647, %v895_v44 }
 0x568   :  { %v8246_v45 = vpop.eup %6748  ;;  %v1140_v46 = vpop.xlane.xlu2 %1139  ;;  %v908_v1 = vor.u32 1.1754944e-38, %v907_v61  ;;  %vm906_vm13 = vcmp.eq.f32.partialorder %v905_v63, 8.507059e+37 }
 0x569   :  { %v1141_v47 = vsub.f32 %v1135_v30, %v1140_v46  ;;  %v1219_v48 = vsel %vm785_vm5, %v8246_v45, 0.0 }
 0x56a   :  { %1220 = vadd.xlane.f32.xlu0 %v1219_v48 }
 0x56b   :  { %v1142_v49 = vmul.f32 1.442695, %v1141_v47 }
 0x56c   :  { %v6751_v50 = vpop.eup %6750 }
 0x56d   :  { %v897_v51 = vmul.f32 %v6751_v50, %v895_v44  ;;  %6752 = vpow2.f32 %v1142_v49  ;;  %vm902_vm10 = vweird.f32 %v6751_v50 }
 0x56e   :  { %vm903_vm12 = vmor %vm901_vm11, %vm902_vm10 }
 0x56f   :  { %v898_v53 = vsub.f32 1.0, %v897_v51 }
 0x570   :  { %v1372_v54 = vpop.xlane.xlu2 %1371 }
 0x571   :  { %v899_v55 = vmul.f32 %v6751_v50, %v898_v53  ;;  %v1373_v56 = vsub.f32 %v1367_v32, %v1372_v54 }
 0x572   :  { %1293 = vmax.xlane.f32.xlu0 %v1292_v57 }
 0x573   :  { %v8251_v58 = vpop.eup %6752  ;;  %v900_v59 = vadd.f32 %v6751_v50, %v899_v55  ;;  %v1374_v60 = vmul.f32 1.442695, %v1373_v56 }
 0x574   :  { %v1144_v62 = vsel %vm785_vm5, %v8251_v58, 0.0 }
 0x575   :  { %6754 = vpow2.f32 %v1374_v60  ;;  %1145 = vadd.xlane.f32.xlu1 %v1144_v62  ;;  %v904_v0 = vsel %vm903_vm12, %v6751_v50, %v900_v59 }
 0x576   :  { %v909_v2 = vsel %vm906_vm13, %v908_v1, %v904_v0  ;;  %6756 = vpow2.f32 %v970_v9 }
 0x577   :  { %v910_v6 = vmul.f32 %v6745_v24, %v909_v2 }
 0x57b   :  { %v8255_v3 = vpop.eup %6754 }
 0x57c   :  { %v1376_v4 = vsel %vm785_vm5, %v8255_v3, 0.0  ;;  %v6757_v10 = vpop.eup %6756 }
 0x57d   :  { %v913_v5 = vpop.permute.xlu1 %912  ;;  %1377 = vadd.xlane.f32.xlu2 %v1376_v4  ;;  %v972_v11 = vsel %vm785_vm5, %v6757_v10, 0.0 }
 0x57e   :  { %933 = vmatpush.msrb.mxu1 %v913_v5 }
 0x57f   :  { %6360 = vmatmul.msk.f32.vlgmr.msrb.gmra.mxu1 %vm785_vm5, %v910_v6 }
 0x586   :  { %990 = vrot.lane.b32.xlu0 %v8191_v33, %s7732_s21 }
 0x58e   :  { %1316 = vrot.lane.b32.xlu1 %v782_v7, %s7732_s21 }
 0x5b0   :  { %973 = vadd.xlane.f32.xlu0 %v972_v11 }
 0x5c4   :  { %1238 = vrot.lane.b32.xlu0 %v782_v7, %s7731_s30 }
 0x5cc   :  { %1394 = vrot.lane.b32.xlu0 %v782_v7, %s7733_s1 }
 0x5dd   :  { %v8269_v13 = vpop.xlane.xlu0 %1220 }
 0x5e5   :  { %v1294_v14 = vpop.xlane.xlu0 %1293 }
 0x5e6   :  { %v1295_v15 = vsub.f32 %v1289_v52, %v1294_v14  ;;  %v1052_v52 = vpop.xlane.xlu2 %1051 }
 0x5e7   :  { %v1064_v63 = vand.u32 2147483648, %v1052_v52  ;;  %vm1058_vm10 = vweird.f32 %v1052_v52  ;;  %v1062_v0 = vand.u32 2147483647, %v1052_v52 }
 0x5e8   :  { %v1296_v16 = vmul.f32 1.442695, %v1295_v15  ;;  %v1146_v20 = vpop.xlane.xlu1 %1145  ;;  %v1231_v15 = vand.u32 2147483647, %v8269_v13 }
 0x5e9   :  { %v1158_v42 = vand.u32 2147483648, %v1146_v20  ;;  %vm1152_vm6 = vweird.f32 %v1146_v20  ;;  %v1156_v44 = vand.u32 2147483647, %v1146_v20  ;;  %vm1063_vm12 = vcmp.eq.f32.partialorder %v1062_v0, 8.507059e+37 }
 0x5ea   :  { %6758 = vpow2.f32 %v1296_v16 }
 0x5eb   :  { %6760 = vrcp.f32 %v1146_v20  ;;  %v1159_v49 = vor.u32 1.1754944e-38, %v1158_v42  ;;  %vm1157_vm8 = vcmp.eq.f32.partialorder %v1156_v44, 8.507059e+37 }
 0x5f0   :  { %v8271_v29 = vpop.eup %6758  ;;  %v8282_v57 = vpop.xlane.xlu2 %1377 }
 0x5f1   :  { %v1298_v12 = vsel %vm785_vm5, %v8271_v29, 0.0  ;;  %v6761_v23 = vpop.eup %6760 }
 0x5f2   :  { %1299 = vadd.xlane.f32.xlu2 %v1298_v12  ;;  %v1148_v24 = vmul.f32 %v6761_v23, %v1146_v20  ;;  %vm1153_vm1 = vweird.f32 %v6761_v23 }
 0x5f3   :  { %vm1154_vm7 = vmor %vm1152_vm6, %vm1153_vm1 }
 0x5f4   :  { %v1149_v30 = vsub.f32 1.0, %v1148_v24 }
 0x5f6   :  { %v1150_v35 = vmul.f32 %v6761_v23, %v1149_v30 }
 0x5f8   :  { %v991_v18 = vpop.permute.xlu0 %990 }
 0x5f9   :  { %1011 = vmatpush.msra.mxu3 %v991_v18 }
 0x5fb   :  { %1180 = vmatpush.msrb.mxu3 %v782_v7  ;;  %v1065_v7 = vor.u32 1.1754944e-38, %v1064_v63 }
 0x5fc   :  { %v935_v19 = vpop.f32.mrf.mxu1 }
 0x5fd   :  { %1095 = vrot.lane.b32.xlu1 %v935_v19, %s7718_s24 }
 0x600   :  { %v1317_v48 = vpop.permute.xlu1 %1316 }
 0x60a   :  { %1068 = vrot.lane.b32.xlu2 %v8191_v33, %s7733_s1  ;;  %v1151_v33 = vadd.f32 %v6761_v23, %v1150_v35  ;;  %v1390_v35 = vand.u32 2147483648, %v8282_v57 }
 0x60c   :  { %v1155_v47 = vsel %vm1154_vm7, %v6761_v23, %v1151_v33 }
 0x60d   :  { %v1160_v50 = vsel %vm1157_vm8, %v1159_v49, %v1155_v47  ;;  %vm1384_vm8 = vweird.f32 %v8282_v57 }
 0x60e   :  { %v1161_v51 = vmul.f32 %v8251_v58, %v1160_v50 }
 0x623   :  { %v974_v21 = vpop.xlane.xlu0 %973 }
 0x624   :  { %6762 = vrcp.f32 %v974_v21  ;;  %v986_v34 = vand.u32 2147483648, %v974_v21  ;;  %v984_v37 = vand.u32 2147483647, %v974_v21  ;;  %vm980_vm15 = vweird.f32 %v974_v21 }
 0x625   :  { %6764 = vrcp.f32 %v1052_v52 }
 0x626   :  { %v987_v39 = vor.u32 1.1754944e-38, %v986_v34  ;;  %vm985_vm2 = vcmp.eq.f32.partialorder %v984_v37, 8.507059e+37  ;;  %6766 = vrcp.f32 %v8269_v13 }
 0x627   :  { %6768 = vrcp.f32 %v8282_v57 }
 0x62a   :  { %v6763_v28 = vpop.eup %6762 }
 0x62b   :  { %v976_v31 = vmul.f32 %v6763_v28, %v974_v21  ;;  %vm981_vm14 = vweird.f32 %v6763_v28  ;;  %v6765_v53 = vpop.eup %6764 }
 0x62c   :  { %vm982_vm0 = vmor %vm980_vm15, %vm981_vm14  ;;  %v1054_v54 = vmul.f32 %v6765_v53, %v1052_v52  ;;  %v6767_v55 = vpop.eup %6766  ;;  %vm1059_vm9 = vweird.f32 %v6765_v53  ;;  %vm1227_vm14 = vweird.f32 %v8269_v13  ;;  %v701_v52 = vld [vmem:[%s9546_s27 + $0x8] sm:$0xff] }
 0x62d   :  { %v977_v32 = vsub.f32 1.0, %v976_v31  ;;  %v1223_v59 = vmul.f32 %v6767_v55, %v8269_v13  ;;  %v6769_v58 = vpop.eup %6768  ;;  %vm1060_vm11 = vmor %vm1058_vm10, %vm1059_vm9  ;;  %vm1228_vm13 = vweird.f32 %v6767_v55 }
 0x62e   :  { %v1055_v56 = vsub.f32 1.0, %v1054_v54  ;;  %v1380_v6 = vmul.f32 %v6769_v58, %v8282_v57  ;;  %vm8290_vm15 = vmor %vm1227_vm14, %vm1228_vm13  ;;  %vm1109_vm13 = vcmask 195584  }
 0x62f   :  { %v978_v36 = vmul.f32 %v6763_v28, %v977_v32  ;;  %v1224_v61 = vsub.f32 1.0, %v1223_v59 }
 0x630   :  { %v1056_v60 = vmul.f32 %v6765_v53, %v1055_v56  ;;  %v1381_v11 = vsub.f32 1.0, %v1380_v6 }
 0x631   :  { %v979_v38 = vadd.f32 %v6763_v28, %v978_v36  ;;  %v1225_v2 = vmul.f32 %v6767_v55, %v1224_v61 }
 0x632   :  { %v1057_v62 = vadd.f32 %v6765_v53, %v1056_v60  ;;  %v1382_v23 = vmul.f32 %v6769_v58, %v1381_v11 }
 0x633   :  { %v983_v41 = vsel %vm982_vm0, %v6763_v28, %v979_v38  ;;  %v1226_v8 = vadd.f32 %v6767_v55, %v1225_v2  ;;  %vm1232_vm0 = vcmp.eq.f32.partialorder %v1231_v15, 8.507059e+37  ;;  %v1388_v38 = vand.u32 2147483647, %v8282_v57  ;;  %v6690_v2 = vld [vmem:[%s9547_s19] ss:$0 sm:$0xff] }
 0x634   :  { %v988_v43 = vsel %vm985_vm2, %v987_v39, %v983_v41  ;;  %v1061_v5 = vsel %vm1060_vm11, %v6765_v53, %v1057_v62  ;;  %v1383_v34 = vadd.f32 %v6769_v58, %v1382_v23  ;;  %vm1385_vm2 = vweird.f32 %v6769_v58  ;;  %v700_v53 = vld [vmem:[%s9546_s27] sm:$0xff] }
 0x635   :  { %v989_v46 = vmul.f32 %v6757_v10, %v988_v43  ;;  %v1066_v9 = vsel %vm1063_vm12, %v1065_v7, %v1061_v5  ;;  %v1233_v10 = vand.u32 2147483648, %v8269_v13  ;;  %v1230_v20 = vsel %vm8290_vm15, %v6767_v55, %v1226_v8  ;;  %vm1386_vm10 = vmor %vm1384_vm8, %vm1385_vm2 }
 0x636   :  { %v1239_v4 = vpop.permute.xlu0 %1238  ;;  %v1067_v19 = vmul.f32 %v8242_v40, %v1066_v9  ;;  %v1387_v41 = vsel %vm1386_vm10, %v6769_v58, %v1383_v34  ;;  %v1391_v43 = vor.u32 1.1754944e-38, %v1390_v35  ;;  %vm1389_vm11 = vcmp.eq.f32.partialorder %v1388_v38, 8.507059e+37  ;;  %v1528_v34 = vld [vmem:[%s9548_s2 + $0x10] sm:$0xff]  ;;  %v1526_v35 = vld [vmem:[%s9548_s2] sm:$0xff] }
 0x637   :  { %6363 = vmatmul.msk.f32.vlgmr.msra.gmra.mxu3 %vm785_vm5, %v989_v46  ;;  %v1234_v21 = vor.u32 1.1754944e-38, %v1233_v10  ;;  %vm1107_vm12 = vcmask 130048   ;;  %v7736_v9 = vmov 32.0   ;;  %vm1573_vm8 = vcmask 523264  }
 0x638   :  { %1337 = vmatpush.msra.mxu3 %v1317_v48  ;;  %v1392_v44 = vsel %vm1389_vm11, %v1391_v43, %v1387_v41  ;;  %v1537_v43 = vld [vmem:[%s9549_s13 + $0x30] sm:$0xff] }
 0x639   :  { %v1235_v32 = vsel %vm1232_vm0, %v1234_v21, %v1230_v20 }
 0x63a   :  { %v1236_v37 = vmul.f32 %v8246_v45, %v1235_v32  ;;  %v1393_v45 = vmul.f32 %v8255_v3, %v1392_v44  ;;  %v703_v3 = vld [vmem:[%s9546_s27 + $0x18] sm:$0xff] }
 0x63b   :  { %1454 = vmatpush.msrb.mxu2 %v703_v3  ;;  %v1529_v32 = vld [vmem:[%s9548_s2 + $0x18] sm:$0xff]  ;;  %v6691_v3 = vld [vmem:[%s9550_s7] ss:$0 sm:$0xff] }
 0x63e   :  { %v1395_v28 = vpop.permute.xlu0 %1394 }
 0x63f   :  { %6369 = vmatmul.msk.f32.vlgmr.msrb.gmra.mxu3 %vm785_vm5, %v1161_v51  ;;  %v702_v51 = vld [vmem:[%s9546_s27 + $0x10] sm:$0xff] }
 0x640   :  { %1455 = vmatpush.msrb.mxu2 %v702_v51  ;;  %1559 = vmatpush.msrb.mxu3 %v1529_v32  ;;  %v1534_v51 = vld [vmem:[%s9549_s13 + $0x18] sm:$0xff] }
 0x642   :  { %1456 = vmatpush.msrb.mxu2 %v701_v52  ;;  %1560 = vmatpush.msrb.mxu3 %v1528_v34 }
 0x644   :  { %1457 = vmatpush.msrb.mxu2 %v700_v53 }
 0x665   :  { %v1300_v1 = vpop.xlane.xlu2 %1299 }
 0x666   :  { %6770 = vrcp.f32 %v1300_v1  ;;  %v1312_v13 = vand.u32 2147483648, %v1300_v1  ;;  %v1310_v31 = vand.u32 2147483647, %v1300_v1  ;;  %vm1306_vm6 = vweird.f32 %v1300_v1 }
 0x667   :  { %6772 = vrcp.f32 %v7736_v9 }
 0x668   :  { %v1313_v36 = vor.u32 1.1754944e-38, %v1312_v13  ;;  %vm1311_vm9 = vcmp.eq.f32.partialorder %v1310_v31, 8.507059e+37 }
 0x66c   :  { %v6771_v14 = vpop.eup %6770 }
 0x66d   :  { %v1302_v12 = vmul.f32 %v6771_v14, %v1300_v1  ;;  %v1069_v18 = vpop.permute.xlu2 %1068  ;;  %vm1307_vm1 = vweird.f32 %v6771_v14  ;;  %v6773_v10 = vpop.eup %6772 }
 0x66e   :  { %1089 = vmatpush.msra.mxu1 %v1069_v18  ;;  %vm1308_vm7 = vmor %vm1306_vm6, %vm1307_vm1  ;;  %v1474_v11 = vmul.f32 32.0, %v6773_v10  ;;  %vm1478_vm14 = vweird.f32 %v6773_v10 }
 0x66f   :  { %v1303_v24 = vsub.f32 1.0, %v1302_v12  ;;  %6366 = vmatmul.msk.f32.vlgmr.msra.gmra.mxu1 %vm785_vm5, %v1067_v19  ;;  %v1096_v54 = vpop.permute.xlu1 %1095 }
 0x670   :  { %1259 = vmatpush.msrb.mxu1 %v1239_v4  ;;  %v1106_v56 = vsel %vm785_vm5, %v8230_v17, %v1096_v54  ;;  %v6692_v54 = vld [vmem:[%s9551_s10] ss:$0 sm:$0xff] }
 0x671   :  { %v1304_v30 = vmul.f32 %v6771_v14, %v1303_v24 }
 0x672   :  { %1415 = vmatpush.msra.mxu1 %v1395_v28 }
 0x673   :  { %v1305_v40 = vadd.f32 %v6771_v14, %v1304_v30 }
 0x675   :  { %v1309_v39 = vsel %vm1308_vm7, %v6771_v14, %v1305_v40  ;;  %v1475_v14 = vsub.f32 1.0, %v1474_v11  ;;  %v1527_v40 = vld [vmem:[%s9548_s2 + $0x8] sm:$0xff] }
 0x676   :  { %v1314_v33 = vsel %vm1311_vm9, %v1313_v36, %v1309_v39  ;;  %1561 = vmatpush.msrb.mxu3 %v1527_v40 }
 0x677   :  { %6372 = vmatmul.msk.f32.vlgmr.msrb.gmra.mxu1 %vm785_vm5, %v1236_v37  ;;  %v1315_v42 = vmul.f32 %v8271_v29, %v1314_v33  ;;  %v1476_v15 = vmul.f32 %v6773_v10, %v1475_v14 }
 0x678   :  { %1562 = vmatpush.msrb.mxu3 %v1526_v35 }
 0x679   :  { %6375 = vmatmul.msk.f32.vlgmr.msra.gmra.mxu3 %vm785_vm5, %v1315_v42  ;;  %v1477_v16 = vadd.f32 %v6773_v10, %v1476_v15  ;;  %v1538_v42 = vld [vmem:[%s9549_s13 + $0x38] sm:$0xff]  ;;  %v6694_v15 = vld [vmem:[#allocation4] ss:$0 sm:$0xff] }
 0x67a   :  { %1588 = vmatpush.msrb.mxu0 %v1538_v42  ;;  %v6395_v42 = vld [vmem:[%s9538_s17 + $0x30] sm:$0xff] }
 0x67b   :  { %v8328_v12 = vsel %vm1478_vm14, %v6773_v10, %v1477_v16 }
 0x67c   :  { %1589 = vmatpush.msrb.mxu0 %v1537_v43  ;;  %v6386_v43 = vld [vmem:[%s9536_s22 + $0x28] sm:$0xff] }
 0x67f   :  { %6378 = vmatmul.msk.f32.vlgmr.msra.gmra.mxu1 %vm785_vm5, %v1393_v45 }
 0x6ba   :  { %v1013_v46 = vpop.f32.mrf.mxu3 }
 0x6bb   :  { %1099 = vrot.lane.b32.xlu2 %v1013_v46, %s7734_s29 }
 0x6c2   :  { %v1182_v29 = vpop.f32.mrf.mxu3 }
 0x6ec   :  { %v1091_v47 = vpop.f32.mrf.mxu1 }
 0x6ed   :  { %1103 = vrot.lane.b32.xlu0 %v1091_v47, %s7735_s26  ;;  %v1536_v47 = vld [vmem:[%s9549_s13 + $0x28] sm:$0xff] }
 0x6ee   :  { %1590 = vmatpush.msrb.mxu0 %v1536_v47  ;;  %v6389_v47 = vld [vmem:[%s9537_s14 + $0x20] sm:$0xff] }
 0x6f4   :  { %v1261_v48 = vpop.f32.mrf.mxu1 }
 0x6f5   :  { %1421 = vrot.lane.b32.xlu1 %v1261_v48, %s7718_s24 }
 0x6fc   :  { %v1339_v49 = vpop.f32.mrf.mxu3  ;;  %v1417_v50 = vpop.f32.mrf.mxu1 }
 0x6fd   :  { %1425 = vrot.lane.b32.xlu2 %v1339_v49, %s7734_s29  ;;  %1429 = vrot.lane.b32.xlu0 %v1417_v50, %s7735_s26  ;;  %v1535_v49 = vld [vmem:[%s9549_s13 + $0x20] sm:$0xff] }
 0x6fe   :  { %1591 = vmatpush.msrb.mxu0 %v1535_v49 }
 0x700   :  { %1592 = vmatpush.msrb.mxu0 %v1534_v51 }
 0x715   :  { %v1100_v55 = vpop.permute.xlu2 %1099 }
 0x716   :  { %v1108_v57 = vsel %vm1107_vm12, %v1106_v56, %v1100_v55 }
 0x757   :  { %v1426_v58 = vpop.permute.xlu2 %1425 }
 0x75f   :  { %v1104_v59 = vpop.permute.xlu0 %1103 }
 0x760   :  { %v1110_v60 = vsel %vm1109_vm13, %v1108_v57, %v1104_v59 }
 0x761   :  { %6379 = vmatmul.msk.f32.vlgmr.msrb.gmra.mxu2 %vm706_vm4, %v1110_v60 }
 0x767   :  { %v1422_v61 = vpop.permute.xlu1 %1421 }
 0x768   :  { %v1432_v62 = vsel %vm785_vm5, %v1182_v29, %v1422_v61 }
 0x769   :  { %v1433_v0 = vsel %vm1107_vm12, %v1432_v62, %v1426_v58 }
 0x76f   :  { %v1430_v63 = vpop.permute.xlu0 %1429 }
 0x770   :  { %v1434_v1 = vsel %vm1109_vm13, %v1433_v0, %v1430_v63 }
 0x771   :  { %6380 = vmatmul.msk.f32.gmra.mxu2 %vm706_vm4, %v1434_v1 }
 0x7e4   :  { %v1459_v17 = vpop.f32.mrf.mxu2 }
 0x7e5   :  { %v1460_v4 = vadd.f32 %v6690_v2, %v1459_v17 }
 0x7e7   :  { %v1467_v5 = vsel %vm706_vm4, %v1460_v4, 0.0 }
 0x7e8   :  { %1468 = vadd.xlane.f32.xlu1 %v1467_v5  ;;  %v1532_v5 = vld [vmem:[%s9549_s13 + $0x8] sm:$0xff] }
 0x7f4   :  { %v1462_v6 = vpop.f32.mrf.mxu2 }
 0x7f5   :  { %v1463_v7 = vadd.f32 %v6690_v2, %v1462_v6  ;;  %v1531_v6 = vld [vmem:[%s9549_s13] sm:$0xff] }
 0x7f7   :  { %v1470_v8 = vsel %vm706_vm4, %v1463_v7, 0.0 }
 0x7f8   :  { %1471 = vadd.xlane.f32.xlu2 %v1470_v8 }
 0x85b   :  { %v1469_v18 = vpop.xlane.xlu1 %1468 }
 0x85c   :  { %v1480_v19 = vmul.f32 %v8328_v12, %v1469_v18 }
 0x85e   :  { %v1482_v20 = vsub.f32 %v1460_v4, %v1480_v19 }
 0x860   :  { %v1484_v21 = vmul.f32 %v1482_v20, %v1482_v20 }
 0x862   :  { %v1486_v23 = vsel %vm706_vm4, %v1484_v21, 0.0 }
 0x863   :  { %1487 = vadd.xlane.f32.xlu0 %v1486_v23 }
 0x86b   :  { %v1472_v24 = vpop.xlane.xlu2 %1471 }
 0x86c   :  { %v1481_v28 = vmul.f32 %v8328_v12, %v1472_v24 }
 0x86e   :  { %v1483_v13 = vsub.f32 %v1463_v7, %v1481_v28  ;;  %v6693_v7 = vld [vmem:[#allocation2] ss:$0 sm:$0xff] }
 0x870   :  { %v1485_v30 = vmul.f32 %v1483_v13, %v1483_v13 }
 0x872   :  { %v1489_v31 = vsel %vm706_vm4, %v1485_v30, 0.0 }
 0x873   :  { %1490 = vadd.xlane.f32.xlu1 %v1489_v31 }
 0x8d6   :  { %v1488_v36 = vpop.xlane.xlu0 %1487 }
 0x8d7   :  { %v1492_v37 = vmul.f32 %v1488_v36, %v8328_v12 }
 0x8d9   :  { %v1494_v38 = vadd.f32 1e-05, %v1492_v37  ;;  %v6388_v37 = vld [vmem:[%s9536_s22 + $0x38] sm:$0xff] }
 0x8da   :  { %1700 = vmatpush.msrb.mxu1 %v6388_v37 }
 0x8db   :  { %6774 = vrsqrt.f32 %v1494_v38  ;;  %vm1502_vm0 = vweird.f32 %v1494_v38 }
 0x8e1   :  { %v6775_v39 = vpop.eup %6774 }
 0x8e2   :  { %v1497_v33 = vmul.f32 %v6775_v39, %v1494_v38  ;;  %vm1503_vm15 = vweird.f32 %v6775_v39  ;;  %v6392_v38 = vld [vmem:[%s9537_s14 + $0x38] sm:$0xff] }
 0x8e3   :  { %vm1504_vm1 = vmor %vm1502_vm0, %vm1503_vm15  ;;  %1724 = vmatpush.msra.mxu2 %v6392_v38 }
 0x8e4   :  { %v1498_v41 = vmul.f32 %v6775_v39, %v1497_v33  ;;  %v6387_v33 = vld [vmem:[%s9536_s22 + $0x30] sm:$0xff] }
 0x8e5   :  { %1701 = vmatpush.msrb.mxu1 %v6387_v33 }
 0x8e6   :  { %v1499_v44 = vmul.f32 0.5, %v1498_v41  ;;  %v1491_v45 = vpop.xlane.xlu1 %1490  ;;  %v6391_v41 = vld [vmem:[%s9537_s14 + $0x30] sm:$0xff] }
 0x8e7   :  { %v1493_v46 = vmul.f32 %v1491_v45, %v8328_v12  ;;  %1725 = vmatpush.msra.mxu2 %v6391_v41  ;;  %v6394_v45 = vld [vmem:[%s9538_s17 + $0x28] sm:$0xff]  ;;  %1702 = vmatpush.msrb.mxu1 %v6386_v43 }
 0x8e8   :  { %v1500_v29 = vsub.f32 1.5, %v1499_v44  ;;  %v6390_v44 = vld [vmem:[%s9537_s14 + $0x28] sm:$0xff] }
 0x8e9   :  { %v1495_v48 = vadd.f32 1e-05, %v1493_v46  ;;  %1726 = vmatpush.msra.mxu2 %v6390_v44  ;;  %v6385_v46 = vld [vmem:[%s9536_s22 + $0x20] sm:$0xff] }
 0x8ea   :  { %v1501_v50 = vmul.f32 %v6775_v39, %v1500_v29  ;;  %v6393_v29 = vld [vmem:[%s9538_s17 + $0x20] sm:$0xff]  ;;  %1703 = vmatpush.msrb.mxu1 %v6385_v46 }
 0x8eb   :  { %6776 = vrsqrt.f32 %v1495_v48  ;;  %vm1512_vm6 = vweird.f32 %v1495_v48  ;;  %1727 = vmatpush.msra.mxu2 %v6389_v47 }
 0x8ec   :  { %v1505_v52 = vsel %vm1504_vm1, %v6775_v39, %v1501_v50  ;;  %v6396_v39 = vld [vmem:[%s9538_s17 + $0x38] sm:$0xff] }
 0x8ed   :  { %v1516_v53 = vmul.f32 %v1505_v52, %v1482_v20  ;;  %1748 = vmatpush.msra.mxu3 %v6396_v39 }
 0x8ef   :  { %v1519_v55 = vmul.f32 %v6691_v3, %v1516_v53  ;;  %1749 = vmatpush.msra.mxu3 %v6395_v42 }
 0x8f1   :  { %v6777_v56 = vpop.eup %6776  ;;  %v1522_v57 = vadd.f32 %v6692_v54, %v1519_v55  ;;  %1750 = vmatpush.msra.mxu3 %v6394_v45 }
 0x8f2   :  { %v1507_v59 = vmul.f32 %v6777_v56, %v1495_v48  ;;  %vm1513_vm2 = vweird.f32 %v6777_v56 }
 0x8f3   :  { %v8348_v60 = vadd.f32 %v1522_v57, %v8166_v22  ;;  %vm1514_vm7 = vmor %vm1512_vm6, %vm1513_vm2  ;;  %v1533_v22 = vld [vmem:[%s9549_s13 + $0x10] sm:$0xff]  ;;  %1751 = vmatpush.msra.mxu3 %v6393_v29 }
 0x8f4   :  { %v1508_v61 = vmul.f32 %v6777_v56, %v1507_v59  ;;  %1593 = vmatpush.msrb.mxu0 %v1533_v22 }
 0x8f5   :  { %6381 = vmatmul.msk.f32.vlgmr.msrb.gmra.mxu3 %vm706_vm4, %v8348_v60 }
 0x8f6   :  { %v1509_v62 = vmul.f32 0.5, %v1508_v61  ;;  %1594 = vmatpush.msrb.mxu0 %v1532_v5  ;;  %v6695_v61 = vld [vmem:[%s9552_s15] ss:$0 sm:$0xff] }
 0x8f8   :  { %v1510_v58 = vsub.f32 1.5, %v1509_v62  ;;  %1595 = vmatpush.msrb.mxu0 %v1531_v6 }
 0x8fa   :  { %v1511_v63 = vmul.f32 %v6777_v56, %v1510_v58 }
 0x8fc   :  { %v1515_v0 = vsel %vm1514_vm7, %v6777_v56, %v1511_v63  ;;  %v6696_v63 = vld [vmem:[%s9553_s6] ss:$0 sm:$0xff] }
 0x8fd   :  { %v1517_v1 = vmul.f32 %v1515_v0, %v1483_v13 }
 0x8ff   :  { %v1520_v2 = vmul.f32 %v6691_v3, %v1517_v1 }
 0x901   :  { %v1523_v17 = vadd.f32 %v6692_v54, %v1520_v2 }
 0x903   :  { %v8353_v4 = vadd.f32 %v1523_v17, %v8174_v25 }
 0x905   :  { %6382 = vmatmul.msk.f32.gmra.mxu3 %vm706_vm4, %v8353_v4 }
 0x978   :  { %v1564_v8 = vpop.f32.mrf.mxu3 }
 0x979   :  { %v1565_v9 = vadd.f32 %v6693_v7, %v1564_v8 }
 0x97b   :  { %v1570_v10 = vmax.f32 %v1565_v9, 0.0 }
 0x97d   :  { %6383 = vmatmul.msk.f32.vlgmr.msrb.gmra.mxu0 %vm1573_vm8, %v1570_v10 }
 0x988   :  { %v1567_v11 = vpop.f32.mrf.mxu3 }
 0x989   :  { %v1568_v14 = vadd.f32 %v6693_v7, %v1567_v11 }
 0x98b   :  { %v1571_v25 = vmax.f32 %v1568_v14, 0.0 }
 0x98d   :  { %6384 = vmatmul.msk.f32.gmra.mxu0 %vm1573_vm8, %v1571_v25  ;;  %v6697_v25 = vld [vmem:[%s9543_s28 + $0x1] ss:$0 sm:$0xff] }
 0x9fa   :  { %v1597_v16 = vpop.f32.mrf.mxu0 }
 0x9fb   :  { %v1598_v18 = vadd.f32 %v6694_v15, %v1597_v16 }
 0x9fd   :  { %v1605_v19 = vsel %vm706_vm4, %v1598_v18, 0.0 }
 0x9fe   :  { %1606 = vadd.xlane.f32.xlu2 %v1605_v19  ;;  %v6698_v19 = vld [vmem:[%s9541_s25 + $0x1] ss:$0 sm:$0xff] }
 0xa0a   :  { %v1600_v20 = vpop.f32.mrf.mxu0 }
 0xa0b   :  { %v1601_v21 = vadd.f32 %v6694_v15, %v1600_v20  ;;  %v8410_v20 = vld [vmem:[%s9542_s23 + $0x1] ss:$0 sm:$0xff] }
 0xa0d   :  { %v1608_v23 = vsel %vm706_vm4, %v1601_v21, 0.0 }
 0xa0e   :  { %1609 = vadd.xlane.f32.xlu0 %v1608_v23 }
 0xa71   :  { %v1607_v24 = vpop.xlane.xlu2 %1606 }
 0xa72   :  { %v1611_v28 = vmul.f32 %v1607_v24, %v8328_v12 }
 0xa74   :  { %v1613_v13 = vsub.f32 %v1598_v18, %v1611_v28 }
 0xa76   :  { %v1615_v30 = vmul.f32 %v1613_v13, %v1613_v13 }
 0xa78   :  { %v1617_v31 = vsel %vm706_vm4, %v1615_v30, 0.0 }
 0xa79   :  { %1618 = vadd.xlane.f32.xlu1 %v1617_v31 }
 0xa81   :  { %v1610_v32 = vpop.xlane.xlu0 %1609 }
 0xa82   :  { %v1612_v34 = vmul.f32 %v1610_v32, %v8328_v12 }
 0xa84   :  { %v8367_v40 = vsub.f32 %v1601_v21, %v1612_v34 }
 0xa86   :  { %v1616_v35 = vmul.f32 %v8367_v40, %v8367_v40 }
 0xa88   :  { %v1620_v36 = vsel %vm706_vm4, %v1616_v35, 0.0 }
 0xa89   :  { %1621 = vadd.xlane.f32.xlu2 %v1620_v36 }
 0xaec   :  { %v1619_v48 = vpop.xlane.xlu1 %1618 }
 0xaed   :  { %v1623_v49 = vmul.f32 %v1619_v48, %v8328_v12 }
 0xaef   :  { %v1625_v50 = vadd.f32 1e-05, %v1623_v49 }
 0xaf1   :  { %6778 = vrsqrt.f32 %v1625_v50  ;;  %vm1633_vm10 = vweird.f32 %v1625_v50 }
 0xaf7   :  { %v6779_v3 = vpop.eup %6778 }
 0xaf8   :  { %v1628_v51 = vmul.f32 %v6779_v3, %v1625_v50  ;;  %vm1634_vm9 = vweird.f32 %v6779_v3 }
 0xaf9   :  { %vm1635_vm11 = vmor %vm1633_vm10, %vm1634_vm9 }
 0xafa   :  { %v1629_v52 = vmul.f32 %v6779_v3, %v1628_v51 }
 0xafc   :  { %v1630_v53 = vmul.f32 0.5, %v1629_v52  ;;  %v1622_v54 = vpop.xlane.xlu2 %1621 }
 0xafd   :  { %v1624_v55 = vmul.f32 %v1622_v54, %v8328_v12 }
 0xafe   :  { %v1631_v56 = vsub.f32 1.5, %v1630_v53 }
 0xaff   :  { %v1626_v57 = vadd.f32 1e-05, %v1624_v55 }
 0xb00   :  { %v1632_v59 = vmul.f32 %v6779_v3, %v1631_v56 }
 0xb01   :  { %6780 = vrsqrt.f32 %v1626_v57  ;;  %vm1643_vm15 = vweird.f32 %v1626_v57 }
 0xb02   :  { %v1636_v62 = vsel %vm1635_vm11, %v6779_v3, %v1632_v59 }
 0xb03   :  { %v1647_v58 = vmul.f32 %v1636_v62, %v1613_v13 }
 0xb05   :  { %v1650_v0 = vmul.f32 %v6695_v61, %v1647_v58 }
 0xb07   :  { %v6781_v1 = vpop.eup %6780  ;;  %v1653_v2 = vadd.f32 %v6696_v63, %v1650_v0 }
 0xb08   :  { %v1638_v17 = vmul.f32 %v6781_v1, %v1626_v57  ;;  %vm1644_vm14 = vweird.f32 %v6781_v1 }
 0xb09   :  { %v8389_v22 = vadd.f32 %v1653_v2, %v8348_v60  ;;  %vm1645_vm0 = vmor %vm1643_vm15, %vm1644_vm14 }
 0xb0a   :  { %v1639_v5 = vmul.f32 %v6781_v1, %v1638_v17 }
 0xb0b   :  { %6401 = vmatmul.msk.f32.vlgmr.msrb.gmra.mxu1 %vm706_vm4, %v8389_v22  ;;  %6403 = vmatmul.msk.f32.vlgmr.msra.gmra.mxu2 %vm706_vm4, %v8389_v22 }
 0xb0c   :  { %v1640_v6 = vmul.f32 0.5, %v1639_v5  ;;  %6405 = vmatmul.msk.f32.vlgmr.msra.gmra.mxu3 %vm706_vm4, %v8389_v22 }
 0xb0e   :  { %v1641_v7 = vsub.f32 1.5, %v1640_v6 }
 0xb10   :  { %v1642_v8 = vmul.f32 %v6781_v1, %v1641_v7 }
 0xb12   :  { %v1646_v60 = vsel %vm1645_vm0, %v6781_v1, %v1642_v8 }
 0xb13   :  { %v1648_v9 = vmul.f32 %v1646_v60, %v8367_v40 }
 0xb15   :  { %v1651_v10 = vmul.f32 %v6695_v61, %v1648_v9 }
 0xb17   :  { %v1654_v11 = vadd.f32 %v6696_v63, %v1651_v10 }
 0xb19   :  { %v8399_v14 = vadd.f32 %v1654_v11, %v8353_v4 }
 0xb1b   :  { %6402 = vmatmul.msk.f32.gmra.mxu1 %vm706_vm4, %v8399_v14  ;;  %6404 = vmatmul.msk.f32.gmra.mxu2 %vm706_vm4, %v8399_v14 }
 0xb1c   :  { %6406 = vmatmul.msk.f32.gmra.mxu3 %vm706_vm4, %v8399_v14 }
 0xb88   :  { %v1705_v15 = vpop.f32.mrf.mxu1 }
 0xb89   :  { %v1706_v16 = vadd.f32 %v6697_v25, %v1705_v15 }
 0xb8b   :  { %v1759_v18 = vmul.f32 0.35355338, %v1706_v16 }
 0xb8d   :  { %1833 = vrot.lane.b32.xlu1 %v1759_v18, %s7731_s30 }
 0xb8e   :  { %v1729_v4 = vpop.f32.mrf.mxu2 }
 0xb8f   :  { %v1730_v21 = vadd.f32 %v6698_v19, %v1729_v4  ;;  %v1753_v23 = vpop.f32.mrf.mxu3 }
 0xb90   :  { %v8414_v24 = vadd.f32 %v8410_v20, %v1753_v23 }
 0xb91   :  { %1914 = vrot.lane.b32.xlu2 %v1730_v21, %s7732_s21  ;;  %1835 = vrot.lane.b32.xlu0 %v1730_v21, %s7731_s30 }
 0xb92   :  { %1828 = vmatpush.msra.mxu0 %v8414_v24  ;;  %6407 = vmatpush.xpose.msk.msra.mxu1 %vm785_vm5, %v1730_v21 }
 0xb95   :  { %6408 = vmatmul.msk.f32.vlgmr.msra.gmra.mxu1 %vm785_vm5, %v1759_v18  ;;  %1912 = vrot.lane.b32.xlu1 %v1759_v18, %s7732_s21 }
 0xb98   :  { %v1708_v28 = vpop.f32.mrf.mxu1 }
 0xb99   :  { %v1709_v13 = vadd.f32 %v6697_v25, %v1708_v28  ;;  %1992 = vrot.lane.b32.xlu0 %v1730_v21, %s7733_s1 }
 0xb9b   :  { %v2083_v30 = vmul.f32 0.35355338, %v1709_v13 }
 0xb9d   :  { %2157 = vrot.lane.b32.xlu1 %v2083_v30, %s7731_s30 }
 0xb9e   :  { %v1732_v31 = vpop.f32.mrf.mxu2 }
 0xb9f   :  { %v1733_v32 = vadd.f32 %v6698_v19, %v1732_v31  ;;  %v8445_v47 = vpop.f32.mrf.mxu3 }
 0xba1   :  { %1990 = vrot.lane.b32.xlu0 %v1759_v18, %s7733_s1  ;;  %2159 = vrot.lane.b32.xlu2 %v1733_v32, %s7731_s30 }
 0xba5   :  { %2236 = vrot.lane.b32.xlu1 %v2083_v30, %s7732_s21 }
 0xba9   :  { %2238 = vrot.lane.b32.xlu0 %v1733_v32, %s7732_s21  ;;  %2316 = vrot.lane.b32.xlu2 %v1733_v32, %s7733_s1 }
 0xbb1   :  { %2314 = vrot.lane.b32.xlu0 %v2083_v30, %s7733_s1 }
 0xbeb   :  { %v1915_v34 = vpop.permute.xlu2 %1914 }
 0xbec   :  { %6413 = vmatpush.xpose.msk.msrb.mxu3 %vm785_vm5, %v1915_v34 }
 0xbf0   :  { %6419 = vmatpush.xpose.msk.msra.mxu3 %vm785_vm5, %v1733_v32 }
 0xbfb   :  { %v2160_v37 = vpop.permute.xlu2 %2159 }
 0xbff   :  { %v1834_v40 = vpop.permute.xlu1 %1833 }
 0xc03   :  { %v1836_v35 = vpop.permute.xlu0 %1835  ;;  %v2317_v42 = vpop.permute.xlu2 %2316 }
 0xc04   :  { %6410 = vmatpush.xpose.msk.msrb.mxu1 %vm785_vm5, %v1836_v35 }
 0xc07   :  { %v1913_v36 = vpop.permute.xlu1 %1912  ;;  %6411 = vmatmul.msk.f32.vlgmr.msrb.gmra.mxu1 %vm785_vm5, %v1834_v40 }
 0xc08   :  { %6414 = vmatmul.msk.f32.vlgmr.msrb.gmra.mxu3 %vm785_vm5, %v1913_v36 }
 0xc0b   :  { %v1993_v38 = vpop.permute.xlu0 %1992 }
 0xc0c   :  { %6416 = vmatpush.xpose.msk.msra.mxu1 %vm785_vm5, %v1993_v38 }
 0xc0f   :  { %v2158_v43 = vpop.permute.xlu1 %2157 }
 0xc10   :  { %6422 = vmatpush.xpose.msk.msrb.mxu1 %vm785_vm5, %v2160_v37  ;;  %6420 = vmatmul.msk.f32.vlgmr.msra.gmra.mxu3 %vm785_vm5, %v2083_v30 }
 0xc12   :  { %v1783_v39 = vpop.f32.mrf.mxu1 }
 0xc13   :  { %v1991_v33 = vpop.permute.xlu0 %1990  ;;  %v1786_v41 = vsel %vm785_vm5, %v1783_v39, -inf }
 0xc14   :  { %1787 = vmax.xlane.f32.xlu1 %v1786_v41  ;;  %6417 = vmatmul.msk.f32.vlgmr.msra.gmra.mxu1 %vm785_vm5, %v1991_v33 }
 0xc15   :  { %6428 = vmatpush.xpose.msk.msra.mxu1 %vm785_vm5, %v2317_v42 }
 0xc17   :  { %v2237_v45 = vpop.permute.xlu1 %2236 }
 0xc1b   :  { %v2239_v44 = vpop.permute.xlu0 %2238 }
 0xc1c   :  { %6423 = vmatmul.msk.f32.vlgmr.msrb.gmra.mxu1 %vm785_vm5, %v2158_v43  ;;  %6425 = vmatpush.xpose.msk.msrb.mxu3 %vm785_vm5, %v2239_v44 }
 0xc1f   :  { %6426 = vmatmul.msk.f32.vlgmr.msrb.gmra.mxu3 %vm785_vm5, %v2237_v45 }
 0xc23   :  { %v2315_v46 = vpop.permute.xlu0 %2314 }
 0xc24   :  { %6429 = vmatmul.msk.f32.vlgmr.msra.gmra.mxu1 %vm785_vm5, %v2315_v46 }
 0xc84   :  { %v1858_v29 = vpop.f32.mrf.mxu1 }
 0xc85   :  { %v1861_v48 = vsel %vm785_vm5, %v1858_v29, -inf }
 0xc86   :  { %1862 = vmax.xlane.f32.xlu2 %v1861_v48 }
 0xc87   :  { %v1788_v49 = vpop.xlane.xlu1 %1787 }
 0xc88   :  { %v1789_v50 = vsub.f32 %v1783_v39, %v1788_v49 }
 0xc8a   :  { %v1790_v3 = vmul.f32 1.442695, %v1789_v50 }
 0xc8b   :  { %v1937_v51 = vpop.f32.mrf.mxu3 }
 0xc8c   :  { %6782 = vpow2.f32 %v1790_v3  ;;  %v1940_v52 = vsel %vm785_vm5, %v1937_v51, -inf }
 0xc8e   :  { %1941 = vmax.xlane.f32.xlu2 %v1940_v52 }
 0xc91   :  { %v2015_v53 = vpop.f32.mrf.mxu1 }
 0xc92   :  { %v8449_v54 = vpop.eup %6782  ;;  %v2018_v55 = vsel %vm785_vm5, %v2015_v53, -inf }
 0xc93   :  { %2019 = vmax.xlane.f32.xlu0 %v2018_v55  ;;  %v1792_v56 = vsel %vm785_vm5, %v8449_v54, 0.0  ;;  %v2107_v57 = vpop.f32.mrf.mxu3 }
 0xc94   :  { %v2110_v61 = vsel %vm785_vm5, %v2107_v57, -inf }
 0xc96   :  { %1793 = vadd.xlane.f32.xlu2 %v1792_v56  ;;  %v8496_v56 = vadd.f32 %v8410_v20, %v8445_v47 }
 0xc99   :  { %v2182_v59 = vpop.f32.mrf.mxu1 }
 0xc9a   :  { %v2185_v62 = vsel %vm785_vm5, %v2182_v59, -inf }
 0xc9b   :  { %2111 = vmax.xlane.f32.xlu0 %v2110_v61  ;;  %2186 = vmax.xlane.f32.xlu1 %v2185_v62 }
 0xca1   :  { %v8456_v58 = vpop.f32.mrf.mxu1 }
 0xca2   :  { %v2261_v63 = vpop.f32.mrf.mxu3  ;;  %v2342_v0 = vsel %vm785_vm5, %v8456_v58, -inf }
 0xca3   :  { %2343 = vmax.xlane.f32.xlu2 %v2342_v0  ;;  %v2264_v1 = vsel %vm785_vm5, %v2261_v63, -inf }
 0xca4   :  { %2265 = vmax.xlane.f32.xlu1 %v2264_v1 }
 0xcaf   :  { %2042 = vrot.lane.b32.xlu0 %v8414_v24, %s7733_s1 }
 0xcbd   :  { %1886 = vrot.lane.b32.xlu1 %v8414_v24, %s7731_s30 }
 0xcf9   :  { %v1863_v2 = vpop.xlane.xlu2 %1862 }
 0xcfa   :  { %v1864_v17 = vsub.f32 %v1858_v29, %v1863_v2 }
 0xcfc   :  { %v1865_v5 = vmul.f32 1.442695, %v1864_v17 }
 0xcfe   :  { %6784 = vpow2.f32 %v1865_v5 }
 0xd01   :  { %v1942_v6 = vpop.xlane.xlu2 %1941 }
 0xd02   :  { %v1943_v7 = vsub.f32 %v1937_v51, %v1942_v6 }
 0xd04   :  { %v8465_v8 = vpop.eup %6784  ;;  %v1944_v60 = vmul.f32 1.442695, %v1943_v7 }
 0xd05   :  { %v1867_v9 = vsel %vm785_vm5, %v8465_v8, 0.0 }
 0xd06   :  { %6786 = vpow2.f32 %v1944_v60  ;;  %v2020_v10 = vpop.xlane.xlu0 %2019  ;;  %1868 = vadd.xlane.f32.xlu0 %v1867_v9 }
 0xd07   :  { %v2021_v11 = vsub.f32 %v2015_v53, %v2020_v10 }
 0xd09   :  { %v2022_v25 = vmul.f32 1.442695, %v2021_v11  ;;  %v1794_v15 = vpop.xlane.xlu2 %1793 }
 0xd0a   :  { %6788 = vrcp.f32 %v1794_v15  ;;  %v1806_v35 = vand.u32 2147483648, %v1794_v15  ;;  %v1804_v37 = vand.u32 2147483647, %v1794_v15  ;;  %vm1800_vm2 = vweird.f32 %v1794_v15 }
 0xd0b   :  { %6790 = vpow2.f32 %v2022_v25 }
 0xd0c   :  { %v8469_v16 = vpop.eup %6786  ;;  %v1807_v41 = vor.u32 1.1754944e-38, %v1806_v35  ;;  %vm1805_vm7 = vcmp.eq.f32.partialorder %v1804_v37, 8.507059e+37 }
 0xd0d   :  { %v1946_v18 = vsel %vm785_vm5, %v8469_v16, 0.0 }
 0xd0e   :  { %v2112_v19 = vpop.xlane.xlu0 %2111  ;;  %v2187_v4 = vpop.xlane.xlu1 %2186  ;;  %1947 = vadd.xlane.f32.xlu0 %v1946_v18 }
 0xd0f   :  { %v2113_v21 = vsub.f32 %v2107_v57, %v2112_v19  ;;  %v2188_v23 = vsub.f32 %v2182_v59, %v2187_v4 }
 0xd10   :  { %v6789_v28 = vpop.eup %6788 }
 0xd11   :  { %v8473_v13 = vpop.eup %6790  ;;  %v1796_v30 = vmul.f32 %v6789_v28, %v1794_v15  ;;  %v2114_v31 = vmul.f32 1.442695, %v2113_v21  ;;  %v2189_v32 = vmul.f32 1.442695, %v2188_v23  ;;  %vm1801_vm1 = vweird.f32 %v6789_v28 }
 0xd12   :  { %v2024_v34 = vsel %vm785_vm5, %v8473_v13, 0.0  ;;  %vm1802_vm6 = vmor %vm1800_vm2, %vm1801_vm1 }
 0xd13   :  { %v1797_v40 = vsub.f32 1.0, %v1796_v30  ;;  %6792 = vpow2.f32 %v2114_v31  ;;  %2025 = vadd.xlane.f32.xlu1 %v2024_v34 }
 0xd14   :  { %6794 = vpow2.f32 %v2189_v32 }
 0xd15   :  { %v1798_v36 = vmul.f32 %v6789_v28, %v1797_v40 }
 0xd16   :  { %v2344_v39 = vpop.xlane.xlu2 %2343 }
 0xd17   :  { %v1799_v38 = vadd.f32 %v6789_v28, %v1798_v36  ;;  %v2266_v33 = vpop.xlane.xlu1 %2265  ;;  %v2345_v46 = vsub.f32 %v8456_v58, %v2344_v39 }
 0xd18   :  { %v2267_v42 = vsub.f32 %v2261_v63, %v2266_v33 }
 0xd19   :  { %v8477_v43 = vpop.eup %6792  ;;  %v1803_v44 = vsel %vm1802_vm6, %v6789_v28, %v1799_v38  ;;  %v2346_v51 = vmul.f32 1.442695, %v2345_v46 }
 0xd1a   :  { %v8479_v45 = vpop.eup %6794  ;;  %v2268_v29 = vmul.f32 1.442695, %v2267_v42  ;;  %v2116_v48 = vsel %vm785_vm5, %v8477_v43, 0.0  ;;  %v1808_v49 = vsel %vm1805_vm7, %v1807_v41, %v1803_v44 }
 0xd1b   :  { %v2191_v50 = vsel %vm785_vm5, %v8479_v45, 0.0  ;;  %2117 = vadd.xlane.f32.xlu0 %v2116_v48  ;;  %v1809_v3 = vmul.f32 %v8449_v54, %v1808_v49 }
 0xd1c   :  { %6796 = vpow2.f32 %v2268_v29  ;;  %2192 = vadd.xlane.f32.xlu2 %v2191_v50 }
 0xd1d   :  { %6409 = vmatmul.msk.f32.vlgmr.msra.gmra.mxu0 %vm785_vm5, %v1809_v3  ;;  %6798 = vpow2.f32 %v2346_v51 }
 0xd21   :  { %v2043_v59 = vpop.permute.xlu0 %2042 }
 0xd22   :  { %v8488_v52 = vpop.eup %6796 }
 0xd23   :  { %v2270_v53 = vsel %vm785_vm5, %v8488_v52, 0.0  ;;  %v8492_v55 = vpop.eup %6798 }
 0xd24   :  { %2271 = vadd.xlane.f32.xlu2 %v2270_v53  ;;  %v2348_v54 = vsel %vm785_vm5, %v8492_v55, 0.0 }
 0xd2c   :  { %2210 = vrot.lane.b32.xlu1 %v8496_v56, %s7731_s30  ;;  %2349 = vadd.xlane.f32.xlu2 %v2348_v54 }
 0xd2f   :  { %v1887_v57 = vpop.permute.xlu1 %1886  ;;  %2366 = vrot.lane.b32.xlu0 %v8496_v56, %s7733_s1 }
 0xd30   :  { %1907 = vmatpush.msrb.mxu2 %v1887_v57 }
 0xd32   :  { %2063 = vmatpush.msra.mxu2 %v2043_v59 }
 0xd34   :  { %2288 = vrot.lane.b32.xlu1 %v8496_v56, %s7732_s21 }
 0xd44   :  { %1964 = vrot.lane.b32.xlu2 %v8414_v24, %s7732_s21 }
 0xd79   :  { %v1869_v20 = vpop.xlane.xlu0 %1868 }
 0xd7a   :  { %6800 = vrcp.f32 %v1869_v20  ;;  %v1881_v58 = vand.u32 2147483648, %v1869_v20  ;;  %v1879_v0 = vand.u32 2147483647, %v1869_v20  ;;  %vm1875_vm10 = vweird.f32 %v1869_v20 }
 0xd7c   :  { %v1882_v5 = vor.u32 1.1754944e-38, %v1881_v58  ;;  %vm1880_vm14 = vcmp.eq.f32.partialorder %v1879_v0, 8.507059e+37 }
 0xd80   :  { %v6801_v47 = vpop.eup %6800 }
 0xd81   :  { %v1871_v61 = vmul.f32 %v6801_v47, %v1869_v20  ;;  %vm1876_vm9 = vweird.f32 %v6801_v47  ;;  %v8508_v1 = vpop.xlane.xlu0 %1947 }
 0xd82   :  { %vm1877_vm11 = vmor %vm1875_vm10, %vm1876_vm9  ;;  %v1960_v49 = vand.u32 2147483648, %v8508_v1  ;;  %v1958_v3 = vand.u32 2147483647, %v8508_v1 }
 0xd83   :  { %v1872_v62 = vsub.f32 1.0, %v1871_v61 }
 0xd85   :  { %v1873_v63 = vmul.f32 %v6801_v47, %v1872_v62  ;;  %v1961_v62 = vor.u32 1.1754944e-38, %v1960_v49 }
 0xd86   :  { %v2026_v2 = vpop.xlane.xlu1 %2025 }
 0xd87   :  { %v1874_v17 = vadd.f32 %v6801_v47, %v1873_v63  ;;  %6802 = vrcp.f32 %v2026_v2  ;;  %v2038_v19 = vand.u32 2147483648, %v2026_v2  ;;  %vm2032_vm0 = vweird.f32 %v2026_v2  ;;  %v2626_v63 = vld [vmem:[#allocation6 + $0x18] sm:$0xff] }
 0xd88   :  { %6804 = vrcp.f32 %v8508_v1 }
 0xd89   :  { %v1878_v24 = vsel %vm1877_vm11, %v6801_v47, %v1874_v17  ;;  %v2039_v30 = vor.u32 1.1754944e-38, %v2038_v19  ;;  %vm1954_vm11 = vweird.f32 %v8508_v1 }
 0xd8a   :  { %v1883_v6 = vsel %vm1880_vm14, %v1882_v5, %v1878_v24 }
 0xd8b   :  { %v1884_v7 = vmul.f32 %v8465_v8, %v1883_v6  ;;  %v2036_v8 = vand.u32 2147483647, %v2026_v2  ;;  %v2624_v6 = vld [vmem:[#allocation6 + $0x8] sm:$0xff] }
 0xd8d   :  { %v6803_v60 = vpop.eup %6802  ;;  %6412 = vmatmul.msk.f32.vlgmr.msrb.gmra.mxu2 %vm785_vm5, %v1884_v7  ;;  %vm2037_vm2 = vcmp.eq.f32.partialorder %v2036_v8, 8.507059e+37 }
 0xd8e   :  { %v8513_v9 = vpop.eup %6804  ;;  %v2028_v10 = vmul.f32 %v6803_v60, %v2026_v2  ;;  %v8515_v11 = vpop.xlane.xlu0 %2117  ;;  %vm2033_vm15 = vweird.f32 %v6803_v60 }
 0xd8f   :  { %6806 = vrcp.f32 %v8515_v11  ;;  %v2193_v25 = vpop.xlane.xlu2 %2192  ;;  %v1950_v18 = vmul.f32 %v8513_v9, %v8508_v1  ;;  %vm2034_vm1 = vmor %vm2032_vm0, %vm2033_vm15  ;;  %vm1955_vm7 = vweird.f32 %v8513_v9  ;;  %vm1959_vm0 = vcmp.eq.f32.partialorder %v1958_v3, 8.507059e+37  ;;  %v2625_v1 = vld [vmem:[#allocation6 + $0x10] sm:$0xff] }
 0xd90   :  { %v2029_v15 = vsub.f32 1.0, %v2028_v10  ;;  %6808 = vrcp.f32 %v2193_v25  ;;  %v2205_v41 = vand.u32 2147483648, %v2193_v25  ;;  %v2203_v42 = vand.u32 2147483647, %v2193_v25  ;;  %vm1956_vm14 = vmor %vm1954_vm11, %vm1955_vm7  ;;  %v6400_v3 = vld [vmem:[%s9546_s27 + $0x38] sm:$0xff] }
 0xd91   :  { %v1951_v28 = vsub.f32 1.0, %v1950_v18  ;;  %vm2199_vm9 = vweird.f32 %v2193_v25  ;;  %v2130_v24 = vand.u32 2147483648, %v8515_v11  ;;  %2426 = vmatpush.msra.mxu3 %v6400_v3  ;;  %v6434_v3 = vld [vmem:[%s9548_s2 + $0x28] sm:$0xff] }
 0xd92   :  { %v2030_v4 = vmul.f32 %v6803_v60, %v2029_v15  ;;  %v2206_v53 = vor.u32 1.1754944e-38, %v2205_v41  ;;  %vm2204_vm15 = vcmp.eq.f32.partialorder %v2203_v42, 8.507059e+37 }
 0xd93   :  { %v1952_v36 = vmul.f32 %v8513_v9, %v1951_v28 }
 0xd94   :  { %v2031_v21 = vadd.f32 %v6803_v60, %v2030_v4 }
 0xd95   :  { %v8520_v23 = vpop.eup %6806  ;;  %v1953_v44 = vadd.f32 %v8513_v9, %v1952_v36 }
 0xd96   :  { %v6809_v31 = vpop.eup %6808  ;;  %v2035_v32 = vsel %vm2034_vm1, %v6803_v60, %v2031_v21  ;;  %v2120_v37 = vmul.f32 %v8520_v23, %v8515_v11  ;;  %vm2125_vm1 = vweird.f32 %v8520_v23 }
 0xd97   :  { %v2195_v34 = vmul.f32 %v6809_v31, %v2193_v25  ;;  %v8522_v40 = vpop.xlane.xlu2 %2271  ;;  %v2040_v35 = vsel %vm2037_vm2, %v2039_v30, %v2035_v32  ;;  %vm2200_vm6 = vweird.f32 %v6809_v31  ;;  %v1957_v57 = vsel %vm1956_vm14, %v8513_v9, %v1953_v44  ;;  %v2623_v25 = vld [vmem:[#allocation6] sm:$0xff] }
 0xd98   :  { %6810 = vrcp.f32 %v8522_v40  ;;  %v2041_v39 = vmul.f32 %v8473_v13, %v2040_v35  ;;  %v2121_v46 = vsub.f32 1.0, %v2120_v37  ;;  %vm8535_vm10 = vmor %vm2199_vm9, %vm2200_vm6  ;;  %v1962_v0 = vsel %vm1959_vm0, %v1961_v62, %v1957_v57  ;;  %v6686_v37 = vld [vmem:[%s9558_s20] ss:$0 sm:$0xff] }
 0xd99   :  { %v2196_v38 = vsub.f32 1.0, %v2195_v34  ;;  %vm2124_vm2 = vweird.f32 %v8515_v11  ;;  %v1963_v9 = vmul.f32 %v8469_v16, %v1962_v0  ;;  %vm2278_vm14 = vweird.f32 %v8522_v40  ;;  %v6974_v44 = vld [vmem:[%s9540_s12] sm:$0xff] }
 0xd9a   :  { %6418 = vmatmul.msk.f32.vlgmr.msra.gmra.mxu2 %vm785_vm5, %v2041_v39  ;;  %v2122_v59 = vmul.f32 %v8520_v23, %v2121_v46  ;;  %vm8557_vm6 = vmor %vm2124_vm2, %vm2125_vm1  ;;  %v2282_v32 = vand.u32 2147483647, %v8522_v40  ;;  %v676_v46 = vadd.f32 %v6686_v37, %v8184_v27  ;;  %v2631_v57 = vld [vmem:[#allocation9 + $0x18] sm:$0xff] }
 0xd9b   :  { %v2197_v33 = vmul.f32 %v6809_v31, %v2196_v38 }
 0xd9c   :  { %v2123_v2 = vadd.f32 %v8520_v23, %v2122_v59  ;;  %vm2283_vm2 = vcmp.eq.f32.partialorder %v2282_v32, 8.507059e+37  ;;  %v2630_v59 = vld [vmem:[#allocation9 + $0x10] sm:$0xff] }
 0xd9d   :  { %v2198_v29 = vadd.f32 %v6809_v31, %v2197_v33 }
 0xd9e   :  { %v8532_v48 = vpop.eup %6810  ;;  %v2211_v13 = vpop.permute.xlu1 %2210  ;;  %v2127_v15 = vsel %vm8557_vm6, %v8520_v23, %v2123_v2 }
 0xd9f   :  { %v2202_v51 = vsel %vm8535_vm10, %v6809_v31, %v2198_v29  ;;  %2231 = vmatpush.msrb.mxu2 %v2211_v13  ;;  %v2350_v54 = vpop.xlane.xlu2 %2349  ;;  %v2274_v20 = vmul.f32 %v8532_v48, %v8522_v40  ;;  %vm2279_vm10 = vweird.f32 %v8532_v48  ;;  %v2284_v31 = vand.u32 2147483648, %v8522_v40 }
 0xda0   :  { %6812 = vrcp.f32 %v2350_v54  ;;  %v2207_v61 = vsel %vm2204_vm15, %v2206_v53, %v2202_v51  ;;  %v2362_v4 = vand.u32 2147483648, %v2350_v54  ;;  %v2360_v21 = vand.u32 2147483647, %v2350_v54  ;;  %vm2280_vm1 = vmor %vm2278_vm14, %vm2279_vm10  ;;  %v6399_v51 = vld [vmem:[%s9546_s27 + $0x30] sm:$0xff]  ;;  %v6398_v53 = vld [vmem:[%s9546_s27 + $0x28] sm:$0xff] }
 0xda1   :  { %v2367_v47 = vpop.permute.xlu0 %2366  ;;  %v2208_v58 = vmul.f32 %v8479_v45, %v2207_v61  ;;  %v2275_v17 = vsub.f32 1.0, %v2274_v20  ;;  %v2128_v45 = vand.u32 2147483647, %v8515_v11  ;;  %v2131_v11 = vor.u32 1.1754944e-38, %v2130_v24  ;;  %2427 = vmatpush.msra.mxu3 %v6399_v51  ;;  %v2629_v20 = vld [vmem:[#allocation9 + $0x8] sm:$0xff]  ;;  %v6433_v51 = vld [vmem:[%s9548_s2 + $0x20] sm:$0xff] }
 0xda2   :  { %2387 = vmatpush.msra.mxu2 %v2367_v47  ;;  %vm2356_vm11 = vweird.f32 %v2350_v54  ;;  %vm2361_vm0 = vcmp.eq.f32.partialorder %v2360_v21, 8.507059e+37  ;;  %v2285_v33 = vor.u32 1.1754944e-38, %v2284_v31  ;;  %v673_v40 = vadd.f32 %v6686_v37, %v8182_v26  ;;  %v2628_v47 = vld [vmem:[#allocation9] sm:$0xff] }
 0xda3   :  { %6424 = vmatmul.msk.f32.vlgmr.msrb.gmra.mxu2 %vm785_vm5, %v2208_v58  ;;  %v2276_v18 = vmul.f32 %v8532_v48, %v2275_v17  ;;  %vm2129_vm7 = vcmp.eq.f32.partialorder %v2128_v45, 8.507059e+37  ;;  %2428 = vmatpush.msra.mxu3 %v6398_v53  ;;  %v2636_v53 = vld [vmem:[#allocation12 + $0x18] sm:$0xff] }
 0xda4   :  { %2662 = vmatpush.msrb.mxu2 %v2626_v63  ;;  %v2132_v28 = vsel %vm2129_vm7, %v2131_v11, %v2127_v15 }
 0xda5   :  { %v2277_v23 = vadd.f32 %v8532_v48, %v2276_v18  ;;  %v2133_v35 = vmul.f32 %v8477_v43, %v2132_v28  ;;  %v8581_v43 = vadd.f32 %v6974_v44, %v673_v40 }
 0xda6   :  { %v6813_v5 = vpop.eup %6812  ;;  %2663 = vmatpush.msrb.mxu2 %v2625_v1  ;;  %v2289_v16 = vpop.permute.xlu1 %2288 }
 0xda7   :  { %v2352_v7 = vmul.f32 %v6813_v5, %v2350_v54  ;;  %v1965_v60 = vpop.permute.xlu2 %1964  ;;  %vm2357_vm9 = vweird.f32 %v6813_v5  ;;  %v2281_v38 = vsel %vm2280_vm1, %v8532_v48, %v2277_v23  ;;  %v6397_v54 = vld [vmem:[%s9546_s27 + $0x20] sm:$0xff] }
 0xda8   :  { %1985 = vmatpush.msrb.mxu0 %v1965_v60  ;;  %2664 = vmatpush.msrb.mxu2 %v2624_v6  ;;  %vm2358_vm15 = vmor %vm2356_vm11, %vm2357_vm9  ;;  %v2286_v41 = vsel %vm2283_vm2, %v2285_v33, %v2281_v38 }
 0xda9   :  { %v2353_v19 = vsub.f32 1.0, %v2352_v7  ;;  %6415 = vmatmul.msk.f32.vlgmr.msrb.gmra.mxu0 %vm785_vm5, %v1963_v9  ;;  %v2287_v42 = vmul.f32 %v8488_v52, %v2286_v41  ;;  %v1830_v52 = vpop.f32.mrf.mxu0  ;;  %2429 = vmatpush.msra.mxu3 %v6397_v54  ;;  %v6701_v7 = vld [vmem:[%s9547_s19 + $0x1] ss:$0 sm:$0xff]  ;;  %v680_v41 = vlaneseq  ;;  %v2635_v54 = vld [vmem:[#allocation12 + $0x10] sm:$0xff] }
 0xdaa   :  { %2152 = vmatpush.msra.mxu0 %v8496_v56  ;;  %2665 = vmatpush.msrb.mxu2 %v2623_v25  ;;  %v2363_v56 = vor.u32 1.1754944e-38, %v2362_v4  ;;  %v6702_v4 = vld [vmem:[#allocation10] ss:$0 sm:$0xff] }
 0xdab   :  { %v2354_v8 = vmul.f32 %v6813_v5, %v2353_v19  ;;  %2686 = vmatpush.msrb.mxu3 %v2631_v57  ;;  %v6700_v19 = vld [vmem:[#allocation7] ss:$0 sm:$0xff]  ;;  %v2634_v57 = vld [vmem:[#allocation12 + $0x8] sm:$0xff] }
 0xdac   :  { %2309 = vmatpush.msrb.mxu0 %v2289_v16 }
 0xdad   :  { %v2355_v30 = vadd.f32 %v6813_v5, %v2354_v8  ;;  %2687 = vmatpush.msrb.mxu3 %v2630_v59  ;;  %v2633_v59 = vld [vmem:[#allocation12] sm:$0xff] }
 0xdaf   :  { %v2359_v34 = vsel %vm2358_vm15, %v6813_v5, %v2355_v30  ;;  %2688 = vmatpush.msrb.mxu3 %v2629_v20 }
 0xdb0   :  { %v2364_v36 = vsel %vm2361_vm0, %v2363_v56, %v2359_v34 }
 0xdb1   :  { %6421 = vmatmul.msk.f32.vlgmr.msra.gmra.mxu0 %vm785_vm5, %v2133_v35  ;;  %v2365_v39 = vmul.f32 %v8492_v55, %v2364_v36  ;;  %v8587_v55 = vadd.f32 %v6974_v44, %v676_v46  ;;  %2689 = vmatpush.msrb.mxu3 %v2628_v47  ;;  %v683_v44 = vand.u32 127, %v680_v41 }
 0xdb3   :  { %6430 = vmatmul.msk.f32.vlgmr.msra.gmra.mxu2 %vm785_vm5, %v2365_v39 }
 0xdb9   :  { %6427 = vmatmul.msk.f32.vlgmr.msrb.gmra.mxu0 %vm785_vm5, %v2287_v42  ;;  %v681_v42 = vshrl.u32 %v680_v41, 7  ;;  %v6443_v41 = vld [vmem:[%s9549_s13 + $0x70] sm:$0xff] }
 0xdbb   :  { %6449 = vmatmul.msk.f32.vlgmr.msrb.gmra.mxu2 %vm706_vm4, %v8581_v43  ;;  %vm8640_vm6 = vcmp.ge.s32.totalorder %v681_v42, %v683_v44  ;;  %v6441_v42 = vld [vmem:[%s9549_s13 + $0x60] sm:$0xff]  ;;  %v6440_v44 = vld [vmem:[%s9549_s13 + $0x58] sm:$0xff] }
 0xdc3   :  { %6450 = vmatmul.msk.f32.gmra.mxu2 %vm706_vm4, %v8587_v55 }
 0xe10   :  { %v1909_v26 = vpop.f32.mrf.mxu2 }
 0xe11   :  { %2069 = vrot.lane.b32.xlu0 %v1909_v26, %s7718_s24 }
 0xe1d   :  { %v2065_v29 = vpop.f32.mrf.mxu2 }
 0xe1e   :  { %2077 = vrot.lane.b32.xlu2 %v2065_v29, %s7735_s26 }
 0xe26   :  { %v1987_v48 = vpop.f32.mrf.mxu0  ;;  %v2233_v49 = vpop.f32.mrf.mxu2 }
 0xe27   :  { %2073 = vrot.lane.b32.xlu1 %v1987_v48, %s7734_s29  ;;  %2393 = vrot.lane.b32.xlu0 %v2233_v49, %s7718_s24 }
 0xe2e   :  { %v2154_v27 = vpop.f32.mrf.mxu0 }
 0xe36   :  { %v2311_v50 = vpop.f32.mrf.mxu0  ;;  %v2389_v13 = vpop.f32.mrf.mxu2 }
 0xe37   :  { %2401 = vrot.lane.b32.xlu2 %v2389_v13, %s7735_s26  ;;  %2397 = vrot.lane.b32.xlu1 %v2311_v50, %s7734_s29  ;;  %v6436_v50 = vld [vmem:[%s9548_s2 + $0x38] sm:$0xff]  ;;  %v6435_v13 = vld [vmem:[%s9548_s2 + $0x30] sm:$0xff] }
 0xe38   :  { %2526 = vmatpush.msra.mxu0 %v6436_v50 }
 0xe3a   :  { %2527 = vmatpush.msra.mxu0 %v6435_v13  ;;  %v6705_v13 = vld [vmem:[#allocation2 + $0x1] ss:$0 sm:$0xff] }
 0xe3c   :  { %2528 = vmatpush.msra.mxu0 %v6434_v3 }
 0xe3e   :  { %v2667_v11 = vpop.f32.mrf.mxu2  ;;  %2529 = vmatpush.msra.mxu0 %v6433_v51 }
 0xe3f   :  { %v2668_v16 = vadd.f32 %v6700_v19, %v2667_v11 }
 0xe40   :  { %2710 = vmatpush.msrb.mxu0 %v2636_v53 }
 0xe41   :  { %v2721_v28 = vmul.f32 0.35355338, %v2668_v16 }
 0xe42   :  { %2711 = vmatpush.msrb.mxu0 %v2635_v54 }
 0xe44   :  { %2712 = vmatpush.msrb.mxu0 %v2634_v57 }
 0xe46   :  { %v2670_v40 = vpop.f32.mrf.mxu2  ;;  %2713 = vmatpush.msrb.mxu0 %v2633_v59 }
 0xe47   :  { %v2671_v49 = vadd.f32 %v6700_v19, %v2670_v40  ;;  %v6442_v40 = vld [vmem:[%s9549_s13 + $0x68] sm:$0xff] }
 0xe78   :  { %v2078_v63 = vpop.permute.xlu2 %2077 }
 0xe83   :  { %v2070_v61 = vpop.permute.xlu0 %2069 }
 0xe84   :  { %v2080_v62 = vsel %vm785_vm5, %v1830_v52, %v2070_v61 }
 0xe91   :  { %v2402_v24 = vpop.permute.xlu2 %2401 }
 0xe99   :  { %v2074_v58 = vpop.permute.xlu1 %2073  ;;  %v2394_v2 = vpop.permute.xlu0 %2393 }
 0xe9a   :  { %v2081_v0 = vsel %vm1107_vm12, %v2080_v62, %v2074_v58  ;;  %v2404_v17 = vsel %vm785_vm5, %v2154_v27, %v2394_v2  ;;  %v8655_v27 = vmul.f32 0.35355338, %v2671_v49 }
 0xe9b   :  { %v2082_v1 = vsel %vm1109_vm13, %v2081_v0, %v2078_v63 }
 0xe9c   :  { %6431 = vmatmul.msk.f32.vlgmr.msra.gmra.mxu3 %vm706_vm4, %v2082_v1 }
 0xea9   :  { %v2398_v5 = vpop.permute.xlu1 %2397 }
 0xeaa   :  { %v2405_v6 = vsel %vm1107_vm12, %v2404_v17, %v2398_v5 }
 0xeab   :  { %v2406_v45 = vsel %vm1109_vm13, %v2405_v6, %v2402_v24 }
 0xeac   :  { %6432 = vmatmul.msk.f32.gmra.mxu3 %vm706_vm4, %v2406_v45  ;;  %v6703_v45 = vld [vmem:[%s9550_s7 + $0x1] ss:$0 sm:$0xff] }
 0xeb4   :  { %6451 = vmatmul.msk.f32.vlgmr.msrb.gmra.mxu3 %vm706_vm4, %v8581_v43 }
 0xebc   :  { %6452 = vmatmul.msk.f32.gmra.mxu3 %vm706_vm4, %v8587_v55 }
 0xf1f   :  { %v2431_v60 = vpop.f32.mrf.mxu3 }
 0xf20   :  { %v2432_v9 = vadd.f32 %v6701_v7, %v2431_v60 }
 0xf22   :  { %v2439_v10 = vsel %vm706_vm4, %v2432_v9, 0.0 }
 0xf23   :  { %2440 = vadd.xlane.f32.xlu0 %v2439_v10 }
 0xf2f   :  { %v2434_v25 = vpop.f32.mrf.mxu3 }
 0xf30   :  { %v2435_v15 = vadd.f32 %v6701_v7, %v2434_v25 }
 0xf32   :  { %v2442_v18 = vsel %vm706_vm4, %v2435_v15, 0.0 }
 0xf33   :  { %2443 = vadd.xlane.f32.xlu1 %v2442_v18 }
 0xf37   :  { %v2691_v8 = vpop.f32.mrf.mxu3 }
 0xf38   :  { %v2692_v21 = vadd.f32 %v6702_v4, %v2691_v8 }
 0xf3a   :  { %6455 = vmatpush.xpose.msk.msra.mxu2 %vm785_vm5, %v2692_v21 }
 0xf3d   :  { %6456 = vmatmul.msk.f32.vlgmr.msra.gmra.mxu2 %vm785_vm5, %v2721_v28 }
 0xf3f   :  { %v2694_v23 = vpop.f32.mrf.mxu3 }
 0xf40   :  { %v8619_v30 = vadd.f32 %v6702_v4, %v2694_v23 }
 0xf4c   :  { %2798 = vrot.lane.b32.xlu1 %v2692_v21, %s7731_s30 }
 0xf54   :  { %3126 = vrot.lane.b32.xlu1 %v8619_v30, %s7731_s30 }
 0xf5c   :  { %2876 = vrot.lane.b32.xlu1 %v2721_v28, %s7732_s21 }
 0xf64   :  { %3206 = vrot.lane.b32.xlu1 %v8619_v30, %s7732_s21 }
 0xf96   :  { %v2441_v31 = vpop.xlane.xlu0 %2440 }
 0xf97   :  { %v2445_v56 = vmul.f32 %v2441_v31, %v8328_v12 }
 0xf99   :  { %v8627_v32 = vsub.f32 %v2432_v9, %v2445_v56  ;;  %v6704_v9 = vld [vmem:[%s9551_s10 + $0x1] ss:$0 sm:$0xff] }
 0xf9b   :  { %v2449_v34 = vmul.f32 %v8627_v32, %v8627_v32 }
 0xf9d   :  { %v2451_v35 = vsel %vm706_vm4, %v2449_v34, 0.0 }
 0xf9e   :  { %2452 = vadd.xlane.f32.xlu2 %v2451_v35 }
 0xfa6   :  { %v2444_v36 = vpop.xlane.xlu1 %2443 }
 0xfa7   :  { %v2446_v37 = vmul.f32 %v2444_v36, %v8328_v12 }
 0xfa9   :  { %v8633_v38 = vsub.f32 %v2435_v15, %v2446_v37 }
 0xfab   :  { %v2450_v39 = vmul.f32 %v8633_v38, %v8633_v38 }
 0xfad   :  { %v2454_v33 = vsel %vm706_vm4, %v2450_v39, 0.0 }
 0xfae   :  { %2455 = vadd.xlane.f32.xlu0 %v2454_v33  ;;  %v6444_v33 = vld [vmem:[%s9549_s13 + $0x78] sm:$0xff] }
 0xfaf   :  { %2554 = vmatpush.msrb.mxu1 %v6444_v33 }
 0xfb1   :  { %2555 = vmatpush.msrb.mxu1 %v6443_v41 }
 0xfb3   :  { %2556 = vmatpush.msrb.mxu1 %v6442_v40 }
 0xfb5   :  { %2557 = vmatpush.msrb.mxu1 %v6441_v42 }
 0xfb6   :  { %2796 = vrot.lane.b32.xlu2 %v2721_v28, %s7731_s30 }
 0xfb7   :  { %2558 = vmatpush.msrb.mxu1 %v6440_v44 }
 0xfbe   :  { %2878 = vrot.lane.b32.xlu2 %v2692_v21, %s7732_s21  ;;  %v2799_v46 = vpop.permute.xlu1 %2798 }
 0xfbf   :  { %6458 = vmatpush.xpose.msk.msrb.mxu2 %vm785_vm5, %v2799_v46  ;;  %v6439_v46 = vld [vmem:[%s9549_s13 + $0x50] sm:$0xff] }
 0xfc0   :  { %v2745_v52 = vpop.f32.mrf.mxu2  ;;  %2559 = vmatpush.msrb.mxu1 %v6439_v46 }
 0xfc1   :  { %v8647_v29 = vsel %vm8640_vm6, %v2745_v52, -1e+09  ;;  %v6438_v52 = vld [vmem:[%s9549_s13 + $0x48] sm:$0xff] }
 0xfc2   :  { %2957 = vrot.lane.b32.xlu0 %v2692_v21, %s7733_s1  ;;  %v2749_v48 = vsel %vm785_vm5, %v8647_v29, -inf  ;;  %2560 = vmatpush.msrb.mxu1 %v6438_v52 }
 0xfc3   :  { %2750 = vmax.xlane.f32.xlu1 %v2749_v48  ;;  %v6437_v48 = vld [vmem:[%s9549_s13 + $0x40] sm:$0xff] }
 0xfc4   :  { %2561 = vmatpush.msrb.mxu1 %v6437_v48 }
 0xfc6   :  { %3285 = vrot.lane.b32.xlu2 %v8619_v30, %s7733_s1 }
 0xfca   :  { %2955 = vrot.lane.b32.xlu0 %v2721_v28, %s7733_s1  ;;  %v3127_v28 = vpop.permute.xlu1 %3126 }
 0xfce   :  { %3204 = vrot.lane.b32.xlu2 %v8655_v27, %s7732_s21 }
 0xfd2   :  { %3124 = vrot.lane.b32.xlu0 %v8655_v27, %s7731_s30 }
 0xfda   :  { %3283 = vrot.lane.b32.xlu0 %v8655_v27, %s7733_s1 }
0x1011   :  { %v2453_v20 = vpop.xlane.xlu2 %2452 }
0x1012   :  { %v2457_v47 = vmul.f32 %v2453_v20, %v8328_v12 }
0x1014   :  { %v2459_v61 = vadd.f32 1e-05, %v2457_v47 }
0x1016   :  { %6814 = vrsqrt.f32 %v2459_v61  ;;  %vm2467_vm9 = vweird.f32 %v2459_v61 }
0x1019   :  { %v2797_v62 = vpop.permute.xlu2 %2796 }
0x101a   :  { %6459 = vmatmul.msk.f32.vlgmr.msrb.gmra.mxu2 %vm785_vm5, %v2797_v62  ;;  %v8718_v62 = vld [vmem:[#allocation13] ss:$0 sm:$0xff] }
0x101c   :  { %v6815_v58 = vpop.eup %6814 }
0x101d   :  { %v2462_v63 = vmul.f32 %v6815_v58, %v2459_v61  ;;  %vm2468_vm7 = vweird.f32 %v6815_v58 }
0x101e   :  { %vm2469_vm10 = vmor %vm2467_vm9, %vm2468_vm7 }
0x101f   :  { %v2463_v0 = vmul.f32 %v6815_v58, %v2462_v63 }
0x1021   :  { %v2464_v1 = vmul.f32 0.5, %v2463_v0  ;;  %v2456_v2 = vpop.xlane.xlu0 %2455  ;;  %v2879_v4 = vpop.permute.xlu2 %2878 }
0x1022   :  { %v2458_v17 = vmul.f32 %v2456_v2, %v8328_v12 }
0x1023   :  { %v2465_v5 = vsub.f32 1.5, %v2464_v1 }
0x1024   :  { %v2460_v24 = vadd.f32 1e-05, %v2458_v17 }
0x1025   :  { %v2466_v6 = vmul.f32 %v6815_v58, %v2465_v5 }
0x1026   :  { %6816 = vrsqrt.f32 %v2460_v24  ;;  %vm2477_vm14 = vweird.f32 %v2460_v24 }
0x1027   :  { %v2470_v7 = vsel %vm2469_vm10, %v6815_v58, %v2466_v6 }
0x1028   :  { %v2481_v60 = vmul.f32 %v2470_v7, %v8627_v32 }
0x1029   :  { %v3286_v35 = vpop.permute.xlu2 %3285 }
0x102a   :  { %v2484_v10 = vmul.f32 %v6703_v45, %v2481_v60 }
0x102c   :  { %v6817_v25 = vpop.eup %6816  ;;  %v2487_v15 = vadd.f32 %v6704_v9, %v2484_v10 }
0x102d   :  { %v2472_v18 = vmul.f32 %v6817_v25, %v2460_v24  ;;  %vm2478_vm11 = vweird.f32 %v6817_v25 }
0x102e   :  { %v8674_v19 = vadd.f32 %v2487_v15, %v8389_v22  ;;  %vm2479_vm15 = vmor %vm2477_vm14, %vm2478_vm11 }
0x102f   :  { %v2473_v11 = vmul.f32 %v6817_v25, %v2472_v18 }
0x1030   :  { %6445 = vmatmul.msk.f32.vlgmr.msra.gmra.mxu0 %vm706_vm4, %v8674_v19 }
0x1031   :  { %v2474_v16 = vmul.f32 0.5, %v2473_v11  ;;  %6461 = vmatpush.xpose.msk.msra.mxu0 %vm785_vm5, %v2879_v4 }
0x1033   :  { %v2475_v8 = vsub.f32 1.5, %v2474_v16 }
0x1034   :  { %v2958_v21 = vpop.permute.xlu0 %2957 }
0x1035   :  { %v2476_v23 = vmul.f32 %v6817_v25, %v2475_v8  ;;  %6464 = vmatpush.xpose.msk.msra.mxu2 %vm785_vm5, %v2958_v21 }
0x1037   :  { %v2480_v22 = vsel %vm2479_vm15, %v6817_v25, %v2476_v23 }
0x1038   :  { %v2482_v31 = vmul.f32 %v2480_v22, %v8633_v38 }
0x1039   :  { %6470 = vmatpush.xpose.msk.msrb.mxu2 %vm785_vm5, %v3127_v28 }
0x103a   :  { %v2485_v56 = vmul.f32 %v6703_v45, %v2482_v31 }
0x103c   :  { %v2956_v32 = vpop.permute.xlu0 %2955  ;;  %v2488_v34 = vadd.f32 %v6704_v9, %v2485_v56 }
0x103d   :  { %6465 = vmatmul.msk.f32.vlgmr.msra.gmra.mxu2 %vm785_vm5, %v2956_v32 }
0x103e   :  { %6476 = vmatpush.xpose.msk.msra.mxu2 %vm785_vm5, %v3286_v35  ;;  %v8685_v36 = vadd.f32 %v2488_v34, %v8399_v14  ;;  %v2877_v14 = vpop.permute.xlu1 %2876 }
0x1040   :  { %6446 = vmatmul.msk.f32.gmra.mxu0 %vm706_vm4, %v8685_v36 }
0x1044   :  { %v3125_v37 = vpop.permute.xlu0 %3124 }
0x1045   :  { %6471 = vmatmul.msk.f32.vlgmr.msrb.gmra.mxu2 %vm785_vm5, %v3125_v37 }
0x1046   :  { %v3207_v39 = vpop.permute.xlu1 %3206 }
0x1048   :  { %6453 = vmatmul.msk.f32.vlgmr.msrb.gmra.mxu0 %vm706_vm4, %v8581_v43 }
0x1049   :  { %6467 = vmatpush.xpose.msk.msrb.mxu0 %vm785_vm5, %v8619_v30  ;;  %v3205_v30 = vpop.permute.xlu2 %3204 }
0x104c   :  { %v3284_v38 = vpop.permute.xlu0 %3283 }
0x104d   :  { %6477 = vmatmul.msk.f32.vlgmr.msra.gmra.mxu2 %vm785_vm5, %v3284_v38 }
0x104e   :  { %v2751_v5 = vpop.xlane.xlu1 %2750 }
0x104f   :  { %v2752_v6 = vsub.f32 %v8647_v29, %v2751_v5 }
0x1050   :  { %6454 = vmatmul.msk.f32.gmra.mxu0 %vm706_vm4, %v8587_v55 }
0x1051   :  { %v2753_v9 = vmul.f32 1.442695, %v2752_v6 }
0x1053   :  { %6818 = vpow2.f32 %v2753_v9 }
0x1058   :  { %6462 = vmatmul.msk.f32.vlgmr.msra.gmra.mxu0 %vm785_vm5, %v2877_v14 }
0x1059   :  { %6473 = vmatpush.xpose.msk.msra.mxu0 %vm785_vm5, %v3207_v39  ;;  %v8736_v15 = vpop.eup %6818 }
0x105a   :  { %v2755_v29 = vsel %vm785_vm5, %v8736_v15, 0.0 }
0x1060   :  { %6468 = vmatmul.msk.f32.vlgmr.msrb.gmra.mxu0 %vm785_vm5, %v8655_v27 }
0x1068   :  { %6474 = vmatmul.msk.f32.vlgmr.msra.gmra.mxu0 %vm785_vm5, %v3205_v30 }
0x109d   :  { %v2821_v49 = vpop.f32.mrf.mxu2 }
0x109e   :  { %v2824_v27 = vsel %vm8640_vm6, %v2821_v49, -1e+09 }
0x109f   :  { %v2825_v50 = vsel %vm785_vm5, %v2824_v27, -inf }
0x10a0   :  { %2826 = vmax.xlane.f32.xlu0 %v2825_v50 }
0x10ad   :  { %v2531_v3 = vpop.f32.mrf.mxu0 }
0x10ae   :  { %v2532_v51 = vadd.f32 %v6705_v13, %v2531_v3 }
0x10b0   :  { %v2537_v53 = vmax.f32 %v2532_v51, 0.0 }
0x10b2   :  { %6447 = vmatmul.msk.f32.vlgmr.msrb.gmra.mxu1 %vm1573_vm8, %v2537_v53 }
0x10bd   :  { %v2534_v54 = vpop.f32.mrf.mxu0 }
0x10be   :  { %v2535_v57 = vadd.f32 %v6705_v13, %v2534_v54 }
0x10c0   :  { %v2538_v59 = vmax.f32 %v2535_v57, 0.0  ;;  %v2980_v20 = vpop.f32.mrf.mxu2 }
0x10c1   :  { %v2983_v47 = vsel %vm8640_vm6, %v2980_v20, -1e+09 }
0x10c2   :  { %6448 = vmatmul.msk.f32.gmra.mxu1 %vm1573_vm8, %v2538_v59  ;;  %v2984_v61 = vsel %vm785_vm5, %v2983_v47, -inf }
0x10c3   :  { %2985 = vmax.xlane.f32.xlu2 %v2984_v61 }
0x10c5   :  { %v2715_v58 = vpop.f32.mrf.mxu0 }
0x10c6   :  { %v8721_v63 = vadd.f32 %v8718_v62, %v2715_v58 }
0x10c8   :  { %2791 = vmatpush.msra.mxu1 %v8721_v63  ;;  %v3149_v0 = vpop.f32.mrf.mxu2 }
0x10c9   :  { %v3152_v1 = vsel %vm8640_vm6, %v3149_v0, -1e+09 }
0x10ca   :  { %v3153_v2 = vsel %vm785_vm5, %v3152_v1, -inf }
0x10cb   :  { %3154 = vmax.xlane.f32.xlu0 %v3153_v2 }
0x10cd   :  { %v8727_v17 = vpop.f32.mrf.mxu0 }
0x10d0   :  { %v3308_v60 = vpop.f32.mrf.mxu2 }
0x10d1   :  { %v3311_v10 = vsel %vm8640_vm6, %v3308_v60, -1e+09 }
0x10d2   :  { %v3312_v25 = vsel %vm785_vm5, %v3311_v10, -inf }
0x10d5   :  { %v2901_v24 = vpop.f32.mrf.mxu0 }
0x10d6   :  { %v2904_v45 = vsel %vm8640_vm6, %v2901_v24, -1e+09 }
0x10d7   :  { %v2905_v7 = vsel %vm785_vm5, %v2904_v45, -inf }
0x10d8   :  { %2906 = vmax.xlane.f32.xlu2 %v2905_v7 }
0x10dd   :  { %v3073_v21 = vpop.f32.mrf.mxu0 }
0x10de   :  { %v3076_v28 = vsel %vm8640_vm6, %v3073_v21, -1e+09 }
0x10df   :  { %v3077_v23 = vsel %vm785_vm5, %v3076_v28, -inf }
0x10e0   :  { %3313 = vmax.xlane.f32.xlu2 %v3312_v25 }
0x10e5   :  { %v3229_v14 = vpop.f32.mrf.mxu0 }
0x10e6   :  { %v3232_v39 = vsel %vm8640_vm6, %v3229_v14, -1e+09 }
0x10e7   :  { %v3233_v41 = vsel %vm785_vm5, %v3232_v39, -inf }
0x10e8   :  { %2756 = vadd.xlane.f32.xlu2 %v2755_v29 }
0x1113   :  { %v2827_v18 = vpop.xlane.xlu0 %2826 }
0x1114   :  { %v2828_v11 = vsub.f32 %v2824_v27, %v2827_v18 }
0x1116   :  { %v2829_v4 = vmul.f32 1.442695, %v2828_v11 }
0x1118   :  { %6820 = vpow2.f32 %v2829_v4 }
0x111e   :  { %v8740_v16 = vpop.eup %6820 }
0x111f   :  { %v2831_v8 = vsel %vm785_vm5, %v8740_v16, 0.0 }
0x1120   :  { %2832 = vadd.xlane.f32.xlu1 %v2831_v8 }
0x1128   :  { %3078 = vmax.xlane.f32.xlu1 %v3077_v23 }
0x1136   :  { %v2986_v22 = vpop.xlane.xlu2 %2985 }
0x1137   :  { %v2987_v31 = vsub.f32 %v2983_v47, %v2986_v22 }
0x1139   :  { %v2988_v56 = vmul.f32 1.442695, %v2987_v31 }
0x113b   :  { %6822 = vpow2.f32 %v2988_v56 }
0x113e   :  { %v3155_v32 = vpop.xlane.xlu0 %3154 }
0x113f   :  { %v3156_v34 = vsub.f32 %v3152_v1, %v3155_v32  ;;  %v8774_v1 = vadd.f32 %v8718_v62, %v8727_v17 }
0x1141   :  { %v8747_v35 = vpop.eup %6822  ;;  %v3157_v37 = vmul.f32 1.442695, %v3156_v34  ;;  %3008 = vrot.lane.b32.xlu1 %v8721_v63, %s7733_s1 }
0x1142   :  { %v2990_v38 = vsel %vm785_vm5, %v8747_v35, 0.0 }
0x1143   :  { %6824 = vpow2.f32 %v3157_v37  ;;  %2991 = vadd.xlane.f32.xlu0 %v2990_v38 }
0x1149   :  { %v8755_v30 = vpop.eup %6824 }
0x114a   :  { %v3159_v33 = vsel %vm785_vm5, %v8755_v30, 0.0 }
0x114b   :  { %3160 = vadd.xlane.f32.xlu2 %v3159_v33  ;;  %3234 = vmax.xlane.f32.xlu0 %v3233_v41  ;;  %v2907_v40 = vpop.xlane.xlu2 %2906 }
0x114c   :  { %v2908_v52 = vsub.f32 %v2904_v45, %v2907_v40 }
0x114e   :  { %v2909_v49 = vmul.f32 1.442695, %v2908_v52 }
0x1153   :  { %v3314_v42 = vpop.xlane.xlu2 %3313 }
0x1154   :  { %v3315_v44 = vsub.f32 %v3311_v10, %v3314_v42 }
0x1156   :  { %v3316_v46 = vmul.f32 1.442695, %v3315_v44 }
0x1158   :  { %6826 = vpow2.f32 %v3316_v46 }
0x115b   :  { %v2757_v48 = vpop.xlane.xlu2 %2756 }
0x115c   :  { %6828 = vrcp.f32 %v2757_v48  ;;  %v2769_v53 = vand.u32 2147483648, %v2757_v48  ;;  %v2767_v59 = vand.u32 2147483647, %v2757_v48  ;;  %vm2763_vm1 = vweird.f32 %v2757_v48 }
0x115d   :  { %6830 = vpow2.f32 %v2909_v49 }
0x115e   :  { %v8760_v27 = vpop.eup %6826  ;;  %v2770_v47 = vor.u32 1.1754944e-38, %v2769_v53  ;;  %vm2768_vm7 = vcmp.eq.f32.partialorder %v2767_v59, 8.507059e+37 }
0x115f   :  { %2850 = vrot.lane.b32.xlu0 %v8721_v63, %s7731_s30  ;;  %v3318_v50 = vsel %vm785_vm5, %v8760_v27, 0.0 }
0x1160   :  { %3319 = vadd.xlane.f32.xlu2 %v3318_v50 }
0x1162   :  { %v6829_v13 = vpop.eup %6828 }
0x1163   :  { %v2759_v3 = vmul.f32 %v6829_v13, %v2757_v48  ;;  %v8766_v54 = vpop.eup %6830  ;;  %vm2764_vm0 = vweird.f32 %v6829_v13 }
0x1164   :  { %vm2765_vm2 = vmor %vm2763_vm1, %vm2764_vm0  ;;  %v2911_v61 = vsel %vm785_vm5, %v8766_v54, 0.0 }
0x1165   :  { %v2760_v51 = vsub.f32 1.0, %v2759_v3 }
0x1167   :  { %v2761_v57 = vmul.f32 %v6829_v13, %v2760_v51  ;;  %2929 = vrot.lane.b32.xlu0 %v8721_v63, %s7732_s21 }
0x1169   :  { %v2762_v20 = vadd.f32 %v6829_v13, %v2761_v57 }
0x116b   :  { %v2766_v58 = vsel %vm2765_vm2, %v6829_v13, %v2762_v20  ;;  %2912 = vadd.xlane.f32.xlu1 %v2911_v61 }
0x116c   :  { %v2771_v0 = vsel %vm2768_vm7, %v2770_v47, %v2766_v58 }
0x116d   :  { %v2772_v2 = vmul.f32 %v8736_v15, %v2771_v0 }
0x116f   :  { %3336 = vrot.lane.b32.xlu0 %v8774_v1, %s7733_s1  ;;  %6457 = vmatmul.msk.f32.vlgmr.msra.gmra.mxu1 %vm785_vm5, %v2772_v2 }
0x1193   :  { %v2833_v63 = vpop.xlane.xlu1 %2832 }
0x1194   :  { %v2845_v21 = vand.u32 2147483648, %v2833_v63  ;;  %vm2839_vm10 = vweird.f32 %v2833_v63  ;;  %v2843_v23 = vand.u32 2147483647, %v2833_v63 }
0x1196   :  { %v2846_v32 = vor.u32 1.1754944e-38, %v2845_v21  ;;  %vm2844_vm14 = vcmp.eq.f32.partialorder %v2843_v23, 8.507059e+37 }
0x119b   :  { %v3079_v5 = vpop.xlane.xlu1 %3078 }
0x119c   :  { %v3080_v24 = vsub.f32 %v3076_v28, %v3079_v5 }
0x119e   :  { %v3081_v6 = vmul.f32 1.442695, %v3080_v24 }
0x11a0   :  { %6832 = vpow2.f32 %v3081_v6 }
0x11a1   :  { %6834 = vrcp.f32 %v2833_v63 }
0x11a6   :  { %v8780_v45 = vpop.eup %6832 }
0x11a7   :  { %v3083_v7 = vsel %vm785_vm5, %v8780_v45, 0.0  ;;  %v6835_v17 = vpop.eup %6834 }
0x11a8   :  { %3084 = vadd.xlane.f32.xlu1 %v3083_v7  ;;  %v2835_v60 = vmul.f32 %v6835_v17, %v2833_v63  ;;  %vm2840_vm9 = vweird.f32 %v6835_v17 }
0x11a9   :  { %vm2841_vm11 = vmor %vm2839_vm10, %vm2840_vm9 }
0x11aa   :  { %v2836_v10 = vsub.f32 1.0, %v2835_v60 }
0x11ac   :  { %v2837_v18 = vmul.f32 %v6835_v17, %v2836_v10 }
0x11ae   :  { %v2838_v4 = vadd.f32 %v6835_v17, %v2837_v18 }
0x11b0   :  { %v2842_v31 = vsel %vm2841_vm11, %v6835_v17, %v2838_v4 }
0x11b1   :  { %v2847_v34 = vsel %vm2844_vm14, %v2846_v32, %v2842_v31 }
0x11b2   :  { %v2848_v33 = vmul.f32 %v8740_v16, %v2847_v34 }
0x11b3   :  { %v3009_v41 = vpop.permute.xlu1 %3008 }
0x11b6   :  { %v2992_v62 = vpop.xlane.xlu0 %2991 }
0x11b7   :  { %6836 = vrcp.f32 %v2992_v62  ;;  %v3004_v38 = vand.u32 2147483648, %v2992_v62  ;;  %vm2998_vm0 = vweird.f32 %v2992_v62  ;;  %v3002_v14 = vand.u32 2147483647, %v2992_v62 }
0x11b9   :  { %v3005_v42 = vor.u32 1.1754944e-38, %v3004_v38  ;;  %vm3003_vm2 = vcmp.eq.f32.partialorder %v3002_v14, 8.507059e+37 }
0x11bd   :  { %v6837_v15 = vpop.eup %6836 }
0x11be   :  { %v3235_v9 = vpop.xlane.xlu0 %3234  ;;  %v2994_v11 = vmul.f32 %v6837_v15, %v2992_v62  ;;  %vm2999_vm15 = vweird.f32 %v6837_v15  ;;  %v3161_v0 = vpop.xlane.xlu2 %3160 }
0x11bf   :  { %v3236_v25 = vsub.f32 %v3232_v39, %v3235_v9  ;;  %vm3000_vm1 = vmor %vm2998_vm0, %vm2999_vm15  ;;  %v3171_v21 = vand.u32 2147483647, %v3161_v0 }
0x11c0   :  { %v2995_v8 = vsub.f32 1.0, %v2994_v11 }
0x11c1   :  { %v3237_v29 = vmul.f32 1.442695, %v3236_v25  ;;  %3257 = vrot.lane.b32.xlu1 %v8774_v1, %s7732_s21 }
0x11c2   :  { %v2996_v56 = vmul.f32 %v6837_v15, %v2995_v8  ;;  %v3173_v8 = vand.u32 2147483648, %v3161_v0 }
0x11c3   :  { %6838 = vpow2.f32 %v3237_v29 }
0x11c4   :  { %v2997_v37 = vadd.f32 %v6837_v15, %v2996_v56  ;;  %v3174_v31 = vor.u32 1.1754944e-38, %v3173_v8 }
0x11c6   :  { %v3001_v40 = vsel %vm3000_vm1, %v6837_v15, %v2997_v37 }
0x11c7   :  { %v3006_v44 = vsel %vm3003_vm2, %v3005_v42, %v3001_v40 }
0x11c8   :  { %v3007_v52 = vmul.f32 %v8747_v35, %v3006_v44 }
0x11c9   :  { %v8786_v28 = vpop.eup %6838 }
0x11ca   :  { %v3239_v22 = vsel %vm785_vm5, %v8786_v28, 0.0 }
0x11cb   :  { %3240 = vadd.xlane.f32.xlu2 %v3239_v22 }
0x11d1   :  { %v2851_v39 = vpop.permute.xlu0 %2850 }
0x11d2   :  { %2871 = vmatpush.msra.mxu3 %v2851_v39 }
0x11d3   :  { %6460 = vmatmul.msk.f32.vlgmr.msra.gmra.mxu3 %vm785_vm5, %v2848_v33 }
0x11d4   :  { %3029 = vmatpush.msrb.mxu3 %v3009_v41 }
0x11d9   :  { %v2930_v46 = vpop.permute.xlu0 %2929 }
0x11da   :  { %2950 = vmatpush.msrb.mxu1 %v2930_v46 }
0x11db   :  { %6466 = vmatmul.msk.f32.vlgmr.msrb.gmra.mxu3 %vm785_vm5, %v3007_v52 }
0x11dc   :  { %3119 = vmatpush.msra.mxu1 %v8774_v1 }
0x11de   :  { %v2913_v48 = vpop.xlane.xlu1 %2912 }
0x11df   :  { %6840 = vrcp.f32 %v2913_v48  ;;  %v2925_v13 = vand.u32 2147483648, %v2913_v48  ;;  %v2923_v51 = vand.u32 2147483647, %v2913_v48  ;;  %vm2919_vm9 = vweird.f32 %v2913_v48 }
0x11e1   :  { %v2926_v35 = vor.u32 1.1754944e-38, %v2925_v13  ;;  %vm2924_vm11 = vcmp.eq.f32.partialorder %v2923_v51, 8.507059e+37  ;;  %v3337_v40 = vpop.permute.xlu0 %3336 }
0x11e3   :  { %3178 = vrot.lane.b32.xlu2 %v8774_v1, %s7731_s30 }
0x11e5   :  { %v6841_v16 = vpop.eup %6840 }
0x11e6   :  { %v2915_v49 = vmul.f32 %v6841_v16, %v2913_v48  ;;  %vm2920_vm7 = vweird.f32 %v6841_v16 }
0x11e7   :  { %vm2921_vm10 = vmor %vm2919_vm9, %vm2920_vm7  ;;  %vm3167_vm7 = vweird.f32 %v3161_v0 }
0x11e8   :  { %v2916_v50 = vsub.f32 1.0, %v2915_v49 }
0x11ea   :  { %v2917_v3 = vmul.f32 %v6841_v16, %v2916_v50 }
0x11ec   :  { %v2918_v53 = vadd.f32 %v6841_v16, %v2917_v3 }
0x11ee   :  { %v2922_v57 = vsel %vm2921_vm10, %v6841_v16, %v2918_v53  ;;  %vm3172_vm10 = vcmp.eq.f32.partialorder %v3171_v21, 8.507059e+37  ;;  %v6708_v21 = vld [vmem:[#allocation16] ss:$0 sm:$0xff] }
0x11ef   :  { %v2927_v59 = vsel %vm2924_vm11, %v2926_v35, %v2922_v57  ;;  %v2563_v35 = vpop.f32.mrf.mxu1 }
0x11f0   :  { %v2928_v20 = vmul.f32 %v8766_v54, %v2927_v59  ;;  %v3320_v54 = vpop.xlane.xlu2 %3319 }
0x11f1   :  { %v3332_v37 = vand.u32 2147483648, %v3320_v54  ;;  %v3330_v38 = vand.u32 2147483647, %v3320_v54 }
0x11f2   :  { %6463 = vmatmul.msk.f32.vlgmr.msrb.gmra.mxu1 %vm785_vm5, %v2928_v20 }
0x11f3   :  { %v3333_v44 = vor.u32 1.1754944e-38, %v3332_v37 }
0x11f7   :  { %v2566_v59 = vpop.f32.mrf.mxu1 }
0x11ff   :  { %v2793_v20 = vpop.f32.mrf.mxu1 }
0x121b   :  { %v3085_v47 = vpop.xlane.xlu1 %3084 }
0x121c   :  { %6842 = vrcp.f32 %v3085_v47  ;;  %v3097_v2 = vand.u32 2147483648, %v3085_v47  ;;  %v3095_v5 = vand.u32 2147483647, %v3085_v47  ;;  %vm3091_vm15 = vweird.f32 %v3085_v47 }
0x121d   :  { %6844 = vrcp.f32 %v3161_v0 }
0x121e   :  { %v3098_v6 = vor.u32 1.1754944e-38, %v3097_v2  ;;  %vm3096_vm1 = vcmp.eq.f32.partialorder %v3095_v5, 8.507059e+37  ;;  %6846 = vrcp.f32 %v3320_v54 }
0x1222   :  { %v6843_v61 = vpop.eup %6842 }
0x1223   :  { %v3087_v58 = vmul.f32 %v6843_v61, %v3085_v47  ;;  %vm3092_vm14 = vweird.f32 %v6843_v61  ;;  %v6845_v17 = vpop.eup %6844 }
0x1224   :  { %vm3093_vm0 = vmor %vm3091_vm15, %vm3092_vm14  ;;  %v3163_v9 = vmul.f32 %v6845_v17, %v3161_v0  ;;  %v6847_v15 = vpop.eup %6846  ;;  %vm3168_vm2 = vweird.f32 %v6845_v17  ;;  %vm3326_vm14 = vweird.f32 %v3320_v54 }
0x1225   :  { %v3088_v1 = vsub.f32 1.0, %v3087_v58  ;;  %v3322_v18 = vmul.f32 %v6847_v15, %v3320_v54  ;;  %vm3169_vm9 = vmor %vm3167_vm7, %vm3168_vm2  ;;  %vm3327_vm11 = vweird.f32 %v6847_v15  ;;  %v2639_v58 = vld [vmem:[#allocation15 + $0x8] sm:$0xff] }
0x1226   :  { %v3164_v25 = vsub.f32 1.0, %v3163_v9  ;;  %vm3328_vm15 = vmor %vm3326_vm14, %vm3327_vm11 }
0x1227   :  { %v3089_v63 = vmul.f32 %v6843_v61, %v3088_v1  ;;  %v3323_v4 = vsub.f32 1.0, %v3322_v18 }
0x1228   :  { %v3165_v29 = vmul.f32 %v6845_v17, %v3164_v25 }
0x1229   :  { %v3090_v24 = vadd.f32 %v6843_v61, %v3089_v63  ;;  %v3324_v22 = vmul.f32 %v6847_v15, %v3323_v4 }
0x122a   :  { %v3166_v11 = vadd.f32 %v6845_v17, %v3165_v29 }
0x122b   :  { %v3094_v7 = vsel %vm3093_vm0, %v6843_v61, %v3090_v24  ;;  %v3325_v32 = vadd.f32 %v6847_v15, %v3324_v22  ;;  %vm3331_vm0 = vcmp.eq.f32.partialorder %v3330_v38, 8.507059e+37  ;;  %v2640_v61 = vld [vmem:[#allocation15 + $0x10] sm:$0xff] }
0x122c   :  { %v3099_v62 = vsel %vm3096_vm1, %v3098_v6, %v3094_v7 }
0x122d   :  { %v3100_v60 = vmul.f32 %v8780_v45, %v3099_v62  ;;  %v3170_v45 = vsel %vm3169_vm9, %v6845_v17, %v3166_v11  ;;  %v3329_v41 = vsel %vm3328_vm15, %v6847_v15, %v3325_v32  ;;  %v6707_v17 = vld [vmem:[#allocation4 + $0x1] ss:$0 sm:$0xff] }
0x122e   :  { %v3175_v56 = vsel %vm3172_vm10, %v3174_v31, %v3170_v45  ;;  %v3334_v16 = vsel %vm3331_vm0, %v3333_v44, %v3329_v41 }
0x122f   :  { %6469 = vmatmul.msk.f32.vlgmr.msra.gmra.mxu1 %vm785_vm5, %v3100_v60  ;;  %v3176_v33 = vmul.f32 %v8755_v30, %v3175_v56  ;;  %v3335_v13 = vmul.f32 %v8760_v27, %v3334_v16  ;;  %v2641_v27 = vld [vmem:[#allocation15 + $0x18] sm:$0xff]  ;;  %v2564_v60 = vadd.f32 %v6707_v17, %v2563_v35  ;;  %v3466_v35 = vld [vmem:[#allocation21] sm:$0xff] }
0x1230   :  { %3396 = vmatpush.msrb.mxu0 %v2641_v27  ;;  %v3469_v16 = vld [vmem:[#allocation21 + $0x18] sm:$0xff] }
0x1231   :  { %v2571_v9 = vsel %vm706_vm4, %v2564_v60, 0.0  ;;  %3530 = vmatpush.msrb.mxu2 %v3469_v16 }
0x1232   :  { %3397 = vmatpush.msrb.mxu0 %v2640_v61 }
0x1233   :  { %v3258_v10 = vpop.permute.xlu1 %3257 }
0x1234   :  { %3278 = vmatpush.msrb.mxu1 %v3258_v10  ;;  %3398 = vmatpush.msrb.mxu0 %v2639_v58  ;;  %v2567_v10 = vadd.f32 %v6707_v17, %v2566_v59 }
0x1236   :  { %v2574_v25 = vsel %vm706_vm4, %v2567_v10, 0.0 }
0x123e   :  { %v3241_v23 = vpop.xlane.xlu2 %3240 }
0x123f   :  { %6848 = vrcp.f32 %v3241_v23  ;;  %v3253_v46 = vand.u32 2147483648, %v3241_v23  ;;  %v3251_v48 = vand.u32 2147483647, %v3241_v23  ;;  %vm3247_vm2 = vweird.f32 %v3241_v23 }
0x1241   :  { %v3254_v50 = vor.u32 1.1754944e-38, %v3253_v46  ;;  %vm3252_vm9 = vcmp.eq.f32.partialorder %v3251_v48, 8.507059e+37 }
0x1245   :  { %v6849_v34 = vpop.eup %6848 }
0x1246   :  { %v3243_v14 = vmul.f32 %v6849_v34, %v3241_v23  ;;  %v3179_v39 = vpop.permute.xlu2 %3178  ;;  %vm3248_vm1 = vweird.f32 %v6849_v34 }
0x1247   :  { %3199 = vmatpush.msra.mxu3 %v3179_v39  ;;  %vm3249_vm7 = vmor %vm3247_vm2, %vm3248_vm1 }
0x1248   :  { %v3244_v42 = vsub.f32 1.0, %v3243_v14  ;;  %6472 = vmatmul.msk.f32.vlgmr.msra.gmra.mxu3 %vm785_vm5, %v3176_v33 }
0x1249   :  { %3357 = vmatpush.msrb.mxu3 %v3337_v40 }
0x124a   :  { %v3245_v52 = vmul.f32 %v6849_v34, %v3244_v42 }
0x124c   :  { %v3246_v49 = vadd.f32 %v6849_v34, %v3245_v52 }
0x124e   :  { %v3250_v30 = vsel %vm3249_vm7, %v6849_v34, %v3246_v49  ;;  %v3474_v49 = vld [vmem:[#allocation24 + $0x18] sm:$0xff] }
0x124f   :  { %v3255_v3 = vsel %vm3252_vm9, %v3254_v50, %v3250_v30  ;;  %3554 = vmatpush.msra.mxu3 %v3474_v49  ;;  %v3468_v30 = vld [vmem:[#allocation21 + $0x10] sm:$0xff] }
0x1250   :  { %6478 = vmatmul.msk.f32.vlgmr.msrb.gmra.mxu3 %vm785_vm5, %v3335_v13  ;;  %v3256_v51 = vmul.f32 %v8786_v28, %v3255_v3  ;;  %v2638_v28 = vld [vmem:[#allocation15] sm:$0xff]  ;;  %v3473_v13 = vld [vmem:[#allocation24 + $0x10] sm:$0xff]  ;;  %v3467_v3 = vld [vmem:[#allocation21 + $0x8] sm:$0xff]  ;;  %3531 = vmatpush.msrb.mxu2 %v3468_v30 }
0x1251   :  { %3399 = vmatpush.msrb.mxu0 %v2638_v28  ;;  %3555 = vmatpush.msra.mxu3 %v3473_v13  ;;  %v6712_v30 = vld [vmem:[#allocation31] ss:$0 sm:$0xff] }
0x1252   :  { %6475 = vmatmul.msk.f32.vlgmr.msrb.gmra.mxu1 %vm785_vm5, %v3256_v51  ;;  %v3472_v51 = vld [vmem:[#allocation24 + $0x8] sm:$0xff]  ;;  %3532 = vmatpush.msrb.mxu2 %v3467_v3 }
0x1253   :  { %3556 = vmatpush.msra.mxu3 %v3472_v51  ;;  %v6713_v51 = vld [vmem:[#allocation22] ss:$0 sm:$0xff] }
0x1254   :  { %3533 = vmatpush.msrb.mxu2 %v3466_v35 }
0x1256   :  { %v2873_v53 = vpop.f32.mrf.mxu3 }
0x1257   :  { %3035 = vrot.lane.b32.xlu0 %v2873_v53, %s7718_s24 }
0x125e   :  { %v3031_v57 = vpop.f32.mrf.mxu3 }
0x125f   :  { %3043 = vrot.lane.b32.xlu0 %v3031_v57, %s7735_s26  ;;  %v3471_v57 = vld [vmem:[#allocation24] sm:$0xff] }
0x1260   :  { %3557 = vmatpush.msra.mxu3 %v3471_v57 }
0x126f   :  { %v2952_v47 = vpop.f32.mrf.mxu1 }
0x1270   :  { %3039 = vrot.lane.b32.xlu1 %v2952_v47, %s7734_s29 }
0x12ac   :  { %v3121_v0 = vpop.f32.mrf.mxu1 }
0x12c9   :  { %v3036_v5 = vpop.permute.xlu0 %3035 }
0x12ca   :  { %v3046_v24 = vsel %vm785_vm5, %v2793_v20, %v3036_v5  ;;  %v6710_v5 = vld [vmem:[%s9553_s6 + $0x1] ss:$0 sm:$0xff] }
0x12cb   :  { %v3201_v1 = vpop.f32.mrf.mxu3 }
0x12cc   :  { %3363 = vrot.lane.b32.xlu2 %v3201_v1, %s7718_s24 }
0x12cf   :  { %v3280_v2 = vpop.f32.mrf.mxu1 }
0x12d0   :  { %3367 = vrot.lane.b32.xlu1 %v3280_v2, %s7734_s29  ;;  %v6709_v2 = vld [vmem:[%s9552_s15 + $0x1] ss:$0 sm:$0xff] }
0x12d1   :  { %v3044_v7 = vpop.permute.xlu0 %3043 }
0x12d3   :  { %v3359_v63 = vpop.f32.mrf.mxu3 }
0x12d4   :  { %3371 = vrot.lane.b32.xlu0 %v3359_v63, %s7735_s26 }
0x12e2   :  { %v3040_v6 = vpop.permute.xlu1 %3039 }
0x12e3   :  { %v3047_v54 = vsel %vm1107_vm12, %v3046_v24, %v3040_v6 }
0x12e4   :  { %v3048_v62 = vsel %vm1109_vm13, %v3047_v54, %v3044_v7 }
0x12e5   :  { %6479 = vmatmul.msk.f32.vlgmr.msrb.gmra.mxu0 %vm706_vm4, %v3048_v62 }
0x12f5   :  { %2572 = vadd.xlane.f32.xlu2 %v2571_v9 }
0x12fe   :  { %2575 = vadd.xlane.f32.xlu0 %v2574_v25 }
0x1326   :  { %v3364_v15 = vpop.permute.xlu2 %3363 }
0x1327   :  { %v3374_v18 = vsel %vm785_vm5, %v3121_v0, %v3364_v15 }
0x1342   :  { %v3368_v29 = vpop.permute.xlu1 %3367 }
0x1343   :  { %v3375_v11 = vsel %vm1107_vm12, %v3374_v18, %v3368_v29  ;;  %v3464_v29 = vld [vmem:[#allocation18 + $0x18] sm:$0xff]  ;;  %v3463_v18 = vld [vmem:[#allocation18 + $0x10] sm:$0xff] }
0x1344   :  { %3500 = vmatpush.msra.mxu1 %v3464_v29 }
0x1346   :  { %v3372_v4 = vpop.permute.xlu0 %3371  ;;  %3501 = vmatpush.msra.mxu1 %v3463_v18 }
0x1347   :  { %v3376_v8 = vsel %vm1109_vm13, %v3375_v11, %v3372_v4  ;;  %v3462_v4 = vld [vmem:[#allocation18 + $0x8] sm:$0xff] }
0x1348   :  { %6480 = vmatmul.msk.f32.gmra.mxu0 %vm706_vm4, %v3376_v8  ;;  %3502 = vmatpush.msra.mxu1 %v3462_v4 }
0x1362   :  { %v3401_v23 = vpop.f32.mrf.mxu0 }
0x1363   :  { %v3402_v45 = vadd.f32 %v6708_v21, %v3401_v23 }
0x1365   :  { %v3409_v22 = vsel %vm706_vm4, %v3402_v45, 0.0 }
0x1366   :  { %3410 = vadd.xlane.f32.xlu1 %v3409_v22 }
0x1368   :  { %v2573_v31 = vpop.xlane.xlu2 %2572 }
0x1369   :  { %v2577_v56 = vmul.f32 %v2573_v31, %v8328_v12 }
0x136b   :  { %v2579_v32 = vsub.f32 %v2564_v60, %v2577_v56 }
0x136d   :  { %v2581_v34 = vmul.f32 %v2579_v32, %v2579_v32 }
0x136f   :  { %v2583_v37 = vsel %vm706_vm4, %v2581_v34, 0.0 }
0x1370   :  { %2584 = vadd.xlane.f32.xlu1 %v2583_v37 }
0x1371   :  { %v2576_v38 = vpop.xlane.xlu0 %2575 }
0x1372   :  { %v2578_v14 = vmul.f32 %v2576_v38, %v8328_v12 }
0x1374   :  { %v8827_v41 = vsub.f32 %v2567_v10, %v2578_v14 }
0x1376   :  { %v2582_v42 = vmul.f32 %v8827_v41, %v8827_v41 }
0x1378   :  { %v2586_v44 = vsel %vm706_vm4, %v2582_v42, 0.0 }
0x13c5   :  { %v3404_v39 = vpop.f32.mrf.mxu0 }
0x13c6   :  { %v3405_v33 = vadd.f32 %v6708_v21, %v3404_v39  ;;  %v3461_v21 = vld [vmem:[#allocation18] sm:$0xff] }
0x13c7   :  { %3503 = vmatpush.msra.mxu1 %v3461_v21 }
0x13c8   :  { %v3412_v40 = vsel %vm706_vm4, %v3405_v33, 0.0 }
0x13c9   :  { %3413 = vadd.xlane.f32.xlu2 %v3412_v40 }
0x13d1   :  { %2587 = vadd.xlane.f32.xlu2 %v2586_v44 }
0x13d9   :  { %v3411_v46 = vpop.xlane.xlu1 %3410 }
0x13da   :  { %v3415_v52 = vmul.f32 %v3411_v46, %v8328_v12 }
0x13dc   :  { %v8834_v48 = vsub.f32 %v3402_v45, %v3415_v52 }
0x13de   :  { %v3419_v50 = vmul.f32 %v8834_v48, %v8834_v48 }
0x13e0   :  { %v3421_v53 = vsel %vm706_vm4, %v3419_v50, 0.0 }
0x13e1   :  { %3422 = vadd.xlane.f32.xlu0 %v3421_v53  ;;  %v8871_v53 = vld [vmem:[#allocation25] ss:$0 sm:$0xff] }
0x13e3   :  { %v2585_v59 = vpop.xlane.xlu1 %2584 }
0x13e4   :  { %v2589_v20 = vmul.f32 %v2585_v59, %v8328_v12 }
0x13e6   :  { %v2591_v47 = vadd.f32 1e-05, %v2589_v20 }
0x13e8   :  { %6850 = vrsqrt.f32 %v2591_v47  ;;  %vm2599_vm11 = vweird.f32 %v2591_v47 }
0x13ee   :  { %v6851_v27 = vpop.eup %6850 }
0x13ef   :  { %v2594_v61 = vmul.f32 %v6851_v27, %v2591_v47  ;;  %vm2600_vm10 = vweird.f32 %v6851_v27 }
0x13f0   :  { %vm2601_vm14 = vmor %vm2599_vm11, %vm2600_vm10 }
0x13f1   :  { %v2595_v58 = vmul.f32 %v6851_v27, %v2594_v61 }
0x13f3   :  { %v2596_v28 = vmul.f32 0.5, %v2595_v58 }
0x13f5   :  { %v2597_v0 = vsub.f32 1.5, %v2596_v28 }
0x13f7   :  { %v2598_v1 = vmul.f32 %v6851_v27, %v2597_v0 }
0x13f9   :  { %v2602_v63 = vsel %vm2601_vm14, %v6851_v27, %v2598_v1 }
0x13fa   :  { %v2613_v24 = vmul.f32 %v2602_v63, %v2579_v32 }
0x13fc   :  { %v2616_v6 = vmul.f32 %v6709_v2, %v2613_v24 }
0x13fe   :  { %v2619_v7 = vadd.f32 %v6710_v5, %v2616_v6 }
0x1400   :  { %v8843_v54 = vadd.f32 %v2619_v7, %v8674_v19  ;;  %v6715_v7 = vld [vmem:[#allocation19] ss:$0 sm:$0xff] }
0x1402   :  { %6483 = vmatmul.msk.f32.vlgmr.msrb.gmra.mxu2 %vm706_vm4, %v8843_v54  ;;  %6485 = vmatmul.msk.f32.vlgmr.msra.gmra.mxu3 %vm706_vm4, %v8843_v54 }
0x143c   :  { %v3414_v62 = vpop.xlane.xlu2 %3413 }
0x143d   :  { %v3416_v17 = vmul.f32 %v3414_v62, %v8328_v12 }
0x143f   :  { %v8850_v60 = vsub.f32 %v3405_v33, %v3416_v17 }
0x1441   :  { %v3420_v9 = vmul.f32 %v8850_v60, %v8850_v60 }
0x1443   :  { %v3424_v10 = vsel %vm706_vm4, %v3420_v9, 0.0 }
0x1444   :  { %3425 = vadd.xlane.f32.xlu1 %v3424_v10  ;;  %v2588_v25 = vpop.xlane.xlu2 %2587 }
0x1445   :  { %v2590_v19 = vmul.f32 %v2588_v25, %v8328_v12 }
0x1447   :  { %v2592_v15 = vadd.f32 1e-05, %v2590_v19 }
0x1449   :  { %6852 = vrsqrt.f32 %v2592_v15  ;;  %vm2609_vm0 = vweird.f32 %v2592_v15 }
0x144f   :  { %v6853_v11 = vpop.eup %6852 }
0x1450   :  { %v2604_v8 = vmul.f32 %v6853_v11, %v2592_v15  ;;  %vm2610_vm15 = vweird.f32 %v6853_v11 }
0x1451   :  { %vm2611_vm1 = vmor %vm2609_vm0, %vm2610_vm15 }
0x1452   :  { %v2605_v23 = vmul.f32 %v6853_v11, %v2604_v8 }
0x1454   :  { %v2606_v45 = vmul.f32 0.5, %v2605_v23  ;;  %v3423_v22 = vpop.xlane.xlu0 %3422 }
0x1455   :  { %v3427_v31 = vmul.f32 %v3423_v22, %v8328_v12 }
0x1456   :  { %v2607_v56 = vsub.f32 1.5, %v2606_v45 }
0x1457   :  { %v3429_v32 = vadd.f32 1e-05, %v3427_v31 }
0x1458   :  { %v2608_v34 = vmul.f32 %v6853_v11, %v2607_v56 }
0x1459   :  { %6854 = vrsqrt.f32 %v3429_v32  ;;  %vm3437_vm7 = vweird.f32 %v3429_v32 }
0x145a   :  { %v2612_v37 = vsel %vm2611_vm1, %v6853_v11, %v2608_v34 }
0x145b   :  { %v2614_v38 = vmul.f32 %v2612_v37, %v8827_v41  ;;  %v6711_v41 = vld [vmem:[#allocation30] ss:$0 sm:$0xff] }
0x145d   :  { %v2617_v14 = vmul.f32 %v6709_v2, %v2614_v38 }
0x145f   :  { %v6855_v39 = vpop.eup %6854  ;;  %v2620_v33 = vadd.f32 %v6710_v5, %v2617_v14 }
0x1460   :  { %v3432_v40 = vmul.f32 %v6855_v39, %v3429_v32  ;;  %vm3438_vm2 = vweird.f32 %v6855_v39 }
0x1461   :  { %v8859_v42 = vadd.f32 %v2620_v33, %v8685_v36  ;;  %vm3439_vm9 = vmor %vm3437_vm7, %vm3438_vm2 }
0x1462   :  { %v3433_v44 = vmul.f32 %v6855_v39, %v3432_v40 }
0x1463   :  { %6484 = vmatmul.msk.f32.gmra.mxu2 %vm706_vm4, %v8859_v42  ;;  %6486 = vmatmul.msk.f32.gmra.mxu3 %vm706_vm4, %v8859_v42 }
0x1464   :  { %v3434_v46 = vmul.f32 0.5, %v3433_v44 }
0x1466   :  { %v3435_v52 = vsub.f32 1.5, %v3434_v46 }
0x1468   :  { %v3436_v16 = vmul.f32 %v6855_v39, %v3435_v52 }
0x146a   :  { %v3440_v49 = vsel %vm3439_vm9, %v6855_v39, %v3436_v16 }
0x146b   :  { %v3451_v50 = vmul.f32 %v3440_v49, %v8834_v48 }
0x146d   :  { %v3454_v36 = vmul.f32 %v6711_v41, %v3451_v50 }
0x146f   :  { %v3457_v13 = vadd.f32 %v6712_v30, %v3454_v36 }
0x1471   :  { %v8867_v3 = vadd.f32 %v3457_v13, %v8581_v43 }
0x1473   :  { %6481 = vmatmul.msk.f32.vlgmr.msra.gmra.mxu1 %vm706_vm4, %v8867_v3 }
0x1485   :  { %v3535_v35 = vpop.f32.mrf.mxu2  ;;  %v3559_v57 = vpop.f32.mrf.mxu3 }
0x1486   :  { %v3536_v59 = vadd.f32 %v6713_v51, %v3535_v35  ;;  %v8874_v20 = vadd.f32 %v8871_v53, %v3559_v57 }
0x1488   :  { %6487 = vmatpush.xpose.msk.msra.mxu0 %vm785_vm5, %v3536_v59  ;;  %3641 = vrot.lane.b32.xlu0 %v3536_v59, %s7731_s30 }
0x1489   :  { %3798 = vrot.lane.b32.xlu1 %v3536_v59, %s7733_s1  ;;  %3634 = vmatpush.msrb.mxu1 %v8874_v20 }
0x14b7   :  { %v3426_v43 = vpop.xlane.xlu1 %3425 }
0x14b8   :  { %v3428_v48 = vmul.f32 %v3426_v43, %v8328_v12 }
0x14ba   :  { %v3430_v47 = vadd.f32 1e-05, %v3428_v48 }
0x14bc   :  { %6856 = vrsqrt.f32 %v3430_v47  ;;  %vm3447_vm11 = vweird.f32 %v3430_v47 }
0x14c2   :  { %v6857_v27 = vpop.eup %6856 }
0x14c3   :  { %v3442_v61 = vmul.f32 %v6857_v27, %v3430_v47  ;;  %vm3448_vm10 = vweird.f32 %v6857_v27 }
0x14c4   :  { %vm3449_vm14 = vmor %vm3447_vm11, %vm3448_vm10 }
0x14c5   :  { %v3443_v58 = vmul.f32 %v6857_v27, %v3442_v61 }
0x14c7   :  { %v3444_v28 = vmul.f32 0.5, %v3443_v58 }
0x14c9   :  { %v3445_v0 = vsub.f32 1.5, %v3444_v28 }
0x14cb   :  { %v3446_v1 = vmul.f32 %v6857_v27, %v3445_v0 }
0x14cd   :  { %v3450_v2 = vsel %vm3449_vm14, %v6857_v27, %v3446_v1 }
0x14ce   :  { %v3452_v63 = vmul.f32 %v3450_v2, %v8850_v60 }
0x14d0   :  { %v3455_v5 = vmul.f32 %v6711_v41, %v3452_v63 }
0x14d2   :  { %v3458_v24 = vadd.f32 %v6712_v30, %v3455_v5 }
0x14d4   :  { %v8883_v6 = vadd.f32 %v3458_v24, %v8587_v55 }
0x14d6   :  { %6482 = vmatmul.msk.f32.gmra.mxu1 %vm706_vm4, %v8883_v6 }
0x14e6   :  { %v3538_v10 = vpop.f32.mrf.mxu2 }
0x14e7   :  { %v3539_v25 = vadd.f32 %v6713_v51, %v3538_v10 }
0x14f0   :  { %v3505_v62 = vpop.f32.mrf.mxu1 }
0x14f1   :  { %v3506_v17 = vadd.f32 %v6715_v7, %v3505_v62 }
0x14f3   :  { %v3565_v9 = vmul.f32 0.35355338, %v3506_v17 }
0x14f5   :  { %3796 = vrot.lane.b32.xlu0 %v3565_v9, %s7733_s1  ;;  %3639 = vrot.lane.b32.xlu2 %v3565_v9, %s7731_s30 }
0x14f6   :  { %6488 = vmatmul.msk.f32.vlgmr.msra.gmra.mxu0 %vm785_vm5, %v3565_v9 }
0x14fa   :  { %v3642_v60 = vpop.permute.xlu0 %3641 }
0x14fb   :  { %v3799_v19 = vpop.permute.xlu1 %3798  ;;  %6490 = vmatpush.xpose.msk.msra.mxu2 %vm785_vm5, %v3642_v60 }
0x14fd   :  { %3720 = vrot.lane.b32.xlu0 %v3536_v59, %s7732_s21  ;;  %3965 = vrot.lane.b32.xlu2 %v3539_v25, %s7731_s30 }
0x14ff   :  { %6496 = vmatpush.xpose.msk.msrb.mxu2 %vm785_vm5, %v3799_v19 }
0x1505   :  { %4122 = vrot.lane.b32.xlu0 %v3539_v25, %s7733_s1  ;;  %3718 = vrot.lane.b32.xlu2 %v3565_v9, %s7732_s21 }
0x150d   :  { %4044 = vrot.lane.b32.xlu2 %v3539_v25, %s7732_s21 }
0x154f   :  { %v3640_v55 = vpop.permute.xlu2 %3639 }
0x1550   :  { %6491 = vmatmul.msk.f32.vlgmr.msra.gmra.mxu2 %vm785_vm5, %v3640_v55 }
0x1553   :  { %v3508_v15 = vpop.f32.mrf.mxu1 }
0x1554   :  { %v3509_v29 = vadd.f32 %v6715_v7, %v3508_v15 }
0x1556   :  { %v3889_v18 = vmul.f32 0.35355338, %v3509_v29 }
0x1557   :  { %v3966_v11 = vpop.permute.xlu2 %3965 }
0x1558   :  { %3963 = vrot.lane.b32.xlu1 %v3889_v18, %s7731_s30  ;;  %4042 = vrot.lane.b32.xlu0 %v3889_v18, %s7732_s21 }
0x1559   :  { %6502 = vmatpush.xpose.msk.msra.mxu2 %vm785_vm5, %v3966_v11 }
0x155f   :  { %v3719_v8 = vpop.permute.xlu2 %3718 }
0x1560   :  { %4120 = vrot.lane.b32.xlu1 %v3889_v18, %s7733_s1 }
0x1567   :  { %v3797_v4 = vpop.permute.xlu0 %3796  ;;  %v4045_v23 = vpop.permute.xlu2 %4044 }
0x1568   :  { %6497 = vmatmul.msk.f32.vlgmr.msrb.gmra.mxu2 %vm785_vm5, %v3797_v4 }
0x156f   :  { %v3721_v21 = vpop.permute.xlu0 %3720 }
0x1570   :  { %6493 = vmatpush.xpose.msk.msrb.mxu0 %vm785_vm5, %v3721_v21 }
0x1573   :  { %v3589_v45 = vpop.f32.mrf.mxu0  ;;  %6494 = vmatmul.msk.f32.vlgmr.msrb.gmra.mxu0 %vm785_vm5, %v3719_v8 }
0x1574   :  { %6499 = vmatpush.xpose.msk.msra.mxu0 %vm785_vm5, %v3539_v25  ;;  %v3592_v22 = vsel %vm785_vm5, %v3589_v45, -inf }
0x1575   :  { %3593 = vmax.xlane.f32.xlu2 %v3592_v22 }
0x1577   :  { %v4123_v31 = vpop.permute.xlu0 %4122 }
0x1578   :  { %6505 = vmatpush.xpose.msk.msrb.mxu0 %vm785_vm5, %v4045_v23  ;;  %6508 = vmatpush.xpose.msk.msrb.mxu2 %vm785_vm5, %v4123_v31 }
0x157b   :  { %6500 = vmatmul.msk.f32.vlgmr.msra.gmra.mxu0 %vm785_vm5, %v3889_v18 }
0x15ca   :  { %v3964_v56 = vpop.permute.xlu1 %3963  ;;  %v4043_v32 = vpop.permute.xlu0 %4042 }
0x15cb   :  { %6503 = vmatmul.msk.f32.vlgmr.msra.gmra.mxu2 %vm785_vm5, %v3964_v56  ;;  %6506 = vmatmul.msk.f32.vlgmr.msrb.gmra.mxu0 %vm785_vm5, %v4043_v32 }
0x15d2   :  { %v4121_v34 = vpop.permute.xlu1 %4120 }
0x15d3   :  { %v3664_v37 = vpop.f32.mrf.mxu2  ;;  %6509 = vmatmul.msk.f32.vlgmr.msrb.gmra.mxu2 %vm785_vm5, %v4121_v34 }
0x15d4   :  { %v3667_v38 = vsel %vm785_vm5, %v3664_v37, -inf }
0x15d5   :  { %3668 = vmax.xlane.f32.xlu1 %v3667_v38 }
0x15e8   :  { %v3594_v14 = vpop.xlane.xlu2 %3593 }
0x15e9   :  { %v3595_v39 = vsub.f32 %v3589_v45, %v3594_v14  ;;  %v3562_v45 = vpop.f32.mrf.mxu3 }
0x15ea   :  { %v8952_v31 = vadd.f32 %v8871_v53, %v3562_v45 }
0x15eb   :  { %v3596_v33 = vmul.f32 1.442695, %v3595_v39  ;;  %v3821_v49 = vpop.f32.mrf.mxu2 }
0x15ec   :  { %v3824_v50 = vsel %vm785_vm5, %v3821_v49, -inf }
0x15ed   :  { %6858 = vpow2.f32 %v3596_v33 }
0x15f0   :  { %v3743_v40 = vpop.f32.mrf.mxu0 }
0x15f1   :  { %v3746_v44 = vsel %vm785_vm5, %v3743_v40, -inf }
0x15f2   :  { %3747 = vmax.xlane.f32.xlu1 %v3746_v44 }
0x15f3   :  { %v6859_v46 = vpop.eup %6858 }
0x15f4   :  { %v3598_v41 = vsel %vm785_vm5, %v6859_v46, 0.0 }
0x15f8   :  { %v3913_v52 = vpop.f32.mrf.mxu0 }
0x15f9   :  { %v3916_v16 = vsel %vm785_vm5, %v3913_v52, -inf }
0x15fa   :  { %3917 = vmax.xlane.f32.xlu0 %v3916_v16  ;;  %3599 = vadd.xlane.f32.xlu1 %v3598_v41 }
0x1602   :  { %3825 = vmax.xlane.f32.xlu0 %v3824_v50 }
0x1616   :  { %3848 = vrot.lane.b32.xlu0 %v8874_v20, %s7733_s1 }
0x1648   :  { %v8920_v30 = vpop.f32.mrf.mxu0  ;;  %v3669_v59 = vpop.xlane.xlu1 %3668 }
0x1649   :  { %v4070_v36 = vsel %vm785_vm5, %v8920_v30, -inf  ;;  %v3670_v47 = vsub.f32 %v3664_v37, %v3669_v59 }
0x164a   :  { %4071 = vmax.xlane.f32.xlu2 %v4070_v36 }
0x164b   :  { %v3671_v61 = vmul.f32 1.442695, %v3670_v47 }
0x164e   :  { %v8924_v13 = vpop.f32.mrf.mxu2 }
0x164f   :  { %v3991_v51 = vsel %vm785_vm5, %v8924_v13, -inf }
0x1652   :  { %3992 = vmax.xlane.f32.xlu2 %v3991_v51 }
0x1656   :  { %v8928_v35 = vpop.f32.mrf.mxu2 }
0x1657   :  { %v4148_v57 = vsel %vm785_vm5, %v8928_v35, -inf }
0x1658   :  { %4149 = vmax.xlane.f32.xlu1 %v4148_v57 }
0x1665   :  { %v3748_v43 = vpop.xlane.xlu1 %3747 }
0x1666   :  { %v3749_v48 = vsub.f32 %v3743_v40, %v3748_v43 }
0x1668   :  { %v3750_v27 = vmul.f32 1.442695, %v3749_v48 }
0x166a   :  { %6860 = vpow2.f32 %v3750_v27  ;;  %3692 = vrot.lane.b32.xlu2 %v8874_v20, %s7731_s30 }
0x166d   :  { %v3600_v58 = vpop.xlane.xlu1 %3599  ;;  %v3918_v28 = vpop.xlane.xlu0 %3917 }
0x166e   :  { %6862 = vrcp.f32 %v3600_v58  ;;  %v3919_v1 = vsub.f32 %v3913_v52, %v3918_v28  ;;  %v3612_v17 = vand.u32 2147483648, %v3600_v58  ;;  %v3610_v10 = vand.u32 2147483647, %v3600_v58 }
0x166f   :  { %6864 = vpow2.f32 %v3671_v61  ;;  %vm3606_vm0 = vweird.f32 %v3600_v58 }
0x1670   :  { %v8934_v0 = vpop.eup %6860  ;;  %v3920_v5 = vmul.f32 1.442695, %v3919_v1  ;;  %v3613_v19 = vor.u32 1.1754944e-38, %v3612_v17  ;;  %vm3611_vm2 = vcmp.eq.f32.partialorder %v3610_v10, 8.507059e+37 }
0x1671   :  { %v3752_v2 = vsel %vm785_vm5, %v8934_v0, 0.0 }
0x1672   :  { %3753 = vadd.xlane.f32.xlu0 %v3752_v2  ;;  %6866 = vpow2.f32 %v3920_v5 }
0x1674   :  { %v6863_v63 = vpop.eup %6862 }
0x1675   :  { %v3602_v24 = vmul.f32 %v6863_v63, %v3600_v58  ;;  %v8938_v7 = vpop.eup %6864  ;;  %vm3607_vm15 = vweird.f32 %v6863_v63  ;;  %v3826_v18 = vpop.xlane.xlu0 %3825 }
0x1676   :  { %v3673_v60 = vsel %vm785_vm5, %v8938_v7, 0.0  ;;  %vm3608_vm1 = vmor %vm3606_vm0, %vm3607_vm15  ;;  %v3827_v4 = vsub.f32 %v3821_v49, %v3826_v18 }
0x1677   :  { %v3603_v62 = vsub.f32 1.0, %v3602_v24 }
0x1678   :  { %v8942_v15 = vpop.eup %6866  ;;  %v3828_v21 = vmul.f32 1.442695, %v3827_v4 }
0x1679   :  { %v3604_v9 = vmul.f32 %v6863_v63, %v3603_v62  ;;  %v3922_v8 = vsel %vm785_vm5, %v8942_v15, 0.0 }
0x167a   :  { %3674 = vadd.xlane.f32.xlu0 %v3673_v60  ;;  %6868 = vpow2.f32 %v3828_v21 }
0x167b   :  { %v3605_v25 = vadd.f32 %v6863_v63, %v3604_v9 }
0x167d   :  { %v3609_v55 = vsel %vm3608_vm1, %v6863_v63, %v3605_v25 }
0x167e   :  { %v3614_v29 = vsel %vm3611_vm2, %v3613_v19, %v3609_v55 }
0x167f   :  { %v3615_v11 = vmul.f32 %v6859_v46, %v3614_v29 }
0x1680   :  { %v8947_v23 = vpop.eup %6868 }
0x1681   :  { %6489 = vmatmul.msk.f32.vlgmr.msrb.gmra.mxu1 %vm785_vm5, %v3615_v11  ;;  %v3830_v22 = vsel %vm785_vm5, %v8947_v23, 0.0 }
0x1682   :  { %3923 = vadd.xlane.f32.xlu0 %v3922_v8 }
0x1688   :  { %v3849_v46 = vpop.permute.xlu0 %3848 }
0x1693   :  { %3831 = vadd.xlane.f32.xlu2 %v3830_v22 }
0x1696   :  { %4172 = vrot.lane.b32.xlu0 %v8952_v31, %s7733_s1 }
0x16ab   :  { %4016 = vrot.lane.b32.xlu2 %v8952_v31, %s7731_s30 }
0x16b3   :  { %4094 = vrot.lane.b32.xlu2 %v8952_v31, %s7732_s21 }
0x16bd   :  { %v4072_v56 = vpop.xlane.xlu2 %4071 }
0x16be   :  { %v4073_v32 = vsub.f32 %v8920_v30, %v4072_v56 }
0x16c0   :  { %v4074_v34 = vmul.f32 1.442695, %v4073_v32 }
0x16c2   :  { %6870 = vpow2.f32 %v4074_v34 }
0x16c5   :  { %v3993_v37 = vpop.xlane.xlu2 %3992 }
0x16c6   :  { %v3994_v38 = vsub.f32 %v8924_v13, %v3993_v37 }
0x16c8   :  { %v8962_v14 = vpop.eup %6870  ;;  %v3995_v53 = vmul.f32 1.442695, %v3994_v38 }
0x16c9   :  { %v4076_v39 = vsel %vm785_vm5, %v8962_v14, 0.0 }
0x16ca   :  { %6872 = vpow2.f32 %v3995_v53  ;;  %4077 = vadd.xlane.f32.xlu1 %v4076_v39 }
0x16cb   :  { %v4150_v33 = vpop.xlane.xlu1 %4149 }
0x16cc   :  { %v4151_v40 = vsub.f32 %v8928_v35, %v4150_v33 }
0x16cd   :  { %v3693_v44 = vpop.permute.xlu2 %3692 }
0x16ce   :  { %v4152_v52 = vmul.f32 1.442695, %v4151_v40  ;;  %3713 = vmatpush.msrb.mxu3 %v3693_v44 }
0x16d0   :  { %3869 = vmatpush.msra.mxu3 %v3849_v46  ;;  %v8967_v16 = vpop.eup %6872  ;;  %6874 = vpow2.f32 %v4152_v52 }
0x16d1   :  { %v3997_v41 = vsel %vm785_vm5, %v8967_v16, 0.0 }
0x16d2   :  { %3998 = vadd.xlane.f32.xlu1 %v3997_v41 }
0x16d6   :  { %v8971_v49 = vpop.eup %6874 }
0x16d7   :  { %v4154_v50 = vsel %vm785_vm5, %v8971_v49, 0.0 }
0x16da   :  { %4155 = vadd.xlane.f32.xlu1 %v4154_v50 }
0x16e5   :  { %v8975_v30 = vpop.xlane.xlu0 %3753 }
0x16ed   :  { %v3675_v36 = vpop.xlane.xlu0 %3674 }
0x16ee   :  { %6876 = vrcp.f32 %v3675_v36  ;;  %v3687_v57 = vand.u32 2147483648, %v3675_v36  ;;  %v3685_v43 = vand.u32 2147483647, %v3675_v36  ;;  %vm3681_vm9 = vweird.f32 %v3675_v36 }
0x16f0   :  { %v3688_v47 = vor.u32 1.1754944e-38, %v3687_v57  ;;  %vm3686_vm11 = vcmp.eq.f32.partialorder %v3685_v43, 8.507059e+37  ;;  %v3766_v43 = vand.u32 2147483648, %v8975_v30 }
0x16f3   :  { %3770 = vrot.lane.b32.xlu1 %v8874_v20, %s7732_s21 }
0x16f4   :  { %v6877_v13 = vpop.eup %6876 }
0x16f5   :  { %v3677_v51 = vmul.f32 %v6877_v13, %v3675_v36  ;;  %vm3682_vm7 = vweird.f32 %v6877_v13  ;;  %v8981_v24 = vpop.xlane.xlu0 %3923 }
0x16f6   :  { %vm3683_vm10 = vmor %vm3681_vm9, %vm3682_vm7 }
0x16f7   :  { %v3678_v35 = vsub.f32 1.0, %v3677_v51 }
0x16f9   :  { %v3679_v59 = vmul.f32 %v6877_v13, %v3678_v35 }
0x16fb   :  { %v3680_v48 = vadd.f32 %v6877_v13, %v3679_v59 }
0x16fd   :  { %v3684_v27 = vsel %vm3683_vm10, %v6877_v13, %v3680_v48 }
0x16fe   :  { %v3689_v61 = vsel %vm3686_vm11, %v3688_v47, %v3684_v27 }
0x16ff   :  { %v3690_v58 = vmul.f32 %v8938_v7, %v3689_v61 }
0x1701   :  { %6492 = vmatmul.msk.f32.vlgmr.msrb.gmra.mxu3 %vm785_vm5, %v3690_v58 }
0x1706   :  { %v3832_v28 = vpop.xlane.xlu2 %3831 }
0x1707   :  { %6878 = vrcp.f32 %v3832_v28  ;;  %v3844_v5 = vand.u32 2147483648, %v3832_v28  ;;  %v3842_v17 = vand.u32 2147483647, %v3832_v28  ;;  %vm3838_vm15 = vweird.f32 %v3832_v28 }
0x1708   :  { %v4173_v19 = vpop.permute.xlu0 %4172  ;;  %6880 = vrcp.f32 %v8975_v30 }
0x1709   :  { %v3845_v10 = vor.u32 1.1754944e-38, %v3844_v5  ;;  %vm3843_vm1 = vcmp.eq.f32.partialorder %v3842_v17, 8.507059e+37  ;;  %v3936_v5 = vand.u32 2147483648, %v8981_v24  ;;  %v3934_v17 = vand.u32 2147483647, %v8981_v24 }
0x170d   :  { %v6879_v20 = vpop.eup %6878 }
0x170e   :  { %v3834_v1 = vmul.f32 %v6879_v20, %v3832_v28  ;;  %v4017_v2 = vpop.permute.xlu2 %4016  ;;  %vm3839_vm14 = vweird.f32 %v6879_v20  ;;  %v6881_v18 = vpop.eup %6880 }
0x170f   :  { %4037 = vmatpush.msrb.mxu3 %v4017_v2  ;;  %vm3840_vm0 = vmor %vm3838_vm15, %vm3839_vm14  ;;  %v3756_v21 = vmul.f32 %v6881_v18, %v8975_v30  ;;  %vm3761_vm14 = vweird.f32 %v6881_v18 }
0x1710   :  { %v3835_v63 = vsub.f32 1.0, %v3834_v1  ;;  %v3767_v1 = vor.u32 1.1754944e-38, %v3766_v43 }
0x1711   :  { %v3757_v34 = vsub.f32 1.0, %v3756_v21 }
0x1712   :  { %v3836_v62 = vmul.f32 %v6879_v20, %v3835_v63 }
0x1713   :  { %v3758_v44 = vmul.f32 %v6881_v18, %v3757_v34 }
0x1714   :  { %v3837_v9 = vadd.f32 %v6879_v20, %v3836_v62 }
0x1715   :  { %v3759_v51 = vadd.f32 %v6881_v18, %v3758_v44 }
0x1716   :  { %v3841_v7 = vsel %vm3840_vm0, %v6879_v20, %v3837_v9 }
0x1717   :  { %v3846_v60 = vsel %vm3843_vm1, %v3845_v10, %v3841_v7  ;;  %vm3760_vm1 = vweird.f32 %v8975_v30  ;;  %v3937_v7 = vor.u32 1.1754944e-38, %v3936_v5  ;;  %v4300_v5 = vld [vmem:[#allocation39 + $0x18] sm:$0xff] }
0x1718   :  { %v3847_v25 = vmul.f32 %v8947_v23, %v3846_v60  ;;  %v4095_v60 = vpop.permute.xlu2 %4094 }
0x171a   :  { %6498 = vmatmul.msk.f32.vlgmr.msra.gmra.mxu3 %vm785_vm5, %v3847_v25 }
0x171b   :  { %4193 = vmatpush.msra.mxu3 %v4173_v19 }
0x173d   :  { %v8985_v55 = vpop.xlane.xlu1 %4077 }
0x173e   :  { %v4090_v19 = vand.u32 2147483648, %v8985_v55 }
0x1745   :  { %v3999_v29 = vpop.xlane.xlu1 %3998 }
0x1746   :  { %6882 = vrcp.f32 %v3999_v29  ;;  %v4011_v45 = vand.u32 2147483648, %v3999_v29  ;;  %v4009_v56 = vand.u32 2147483647, %v3999_v29  ;;  %vm4005_vm7 = vweird.f32 %v3999_v29 }
0x1747   :  { %6884 = vrcp.f32 %v8981_v24 }
0x1748   :  { %v4012_v53 = vor.u32 1.1754944e-38, %v4011_v45  ;;  %vm4010_vm10 = vcmp.eq.f32.partialorder %v4009_v56, 8.507059e+37  ;;  %v3478_v56 = vld [vmem:[#allocation27 + $0x10] sm:$0xff] }
0x174c   :  { %v6883_v11 = vpop.eup %6882 }
0x174d   :  { %v4001_v4 = vmul.f32 %v6883_v11, %v3999_v29  ;;  %v4156_v8 = vpop.xlane.xlu1 %4155  ;;  %vm4006_vm2 = vweird.f32 %v6883_v11  ;;  %v8990_v32 = vpop.eup %6884  ;;  %v4088_v29 = vand.u32 2147483647, %v8985_v55 }
0x174e   :  { %6886 = vrcp.f32 %v4156_v8  ;;  %vm4007_vm9 = vmor %vm4005_vm7, %vm4006_vm2  ;;  %v3926_v46 = vmul.f32 %v8990_v32, %v8981_v24  ;;  %v4168_v50 = vand.u32 2147483648, %v4156_v8  ;;  %v4166_v13 = vand.u32 2147483647, %v4156_v8 }
0x174f   :  { %v4002_v23 = vsub.f32 1.0, %v4001_v4  ;;  %6888 = vrcp.f32 %v8985_v55  ;;  %vm4162_vm15 = vweird.f32 %v4156_v8  ;;  %vm3762_vm7 = vmor %vm3760_vm1, %vm3761_vm14  ;;  %vm4084_vm1 = vweird.f32 %v8985_v55 }
0x1750   :  { %v3927_v35 = vsub.f32 1.0, %v3926_v46  ;;  %v4169_v48 = vor.u32 1.1754944e-38, %v4168_v50  ;;  %vm4167_vm2 = vcmp.eq.f32.partialorder %v4166_v13, 8.507059e+37  ;;  %v3763_v61 = vsel %vm3762_vm7, %v6881_v18, %v3759_v51  ;;  %v6716_v51 = vld [vmem:[#allocation28] ss:$0 sm:$0xff] }
0x1751   :  { %v4003_v22 = vmul.f32 %v6883_v11, %v4002_v23  ;;  %vm4089_vm7 = vcmp.eq.f32.partialorder %v4088_v29, 8.507059e+37 }
0x1752   :  { %v3928_v58 = vmul.f32 %v8990_v32, %v3927_v35 }
0x1753   :  { %v4004_v37 = vadd.f32 %v6883_v11, %v4003_v22 }
0x1754   :  { %v6887_v38 = vpop.eup %6886  ;;  %v3929_v63 = vadd.f32 %v8990_v32, %v3928_v58 }
0x1755   :  { %v4008_v39 = vsel %vm4007_vm9, %v6883_v11, %v4004_v37  ;;  %v4158_v33 = vmul.f32 %v6887_v38, %v4156_v8  ;;  %vm4163_vm11 = vweird.f32 %v6887_v38  ;;  %v6889_v59 = vpop.eup %6888  ;;  %v4091_v11 = vor.u32 1.1754944e-38, %v4090_v19  ;;  %v3476_v37 = vld [vmem:[#allocation27] sm:$0xff] }
0x1756   :  { %v4013_v40 = vsel %vm4010_vm10, %v4012_v53, %v4008_v39  ;;  %vm4164_vm0 = vmor %vm4162_vm15, %vm4163_vm11  ;;  %v4080_v28 = vmul.f32 %v6889_v59, %v8985_v55  ;;  %vm3931_vm10 = vweird.f32 %v8990_v32  ;;  %vm3930_vm11 = vweird.f32 %v8981_v24 }
0x1757   :  { %v4014_v52 = vmul.f32 %v8967_v16, %v4013_v40  ;;  %v4159_v41 = vsub.f32 1.0, %v4158_v33  ;;  %v3764_v16 = vand.u32 2147483647, %v8975_v30  ;;  %vm3932_vm14 = vmor %vm3930_vm11, %vm3931_vm10  ;;  %vm3935_vm15 = vcmp.eq.f32.partialorder %v3934_v17, 8.507059e+37  ;;  %v4298_v17 = vld [vmem:[#allocation39 + $0x8] sm:$0xff] }
0x1758   :  { %v4081_v30 = vsub.f32 1.0, %v4080_v28 }
0x1759   :  { %v4160_v36 = vmul.f32 %v6887_v38, %v4159_v41  ;;  %6504 = vmatmul.msk.f32.vlgmr.msrb.gmra.mxu3 %vm785_vm5, %v4014_v52  ;;  %vm3765_vm9 = vcmp.eq.f32.partialorder %v3764_v16, 8.507059e+37 }
0x175a   :  { %v3768_v2 = vsel %vm3765_vm9, %v3767_v1, %v3763_v61  ;;  %v4082_v10 = vmul.f32 %v6889_v59, %v4081_v30 }
0x175b   :  { %v4161_v57 = vadd.f32 %v6887_v38, %v4160_v36  ;;  %v3769_v62 = vmul.f32 %v8934_v0, %v3768_v2 }
0x175c   :  { %v4083_v0 = vadd.f32 %v6889_v59, %v4082_v10 }
0x175d   :  { %v4165_v47 = vsel %vm4164_vm0, %v6887_v38, %v4161_v57  ;;  %vm4085_vm0 = vweird.f32 %v6889_v59 }
0x175e   :  { %v4170_v27 = vsel %vm4167_vm2, %v4169_v48, %v4165_v47  ;;  %vm4086_vm2 = vmor %vm4084_vm1, %vm4085_vm0 }
0x175f   :  { %v4171_v20 = vmul.f32 %v8971_v49, %v4170_v27  ;;  %v3933_v49 = vsel %vm3932_vm14, %v8990_v32, %v3929_v63  ;;  %v4087_v18 = vsel %vm4086_vm2, %v6889_v59, %v4083_v0  ;;  %v3477_v32 = vld [vmem:[#allocation27 + $0x8] sm:$0xff] }
0x1760   :  { %v3938_v25 = vsel %vm3935_vm15, %v3937_v7, %v3933_v49 }
0x1761   :  { %6510 = vmatmul.msk.f32.vlgmr.msra.gmra.mxu3 %vm785_vm5, %v4171_v20  ;;  %v3939_v24 = vmul.f32 %v8942_v15, %v3938_v25  ;;  %v3636_v15 = vpop.f32.mrf.mxu1 }
0x1765   :  { %v3771_v9 = vpop.permute.xlu1 %3770 }
0x1766   :  { %3791 = vmatpush.msra.mxu1 %v3771_v9  ;;  %v4297_v9 = vld [vmem:[#allocation39] sm:$0xff] }
0x1767   :  { %6495 = vmatmul.msk.f32.vlgmr.msra.gmra.mxu1 %vm785_vm5, %v3769_v62  ;;  %v4299_v62 = vld [vmem:[#allocation39 + $0x10] sm:$0xff] }
0x1768   :  { %3958 = vmatpush.msrb.mxu1 %v8952_v31  ;;  %v4092_v31 = vsel %vm4089_vm7, %v4091_v11, %v4087_v18  ;;  %v6717_v18 = vld [vmem:[#allocation33] ss:$0 sm:$0xff] }
0x1769   :  { %v4093_v4 = vmul.f32 %v8962_v14, %v4092_v31  ;;  %v3479_v14 = vld [vmem:[#allocation27 + $0x18] sm:$0xff]  ;;  %v4309_v31 = vld [vmem:[%s7990_s9 + $0x38] sm:$0xff] }
0x176a   :  { %4115 = vmatpush.msra.mxu1 %v4095_v60  ;;  %4232 = vmatpush.msra.mxu0 %v3479_v14  ;;  %v4306_v14 = vld [vmem:[%s7990_s9 + $0x20] sm:$0xff] }
0x176b   :  { %4358 = vmatpush.msra.mxu2 %v4309_v31  ;;  %v4428_v31 = vld [vmem:[#allocation6 + $0x20] sm:$0xff] }
0x176c   :  { %4233 = vmatpush.msra.mxu0 %v3478_v56 }
0x176e   :  { %4234 = vmatpush.msra.mxu0 %v3477_v32  ;;  %v4305_v32 = vld [vmem:[%s7990_s9 + $0x18] sm:$0xff] }
0x176f   :  { %6501 = vmatmul.msk.f32.vlgmr.msrb.gmra.mxu1 %vm785_vm5, %v3939_v24 }
0x1770   :  { %4235 = vmatpush.msra.mxu0 %v3476_v37  ;;  %4330 = vmatpush.msrb.mxu1 %v4300_v5 }
0x1772   :  { %4331 = vmatpush.msrb.mxu1 %v4299_v62 }
0x1774   :  { %4332 = vmatpush.msrb.mxu1 %v4298_v17 }
0x1776   :  { %4333 = vmatpush.msrb.mxu1 %v4297_v9 }
0x1777   :  { %6507 = vmatmul.msk.f32.vlgmr.msra.gmra.mxu1 %vm785_vm5, %v4093_v4  ;;  %v4308_v4 = vld [vmem:[%s7990_s9 + $0x30] sm:$0xff] }
0x1778   :  { %4359 = vmatpush.msra.mxu2 %v4308_v4  ;;  %v4434_v4 = vld [vmem:[#allocation9 + $0x20] sm:$0xff] }
0x1784   :  { %v3715_v8 = vpop.f32.mrf.mxu3 }
0x1785   :  { %3875 = vrot.lane.b32.xlu0 %v3715_v8, %s7718_s24  ;;  %v6718_v8 = vld [vmem:[#allocation34] ss:$0 sm:$0xff] }
0x179d   :  { %v3871_v21 = vpop.f32.mrf.mxu3 }
0x179e   :  { %3883 = vrot.lane.b32.xlu1 %v3871_v21, %s7735_s26 }
0x17dc   :  { %v4039_v23 = vpop.f32.mrf.mxu3 }
0x17dd   :  { %4199 = vrot.lane.b32.xlu0 %v4039_v23, %s7718_s24 }
0x17e4   :  { %v3793_v55 = vpop.f32.mrf.mxu1  ;;  %v4195_v45 = vpop.f32.mrf.mxu3 }
0x17e5   :  { %4207 = vrot.lane.b32.xlu1 %v4195_v45, %s7735_s26  ;;  %3879 = vrot.lane.b32.xlu2 %v3793_v55, %s7734_s29  ;;  %v4307_v55 = vld [vmem:[%s7990_s9 + $0x28] sm:$0xff] }
0x17e6   :  { %4360 = vmatpush.msra.mxu2 %v4307_v55 }
0x17e8   :  { %4361 = vmatpush.msra.mxu2 %v4306_v14 }
0x17ea   :  { %4362 = vmatpush.msra.mxu2 %v4305_v32 }
0x17ec   :  { %v3960_v22 = vpop.f32.mrf.mxu1 }
0x17f4   :  { %v4117_v34 = vpop.f32.mrf.mxu1 }
0x17f5   :  { %4203 = vrot.lane.b32.xlu2 %v4117_v34, %s7734_s29 }
0x17f7   :  { %v3876_v38 = vpop.permute.xlu0 %3875 }
0x17f8   :  { %v3886_v53 = vsel %vm785_vm5, %v3636_v15, %v3876_v38 }
0x1810   :  { %v3884_v33 = vpop.permute.xlu1 %3883 }
0x183f   :  { %v3880_v39 = vpop.permute.xlu2 %3879 }
0x1840   :  { %v3887_v40 = vsel %vm1107_vm12, %v3886_v53, %v3880_v39 }
0x1841   :  { %v3888_v44 = vsel %vm1109_vm13, %v3887_v40, %v3884_v33 }
0x1842   :  { %6511 = vmatmul.msk.f32.vlgmr.msra.gmra.mxu0 %vm706_vm4, %v3888_v44 }
0x184f   :  { %v4200_v46 = vpop.permute.xlu0 %4199  ;;  %v4204_v41 = vpop.permute.xlu2 %4203 }
0x1850   :  { %v4210_v52 = vsel %vm785_vm5, %v3960_v22, %v4200_v46 }
0x1851   :  { %v4211_v50 = vsel %vm1107_vm12, %v4210_v52, %v4204_v41 }
0x1857   :  { %v4208_v36 = vpop.permute.xlu1 %4207 }
0x1858   :  { %v4212_v13 = vsel %vm1109_vm13, %v4211_v50, %v4208_v36  ;;  %v4304_v50 = vld [vmem:[%s7990_s9 + $0x10] sm:$0xff]  ;;  %v4303_v36 = vld [vmem:[%s7990_s9 + $0x8] sm:$0xff] }
0x1859   :  { %6512 = vmatmul.msk.f32.gmra.mxu0 %vm706_vm4, %v4212_v13  ;;  %4363 = vmatpush.msra.mxu2 %v4304_v50  ;;  %v4302_v13 = vld [vmem:[%s7990_s9] sm:$0xff] }
0x185b   :  { %4364 = vmatpush.msra.mxu2 %v4303_v36 }
0x185d   :  { %4365 = vmatpush.msra.mxu2 %v4302_v13 }
0x18bf   :  { %v4237_v35 = vpop.f32.mrf.mxu0 }
0x18c0   :  { %v4238_v57 = vadd.f32 %v6716_v51, %v4237_v35 }
0x18c2   :  { %v4245_v59 = vsel %vm706_vm4, %v4238_v57, 0.0 }
0x18c3   :  { %4246 = vadd.xlane.f32.xlu0 %v4245_v59 }
0x18d6   :  { %v4240_v43 = vpop.f32.mrf.mxu0 }
0x18d7   :  { %v4241_v48 = vadd.f32 %v6716_v51, %v4240_v43  ;;  %v6719_v51 = vld [vmem:[#allocation40] ss:$0 sm:$0xff] }
0x18d9   :  { %v4248_v16 = vsel %vm706_vm4, %v4241_v48, 0.0 }
0x18da   :  { %4249 = vadd.xlane.f32.xlu2 %v4248_v16 }
0x1936   :  { %v4247_v47 = vpop.xlane.xlu0 %4246 }
0x1937   :  { %v4251_v27 = vmul.f32 %v4247_v47, %v8328_v12 }
0x1939   :  { %v4253_v61 = vsub.f32 %v4238_v57, %v4251_v27 }
0x193b   :  { %v4255_v58 = vmul.f32 %v4253_v61, %v4253_v61 }
0x193d   :  { %v4257_v28 = vsel %vm706_vm4, %v4255_v58, 0.0 }
0x193e   :  { %4258 = vadd.xlane.f32.xlu1 %v4257_v28 }
0x194d   :  { %v4250_v20 = vpop.xlane.xlu2 %4249 }
0x194e   :  { %v4252_v1 = vmul.f32 %v4250_v20, %v8328_v12 }
0x1950   :  { %v4254_v2 = vsub.f32 %v4241_v48, %v4252_v1 }
0x1952   :  { %v4256_v63 = vmul.f32 %v4254_v2, %v4254_v2 }
0x1954   :  { %v4260_v30 = vsel %vm706_vm4, %v4256_v63, 0.0 }
0x1955   :  { %4261 = vadd.xlane.f32.xlu0 %v4260_v30 }
0x19b1   :  { %v4259_v49 = vpop.xlane.xlu1 %4258 }
0x19b2   :  { %v4263_v10 = vmul.f32 %v4259_v49, %v8328_v12 }
0x19b4   :  { %v4265_v7 = vadd.f32 1e-05, %v4263_v10 }
0x19b6   :  { %6890 = vrsqrt.f32 %v4265_v7  ;;  %vm4273_vm10 = vweird.f32 %v4265_v7 }
0x19bc   :  { %v6891_v60 = vpop.eup %6890 }
0x19bd   :  { %v4268_v25 = vmul.f32 %v6891_v60, %v4265_v7  ;;  %vm4274_vm9 = vweird.f32 %v6891_v60  ;;  %v4431_v7 = vld [vmem:[#allocation6 + $0x38] sm:$0xff] }
0x19be   :  { %vm4275_vm11 = vmor %vm4273_vm10, %vm4274_vm9  ;;  %4470 = vmatpush.msrb.mxu3 %v4431_v7 }
0x19bf   :  { %v4269_v0 = vmul.f32 %v6891_v60, %v4268_v25  ;;  %v4443_v25 = vld [vmem:[#allocation12 + $0x38] sm:$0xff] }
0x19c0   :  { %4518 = vmatpush.msra.mxu1 %v4443_v25 }
0x19c1   :  { %v4270_v19 = vmul.f32 0.5, %v4269_v0  ;;  %v4430_v0 = vld [vmem:[#allocation6 + $0x30] sm:$0xff] }
0x19c2   :  { %4471 = vmatpush.msrb.mxu3 %v4430_v0 }
0x19c3   :  { %v4271_v24 = vsub.f32 1.5, %v4270_v19  ;;  %v4436_v19 = vld [vmem:[#allocation9 + $0x30] sm:$0xff] }
0x19c5   :  { %v4272_v29 = vmul.f32 %v6891_v60, %v4271_v24  ;;  %v4442_v24 = vld [vmem:[#allocation12 + $0x30] sm:$0xff] }
0x19c6   :  { %4519 = vmatpush.msra.mxu1 %v4442_v24 }
0x19c7   :  { %v4276_v11 = vsel %vm4275_vm11, %v6891_v60, %v4272_v29  ;;  %v4437_v60 = vld [vmem:[#allocation9 + $0x38] sm:$0xff]  ;;  %v4429_v29 = vld [vmem:[#allocation6 + $0x28] sm:$0xff] }
0x19c8   :  { %v4287_v21 = vmul.f32 %v4276_v11, %v4253_v61  ;;  %v4262_v15 = vpop.xlane.xlu0 %4261  ;;  %4494 = vmatpush.msrb.mxu0 %v4437_v60  ;;  %v4441_v11 = vld [vmem:[#allocation12 + $0x28] sm:$0xff]  ;;  %4472 = vmatpush.msrb.mxu3 %v4429_v29 }
0x19c9   :  { %v4264_v23 = vmul.f32 %v4262_v15, %v8328_v12  ;;  %4520 = vmatpush.msra.mxu1 %v4441_v11 }
0x19ca   :  { %v4290_v45 = vmul.f32 %v6717_v18, %v4287_v21  ;;  %4495 = vmatpush.msrb.mxu0 %v4436_v19  ;;  %4473 = vmatpush.msrb.mxu3 %v4428_v31  ;;  %v5279_v31 = vld [vmem:[#allocation21 + $0x38] sm:$0xff] }
0x19cb   :  { %v4266_v22 = vadd.f32 1e-05, %v4264_v23 }
0x19cc   :  { %v4293_v56 = vadd.f32 %v6718_v8, %v4290_v45 }
0x19cd   :  { %6892 = vrsqrt.f32 %v4266_v22  ;;  %vm4283_vm15 = vweird.f32 %v4266_v22 }
0x19ce   :  { %v9048_v34 = vadd.f32 %v4293_v56, %v8867_v3 }
0x19d0   :  { %6513 = vmatmul.msk.f32.vlgmr.msrb.gmra.mxu1 %vm706_vm4, %v9048_v34 }
0x19d3   :  { %v6893_v37 = vpop.eup %6892 }
0x19d4   :  { %v4278_v38 = vmul.f32 %v6893_v37, %v4266_v22  ;;  %vm4284_vm14 = vweird.f32 %v6893_v37 }
0x19d5   :  { %vm4285_vm0 = vmor %vm4283_vm15, %vm4284_vm14 }
0x19d6   :  { %v4279_v53 = vmul.f32 %v6893_v37, %v4278_v38 }
0x19d8   :  { %v4280_v39 = vmul.f32 0.5, %v4279_v53  ;;  %v6722_v53 = vld [vmem:[#allocation37] ss:$0 sm:$0xff] }
0x19da   :  { %v4281_v33 = vsub.f32 1.5, %v4280_v39 }
0x19dc   :  { %v4282_v40 = vmul.f32 %v6893_v37, %v4281_v33 }
0x19de   :  { %v4286_v44 = vsel %vm4285_vm0, %v6893_v37, %v4282_v40  ;;  %v6721_v37 = vld [vmem:[#allocation36] ss:$0 sm:$0xff] }
0x19df   :  { %v4288_v3 = vmul.f32 %v4286_v44, %v4254_v2 }
0x19e1   :  { %v4291_v46 = vmul.f32 %v6717_v18, %v4288_v3  ;;  %v4435_v18 = vld [vmem:[#allocation9 + $0x28] sm:$0xff] }
0x19e2   :  { %4496 = vmatpush.msrb.mxu0 %v4435_v18 }
0x19e3   :  { %v4294_v52 = vadd.f32 %v6718_v8, %v4291_v46  ;;  %v4440_v8 = vld [vmem:[#allocation12 + $0x20] sm:$0xff] }
0x19e4   :  { %4497 = vmatpush.msrb.mxu0 %v4434_v4  ;;  %4521 = vmatpush.msra.mxu1 %v4440_v8  ;;  %v5278_v8 = vld [vmem:[#allocation21 + $0x30] sm:$0xff] }
0x19e5   :  { %v9053_v41 = vadd.f32 %v4294_v52, %v8883_v6  ;;  %v6720_v6 = vld [vmem:[#allocation42] ss:$0 sm:$0xff] }
0x19e7   :  { %6514 = vmatmul.msk.f32.gmra.mxu1 %vm706_vm4, %v9053_v41 }
0x1a4d   :  { %v4335_v35 = vpop.f32.mrf.mxu1 }
0x1a4e   :  { %v4336_v57 = vadd.f32 %v6719_v51, %v4335_v35 }
0x1a50   :  { %v4341_v59 = vmax.f32 %v4336_v57, 0.0 }
0x1a52   :  { %6515 = vmatmul.msk.f32.vlgmr.msra.gmra.mxu2 %vm1573_vm8, %v4341_v59 }
0x1a64   :  { %v4338_v43 = vpop.f32.mrf.mxu1 }
0x1a65   :  { %v4339_v48 = vadd.f32 %v6719_v51, %v4338_v43 }
0x1a67   :  { %v4342_v16 = vmax.f32 %v4339_v48, 0.0 }
0x1a69   :  { %6516 = vmatmul.msk.f32.gmra.mxu2 %vm1573_vm8, %v4342_v16 }
0x1ad5   :  { %v4367_v47 = vpop.f32.mrf.mxu2 }
0x1ad6   :  { %v4368_v27 = vadd.f32 %v6720_v6, %v4367_v47  ;;  %v9093_v47 = vld [vmem:[#allocation13 + $0x1] ss:$0 sm:$0xff] }
0x1ad8   :  { %v4375_v61 = vsel %vm706_vm4, %v4368_v27, 0.0 }
0x1ad9   :  { %4376 = vadd.xlane.f32.xlu2 %v4375_v61 }
0x1aec   :  { %v4370_v58 = vpop.f32.mrf.mxu2 }
0x1aed   :  { %v4371_v28 = vadd.f32 %v6720_v6, %v4370_v58  ;;  %v6723_v6 = vld [vmem:[#allocation10 + $0x1] ss:$0 sm:$0xff] }
0x1aef   :  { %v4378_v20 = vsel %vm706_vm4, %v4371_v28, 0.0 }
0x1af0   :  { %4379 = vadd.xlane.f32.xlu1 %v4378_v20 }
0x1b4c   :  { %v4377_v1 = vpop.xlane.xlu2 %4376 }
0x1b4d   :  { %v4381_v2 = vmul.f32 %v4377_v1, %v8328_v12 }
0x1b4f   :  { %v4383_v63 = vsub.f32 %v4368_v27, %v4381_v2 }
0x1b51   :  { %v4385_v30 = vmul.f32 %v4383_v63, %v4383_v63 }
0x1b53   :  { %v4387_v5 = vsel %vm706_vm4, %v4385_v30, 0.0 }
0x1b54   :  { %4388 = vadd.xlane.f32.xlu0 %v4387_v5 }
0x1b63   :  { %v4380_v62 = vpop.xlane.xlu1 %4379 }
0x1b64   :  { %v4382_v17 = vmul.f32 %v4380_v62, %v8328_v12 }
0x1b66   :  { %v9067_v9 = vsub.f32 %v4371_v28, %v4382_v17 }
0x1b68   :  { %v4386_v49 = vmul.f32 %v9067_v9, %v9067_v9 }
0x1b6a   :  { %v4390_v10 = vsel %vm706_vm4, %v4386_v49, 0.0 }
0x1b6b   :  { %4391 = vadd.xlane.f32.xlu2 %v4390_v10 }
0x1bc7   :  { %v4389_v21 = vpop.xlane.xlu0 %4388 }
0x1bc8   :  { %v4393_v15 = vmul.f32 %v4389_v21, %v8328_v12  ;;  %v5277_v21 = vld [vmem:[#allocation21 + $0x28] sm:$0xff] }
0x1bca   :  { %v4395_v23 = vadd.f32 1e-05, %v4393_v15  ;;  %v5276_v15 = vld [vmem:[#allocation21 + $0x20] sm:$0xff] }
0x1bcc   :  { %6894 = vrsqrt.f32 %v4395_v23  ;;  %vm4403_vm2 = vweird.f32 %v4395_v23 }
0x1bd2   :  { %v6895_v55 = vpop.eup %6894 }
0x1bd3   :  { %v4398_v45 = vmul.f32 %v6895_v55, %v4395_v23  ;;  %vm4404_vm1 = vweird.f32 %v6895_v55 }
0x1bd4   :  { %vm4405_vm7 = vmor %vm4403_vm2, %vm4404_vm1 }
0x1bd5   :  { %v4399_v22 = vmul.f32 %v6895_v55, %v4398_v45 }
0x1bd7   :  { %v4400_v14 = vmul.f32 0.5, %v4399_v22 }
0x1bd9   :  { %v4401_v56 = vsub.f32 1.5, %v4400_v14 }
0x1bdb   :  { %v4402_v32 = vmul.f32 %v6895_v55, %v4401_v56 }
0x1bdd   :  { %v4406_v38 = vsel %vm4405_vm7, %v6895_v55, %v4402_v32 }
0x1bde   :  { %v4417_v39 = vmul.f32 %v4406_v38, %v4383_v63  ;;  %v4392_v33 = vpop.xlane.xlu2 %4391 }
0x1bdf   :  { %v4394_v40 = vmul.f32 %v4392_v33, %v8328_v12 }
0x1be0   :  { %v4420_v44 = vmul.f32 %v6721_v37, %v4417_v39  ;;  %v4448_v39 = vld [vmem:[#allocation15 + $0x30] sm:$0xff] }
0x1be1   :  { %v4396_v3 = vadd.f32 1e-05, %v4394_v40 }
0x1be2   :  { %v4423_v46 = vadd.f32 %v6722_v53, %v4420_v44 }
0x1be3   :  { %6896 = vrsqrt.f32 %v4396_v3  ;;  %vm4413_vm10 = vweird.f32 %v4396_v3 }
0x1be4   :  { %v9075_v52 = vadd.f32 %v4423_v46, %v9048_v34  ;;  %v4447_v46 = vld [vmem:[#allocation15 + $0x28] sm:$0xff] }
0x1be6   :  { %6517 = vmatmul.msk.f32.vlgmr.msrb.gmra.mxu3 %vm706_vm4, %v9075_v52  ;;  %6519 = vmatmul.msk.f32.vlgmr.msrb.gmra.mxu0 %vm706_vm4, %v9075_v52 }
0x1be7   :  { %6521 = vmatmul.msk.f32.vlgmr.msra.gmra.mxu1 %vm706_vm4, %v9075_v52 }
0x1be9   :  { %v6897_v50 = vpop.eup %6896 }
0x1bea   :  { %v4408_v36 = vmul.f32 %v6897_v50, %v4396_v3  ;;  %vm4414_vm9 = vweird.f32 %v6897_v50 }
0x1beb   :  { %vm4415_vm11 = vmor %vm4413_vm10, %vm4414_vm9 }
0x1bec   :  { %v4409_v13 = vmul.f32 %v6897_v50, %v4408_v36 }
0x1bee   :  { %v4410_v51 = vmul.f32 0.5, %v4409_v13  ;;  %v4446_v13 = vld [vmem:[#allocation15 + $0x20] sm:$0xff] }
0x1bf0   :  { %v4411_v35 = vsub.f32 1.5, %v4410_v51 }
0x1bf2   :  { %v4412_v57 = vmul.f32 %v6897_v50, %v4411_v35 }
0x1bf4   :  { %v4416_v34 = vsel %vm4415_vm11, %v6897_v50, %v4412_v57 }
0x1bf5   :  { %v4418_v59 = vmul.f32 %v4416_v34, %v9067_v9 }
0x1bf7   :  { %v4421_v43 = vmul.f32 %v6721_v37, %v4418_v59 }
0x1bf9   :  { %v4424_v48 = vadd.f32 %v6722_v53, %v4421_v43  ;;  %v4449_v53 = vld [vmem:[#allocation15 + $0x38] sm:$0xff] }
0x1bfb   :  { %v9085_v16 = vadd.f32 %v4424_v48, %v9053_v41  ;;  %v6725_v41 = vld [vmem:[#allocation7 + $0x1] ss:$0 sm:$0xff] }
0x1bfd   :  { %6518 = vmatmul.msk.f32.gmra.mxu3 %vm706_vm4, %v9085_v16  ;;  %6520 = vmatmul.msk.f32.gmra.mxu0 %vm706_vm4, %v9085_v16 }
0x1bfe   :  { %6522 = vmatmul.msk.f32.gmra.mxu1 %vm706_vm4, %v9085_v16 }
0x1c63   :  { %v4499_v27 = vpop.f32.mrf.mxu0 }
0x1c64   :  { %v4500_v61 = vadd.f32 %v6723_v6, %v4499_v27  ;;  %v4523_v58 = vpop.f32.mrf.mxu1 }
0x1c65   :  { %v9096_v28 = vadd.f32 %v9093_v47, %v4523_v58 }
0x1c66   :  { %4686 = vrot.lane.b32.xlu2 %v4500_v61, %s7732_s21  ;;  %4606 = vrot.lane.b32.xlu1 %v4500_v61, %s7731_s30 }
0x1c67   :  { %4599 = vmatpush.msrb.mxu2 %v9096_v28  ;;  %6523 = vmatpush.xpose.msk.msra.mxu3 %vm785_vm5, %v4500_v61 }
0x1c69   :  { %v4475_v20 = vpop.f32.mrf.mxu3 }
0x1c6a   :  { %v4476_v1 = vadd.f32 %v6725_v41, %v4475_v20 }
0x1c6c   :  { %v4529_v2 = vmul.f32 0.35355338, %v4476_v1 }
0x1c6e   :  { %4763 = vrot.lane.b32.xlu2 %v4529_v2, %s7733_s1  ;;  %4684 = vrot.lane.b32.xlu1 %v4529_v2, %s7732_s21 }
0x1c6f   :  { %4604 = vrot.lane.b32.xlu0 %v4529_v2, %s7731_s30  ;;  %6524 = vmatmul.msk.f32.vlgmr.msra.gmra.mxu3 %vm785_vm5, %v4529_v2  ;;  %v9164_v2 = vld [vmem:[#allocation22 + $0x1] ss:$0 sm:$0xff] }
0x1c77   :  { %4765 = vrot.lane.b32.xlu0 %v4500_v61, %s7733_s1 }
0x1c7a   :  { %v4502_v63 = vpop.f32.mrf.mxu0 }
0x1c7b   :  { %v4503_v30 = vadd.f32 %v6723_v6, %v4502_v63  ;;  %v9134_v45 = vpop.f32.mrf.mxu1 }
0x1c7d   :  { %5014 = vrot.lane.b32.xlu2 %v4503_v30, %s7732_s21 }
0x1c7f   :  { %4934 = vrot.lane.b32.xlu0 %v4503_v30, %s7731_s30 }
0x1c80   :  { %v4478_v5 = vpop.f32.mrf.mxu3 }
0x1c81   :  { %v4479_v62 = vadd.f32 %v6725_v41, %v4478_v5 }
0x1c83   :  { %v4857_v17 = vmul.f32 0.35355338, %v4479_v62 }
0x1c85   :  { %5091 = vrot.lane.b32.xlu2 %v4857_v17, %s7733_s1  ;;  %4932 = vrot.lane.b32.xlu1 %v4857_v17, %s7731_s30 }
0x1c87   :  { %5093 = vrot.lane.b32.xlu0 %v4503_v30, %s7733_s1 }
0x1c8d   :  { %5012 = vrot.lane.b32.xlu1 %v4857_v17, %s7732_s21 }
0x1cc0   :  { %v4687_v9 = vpop.permute.xlu2 %4686 }
0x1cc1   :  { %6529 = vmatpush.xpose.msk.msrb.mxu1 %vm785_vm5, %v4687_v9 }
0x1cc5   :  { %6535 = vmatpush.xpose.msk.msra.mxu1 %vm785_vm5, %v4503_v30 }
0x1cc8   :  { %v4764_v10 = vpop.permute.xlu2 %4763 }
0x1cd7   :  { %v5015_v60 = vpop.permute.xlu2 %5014 }
0x1cd8   :  { %v4607_v49 = vpop.permute.xlu1 %4606 }
0x1cd9   :  { %6526 = vmatpush.xpose.msk.msrb.mxu3 %vm785_vm5, %v4607_v49 }
0x1cdf   :  { %v5092_v23 = vpop.permute.xlu2 %5091 }
0x1ce0   :  { %v4685_v7 = vpop.permute.xlu1 %4684 }
0x1ce1   :  { %v4605_v25 = vpop.permute.xlu0 %4604  ;;  %6530 = vmatmul.msk.f32.vlgmr.msrb.gmra.mxu1 %vm785_vm5, %v4685_v7 }
0x1ce2   :  { %6527 = vmatmul.msk.f32.vlgmr.msrb.gmra.mxu3 %vm785_vm5, %v4605_v25  ;;  %6541 = vmatpush.xpose.msk.msrb.mxu1 %vm785_vm5, %v5015_v60 }
0x1ce9   :  { %v4766_v0 = vpop.permute.xlu0 %4765  ;;  %6536 = vmatmul.msk.f32.vlgmr.msra.gmra.mxu1 %vm785_vm5, %v4857_v17 }
0x1cea   :  { %6532 = vmatpush.xpose.msk.msra.mxu3 %vm785_vm5, %v4766_v0  ;;  %5204 = vmatpush.msra.mxu1 %v4449_v53 }
0x1cec   :  { %5205 = vmatpush.msra.mxu1 %v4448_v39 }
0x1ced   :  { %6533 = vmatmul.msk.f32.vlgmr.msra.gmra.mxu3 %vm785_vm5, %v4764_v10 }
0x1cee   :  { %5206 = vmatpush.msra.mxu1 %v4447_v46 }
0x1cf0   :  { %5207 = vmatpush.msra.mxu1 %v4446_v13 }
0x1cf1   :  { %v4935_v19 = vpop.permute.xlu0 %4934 }
0x1cf2   :  { %v4553_v24 = vpop.f32.mrf.mxu3  ;;  %6538 = vmatpush.xpose.msk.msrb.mxu3 %vm785_vm5, %v4935_v19 }
0x1cf3   :  { %v4556_v29 = vsel %vm8640_vm6, %v4553_v24, -1e+09 }
0x1cf4   :  { %v4557_v18 = vsel %vm785_vm5, %v4556_v29, -inf }
0x1cf5   :  { %4558 = vmax.xlane.f32.xlu0 %v4557_v18 }
0x1cf7   :  { %v4933_v11 = vpop.permute.xlu1 %4932 }
0x1cf8   :  { %6539 = vmatmul.msk.f32.vlgmr.msrb.gmra.mxu3 %vm785_vm5, %v4933_v11 }
0x1cf9   :  { %v5094_v4 = vpop.permute.xlu0 %5093 }
0x1cfa   :  { %6544 = vmatpush.xpose.msk.msra.mxu3 %vm785_vm5, %v5094_v4 }
0x1cfe   :  { %5336 = vmatpush.msrb.mxu3 %v5279_v31 }
0x1cff   :  { %v5013_v55 = vpop.permute.xlu1 %5012 }
0x1d00   :  { %5337 = vmatpush.msrb.mxu3 %v5278_v8  ;;  %6542 = vmatmul.msk.f32.vlgmr.msrb.gmra.mxu1 %vm785_vm5, %v5013_v55 }
0x1d01   :  { %6545 = vmatmul.msk.f32.vlgmr.msra.gmra.mxu3 %vm785_vm5, %v5092_v23 }
0x1d02   :  { %5338 = vmatpush.msrb.mxu3 %v5277_v21 }
0x1d04   :  { %5339 = vmatpush.msrb.mxu3 %v5276_v15 }
0x1d09   :  { %6551 = vmatmul.msk.f32.vlgmr.msrb.gmra.mxu3 %vm706_vm4, %v8843_v54 }
0x1d11   :  { %6552 = vmatmul.msk.f32.gmra.mxu3 %vm706_vm4, %v8859_v42 }
0x1d5e   :  { %v4709_v22 = vpop.f32.mrf.mxu1 }
0x1d5f   :  { %v4712_v14 = vsel %vm8640_vm6, %v4709_v22, -1e+09 }
0x1d60   :  { %v4713_v56 = vsel %vm785_vm5, %v4712_v14, -inf }
0x1d61   :  { %4714 = vmax.xlane.f32.xlu2 %v4713_v56 }
0x1d65   :  { %v4629_v32 = vpop.f32.mrf.mxu3 }
0x1d66   :  { %v4632_v37 = vsel %vm8640_vm6, %v4629_v32, -1e+09  ;;  %v4881_v38 = vpop.f32.mrf.mxu1 }
0x1d67   :  { %v4633_v33 = vsel %vm785_vm5, %v4632_v37, -inf  ;;  %v4884_v40 = vsel %vm8640_vm6, %v4881_v38, -1e+09 }
0x1d68   :  { %v4885_v44 = vsel %vm785_vm5, %v4884_v40, -inf  ;;  %v4559_v3 = vpop.xlane.xlu0 %4558  ;;  %4634 = vmax.xlane.f32.xlu1 %v4633_v33 }
0x1d69   :  { %v4560_v50 = vsub.f32 %v4556_v29, %v4559_v3  ;;  %4886 = vmax.xlane.f32.xlu2 %v4885_v44 }
0x1d6b   :  { %v4561_v36 = vmul.f32 1.442695, %v4560_v50 }
0x1d6d   :  { %6898 = vpow2.f32 %v4561_v36 }
0x1d70   :  { %v4788_v51 = vpop.f32.mrf.mxu3 }
0x1d71   :  { %v4791_v35 = vsel %vm8640_vm6, %v4788_v51, -1e+09 }
0x1d72   :  { %v4792_v57 = vsel %vm785_vm5, %v4791_v35, -inf }
0x1d73   :  { %v9148_v34 = vpop.eup %6898  ;;  %4793 = vmax.xlane.f32.xlu0 %v4792_v57 }
0x1d74   :  { %v4563_v59 = vsel %vm785_vm5, %v9148_v34, 0.0 }
0x1d75   :  { %4564 = vadd.xlane.f32.xlu1 %v4563_v59 }
0x1d7b   :  { %v4957_v43 = vpop.f32.mrf.mxu3 }
0x1d7c   :  { %v4960_v48 = vsel %vm8640_vm6, %v4957_v43, -1e+09 }
0x1d7d   :  { %v4961_v6 = vsel %vm785_vm5, %v4960_v48, -inf  ;;  %v5037_v27 = vpop.f32.mrf.mxu1 }
0x1d7e   :  { %v5040_v61 = vsel %vm8640_vm6, %v5037_v27, -1e+09  ;;  %4962 = vmax.xlane.f32.xlu1 %v4961_v6 }
0x1d7f   :  { %v5041_v58 = vsel %vm785_vm5, %v5040_v61, -inf }
0x1d80   :  { %5042 = vmax.xlane.f32.xlu0 %v5041_v58 }
0x1d84   :  { %v5116_v41 = vpop.f32.mrf.mxu3 }
0x1d85   :  { %v9160_v20 = vsel %vm8640_vm6, %v5116_v41, -1e+09 }
0x1d86   :  { %v5120_v1 = vsel %vm785_vm5, %v9160_v20, -inf }
0x1d87   :  { %5121 = vmax.xlane.f32.xlu2 %v5120_v1 }
0x1d8c   :  { %v5341_v63 = vpop.f32.mrf.mxu3 }
0x1d8d   :  { %v9167_v30 = vadd.f32 %v9164_v2, %v5341_v63 }
0x1d8f   :  { %6555 = vmatpush.xpose.msk.msrb.mxu1 %vm785_vm5, %v9167_v30 }
0x1d94   :  { %4658 = vrot.lane.b32.xlu0 %v9096_v28, %s7731_s30 }
0x1d9f   :  { %4737 = vrot.lane.b32.xlu2 %v9096_v28, %s7732_s21 }
0x1dd4   :  { %v4715_v26 = vpop.xlane.xlu2 %4714 }
0x1dd5   :  { %v4716_v5 = vsub.f32 %v4712_v14, %v4715_v26 }
0x1dd7   :  { %v4717_v62 = vmul.f32 1.442695, %v4716_v5 }
0x1dd9   :  { %6900 = vpow2.f32 %v4717_v62 }
0x1ddb   :  { %v4635_v17 = vpop.xlane.xlu1 %4634 }
0x1ddc   :  { %v4636_v9 = vsub.f32 %v4632_v37, %v4635_v17  ;;  %v4887_v49 = vpop.xlane.xlu2 %4886 }
0x1ddd   :  { %v4888_v7 = vsub.f32 %v4884_v40, %v4887_v49 }
0x1dde   :  { %v4637_v10 = vmul.f32 1.442695, %v4636_v9 }
0x1ddf   :  { %v9175_v60 = vpop.eup %6900  ;;  %v4889_v0 = vmul.f32 1.442695, %v4888_v7 }
0x1de0   :  { %6902 = vpow2.f32 %v4637_v10  ;;  %v4719_v25 = vsel %vm785_vm5, %v9175_v60, 0.0 }
0x1de1   :  { %4720 = vadd.xlane.f32.xlu2 %v4719_v25  ;;  %6904 = vpow2.f32 %v4889_v0 }
0x1de6   :  { %v9179_v19 = vpop.eup %6902  ;;  %v4794_v24 = vpop.xlane.xlu0 %4793 }
0x1de7   :  { %v4795_v29 = vsub.f32 %v4791_v35, %v4794_v24  ;;  %v4639_v18 = vsel %vm785_vm5, %v9179_v19, 0.0  ;;  %v9183_v4 = vpop.eup %6904 }
0x1de8   :  { %v4565_v11 = vpop.xlane.xlu1 %4564  ;;  %4640 = vadd.xlane.f32.xlu0 %v4639_v18  ;;  %v4891_v21 = vsel %vm785_vm5, %v9183_v4, 0.0 }
0x1de9   :  { %v4796_v31 = vmul.f32 1.442695, %v4795_v29  ;;  %6906 = vrcp.f32 %v4565_v11  ;;  %v4575_v32 = vand.u32 2147483647, %v4565_v11  ;;  %v4577_v37 = vand.u32 2147483648, %v4565_v11 }
0x1dea   :  { %vm4571_vm14 = vweird.f32 %v4565_v11 }
0x1deb   :  { %6908 = vpow2.f32 %v4796_v31  ;;  %v4578_v3 = vor.u32 1.1754944e-38, %v4577_v37  ;;  %vm4576_vm0 = vcmp.eq.f32.partialorder %v4575_v32, 8.507059e+37 }
0x1def   :  { %v6907_v8 = vpop.eup %6906 }
0x1df0   :  { %v4567_v15 = vmul.f32 %v6907_v8, %v4565_v11  ;;  %4892 = vadd.xlane.f32.xlu0 %v4891_v21  ;;  %vm4572_vm6 = vweird.f32 %v6907_v8 }
0x1df1   :  { %v9187_v23 = vpop.eup %6908  ;;  %v4963_v55 = vpop.xlane.xlu1 %4962  ;;  %vm4573_vm15 = vmor %vm4571_vm14, %vm4572_vm6 }
0x1df2   :  { %v4568_v22 = vsub.f32 1.0, %v4567_v15  ;;  %v4964_v14 = vsub.f32 %v4960_v48, %v4963_v55  ;;  %v4798_v56 = vsel %vm785_vm5, %v9187_v23, 0.0 }
0x1df3   :  { %4799 = vadd.xlane.f32.xlu1 %v4798_v56  ;;  %v5043_v38 = vpop.xlane.xlu0 %5042 }
0x1df4   :  { %v4569_v53 = vmul.f32 %v6907_v8, %v4568_v22  ;;  %v4965_v39 = vmul.f32 1.442695, %v4964_v14  ;;  %v5044_v33 = vsub.f32 %v5040_v61, %v5043_v38 }
0x1df6   :  { %v4570_v40 = vadd.f32 %v6907_v8, %v4569_v53  ;;  %6910 = vpow2.f32 %v4965_v39  ;;  %v5045_v44 = vmul.f32 1.442695, %v5044_v33 }
0x1df8   :  { %v4574_v46 = vsel %vm4573_vm15, %v6907_v8, %v4570_v40  ;;  %6912 = vpow2.f32 %v5045_v44 }
0x1df9   :  { %v4579_v50 = vsel %vm4576_vm0, %v4578_v3, %v4574_v46 }
0x1dfa   :  { %v5122_v36 = vpop.xlane.xlu2 %5121  ;;  %v4580_v13 = vmul.f32 %v9148_v34, %v4579_v50  ;;  %v4527_v34 = vadd.f32 %v9093_v47, %v9134_v45 }
0x1dfb   :  { %v5123_v51 = vsub.f32 %v9160_v20, %v5122_v36 }
0x1dfc   :  { %v9193_v35 = vpop.eup %6910  ;;  %6525 = vmatmul.msk.f32.vlgmr.msrb.gmra.mxu2 %vm785_vm5, %v4580_v13 }
0x1dfd   :  { %v5124_v57 = vmul.f32 1.442695, %v5123_v51  ;;  %v4967_v59 = vsel %vm785_vm5, %v9193_v35, 0.0 }
0x1dfe   :  { %v9198_v43 = vpop.eup %6912  ;;  %4968 = vadd.xlane.f32.xlu2 %v4967_v59 }
0x1dff   :  { %6914 = vpow2.f32 %v5124_v57  ;;  %v5047_v48 = vsel %vm785_vm5, %v9198_v43, 0.0 }
0x1e00   :  { %5048 = vadd.xlane.f32.xlu1 %v5047_v48 }
0x1e02   :  { %v4738_v6 = vpop.permute.xlu2 %4737 }
0x1e03   :  { %4758 = vmatpush.msra.mxu2 %v4738_v6 }
0x1e04   :  { %4986 = vrot.lane.b32.xlu0 %v4527_v34, %s7731_s30 }
0x1e05   :  { %4927 = vmatpush.msrb.mxu2 %v4527_v34  ;;  %v9204_v27 = vpop.eup %6914 }
0x1e06   :  { %v4659_v61 = vpop.permute.xlu0 %4658  ;;  %v5126_v58 = vsel %vm785_vm5, %v9204_v27, 0.0 }
0x1e07   :  { %4679 = vmatpush.msra.mxu0 %v4659_v61 }
0x1e08   :  { %5127 = vadd.xlane.f32.xlu1 %v5126_v58 }
0x1e0c   :  { %5144 = vrot.lane.b32.xlu0 %v4527_v34, %s7733_s1 }
0x1e16   :  { %5065 = vrot.lane.b32.xlu2 %v4527_v34, %s7732_s21 }
0x1e21   :  { %4816 = vrot.lane.b32.xlu1 %v9096_v28, %s7733_s1 }
0x1e54   :  { %v4721_v47 = vpop.xlane.xlu2 %4720 }
0x1e55   :  { %6916 = vrcp.f32 %v4721_v47  ;;  %v4733_v63 = vand.u32 2147483648, %v4721_v47  ;;  %v4731_v5 = vand.u32 2147483647, %v4721_v47  ;;  %vm4727_vm2 = vweird.f32 %v4721_v47 }
0x1e57   :  { %v4734_v9 = vor.u32 1.1754944e-38, %v4733_v63  ;;  %vm4732_vm9 = vcmp.eq.f32.partialorder %v4731_v5, 8.507059e+37 }
0x1e5b   :  { %v6917_v45 = vpop.eup %6916  ;;  %v4641_v41 = vpop.xlane.xlu0 %4640 }
0x1e5c   :  { %v4723_v20 = vmul.f32 %v6917_v45, %v4721_v47  ;;  %6918 = vrcp.f32 %v4641_v41  ;;  %vm4728_vm1 = vweird.f32 %v6917_v45  ;;  %v4653_v24 = vand.u32 2147483648, %v4641_v41 }
0x1e5d   :  { %vm4729_vm7 = vmor %vm4727_vm2, %vm4728_vm1  ;;  %v4651_v18 = vand.u32 2147483647, %v4641_v41  ;;  %vm4647_vm11 = vweird.f32 %v4641_v41 }
0x1e5e   :  { %v4724_v1 = vsub.f32 1.0, %v4723_v20  ;;  %v4654_v8 = vor.u32 1.1754944e-38, %v4653_v24 }
0x1e5f   :  { %vm4652_vm14 = vcmp.eq.f32.partialorder %v4651_v18, 8.507059e+37 }
0x1e60   :  { %v4725_v26 = vmul.f32 %v6917_v45, %v4724_v1 }
0x1e62   :  { %v6919_v62 = vpop.eup %6918  ;;  %v4726_v17 = vadd.f32 %v6917_v45, %v4725_v26 }
0x1e63   :  { %v4643_v49 = vmul.f32 %v6919_v62, %v4641_v41  ;;  %v4893_v10 = vpop.xlane.xlu0 %4892  ;;  %vm4648_vm10 = vweird.f32 %v6919_v62 }
0x1e64   :  { %v4730_v7 = vsel %vm4729_vm7, %v6917_v45, %v4726_v17  ;;  %6920 = vrcp.f32 %v4893_v10  ;;  %vm4649_vm6 = vmor %vm4647_vm11, %vm4648_vm10  ;;  %v4903_v37 = vand.u32 2147483647, %v4893_v10  ;;  %vm4899_vm0 = vweird.f32 %v4893_v10 }
0x1e65   :  { %v4735_v28 = vsel %vm4732_vm9, %v4734_v9, %v4730_v7  ;;  %v4644_v25 = vsub.f32 1.0, %v4643_v49 }
0x1e66   :  { %v4736_v0 = vmul.f32 %v9175_v60, %v4735_v28  ;;  %v4800_v55 = vpop.xlane.xlu1 %4799  ;;  %v4905_v60 = vand.u32 2147483648, %v4893_v10  ;;  %vm4904_vm2 = vcmp.eq.f32.partialorder %v4903_v37, 8.507059e+37  ;;  %v5284_v37 = vld [vmem:[#allocation24 + $0x30] sm:$0xff] }
0x1e67   :  { %v4645_v29 = vmul.f32 %v6919_v62, %v4644_v25  ;;  %6922 = vrcp.f32 %v4800_v55  ;;  %v4810_v17 = vand.u32 2147483647, %v4800_v55 }
0x1e68   :  { %6531 = vmatmul.msk.f32.vlgmr.msra.gmra.mxu2 %vm785_vm5, %v4736_v0  ;;  %v4906_v39 = vor.u32 1.1754944e-38, %v4905_v60  ;;  %v5285_v60 = vld [vmem:[#allocation24 + $0x38] sm:$0xff] }
0x1e69   :  { %v4646_v11 = vadd.f32 %v6919_v62, %v4645_v29 }
0x1e6a   :  { %v6921_v31 = vpop.eup %6920 }
0x1e6b   :  { %v4650_v21 = vsel %vm4649_vm6, %v6919_v62, %v4646_v11  ;;  %v4895_v15 = vmul.f32 %v6921_v31, %v4893_v10  ;;  %vm4900_vm15 = vweird.f32 %v6921_v31  ;;  %v4812_v62 = vand.u32 2147483648, %v4800_v55 }
0x1e6c   :  { %v4655_v22 = vsel %vm4652_vm14, %v4654_v8, %v4650_v21  ;;  %vm4901_vm1 = vmor %vm4899_vm0, %vm4900_vm15  ;;  %vm4806_vm14 = vweird.f32 %v4800_v55  ;;  %vm4811_vm0 = vcmp.eq.f32.partialorder %v4810_v17, 8.507059e+37 }
0x1e6d   :  { %v4656_v14 = vmul.f32 %v9179_v19, %v4655_v22  ;;  %v4896_v56 = vsub.f32 1.0, %v4895_v15  ;;  %v6923_v3 = vpop.eup %6922  ;;  %v4813_v28 = vor.u32 1.1754944e-38, %v4812_v62 }
0x1e6e   :  { %v4802_v13 = vmul.f32 %v6923_v3, %v4800_v55  ;;  %vm4807_vm6 = vweird.f32 %v6923_v3 }
0x1e6f   :  { %v4897_v32 = vmul.f32 %v6921_v31, %v4896_v56  ;;  %6528 = vmatmul.msk.f32.vlgmr.msra.gmra.mxu0 %vm785_vm5, %v4656_v14  ;;  %vm4808_vm15 = vmor %vm4806_vm14, %vm4807_vm6 }
0x1e70   :  { %v4803_v34 = vsub.f32 1.0, %v4802_v13 }
0x1e71   :  { %v4898_v38 = vadd.f32 %v6921_v31, %v4897_v32  ;;  %v9217_v53 = vpop.xlane.xlu2 %4968 }
0x1e72   :  { %v4804_v41 = vmul.f32 %v6923_v3, %v4803_v34  ;;  %v4981_v24 = vand.u32 2147483648, %v9217_v53  ;;  %v4979_v18 = vand.u32 2147483647, %v9217_v53 }
0x1e73   :  { %v4902_v33 = vsel %vm4901_vm1, %v6921_v31, %v4898_v38  ;;  %v5049_v40 = vpop.xlane.xlu1 %5048 }
0x1e74   :  { %v4907_v44 = vsel %vm4904_vm2, %v4906_v39, %v4902_v33  ;;  %6924 = vrcp.f32 %v5049_v40  ;;  %v5061_v57 = vand.u32 2147483648, %v5049_v40  ;;  %v5059_v48 = vand.u32 2147483647, %v5049_v40  ;;  %v5282_v33 = vld [vmem:[#allocation24 + $0x20] sm:$0xff] }
0x1e75   :  { %v4908_v19 = vmul.f32 %v9183_v4, %v4907_v44  ;;  %6926 = vrcp.f32 %v9217_v53  ;;  %vm5055_vm9 = vweird.f32 %v5049_v40  ;;  %v4805_v63 = vadd.f32 %v6923_v3, %v4804_v41 }
0x1e76   :  { %v5062_v58 = vor.u32 1.1754944e-38, %v5061_v57  ;;  %vm5060_vm11 = vcmp.eq.f32.partialorder %v5059_v48, 8.507059e+37  ;;  %v4987_v9 = vpop.permute.xlu0 %4986  ;;  %vm4975_vm2 = vweird.f32 %v9217_v53  ;;  %v4982_v21 = vor.u32 1.1754944e-38, %v4981_v24  ;;  %v9244_v57 = vld [vmem:[#allocation25 + $0x1] ss:$0 sm:$0xff] }
0x1e77   :  { %6537 = vmatmul.msk.f32.vlgmr.msrb.gmra.mxu2 %vm785_vm5, %v4908_v19  ;;  %v4809_v49 = vsel %vm4808_vm15, %v6923_v3, %v4805_v63 }
0x1e78   :  { %v4814_v25 = vsel %vm4811_vm0, %v4813_v28, %v4809_v49 }
0x1e79   :  { %v5066_v46 = vpop.permute.xlu2 %5065  ;;  %v4815_v29 = vmul.f32 %v9187_v23, %v4814_v25 }
0x1e7a   :  { %v6925_v50 = vpop.eup %6924  ;;  %5086 = vmatpush.msra.mxu2 %v5066_v46  ;;  %v5273_v46 = vld [vmem:[#allocation18 + $0x38] sm:$0xff] }
0x1e7b   :  { %v5051_v36 = vmul.f32 %v6925_v50, %v5049_v40  ;;  %vm5056_vm7 = vweird.f32 %v6925_v50  ;;  %v5128_v61 = vpop.xlane.xlu1 %5127  ;;  %v6927_v4 = vpop.eup %6926 }
0x1e7c   :  { %vm5057_vm10 = vmor %vm5055_vm9, %vm5056_vm7  ;;  %6928 = vrcp.f32 %v5128_v61  ;;  %v4971_v20 = vmul.f32 %v6927_v4, %v9217_v53  ;;  %vm4976_vm1 = vweird.f32 %v6927_v4  ;;  %vm4980_vm9 = vcmp.eq.f32.partialorder %v4979_v18, 8.507059e+37  ;;  %v5283_v53 = vld [vmem:[#allocation24 + $0x28] sm:$0xff]  ;;  %5312 = vmatpush.msrb.mxu2 %v5273_v46 }
0x1e7d   :  { %v5052_v51 = vsub.f32 1.0, %v5051_v36  ;;  %vm4977_vm7 = vmor %vm4975_vm2, %vm4976_vm1  ;;  %v5140_v23 = vand.u32 2147483648, %v5128_v61  ;;  %v5138_v56 = vand.u32 2147483647, %v5128_v61 }
0x1e7e   :  { %v4972_v26 = vsub.f32 1.0, %v4971_v20  ;;  %v5145_v15 = vpop.permute.xlu0 %5144 }
0x1e7f   :  { %v5053_v59 = vmul.f32 %v6925_v50, %v5052_v51  ;;  %v5141_v38 = vor.u32 1.1754944e-38, %v5140_v23  ;;  %vm5139_vm14 = vcmp.eq.f32.partialorder %v5138_v56, 8.507059e+37 }
0x1e80   :  { %v4973_v10 = vmul.f32 %v6927_v4, %v4972_v26 }
0x1e81   :  { %v5054_v6 = vadd.f32 %v6925_v50, %v5053_v59 }
0x1e82   :  { %v6929_v5 = vpop.eup %6928  ;;  %v4974_v0 = vadd.f32 %v6927_v4, %v4973_v10 }
0x1e83   :  { %v5058_v47 = vsel %vm5057_vm10, %v6925_v50, %v5054_v6  ;;  %v5130_v7 = vmul.f32 %v6929_v5, %v5128_v61  ;;  %vm5135_vm10 = vweird.f32 %v6929_v5  ;;  %v5272_v50 = vld [vmem:[#allocation18 + $0x30] sm:$0xff] }
0x1e84   :  { %v5063_v45 = vsel %vm5060_vm11, %v5062_v58, %v5058_v47  ;;  %v4978_v31 = vsel %vm4977_vm7, %v6927_v4, %v4974_v0  ;;  %vm5134_vm11 = vweird.f32 %v5128_v61  ;;  %5313 = vmatpush.msrb.mxu2 %v5272_v50 }
0x1e85   :  { %v5064_v1 = vmul.f32 %v9198_v43, %v5063_v45  ;;  %v5131_v43 = vsub.f32 1.0, %v5130_v7  ;;  %v4983_v55 = vsel %vm4980_vm9, %v4982_v21, %v4978_v31  ;;  %vm5136_vm6 = vmor %vm5134_vm11, %vm5135_vm10 }
0x1e86   :  { %v4984_v14 = vmul.f32 %v9193_v35, %v4983_v55  ;;  %v4601_v35 = vpop.f32.mrf.mxu2  ;;  %v5344_v55 = vpop.f32.mrf.mxu3 }
0x1e87   :  { %6543 = vmatmul.msk.f32.vlgmr.msra.gmra.mxu2 %vm785_vm5, %v5064_v1  ;;  %v5132_v8 = vmul.f32 %v6929_v5, %v5131_v43 }
0x1e89   :  { %v5133_v22 = vadd.f32 %v6929_v5, %v5132_v8 }
0x1e8b   :  { %v5137_v32 = vsel %vm5136_vm6, %v6929_v5, %v5133_v22  ;;  %v6728_v5 = vld [vmem:[#allocation16 + $0x1] ss:$0 sm:$0xff]  ;;  %v5345_v22 = vadd.f32 %v9164_v2, %v5344_v55 }
0x1e8c   :  { %v5142_v39 = vsel %vm5139_vm14, %v5141_v38, %v5137_v32 }
0x1e8d   :  { %v5143_v40 = vmul.f32 %v9204_v27, %v5142_v39  ;;  %v5271_v27 = vld [vmem:[#allocation18 + $0x28] sm:$0xff] }
0x1e8e   :  { %5314 = vmatpush.msrb.mxu2 %v5271_v27 }
0x1e93   :  { %v4817_v11 = vpop.permute.xlu1 %4816 }
0x1e94   :  { %4837 = vmatpush.msrb.mxu0 %v4817_v11 }
0x1e95   :  { %6534 = vmatmul.msk.f32.vlgmr.msrb.gmra.mxu0 %vm785_vm5, %v4815_v29 }
0x1e96   :  { %5007 = vmatpush.msra.mxu0 %v4987_v9 }
0x1e98   :  { %5165 = vmatpush.msrb.mxu0 %v5145_v15 }
0x1e9d   :  { %6540 = vmatmul.msk.f32.vlgmr.msra.gmra.mxu0 %vm785_vm5, %v4984_v14 }
0x1e9e   :  { %5360 = vmatpush.msra.mxu0 %v5285_v60 }
0x1ea0   :  { %5361 = vmatpush.msra.mxu0 %v5284_v37 }
0x1ea2   :  { %5362 = vmatpush.msra.mxu0 %v5283_v53 }
0x1ea4   :  { %5363 = vmatpush.msra.mxu0 %v5282_v33 }
0x1ea5   :  { %6546 = vmatmul.msk.f32.vlgmr.msrb.gmra.mxu0 %vm785_vm5, %v5143_v40  ;;  %v6729_v40 = vld [vmem:[#allocation30 + $0x1] ss:$0 sm:$0xff] }
0x1ead   :  { %6553 = vmatmul.msk.f32.vlgmr.msra.gmra.mxu0 %vm706_vm4, %v8843_v54  ;;  %v5270_v54 = vld [vmem:[#allocation18 + $0x20] sm:$0xff] }
0x1eae   :  { %5315 = vmatpush.msrb.mxu2 %v5270_v54 }
0x1eb5   :  { %6554 = vmatmul.msk.f32.gmra.mxu0 %vm706_vm4, %v8859_v42 }
0x1eeb   :  { %v4760_v44 = vpop.f32.mrf.mxu2 }
0x1eec   :  { %v4681_v19 = vpop.f32.mrf.mxu0  ;;  %4847 = vrot.lane.b32.xlu0 %v4760_v44, %s7734_s29  ;;  %v6730_v44 = vld [vmem:[#allocation31 + $0x1] ss:$0 sm:$0xff] }
0x1eed   :  { %4843 = vrot.lane.b32.xlu2 %v4681_v19, %s7718_s24 }
0x1efa   :  { %v4929_v3 = vpop.f32.mrf.mxu2 }
0x1f0a   :  { %v5088_v36 = vpop.f32.mrf.mxu2 }
0x1f0b   :  { %5175 = vrot.lane.b32.xlu0 %v5088_v36, %s7734_s29 }
0x1f12   :  { %v4839_v42 = vpop.f32.mrf.mxu0 }
0x1f13   :  { %4851 = vrot.lane.b32.xlu1 %v4839_v42, %s7735_s26 }
0x1f1a   :  { %v5009_v13 = vpop.f32.mrf.mxu0 }
0x1f1b   :  { %5171 = vrot.lane.b32.xlu2 %v5009_v13, %s7718_s24 }
0x1f22   :  { %v5167_v51 = vpop.f32.mrf.mxu0 }
0x1f23   :  { %5179 = vrot.lane.b32.xlu1 %v5167_v51, %s7735_s26 }
0x1f2a   :  { %v5365_v59 = vpop.f32.mrf.mxu0 }
0x1f2b   :  { %v9247_v48 = vadd.f32 %v9244_v57, %v5365_v59 }
0x1f2d   :  { %5440 = vmatpush.msra.mxu2 %v9247_v48 }
0x1f47   :  { %v4844_v34 = vpop.permute.xlu2 %4843 }
0x1f48   :  { %v4854_v61 = vsel %vm785_vm5, %v4601_v35, %v4844_v34 }
0x1f5e   :  { %v4848_v6 = vpop.permute.xlu0 %4847 }
0x1f5f   :  { %v4855_v4 = vsel %vm1107_vm12, %v4854_v61, %v4848_v6 }
0x1f75   :  { %v5172_v45 = vpop.permute.xlu2 %5171 }
0x1f76   :  { %v5182_v20 = vsel %vm785_vm5, %v4929_v3, %v5172_v45 }
0x1f7d   :  { %v5176_v41 = vpop.permute.xlu0 %5175 }
0x1f7e   :  { %v5183_v1 = vsel %vm1107_vm12, %v5182_v20, %v5176_v41 }
0x1f85   :  { %v4852_v58 = vpop.permute.xlu1 %4851 }
0x1f86   :  { %v4856_v47 = vsel %vm1109_vm13, %v4855_v4, %v4852_v58 }
0x1f87   :  { %6547 = vmatmul.msk.f32.vlgmr.msra.gmra.mxu1 %vm706_vm4, %v4856_v47 }
0x1f95   :  { %v5180_v63 = vpop.permute.xlu1 %5179 }
0x1f96   :  { %v5184_v26 = vsel %vm1109_vm13, %v5183_v1, %v5180_v63 }
0x1f97   :  { %6548 = vmatmul.msk.f32.gmra.mxu1 %vm706_vm4, %v5184_v26 }
0x2004   :  { %v5209_v62 = vpop.f32.mrf.mxu1 }
0x2005   :  { %v5210_v17 = vadd.f32 %v6728_v5, %v5209_v62 }
0x2007   :  { %v5217_v9 = vsel %vm706_vm4, %v5210_v17, 0.0 }
0x2008   :  { %5218 = vadd.xlane.f32.xlu2 %v5217_v9 }
0x2014   :  { %v5212_v49 = vpop.f32.mrf.mxu1 }
0x2015   :  { %v5213_v10 = vadd.f32 %v6728_v5, %v5212_v49 }
0x2017   :  { %v5220_v7 = vsel %vm706_vm4, %v5213_v10, 0.0 }
0x2018   :  { %5221 = vadd.xlane.f32.xlu0 %v5220_v7 }
0x202c   :  { %5447 = vrot.lane.b32.xlu0 %v9167_v30, %s7731_s30 }
0x2034   :  { %5604 = vrot.lane.b32.xlu0 %v9167_v30, %s7733_s1 }
0x207b   :  { %v5219_v28 = vpop.xlane.xlu2 %5218 }
0x207c   :  { %v5223_v25 = vmul.f32 %v5219_v28, %v8328_v12 }
0x207e   :  { %v5225_v0 = vsub.f32 %v5210_v17, %v5223_v25 }
0x2080   :  { %v5227_v43 = vmul.f32 %v5225_v0, %v5225_v0 }
0x2082   :  { %v5229_v24 = vsel %vm706_vm4, %v5227_v43, 0.0 }
0x2083   :  { %5230 = vadd.xlane.f32.xlu1 %v5229_v24 }
0x208b   :  { %v5222_v29 = vpop.xlane.xlu0 %5221 }
0x208c   :  { %v5224_v18 = vmul.f32 %v5222_v29, %v8328_v12 }
0x208e   :  { %v5226_v11 = vsub.f32 %v5213_v10, %v5224_v18 }
0x2090   :  { %v5228_v31 = vmul.f32 %v5226_v11, %v5226_v11 }
0x2092   :  { %v5232_v8 = vsel %vm706_vm4, %v5228_v31, 0.0 }
0x2093   :  { %5233 = vadd.xlane.f32.xlu2 %v5232_v8 }
0x209e   :  { %v5448_v21 = vpop.permute.xlu0 %5447 }
0x209f   :  { %6558 = vmatpush.xpose.msk.msra.mxu3 %vm785_vm5, %v5448_v21 }
0x20a6   :  { %v5605_v15 = vpop.permute.xlu0 %5604 }
0x20a7   :  { %6564 = vmatpush.xpose.msk.msrb.mxu3 %vm785_vm5, %v5605_v15 }
0x20ab   :  { %5526 = vrot.lane.b32.xlu2 %v9167_v30, %s7732_s21 }
0x20b3   :  { %5771 = vrot.lane.b32.xlu2 %v5345_v22, %s7731_s30 }
0x20bb   :  { %5928 = vrot.lane.b32.xlu2 %v5345_v22, %s7733_s1 }
0x20f6   :  { %v5231_v23 = vpop.xlane.xlu1 %5230 }
0x20f7   :  { %v5235_v14 = vmul.f32 %v5231_v23, %v8328_v12 }
0x20f9   :  { %v5237_v56 = vadd.f32 1e-05, %v5235_v14 }
0x20fb   :  { %6930 = vrsqrt.f32 %v5237_v56  ;;  %vm5245_vm0 = vweird.f32 %v5237_v56 }
0x2101   :  { %v6931_v60 = vpop.eup %6930 }
0x2102   :  { %v5240_v32 = vmul.f32 %v6931_v60, %v5237_v56  ;;  %vm5246_vm15 = vweird.f32 %v6931_v60 }
0x2103   :  { %vm5247_vm1 = vmor %vm5245_vm0, %vm5246_vm15 }
0x2104   :  { %v5241_v37 = vmul.f32 %v6931_v60, %v5240_v32 }
0x2106   :  { %v5242_v38 = vmul.f32 0.5, %v5241_v37  ;;  %v5234_v53 = vpop.xlane.xlu2 %5233 }
0x2107   :  { %v5236_v39 = vmul.f32 %v5234_v53, %v8328_v12 }
0x2108   :  { %v5243_v30 = vsub.f32 1.5, %v5242_v38 }
0x2109   :  { %v5238_v33 = vadd.f32 1e-05, %v5236_v39 }
0x210a   :  { %v5244_v2 = vmul.f32 %v6931_v60, %v5243_v30 }
0x210b   :  { %6932 = vrsqrt.f32 %v5238_v33  ;;  %vm5255_vm7 = vweird.f32 %v5238_v33 }
0x210c   :  { %v5248_v35 = vsel %vm5247_vm1, %v6931_v60, %v5244_v2 }
0x210d   :  { %v5259_v19 = vmul.f32 %v5248_v35, %v5225_v0 }
0x210e   :  { %v5527_v3 = vpop.permute.xlu2 %5526 }
0x210f   :  { %v5262_v46 = vmul.f32 %v6729_v40, %v5259_v19  ;;  %6561 = vmatpush.xpose.msk.msra.mxu1 %vm785_vm5, %v5527_v3 }
0x2111   :  { %v6933_v50 = vpop.eup %6932  ;;  %v5265_v27 = vadd.f32 %v6730_v44, %v5262_v46 }
0x2112   :  { %v5250_v36 = vmul.f32 %v6933_v50, %v5238_v33  ;;  %vm5256_vm2 = vweird.f32 %v6933_v50 }
0x2113   :  { %v9279_v54 = vadd.f32 %v5265_v27, %v9075_v52  ;;  %vm5257_vm9 = vmor %vm5255_vm7, %vm5256_vm2  ;;  %v6731_v52 = vld [vmem:[#allocation19 + $0x1] ss:$0 sm:$0xff] }
0x2114   :  { %v5251_v42 = vmul.f32 %v6933_v50, %v5250_v36 }
0x2115   :  { %6549 = vmatmul.msk.f32.vlgmr.msrb.gmra.mxu2 %vm706_vm4, %v9279_v54 }
0x2116   :  { %v5252_v13 = vmul.f32 0.5, %v5251_v42  ;;  %v5772_v63 = vpop.permute.xlu2 %5771 }
0x2118   :  { %v5253_v51 = vsub.f32 1.5, %v5252_v13 }
0x211a   :  { %v5254_v59 = vmul.f32 %v6933_v50, %v5253_v51 }
0x211c   :  { %v5258_v34 = vsel %vm5257_vm9, %v6933_v50, %v5254_v59 }
0x211d   :  { %v5260_v6 = vmul.f32 %v5258_v34, %v5226_v11 }
0x211e   :  { %v5929_v9 = vpop.permute.xlu2 %5928 }
0x211f   :  { %v5263_v61 = vmul.f32 %v6729_v40, %v5260_v6 }
0x2121   :  { %v5266_v4 = vadd.f32 %v6730_v44, %v5263_v61 }
0x2123   :  { %v9284_v58 = vadd.f32 %v5266_v4, %v9085_v16 }
0x2125   :  { %6550 = vmatmul.msk.f32.gmra.mxu2 %vm706_vm4, %v9284_v58 }
0x2198   :  { %v5317_v47 = vpop.f32.mrf.mxu2 }
0x2199   :  { %v5318_v45 = vadd.f32 %v6731_v52, %v5317_v47 }
0x219b   :  { %v5371_v41 = vmul.f32 0.35355338, %v5318_v45 }
0x219d   :  { %5602 = vrot.lane.b32.xlu0 %v5371_v41, %s7733_s1  ;;  %5445 = vrot.lane.b32.xlu1 %v5371_v41, %s7731_s30 }
0x219e   :  { %6556 = vmatmul.msk.f32.vlgmr.msrb.gmra.mxu1 %vm785_vm5, %v5371_v41 }
0x219f   :  { %6567 = vmatpush.xpose.msk.msrb.mxu1 %vm785_vm5, %v5345_v22 }
0x21a5   :  { %5850 = vrot.lane.b32.xlu0 %v5345_v22, %s7732_s21  ;;  %5524 = vrot.lane.b32.xlu1 %v5371_v41, %s7732_s21 }
0x21a8   :  { %v5320_v16 = vpop.f32.mrf.mxu2 }
0x21a9   :  { %v5321_v20 = vadd.f32 %v6731_v52, %v5320_v16 }
0x21ab   :  { %v5695_v1 = vmul.f32 0.35355338, %v5321_v20 }
0x21ad   :  { %5926 = vrot.lane.b32.xlu0 %v5695_v1, %s7733_s1  ;;  %5769 = vrot.lane.b32.xlu1 %v5695_v1, %s7731_s30 }
0x21b5   :  { %5848 = vrot.lane.b32.xlu1 %v5695_v1, %s7732_s21 }
0x220f   :  { %v5603_v26 = vpop.permute.xlu0 %5602  ;;  %v5446_v5 = vpop.permute.xlu1 %5445 }
0x2210   :  { %6559 = vmatmul.msk.f32.vlgmr.msra.gmra.mxu3 %vm785_vm5, %v5446_v5 }
0x2211   :  { %6570 = vmatpush.xpose.msk.msra.mxu3 %vm785_vm5, %v5772_v63 }
0x2217   :  { %v5851_v62 = vpop.permute.xlu0 %5850  ;;  %v5525_v17 = vpop.permute.xlu1 %5524 }
0x2218   :  { %6562 = vmatmul.msk.f32.vlgmr.msra.gmra.mxu1 %vm785_vm5, %v5525_v17  ;;  %6565 = vmatmul.msk.f32.vlgmr.msrb.gmra.mxu3 %vm785_vm5, %v5603_v26 }
0x2219   :  { %6573 = vmatpush.xpose.msk.msra.mxu1 %vm785_vm5, %v5851_v62  ;;  %6576 = vmatpush.xpose.msk.msrb.mxu3 %vm785_vm5, %v5929_v9 }
0x221b   :  { %v5395_v49 = vpop.f32.mrf.mxu1 }
0x221c   :  { %v5398_v10 = vsel %vm785_vm5, %v5395_v49, -inf }
0x221d   :  { %5399 = vmax.xlane.f32.xlu2 %v5398_v10 }
0x221f   :  { %v5770_v7 = vpop.permute.xlu1 %5769  ;;  %v5927_v28 = vpop.permute.xlu0 %5926 }
0x2220   :  { %6568 = vmatmul.msk.f32.vlgmr.msrb.gmra.mxu1 %vm785_vm5, %v5695_v1  ;;  %6571 = vmatmul.msk.f32.vlgmr.msra.gmra.mxu3 %vm785_vm5, %v5770_v7 }
0x2227   :  { %v5849_v25 = vpop.permute.xlu1 %5848 }
0x2228   :  { %6574 = vmatmul.msk.f32.vlgmr.msra.gmra.mxu1 %vm785_vm5, %v5849_v25  ;;  %6577 = vmatmul.msk.f32.vlgmr.msrb.gmra.mxu3 %vm785_vm5, %v5927_v28 }
0x2290   :  { %v5400_v0 = vpop.xlane.xlu2 %5399 }
0x2291   :  { %v5401_v43 = vsub.f32 %v5395_v49, %v5400_v0 }
0x2293   :  { %v5402_v24 = vmul.f32 1.442695, %v5401_v43  ;;  %v5470_v29 = vpop.f32.mrf.mxu3 }
0x2294   :  { %v5473_v18 = vsel %vm785_vm5, %v5470_v29, -inf }
0x2295   :  { %6934 = vpow2.f32 %v5402_v24  ;;  %5474 = vmax.xlane.f32.xlu1 %v5473_v18  ;;  %v5549_v11 = vpop.f32.mrf.mxu1 }
0x2296   :  { %v5552_v31 = vsel %vm785_vm5, %v5549_v11, -inf }
0x2297   :  { %5553 = vmax.xlane.f32.xlu0 %v5552_v31 }
0x229b   :  { %v9310_v8 = vpop.eup %6934  ;;  %v5627_v21 = vpop.f32.mrf.mxu3 }
0x229c   :  { %v5630_v15 = vsel %vm785_vm5, %v5627_v21, -inf  ;;  %v5404_v23 = vsel %vm785_vm5, %v9310_v8, 0.0 }
0x229d   :  { %5631 = vmax.xlane.f32.xlu2 %v5630_v15  ;;  %v5719_v55 = vpop.f32.mrf.mxu1 }
0x229e   :  { %v5722_v22 = vsel %vm785_vm5, %v5719_v55, -inf }
0x229f   :  { %5723 = vmax.xlane.f32.xlu1 %v5722_v22  ;;  %5405 = vadd.xlane.f32.xlu0 %v5404_v23 }
0x22a3   :  { %v5794_v14 = vpop.f32.mrf.mxu3 }
0x22a4   :  { %v5797_v32 = vsel %vm785_vm5, %v5794_v14, -inf }
0x22a5   :  { %v5873_v56 = vpop.f32.mrf.mxu1 }
0x22a6   :  { %v5876_v60 = vsel %vm785_vm5, %v5873_v56, -inf }
0x22a7   :  { %5877 = vmax.xlane.f32.xlu2 %v5876_v60  ;;  %5798 = vmax.xlane.f32.xlu0 %v5797_v32 }
0x22ab   :  { %v5951_v37 = vpop.f32.mrf.mxu3 }
0x22ac   :  { %v5954_v38 = vsel %vm785_vm5, %v5951_v37, -inf }
0x22ad   :  { %5955 = vmax.xlane.f32.xlu1 %v5954_v38 }
0x22bf   :  { %5498 = vrot.lane.b32.xlu2 %v9247_v48, %s7731_s30 }
0x22c6   :  { %5576 = vrot.lane.b32.xlu1 %v9247_v48, %s7732_s21 }
0x2308   :  { %v5475_v53 = vpop.xlane.xlu1 %5474 }
0x2309   :  { %v5476_v39 = vsub.f32 %v5470_v29, %v5475_v53 }
0x230a   :  { %v5554_v30 = vpop.xlane.xlu0 %5553 }
0x230b   :  { %v5477_v33 = vmul.f32 1.442695, %v5476_v39  ;;  %v5555_v2 = vsub.f32 %v5549_v11, %v5554_v30 }
0x230d   :  { %6936 = vpow2.f32 %v5477_v33  ;;  %v5556_v40 = vmul.f32 1.442695, %v5555_v2 }
0x230f   :  { %6938 = vpow2.f32 %v5556_v40 }
0x2310   :  { %v5632_v35 = vpop.xlane.xlu2 %5631 }
0x2311   :  { %v5633_v44 = vsub.f32 %v5627_v21, %v5632_v35  ;;  %v5368_v21 = vpop.f32.mrf.mxu0 }
0x2312   :  { %v5724_v19 = vpop.xlane.xlu1 %5723  ;;  %v5406_v3 = vpop.xlane.xlu0 %5405  ;;  %v5369_v15 = vadd.f32 %v9244_v57, %v5368_v21 }
0x2313   :  { %v9323_v46 = vpop.eup %6936  ;;  %v5634_v50 = vmul.f32 1.442695, %v5633_v44  ;;  %v5725_v27 = vsub.f32 %v5719_v55, %v5724_v19  ;;  %6940 = vrcp.f32 %v5406_v3  ;;  %v5418_v20 = vand.u32 2147483648, %v5406_v3 }
0x2314   :  { %v5479_v36 = vsel %vm785_vm5, %v9323_v46, 0.0  ;;  %v5416_v5 = vand.u32 2147483647, %v5406_v3  ;;  %vm5412_vm11 = vweird.f32 %v5406_v3 }
0x2315   :  { %v9327_v42 = vpop.eup %6938  ;;  %6942 = vpow2.f32 %v5634_v50  ;;  %v5726_v13 = vmul.f32 1.442695, %v5725_v27  ;;  %5480 = vadd.xlane.f32.xlu2 %v5479_v36  ;;  %v5419_v49 = vor.u32 1.1754944e-38, %v5418_v20 }
0x2316   :  { %v5558_v51 = vsel %vm785_vm5, %v9327_v42, 0.0  ;;  %vm5417_vm14 = vcmp.eq.f32.partialorder %v5416_v5, 8.507059e+37 }
0x2317   :  { %6944 = vpow2.f32 %v5726_v13  ;;  %5559 = vadd.xlane.f32.xlu1 %v5558_v51 }
0x2319   :  { %v6941_v59 = vpop.eup %6940 }
0x231a   :  { %v5408_v34 = vmul.f32 %v6941_v59, %v5406_v3  ;;  %v5799_v6 = vpop.xlane.xlu0 %5798  ;;  %v5878_v61 = vpop.xlane.xlu2 %5877  ;;  %vm5413_vm10 = vweird.f32 %v6941_v59 }
0x231b   :  { %v9331_v4 = vpop.eup %6942  ;;  %v5800_v52 = vsub.f32 %v5794_v14, %v5799_v6  ;;  %v5879_v47 = vsub.f32 %v5873_v56, %v5878_v61  ;;  %vm5414_vm6 = vmor %vm5412_vm11, %vm5413_vm10 }
0x231c   :  { %v5409_v45 = vsub.f32 1.0, %v5408_v34  ;;  %v5636_v41 = vsel %vm785_vm5, %v9331_v4, 0.0 }
0x231d   :  { %v9335_v16 = vpop.eup %6944  ;;  %v5801_v1 = vmul.f32 1.442695, %v5800_v52  ;;  %v5880_v63 = vmul.f32 1.442695, %v5879_v47  ;;  %5637 = vadd.xlane.f32.xlu0 %v5636_v41 }
0x231e   :  { %v5410_v26 = vmul.f32 %v6941_v59, %v5409_v45  ;;  %v5728_v62 = vsel %vm785_vm5, %v9335_v16, 0.0 }
0x231f   :  { %6946 = vpow2.f32 %v5801_v1  ;;  %5729 = vadd.xlane.f32.xlu2 %v5728_v62 }
0x2320   :  { %v5411_v17 = vadd.f32 %v6941_v59, %v5410_v26  ;;  %6948 = vpow2.f32 %v5880_v63  ;;  %v5956_v9 = vpop.xlane.xlu1 %5955 }
0x2321   :  { %v5957_v10 = vsub.f32 %v5951_v37, %v5956_v9 }
0x2322   :  { %v5415_v7 = vsel %vm5414_vm6, %v6941_v59, %v5411_v17  ;;  %v5499_v28 = vpop.permute.xlu2 %5498 }
0x2323   :  { %v5420_v25 = vsel %vm5417_vm14, %v5419_v49, %v5415_v7  ;;  %v5958_v0 = vmul.f32 1.442695, %v5957_v10  ;;  %5519 = vmatpush.msrb.mxu0 %v5499_v28 }
0x2324   :  { %v5421_v43 = vmul.f32 %v9310_v8, %v5420_v25 }
0x2325   :  { %v9340_v24 = vpop.eup %6946  ;;  %6950 = vpow2.f32 %v5958_v0 }
0x2326   :  { %v9342_v29 = vpop.eup %6948  ;;  %6557 = vmatmul.msk.f32.vlgmr.msra.gmra.mxu2 %vm785_vm5, %v5421_v43  ;;  %v5803_v18 = vsel %vm785_vm5, %v9340_v24, 0.0 }
0x2327   :  { %5804 = vadd.xlane.f32.xlu1 %v5803_v18  ;;  %v5882_v11 = vsel %vm785_vm5, %v9342_v29, 0.0 }
0x2328   :  { %5883 = vadd.xlane.f32.xlu0 %v5882_v11 }
0x232b   :  { %v9349_v31 = vpop.eup %6950 }
0x232c   :  { %v5960_v8 = vsel %vm785_vm5, %v9349_v31, 0.0 }
0x2330   :  { %5961 = vadd.xlane.f32.xlu0 %v5960_v8 }
0x2337   :  { %5822 = vrot.lane.b32.xlu2 %v5369_v15, %s7731_s30 }
0x2338   :  { %v5577_v55 = vpop.permute.xlu1 %5576 }
0x2339   :  { %5597 = vmatpush.msrb.mxu2 %v5577_v55 }
0x233b   :  { %5764 = vmatpush.msra.mxu2 %v5369_v15 }
0x233f   :  { %5978 = vrot.lane.b32.xlu2 %v5369_v15, %s7733_s1 }
0x2340   :  { %5900 = vrot.lane.b32.xlu1 %v5369_v15, %s7732_s21 }
0x2344   :  { %5654 = vrot.lane.b32.xlu0 %v9247_v48, %s7733_s1 }
0x2388   :  { %v5481_v22 = vpop.xlane.xlu2 %5480 }
0x2389   :  { %6952 = vrcp.f32 %v5481_v22  ;;  %v5493_v38 = vand.u32 2147483648, %v5481_v22  ;;  %v5491_v30 = vand.u32 2147483647, %v5481_v22  ;;  %vm5487_vm0 = vweird.f32 %v5481_v22 }
0x238a   :  { %v5560_v23 = vpop.xlane.xlu1 %5559 }
0x238b   :  { %6954 = vrcp.f32 %v5560_v23  ;;  %v5572_v48 = vand.u32 2147483648, %v5560_v23  ;;  %v5570_v35 = vand.u32 2147483647, %v5560_v23  ;;  %v5494_v44 = vor.u32 1.1754944e-38, %v5493_v38 }
0x238c   :  { %vm5492_vm7 = vcmp.eq.f32.partialorder %v5491_v30, 8.507059e+37  ;;  %vm5566_vm9 = vweird.f32 %v5560_v23 }
0x238d   :  { %v5573_v36 = vor.u32 1.1754944e-38, %v5572_v48  ;;  %vm5571_vm11 = vcmp.eq.f32.partialorder %v5570_v35, 8.507059e+37 }
0x238f   :  { %v6953_v14 = vpop.eup %6952 }
0x2390   :  { %v5483_v56 = vmul.f32 %v6953_v14, %v5481_v22  ;;  %v9359_v53 = vpop.xlane.xlu0 %5637  ;;  %vm5488_vm15 = vweird.f32 %v6953_v14 }
0x2391   :  { %v6955_v60 = vpop.eup %6954  ;;  %vm5489_vm2 = vmor %vm5487_vm0, %vm5488_vm15  ;;  %v5650_v22 = vand.u32 2147483648, %v9359_v53 }
0x2392   :  { %v5484_v57 = vsub.f32 1.0, %v5483_v56  ;;  %v5562_v32 = vmul.f32 %v6955_v60, %v5560_v23  ;;  %v5730_v37 = vpop.xlane.xlu2 %5729  ;;  %vm5567_vm1 = vweird.f32 %v6955_v60 }
0x2393   :  { %6956 = vrcp.f32 %v5730_v37  ;;  %vm5568_vm10 = vmor %vm5566_vm9, %vm5567_vm1  ;;  %v5742_v41 = vand.u32 2147483648, %v5730_v37  ;;  %v5740_v1 = vand.u32 2147483647, %v5730_v37  ;;  %vm5736_vm14 = vweird.f32 %v5730_v37 }
0x2394   :  { %v5485_v39 = vmul.f32 %v6953_v14, %v5484_v57  ;;  %v5563_v33 = vsub.f32 1.0, %v5562_v32  ;;  %6958 = vrcp.f32 %v9359_v53  ;;  %v5651_v38 = vor.u32 1.1754944e-38, %v5650_v22 }
0x2395   :  { %vm5741_vm0 = vcmp.eq.f32.partialorder %v5740_v1, 8.507059e+37 }
0x2396   :  { %v5486_v2 = vadd.f32 %v6953_v14, %v5485_v39  ;;  %v5564_v40 = vmul.f32 %v6955_v60, %v5563_v33 }
0x2398   :  { %v5490_v19 = vsel %vm5489_vm2, %v6953_v14, %v5486_v2  ;;  %v5565_v3 = vadd.f32 %v6955_v60, %v5564_v40  ;;  %v5648_v14 = vand.u32 2147483647, %v9359_v53 }
0x2399   :  { %v6957_v50 = vpop.eup %6956  ;;  %v5495_v27 = vsel %vm5492_vm7, %v5494_v44, %v5490_v19 }
0x239a   :  { %v5496_v13 = vmul.f32 %v9323_v46, %v5495_v27  ;;  %v5569_v51 = vsel %vm5568_vm10, %v6955_v60, %v5565_v3  ;;  %v5732_v59 = vmul.f32 %v6957_v50, %v5730_v37  ;;  %v9364_v47 = vpop.xlane.xlu1 %5804  ;;  %v6959_v45 = vpop.eup %6958  ;;  %vm5737_vm6 = vweird.f32 %v6957_v50 }
0x239b   :  { %v5574_v34 = vsel %vm5571_vm11, %v5573_v36, %v5569_v51  ;;  %v5884_v6 = vpop.xlane.xlu0 %5883  ;;  %v5640_v46 = vmul.f32 %v6959_v45, %v9359_v53  ;;  %vm5738_vm15 = vmor %vm5736_vm14, %vm5737_vm6  ;;  %vm5645_vm9 = vweird.f32 %v6959_v45  ;;  %vm5644_vm10 = vweird.f32 %v9359_v53  ;;  %v5823_v60 = vpop.permute.xlu2 %5822 }
0x239c   :  { %v5575_v61 = vmul.f32 %v9327_v42, %v5574_v34  ;;  %v5733_v52 = vsub.f32 1.0, %v5732_v59  ;;  %6560 = vmatmul.msk.f32.vlgmr.msrb.gmra.mxu0 %vm785_vm5, %v5496_v13  ;;  %6960 = vrcp.f32 %v5884_v6  ;;  %v5743_v42 = vor.u32 1.1754944e-38, %v5742_v41  ;;  %vm5646_vm6 = vmor %vm5644_vm10, %vm5645_vm9 }
0x239d   :  { %6962 = vrcp.f32 %v9364_v47  ;;  %v5641_v17 = vsub.f32 1.0, %v5640_v46  ;;  %v5896_v18 = vand.u32 2147483648, %v5884_v6  ;;  %vm5890_vm2 = vweird.f32 %v5884_v6  ;;  %v5291_v46 = vld [vmem:[#allocation27 + $0x38] sm:$0xff] }
0x239e   :  { %v5734_v20 = vmul.f32 %v6957_v50, %v5733_v52  ;;  %6563 = vmatmul.msk.f32.vlgmr.msrb.gmra.mxu2 %vm785_vm5, %v5575_v61  ;;  %v5894_v8 = vand.u32 2147483647, %v5884_v6  ;;  %vm5649_vm14 = vcmp.eq.f32.partialorder %v5648_v14, 8.507059e+37  ;;  %v5817_v53 = vand.u32 2147483648, %v9364_v47  ;;  %6038 = vmatpush.msrb.mxu1 %v5291_v46 }
0x239f   :  { %v5642_v25 = vmul.f32 %v6959_v45, %v5641_v17  ;;  %v5897_v23 = vor.u32 1.1754944e-38, %v5896_v18  ;;  %v5815_v35 = vand.u32 2147483647, %v9364_v47 }
0x23a0   :  { %v5735_v63 = vadd.f32 %v6957_v50, %v5734_v20  ;;  %vm5895_vm11 = vcmp.eq.f32.partialorder %v5894_v8, 8.507059e+37  ;;  %v5818_v3 = vor.u32 1.1754944e-38, %v5817_v53 }
0x23a2   :  { %v5739_v26 = vsel %vm5738_vm15, %v6957_v50, %v5735_v63  ;;  %v6961_v5 = vpop.eup %6960  ;;  %v5290_v63 = vld [vmem:[#allocation27 + $0x30] sm:$0xff] }
0x23a3   :  { %v5744_v62 = vsel %vm5741_vm0, %v5743_v42, %v5739_v26  ;;  %v5886_v49 = vmul.f32 %v6961_v5, %v5884_v6  ;;  %v9371_v10 = vpop.xlane.xlu0 %5961  ;;  %v6963_v7 = vpop.eup %6962  ;;  %vm5891_vm1 = vweird.f32 %v6961_v5  ;;  %vm5811_vm0 = vweird.f32 %v9364_v47  ;;  %v5289_v42 = vld [vmem:[#allocation27 + $0x28] sm:$0xff]  ;;  %6039 = vmatpush.msrb.mxu1 %v5290_v63  ;;  %v5288_v26 = vld [vmem:[#allocation27 + $0x20] sm:$0xff] }
0x23a4   :  { %v5745_v9 = vmul.f32 %v9335_v16, %v5744_v62  ;;  %6964 = vrcp.f32 %v9371_v10  ;;  %v5807_v0 = vmul.f32 %v6963_v7, %v9364_v47  ;;  %vm5892_vm7 = vmor %vm5890_vm2, %vm5891_vm1  ;;  %v5643_v16 = vadd.f32 %v6959_v45, %v5642_v25  ;;  %v5979_v50 = vpop.permute.xlu2 %5978 }
0x23a5   :  { %v5887_v28 = vsub.f32 1.0, %v5886_v49  ;;  %vm5812_vm15 = vweird.f32 %v6963_v7  ;;  %vm5816_vm2 = vcmp.eq.f32.partialorder %v5815_v35, 8.507059e+37  ;;  %vm5968_vm9 = vweird.f32 %v9371_v10  ;;  %6040 = vmatpush.msrb.mxu1 %v5289_v42 }
0x23a6   :  { %6569 = vmatmul.msk.f32.vlgmr.msra.gmra.mxu2 %vm785_vm5, %v5745_v9  ;;  %v5808_v21 = vsub.f32 1.0, %v5807_v0  ;;  %v5647_v57 = vsel %vm5646_vm6, %v6959_v45, %v5643_v16  ;;  %vm5813_vm1 = vmor %vm5811_vm0, %vm5812_vm15  ;;  %v5972_v51 = vand.u32 2147483647, %v9371_v10 }
0x23a7   :  { %v5888_v43 = vmul.f32 %v6961_v5, %v5887_v28  ;;  %v5652_v33 = vsel %vm5649_vm14, %v5651_v38, %v5647_v57  ;;  %6041 = vmatpush.msrb.mxu1 %v5288_v26 }
0x23a8   :  { %v5809_v32 = vmul.f32 %v6963_v7, %v5808_v21  ;;  %v5653_v40 = vmul.f32 %v9331_v4, %v5652_v33  ;;  %v5974_v4 = vand.u32 2147483648, %v9371_v10  ;;  %v6107_v33 = vld [vmem:[#allocation39 + $0x38] sm:$0xff] }
0x23a9   :  { %v5889_v11 = vadd.f32 %v6961_v5, %v5888_v43  ;;  %v5442_v52 = vpop.f32.mrf.mxu2 }
0x23aa   :  { %v6965_v55 = vpop.eup %6964  ;;  %v5810_v48 = vadd.f32 %v6963_v7, %v5809_v32  ;;  %v5975_v34 = vor.u32 1.1754944e-38, %v5974_v4  ;;  %v6733_v4 = vld [vmem:[#allocation33 + $0x1] ss:$0 sm:$0xff] }
0x23ab   :  { %v5893_v15 = vsel %vm5892_vm7, %v6961_v5, %v5889_v11  ;;  %v5964_v37 = vmul.f32 %v6965_v55, %v9371_v10  ;;  %vm5969_vm7 = vweird.f32 %v6965_v55  ;;  %v6732_v11 = vld [vmem:[#allocation28 + $0x1] ss:$0 sm:$0xff] }
0x23ac   :  { %v5898_v56 = vsel %vm5895_vm11, %v5897_v23, %v5893_v15  ;;  %vm5970_vm10 = vmor %vm5968_vm9, %vm5969_vm7  ;;  %vm5973_vm11 = vcmp.eq.f32.partialorder %v5972_v51, 8.507059e+37  ;;  %v6734_v51 = vld [vmem:[#allocation34 + $0x1] ss:$0 sm:$0xff] }
0x23ad   :  { %v5899_v39 = vmul.f32 %v9342_v29, %v5898_v56  ;;  %v5965_v2 = vsub.f32 1.0, %v5964_v37  ;;  %v5814_v29 = vsel %vm5813_vm1, %v6963_v7, %v5810_v48  ;;  %v6106_v48 = vld [vmem:[#allocation39 + $0x30] sm:$0xff] }
0x23ae   :  { %v5819_v27 = vsel %vm5816_vm2, %v5818_v3, %v5814_v29 }
0x23af   :  { %v5966_v19 = vmul.f32 %v6965_v55, %v5965_v2  ;;  %v5820_v13 = vmul.f32 %v9340_v24, %v5819_v27  ;;  %v6105_v2 = vld [vmem:[#allocation39 + $0x28] sm:$0xff] }
0x23b1   :  { %v5967_v36 = vadd.f32 %v6965_v55, %v5966_v19 }
0x23b2   :  { %v5901_v30 = vpop.permute.xlu1 %5900 }
0x23b3   :  { %5921 = vmatpush.msrb.mxu2 %v5901_v30  ;;  %v5971_v59 = vsel %vm5970_vm10, %v6965_v55, %v5967_v36 }
0x23b4   :  { %6575 = vmatmul.msk.f32.vlgmr.msrb.gmra.mxu2 %vm785_vm5, %v5899_v39  ;;  %v5976_v6 = vsel %vm5973_vm11, %v5975_v34, %v5971_v59 }
0x23b5   :  { %v5977_v61 = vmul.f32 %v9349_v31, %v5976_v6  ;;  %6138 = vmatpush.msra.mxu2 %v6107_v33 }
0x23b6   :  { %v5655_v44 = vpop.permute.xlu0 %5654 }
0x23b7   :  { %5675 = vmatpush.msra.mxu0 %v5655_v44  ;;  %6139 = vmatpush.msra.mxu2 %v6106_v48 }
0x23b8   :  { %6566 = vmatmul.msk.f32.vlgmr.msra.gmra.mxu0 %vm785_vm5, %v5653_v40  ;;  %v6104_v40 = vld [vmem:[#allocation39 + $0x20] sm:$0xff] }
0x23b9   :  { %5843 = vmatpush.msrb.mxu0 %v5823_v60  ;;  %6140 = vmatpush.msra.mxu2 %v6105_v2 }
0x23bb   :  { %5999 = vmatpush.msra.mxu0 %v5979_v50  ;;  %6141 = vmatpush.msra.mxu2 %v6104_v40 }
0x23c0   :  { %6572 = vmatmul.msk.f32.vlgmr.msrb.gmra.mxu0 %vm785_vm5, %v5820_v13 }
0x23c8   :  { %6578 = vmatmul.msk.f32.vlgmr.msra.gmra.mxu0 %vm785_vm5, %v5977_v61  ;;  %v6588_v61 = vld [vmem:[%s7990_s9 + $0x78] sm:$0xff] }
0x23c9   :  { %6166 = vmatpush.msra.mxu3 %v6588_v61 }
0x2419   :  { %v5521_v47 = vpop.f32.mrf.mxu0 }
0x241a   :  { %5681 = vrot.lane.b32.xlu0 %v5521_v47, %s7718_s24 }
0x2421   :  { %v5599_v24 = vpop.f32.mrf.mxu2 }
0x2422   :  { %5685 = vrot.lane.b32.xlu1 %v5599_v24, %s7734_s29 }
0x2429   :  { %v5766_v45 = vpop.f32.mrf.mxu2 }
0x2435   :  { %v5677_v41 = vpop.f32.mrf.mxu0 }
0x2436   :  { %5689 = vrot.lane.b32.xlu2 %v5677_v41, %s7735_s26  ;;  %v6586_v41 = vld [vmem:[%s7990_s9 + $0x68] sm:$0xff] }
0x2437   :  { %v5923_v20 = vpop.f32.mrf.mxu2 }
0x2438   :  { %6009 = vrot.lane.b32.xlu1 %v5923_v20, %s7734_s29 }
0x243d   :  { %v5845_v1 = vpop.f32.mrf.mxu0 }
0x243e   :  { %6005 = vrot.lane.b32.xlu0 %v5845_v1, %s7718_s24  ;;  %v6585_v1 = vld [vmem:[%s7990_s9 + $0x60] sm:$0xff]  ;;  %s9562_s24 = sld [smem:[#allocation65_spill]] }
0x2445   :  { %v6001_v31 = vpop.f32.mrf.mxu0 }
0x2446   :  { %6013 = vrot.lane.b32.xlu2 %v6001_v31, %s7735_s26  ;;  %v6584_v31 = vld [vmem:[%s7990_s9 + $0x58] sm:$0xff] }
0x248c   :  { %v5682_v5 = vpop.permute.xlu0 %5681 }
0x248d   :  { %v5692_v62 = vsel %vm785_vm5, %v5442_v52, %v5682_v5  ;;  %v6587_v52 = vld [vmem:[%s7990_s9 + $0x70] sm:$0xff] }
0x248e   :  { %6167 = vmatpush.msra.mxu3 %v6587_v52 }
0x2490   :  { %v5690_v9 = vpop.permute.xlu2 %5689  ;;  %6168 = vmatpush.msra.mxu3 %v6586_v41 }
0x2492   :  { %6169 = vmatpush.msra.mxu3 %v6585_v1 }
0x2494   :  { %v5686_v17 = vpop.permute.xlu1 %5685  ;;  %6170 = vmatpush.msra.mxu3 %v6584_v31 }
0x2495   :  { %v5693_v49 = vsel %vm1107_vm12, %v5692_v62, %v5686_v17 }
0x2496   :  { %v5694_v10 = vsel %vm1109_vm13, %v5693_v49, %v5690_v9 }
0x2497   :  { %6579 = vmatmul.msk.f32.vlgmr.msrb.gmra.mxu1 %vm706_vm4, %v5694_v10 }
0x24a0   :  { %v6014_v0 = vpop.permute.xlu2 %6013 }
0x24aa   :  { %v6010_v28 = vpop.permute.xlu1 %6009 }
0x24b0   :  { %v6006_v7 = vpop.permute.xlu0 %6005 }
0x24b1   :  { %v6016_v25 = vsel %vm785_vm5, %v5766_v45, %v6006_v7  ;;  %v6583_v7 = vld [vmem:[%s7990_s9 + $0x50] sm:$0xff] }
0x24b2   :  { %v6017_v43 = vsel %vm1107_vm12, %v6016_v25, %v6010_v28  ;;  %6171 = vmatpush.msra.mxu3 %v6583_v7  ;;  %v6582_v28 = vld [vmem:[%s7990_s9 + $0x48] sm:$0xff]  ;;  %v6581_v25 = vld [vmem:[%s7990_s9 + $0x40] sm:$0xff]  ;;  %s9561_s9 = sld [smem:[#allocation64_spill]] }
0x24b3   :  { %v6018_v18 = vsel %vm1109_vm13, %v6017_v43, %v6014_v0  ;;  %v6735_v0 = vld [vmem:[#allocation40 + $0x1] ss:$0 sm:$0xff] }
0x24b4   :  { %6580 = vmatmul.msk.f32.gmra.mxu1 %vm706_vm4, %v6018_v18  ;;  %6172 = vmatpush.msra.mxu3 %v6582_v28 }
0x24b6   :  { %6173 = vmatpush.msra.mxu3 %v6581_v25 }
0x24b8   :  { %v6237_v40 = vld [vmem:[%s9561_s9 + $0x10] sm:$0xff] }
0x2514   :  { %v6043_v8 = vpop.f32.mrf.mxu1 }
0x2515   :  { %v6044_v16 = vadd.f32 %v6732_v11, %v6043_v8 }
0x2517   :  { %v6051_v21 = vsel %vm706_vm4, %v6044_v16, 0.0 }
0x2518   :  { %6052 = vadd.xlane.f32.xlu0 %v6051_v21 }
0x2531   :  { %v6046_v15 = vpop.f32.mrf.mxu1 }
0x2532   :  { %v6047_v55 = vadd.f32 %v6732_v11, %v6046_v15 }
0x2534   :  { %v6054_v22 = vsel %vm706_vm4, %v6047_v55, 0.0 }
0x2535   :  { %6055 = vadd.xlane.f32.xlu1 %v6054_v22 }
0x258b   :  { %v6053_v23 = vpop.xlane.xlu0 %6052 }
0x258c   :  { %v6057_v14 = vmul.f32 %v6053_v23, %v8328_v12 }
0x258e   :  { %v6059_v56 = vsub.f32 %v6044_v16, %v6057_v14 }
0x2590   :  { %v6061_v60 = vmul.f32 %v6059_v56, %v6059_v56 }
0x2592   :  { %v6063_v57 = vsel %vm706_vm4, %v6061_v60, 0.0 }
0x2593   :  { %6064 = vadd.xlane.f32.xlu2 %v6063_v57 }
0x25a8   :  { %v6056_v32 = vpop.xlane.xlu1 %6055 }
0x25a9   :  { %v6058_v37 = vmul.f32 %v6056_v32, %v8328_v12 }
0x25ab   :  { %v6060_v38 = vsub.f32 %v6047_v55, %v6058_v37 }
0x25ad   :  { %v6062_v39 = vmul.f32 %v6060_v38, %v6060_v38 }
0x25af   :  { %v6066_v30 = vsel %vm706_vm4, %v6062_v39, 0.0 }
0x25b0   :  { %6067 = vadd.xlane.f32.xlu0 %v6066_v30 }
0x2606   :  { %v6065_v53 = vpop.xlane.xlu2 %6064 }
0x2607   :  { %v6069_v35 = vmul.f32 %v6065_v53, %v8328_v12  ;;  %v6238_v53 = vld [vmem:[%s9561_s9 + $0x18] sm:$0xff] }
0x2608   :  { %6261 = vmatpush.msrb.mxu0 %v6238_v53 }
0x2609   :  { %v6071_v44 = vadd.f32 1e-05, %v6069_v35  ;;  %v6236_v35 = vld [vmem:[%s9561_s9 + $0x8] sm:$0xff] }
0x260a   :  { %6262 = vmatpush.msrb.mxu0 %v6237_v40 }
0x260b   :  { %6966 = vrsqrt.f32 %v6071_v44  ;;  %vm6079_vm12 = vweird.f32 %v6071_v44 }
0x260c   :  { %6263 = vmatpush.msrb.mxu0 %v6236_v35 }
0x2611   :  { %v6967_v29 = vpop.eup %6966 }
0x2612   :  { %v6074_v19 = vmul.f32 %v6967_v29, %v6071_v44  ;;  %vm6080_vm5 = vweird.f32 %v6967_v29 }
0x2613   :  { %vm6081_vm13 = vmor %vm6079_vm12, %vm6080_vm5 }
0x2614   :  { %v6075_v3 = vmul.f32 %v6967_v29, %v6074_v19 }
0x2616   :  { %v6076_v50 = vmul.f32 0.5, %v6075_v3 }
0x2618   :  { %v6077_v27 = vsub.f32 1.5, %v6076_v50 }
0x261a   :  { %v6078_v36 = vmul.f32 %v6967_v29, %v6077_v27 }
0x261c   :  { %v6082_v13 = vsel %vm6081_vm13, %v6967_v29, %v6078_v36  ;;  %v6235_v29 = vld [vmem:[%s9561_s9] sm:$0xff] }
0x261d   :  { %v6093_v59 = vmul.f32 %v6082_v13, %v6059_v56  ;;  %6264 = vmatpush.msrb.mxu0 %v6235_v29 }
0x261f   :  { %v6096_v34 = vmul.f32 %v6733_v4, %v6093_v59  ;;  %v6737_v59 = vld [vmem:[#allocation36 + $0x1] ss:$0 sm:$0xff] }
0x2621   :  { %v6099_v6 = vadd.f32 %v6734_v51, %v6096_v34 }
0x2623   :  { %v9418_v47 = vadd.f32 %v6099_v6, %v9279_v54  ;;  %v6068_v24 = vpop.xlane.xlu0 %6067  ;;  %v6738_v6 = vld [vmem:[#allocation37 + $0x1] ss:$0 sm:$0xff] }
0x2624   :  { %v6070_v45 = vmul.f32 %v6068_v24, %v8328_v12 }
0x2625   :  { %6589 = vmatmul.msk.f32.vlgmr.msra.gmra.mxu2 %vm706_vm4, %v9418_v47 }
0x2626   :  { %v6072_v20 = vadd.f32 1e-05, %v6070_v45 }
0x2628   :  { %6968 = vrsqrt.f32 %v6072_v20  ;;  %vm6089_vm14 = vweird.f32 %v6072_v20 }
0x262e   :  { %v6969_v46 = vpop.eup %6968 }
0x262f   :  { %v6084_v54 = vmul.f32 %v6969_v46, %v6072_v20  ;;  %vm6090_vm6 = vweird.f32 %v6969_v46 }
0x2630   :  { %vm6091_vm15 = vmor %vm6089_vm14, %vm6090_vm6 }
0x2631   :  { %v6085_v63 = vmul.f32 %v6969_v46, %v6084_v54 }
0x2633   :  { %v6086_v42 = vmul.f32 0.5, %v6085_v63 }
0x2635   :  { %v6087_v26 = vsub.f32 1.5, %v6086_v42 }
0x2637   :  { %v6088_v5 = vmul.f32 %v6969_v46, %v6087_v26 }
0x2639   :  { %v6092_v62 = vsel %vm6091_vm15, %v6969_v46, %v6088_v5 }
0x263a   :  { %v6094_v17 = vmul.f32 %v6092_v62, %v6060_v38 }
0x263c   :  { %v6097_v9 = vmul.f32 %v6733_v4, %v6094_v17 }
0x263e   :  { %v6100_v49 = vadd.f32 %v6734_v51, %v6097_v9  ;;  %v6739_v9 = vld [vmem:[%s9562_s24] ss:$0 sm:$0xff] }
0x2640   :  { %v9427_v10 = vadd.f32 %v6100_v49, %v9284_v58  ;;  %v6736_v58 = vld [vmem:[#allocation42 + $0x1] ss:$0 sm:$0xff] }
0x2642   :  { %6590 = vmatmul.msk.f32.gmra.mxu2 %vm706_vm4, %v9427_v10 }
0x26a8   :  { %v6143_v43 = vpop.f32.mrf.mxu2 }
0x26a9   :  { %v6144_v18 = vadd.f32 %v6735_v0, %v6143_v43 }
0x26ab   :  { %v6149_v11 = vmax.f32 %v6144_v18, 0.0 }
0x26ad   :  { %6591 = vmatmul.msk.f32.vlgmr.msra.gmra.mxu3 %vm1573_vm8, %v6149_v11 }
0x26c5   :  { %v6146_v8 = vpop.f32.mrf.mxu2 }
0x26c6   :  { %v6147_v16 = vadd.f32 %v6735_v0, %v6146_v8 }
0x26c8   :  { %v6150_v21 = vmax.f32 %v6147_v16, 0.0 }
0x26ca   :  { %6592 = vmatmul.msk.f32.gmra.mxu3 %vm1573_vm8, %v6150_v21 }
0x2730   :  { %v6175_v15 = vpop.f32.mrf.mxu3 }
0x2731   :  { %v6176_v55 = vadd.f32 %v6736_v58, %v6175_v15 }
0x2733   :  { %v6183_v22 = vsel %vm706_vm4, %v6176_v55, 0.0 }
0x2734   :  { %6184 = vadd.xlane.f32.xlu1 %v6183_v22 }
0x274d   :  { %v6178_v23 = vpop.f32.mrf.mxu3 }
0x274e   :  { %v6179_v14 = vadd.f32 %v6736_v58, %v6178_v23 }
0x2750   :  { %v6186_v56 = vsel %vm706_vm4, %v6179_v14, 0.0 }
0x2751   :  { %6187 = vadd.xlane.f32.xlu2 %v6186_v56 }
0x27a7   :  { %v6185_v60 = vpop.xlane.xlu1 %6184 }
0x27a8   :  { %v6189_v57 = vmul.f32 %v6185_v60, %v8328_v12 }
0x27aa   :  { %v6191_v32 = vsub.f32 %v6176_v55, %v6189_v57 }
0x27ac   :  { %v6193_v37 = vmul.f32 %v6191_v32, %v6191_v32 }
0x27ae   :  { %v6195_v38 = vsel %vm706_vm4, %v6193_v37, 0.0 }
0x27af   :  { %6196 = vadd.xlane.f32.xlu0 %v6195_v38 }
0x27c4   :  { %v6188_v39 = vpop.xlane.xlu2 %6187 }
0x27c5   :  { %v6190_v30 = vmul.f32 %v6188_v39, %v8328_v12 }
0x27c7   :  { %v6192_v33 = vsub.f32 %v6179_v14, %v6190_v30 }
0x27c9   :  { %v6194_v48 = vmul.f32 %v6192_v33, %v6192_v33 }
0x27cb   :  { %v6198_v2 = vsel %vm706_vm4, %v6194_v48, 0.0 }
0x27cc   :  { %6199 = vadd.xlane.f32.xlu1 %v6198_v2 }
0x2822   :  { %v6197_v44 = vpop.xlane.xlu0 %6196 }
0x2823   :  { %v6201_v19 = vmul.f32 %v6197_v44, %v8328_v12 }
0x2825   :  { %v6203_v3 = vadd.f32 1e-05, %v6201_v19 }
0x2827   :  { %6970 = vrsqrt.f32 %v6203_v3  ;;  %vm6211_vm0 = vweird.f32 %v6203_v3 }
0x282d   :  { %v6971_v50 = vpop.eup %6970 }
0x282e   :  { %v6206_v27 = vmul.f32 %v6971_v50, %v6203_v3  ;;  %vm6212_vm8 = vweird.f32 %v6971_v50 }
0x282f   :  { %vm6213_vm1 = vmor %vm6211_vm0, %vm6212_vm8 }
0x2830   :  { %v6207_v36 = vmul.f32 %v6971_v50, %v6206_v27 }
0x2832   :  { %v6208_v4 = vmul.f32 0.5, %v6207_v36 }
0x2834   :  { %v6209_v13 = vsub.f32 1.5, %v6208_v4 }
0x2836   :  { %v6210_v51 = vmul.f32 %v6971_v50, %v6209_v13 }
0x2838   :  { %v6214_v34 = vsel %vm6213_vm1, %v6971_v50, %v6210_v51 }
0x2839   :  { %v6225_v61 = vmul.f32 %v6214_v34, %v6191_v32 }
0x283b   :  { %v6228_v52 = vmul.f32 %v6737_v59, %v6225_v61 }
0x283d   :  { %v6231_v24 = vadd.f32 %v6738_v6, %v6228_v52 }
0x283f   :  { %v6233_v45 = vadd.f32 %v6231_v24, %v9418_v47  ;;  %v6200_v41 = vpop.xlane.xlu1 %6199 }
0x2840   :  { %v6202_v20 = vmul.f32 %v6200_v41, %v8328_v12 }
0x2841   :  { %6593 = vmatmul.msk.f32.vlgmr.msrb.gmra.mxu0 %vm706_vm4, %v6233_v45 }
0x2842   :  { %v6204_v1 = vadd.f32 1e-05, %v6202_v20 }
0x2844   :  { %6972 = vrsqrt.f32 %v6204_v1  ;;  %vm6221_vm7 = vweird.f32 %v6204_v1 }
0x284a   :  { %v6973_v31 = vpop.eup %6972 }
0x284b   :  { %v6216_v46 = vmul.f32 %v6973_v31, %v6204_v1  ;;  %vm6222_vm2 = vweird.f32 %v6973_v31 }
0x284c   :  { %vm6223_vm9 = vmor %vm6221_vm7, %vm6222_vm2 }
0x284d   :  { %v6217_v54 = vmul.f32 %v6973_v31, %v6216_v46 }
0x284f   :  { %v6218_v63 = vmul.f32 0.5, %v6217_v54 }
0x2851   :  { %v6219_v42 = vsub.f32 1.5, %v6218_v63 }
0x2853   :  { %v6220_v26 = vmul.f32 %v6973_v31, %v6219_v42 }
0x2855   :  { %v6224_v47 = vsel %vm6223_vm9, %v6973_v31, %v6220_v26 }
0x2856   :  { %v6226_v5 = vmul.f32 %v6224_v47, %v6192_v33 }
0x2858   :  { %v6229_v62 = vmul.f32 %v6737_v59, %v6226_v5 }
0x285a   :  { %v6232_v12 = vadd.f32 %v6738_v6, %v6229_v62 }
0x285c   :  { %v6234_v17 = vadd.f32 %v6232_v12, %v9427_v10 }
0x285e   :  { %6594 = vmatmul.msk.f32.gmra.mxu0 %vm706_vm4, %v6234_v17 }
0x28be   :  { %v6266_v49 = vpop.f32.mrf.mxu0 }
0x28bf   :  { %v6267_v7 = vadd.f32 %v6739_v9, %v6266_v49 }
0x28c1   :  { %6272 = vst.msk [vmem:[%s8000_s5] sm:$0xff] %vm644_vm3, %v6267_v7 }
0x28db   :  { %v6269_v28 = vpop.f32.mrf.mxu0 }
0x28dc   :  { %v6270_v25 = vadd.f32 %v6739_v9, %v6269_v28 }
0x28de   :  { %6273 = vst.msk [vmem:[%s8000_s5 + $0x8] sm:$0xff] %vm644_vm3, %v6270_v25 }
0x28df   :  { %6278 = vsyncpa [#allocation3], 1 }
0x28e0   :  { %6279 = vsyncpa [#allocation5], 1 }
0x28e1   :  { %6280 = vsyncpa [#allocation8], 1 }
0x28e2   :  { %6281 = vsyncpa [#allocation11], 1 }
0x28e3   :  { %6282 = vsyncpa [#allocation14], 1 }
0x28e4   :  { %6283 = vsyncpa [#allocation17], 1 }
0x28e5   :  { %6284 = vsyncpa [#allocation20], 1 }
0x28e6   :  { %6285 = vsyncpa [#allocation23], 1 }
0x28e7   :  { %6286 = vsyncpa [#allocation26], 1 }
0x28e8   :  { %6287 = vsyncpa [#allocation29], 1 }
0x28e9   :  { %6288 = vsyncpa [#allocation32], 1 }
0x28ea   :  { %6289 = vsyncpa [#allocation35], 1 }
0x28eb   :  { %6290 = vsyncpa [#allocation38], 1 }
0x28ec   :  { %6291 = vsyncpa [#allocation41], 1 }

</bundles_post_ra>
